<compile_context>
chip_gen: v6e
topology: v6e:2x2x1
jax: 0.10.0
libtpu: 0.0.40
codegen_flags: <defaults>
</compile_context>

<pallas_src>
import jax
import jax.numpy as jnp
from jax.experimental import pallas as pl
from jax.experimental.pallas import tpu as pltpu

HIDDEN = 256
IN_FEAT = 6
OUT_FEAT = 4
K_PAD = 8        # input features padded 6 -> 8 (MXU-friendly K)
BATCH_PAD = 8    # batch rows padded to one full sublane tile


def lstm_fused_kernel(xp_ref, wih_ref, bih_ref, whh_ref, wlin_ref, blin_ref,
                      out_ref, gx_ref, hs_ref):
    """Whole forward pass in one invocation.

    xp_ref:   (seq*8, 8)    f32  zero-padded inputs (batch->8 rows/step, K 6->8)
    wih_ref:  (8, 4H)       f32  input weight, pre-transposed, K zero-padded, gates [i,f,o,g]
    bih_ref:  (1, 4H)       f32  combined LSTM bias (b_ih + b_hh), gates [i,f,o,g]
    whh_ref:  (H, 4H)       f32  recurrent weight, pre-transposed, gates [i,f,o,g]
    wlin_ref: (H, OUT)      f32  final linear weight, pre-transposed
    blin_ref: (1, OUT)      f32  final linear bias
    out_ref:  (seq, B, OUT) f32  log_softmax(dim=1) output
    gx_ref:   (seq*8, 4H)   f32  VMEM scratch: fused input projection
    hs_ref:   (seq*8, H)    f32  VMEM scratch: every h_t, 8-row stride per step
    """
    seq_len, batch, out_feat = out_ref.shape
    bp = BATCH_PAD
    h_dim = whh_ref.shape[0]

    # ---- Fused input projection: one MXU pass over the whole sequence, with
    # the combined LSTM bias folded in (nothing loop-variant left to add). ----
    gx_ref[...] = (
        jnp.dot(xp_ref[...], wih_ref[...], preferred_element_type=jnp.float32)
        + bih_ref[...])

    h = jnp.zeros((bp, h_dim), jnp.float32)
    c = jnp.zeros((bp, h_dim), jnp.float32)

    # ---- Recurrence, fully unrolled at trace time (seq_len static & small).
    # Everything is full-tile: (8, 4H) gates, (8, H) state, unmasked stores.
    # Padded batch rows evolve independently and are dropped in the epilogue. ----
    for t in range(seq_len):
        gates = gx_ref[pl.ds(t * bp, bp), :] + jnp.dot(
            h, whh_ref[...], preferred_element_type=jnp.float32)        # (8, 4H)
        ifo = jax.nn.sigmoid(gates[:, :3 * h_dim])                      # i|f|o contiguous
        g_g = jnp.tanh(gates[:, 3 * h_dim:])
        i_g = ifo[:, :h_dim]
        f_g = ifo[:, h_dim:2 * h_dim]
        o_g = ifo[:, 2 * h_dim:]
        c = f_g * c + i_g * g_g
        h = o_g * jnp.tanh(c)
        hs_ref[pl.ds(t * bp, bp), :] = h        # own (8,128) tiles each step

    # ---- Epilogue (once per call): ReLU + Linear(256->4) as one lane-dense
    # matmul, then a vectorized log_softmax over the batch axis and one store. ----
    relu_h = jnp.maximum(hs_ref[...], 0.0)                              # (seq*8, H)
    logits = (jnp.dot(relu_h, wlin_ref[...],
                      preferred_element_type=jnp.float32)
              + blin_ref[...])                                          # (seq*8, OUT)
    # Tile-aligned split of the sublane dim into 8-row groups, drop pad rows.
    lg = logits.reshape(seq_len, bp, out_feat)[:, :batch, :]            # (seq, B, OUT)
    m = jnp.max(lg, axis=1, keepdims=True)
    sh = lg - m
    lse = jnp.log(jnp.sum(jnp.exp(sh), axis=1, keepdims=True))
    out_ref[...] = (sh - lse).astype(out_ref.dtype)


def prepare_params(w_ih, w_hh, b_ih, b_hh, w_lin, b_lin):
    """One-time weight prep, OUTSIDE the jitted per-call path:
    gate permutation [i,f,g,o] -> [i,f,o,g], transposes, K zero-pad, bias fold."""
    H = HIDDEN

    def permute_gates(w):
        # PyTorch gate block order along the 4H axis is [i, f, g, o].
        return jnp.concatenate([w[:2 * H], w[3 * H:], w[2 * H:3 * H]], axis=0)

    wih_t = jnp.zeros((K_PAD, 4 * H), jnp.float32).at[:IN_FEAT, :].set(
        permute_gates(w_ih).T)                        # (8, 4H)
    whh_t = permute_gates(w_hh).T                     # (H, 4H)
    bih2 = permute_gates(b_ih + b_hh).reshape(1, 4 * H)
    wlin_t = w_lin.T                                  # (H, OUT)
    blin2 = b_lin.reshape(1, OUT_FEAT)
    return wih_t, bih2, whh_t, wlin_t, blin2


@jax.jit
def my_model_forward(x, wih_t, bih2, whh_t, wlin_t, blin2):
    seq_len, batch, in_feat = x.shape
    assert in_feat == IN_FEAT and batch <= BATCH_PAD

    # Zero-pad batch rows to a full sublane tile and K to 8, and flatten to the
    # lane-dense layout the kernel's fused input projection expects.
    xp = jnp.pad(x.astype(jnp.float32),
                 ((0, 0), (0, BATCH_PAD - batch), (0, K_PAD - in_feat)))
    xp = xp.reshape(seq_len * BATCH_PAD, K_PAD)

    vmem = pltpu.MemorySpace.VMEM
    return pl.pallas_call(
        lstm_fused_kernel,
        out_shape=jax.ShapeDtypeStruct((seq_len, batch, OUT_FEAT), jnp.float32),
        # Gridless single invocation: every operand is whole-array VMEM
        # resident (~1.4 MiB total on any of v5e/v6e/v7x), nothing to pipeline.
        in_specs=[pl.BlockSpec(memory_space=vmem)] * 6,
        out_specs=pl.BlockSpec(memory_space=vmem),
        scratch_shapes=[
            pltpu.VMEM((seq_len * BATCH_PAD, 4 * HIDDEN), jnp.float32),  # gx
            pltpu.VMEM((seq_len * BATCH_PAD, HIDDEN), jnp.float32),      # hs
        ],
    )(xp, wih_t, bih2, whh_t, wlin_t, blin2)


def reference_forward(x, w_ih, w_hh, b_ih, b_hh, w_lin, b_lin):
    """Pure-JAX reference of the PyTorch forward, for verification."""
    seq_len, batch, _ = x.shape
    h = jnp.zeros((batch, HIDDEN), jnp.float32)
    c = jnp.zeros((batch, HIDDEN), jnp.float32)
    outs = []
    for t in range(seq_len):
        gates = x[t] @ w_ih.T + h @ w_hh.T + b_ih + b_hh
        i_g = jax.nn.sigmoid(gates[:, 0 * HIDDEN:1 * HIDDEN])
        f_g = jax.nn.sigmoid(gates[:, 1 * HIDDEN:2 * HIDDEN])
        g_g = jnp.tanh(gates[:, 2 * HIDDEN:3 * HIDDEN])
        o_g = jax.nn.sigmoid(gates[:, 3 * HIDDEN:4 * HIDDEN])
        c = f_g * c + i_g * g_g
        h = o_g * jnp.tanh(c)
        outs.append(h)
    lstm_out = jnp.stack(outs, axis=0)                  # (seq, B, H)
    lstm_out = jnp.maximum(lstm_out, 0.0)               # ReLU
    out = lstm_out @ w_lin.T + b_lin                    # (seq, B, 4)
    return jax.nn.log_softmax(out, axis=1)              # dim=1 == batch axis


if __name__ == "__main__":
    key = jax.random.PRNGKey(0)
    k_x, k_wih, k_whh, k_bih, k_bhh, k_wl, k_bl = jax.random.split(key, 7)

    seq_len, batch = 8, 2
    x = jax.random.normal(k_x, (seq_len, batch, IN_FEAT), jnp.float32)

    # Deterministic init, PyTorch-style uniform(-1/sqrt(H), 1/sqrt(H)).
    bound = 1.0 / jnp.sqrt(jnp.float32(HIDDEN))
    w_ih = jax.random.uniform(k_wih, (4 * HIDDEN, IN_FEAT), jnp.float32, -bound, bound)
    w_hh = jax.random.uniform(k_whh, (4 * HIDDEN, HIDDEN), jnp.float32, -bound, bound)
    b_ih = jax.random.uniform(k_bih, (4 * HIDDEN,), jnp.float32, -bound, bound)
    b_hh = jax.random.uniform(k_bhh, (4 * HIDDEN,), jnp.float32, -bound, bound)
    w_lin = jax.random.uniform(k_wl, (OUT_FEAT, HIDDEN), jnp.float32, -bound, bound)
    b_lin = jax.random.uniform(k_bl, (OUT_FEAT,), jnp.float32, -bound, bound)

    # One-time weight prep (transposes / gate permutation / padding) -- NOT in
    # the jitted per-call path.
    params = prepare_params(w_ih, w_hh, b_ih, b_hh, w_lin, b_lin)

    out = my_model_forward(x, *params)
    out = jax.block_until_ready(out)

    ref = reference_forward(x, w_ih, w_hh, b_ih, b_hh, w_lin, b_lin)
    assert out.shape == (seq_len, batch, OUT_FEAT)
    assert jnp.allclose(out, ref, atol=1e-4, rtol=1e-4), "mismatch vs reference"

    print("KERNEL_OK")
</pallas_src>

<mosaic_0001>
module attributes {stable_mosaic.version = 11 : i64} {
  func.func @lstm_fused_kernel(%arg0: memref<64x8xf32, #tpu.memory_space<vmem>>, %arg1: memref<8x1024xf32, #tpu.memory_space<vmem>>, %arg2: memref<1x1024xf32, #tpu.memory_space<vmem>>, %arg3: memref<256x1024xf32, #tpu.memory_space<vmem>>, %arg4: memref<256x4xf32, #tpu.memory_space<vmem>>, %arg5: memref<1x4xf32, #tpu.memory_space<vmem>>, %arg6: memref<8x2x4xf32, #tpu.memory_space<vmem>>, %arg7: memref<64x1024xf32, #tpu.memory_space<vmem>>, %arg8: memref<64x256xf32, #tpu.memory_space<vmem>>) attributes {dimension_semantics = [], scalar_prefetch = 0 : i64, scratch_operands = 2 : i64, tpu.core_type = #tpu.core_type<tc>} {
    %c0 = arith.constant 0 : index
    %c0_0 = arith.constant 0 : index
    %0 = vector.load %arg0[%c0, %c0_0] : memref<64x8xf32, #tpu.memory_space<vmem>>, vector<64x8xf32>
    %c0_1 = arith.constant 0 : index
    %c0_2 = arith.constant 0 : index
    %1 = vector.load %arg1[%c0_1, %c0_2] : memref<8x1024xf32, #tpu.memory_space<vmem>>, vector<8x1024xf32>
    %cst = arith.constant dense<0.000000e+00> : vector<64x1024xf32>
    %2 = tpu.matmul %0, %1, %cst {dimension_numbers = #tpu.dot_dimension_numbers<[1], [0], [0], [1], [0, 0, 1, 1], [], []>} : vector<64x8xf32>, vector<8x1024xf32>, vector<64x1024xf32> -> vector<64x1024xf32>
    %c0_3 = arith.constant 0 : index
    %c0_4 = arith.constant 0 : index
    %3 = vector.load %arg2[%c0_3, %c0_4] : memref<1x1024xf32, #tpu.memory_space<vmem>>, vector<1x1024xf32>
    %4 = vector.broadcast %3 : vector<1x1024xf32> to vector<64x1024xf32>
    %5 = arith.addf %2, %4 : vector<64x1024xf32>
    %c0_5 = arith.constant 0 : index
    %c0_6 = arith.constant 0 : index
    %6 = vector.load %arg7[%c0_5, %c0_6] : memref<64x1024xf32, #tpu.memory_space<vmem>>, vector<64x1024xf32>
    tpu.vector_store %arg7[%c0_5, %c0_6], %5 {strides = array<i32>} : memref<64x1024xf32, #tpu.memory_space<vmem>>, vector<64x1024xf32>,
    %cst_7 = arith.constant 0.000000e+00 : f32
    %7 = vector.broadcast %cst_7 : f32 to vector<8x256xf32>
    %cst_8 = arith.constant 0.000000e+00 : f32
    %8 = vector.broadcast %cst_8 : f32 to vector<8x256xf32>
    %c0_9 = arith.constant 0 : index
    %c0_10 = arith.constant 0 : index
    %9 = vector.load %arg7[%c0_9, %c0_10] : memref<64x1024xf32, #tpu.memory_space<vmem>>, vector<8x1024xf32>
    %c0_11 = arith.constant 0 : index
    %c0_12 = arith.constant 0 : index
    %10 = vector.load %arg3[%c0_11, %c0_12] : memref<256x1024xf32, #tpu.memory_space<vmem>>, vector<256x1024xf32>
    %cst_13 = arith.constant dense<0.000000e+00> : vector<8x1024xf32>
    %11 = tpu.matmul %7, %10, %cst_13 {dimension_numbers = #tpu.dot_dimension_numbers<[1], [0], [0], [1], [0, 0, 1, 1], [], []>} : vector<8x256xf32>, vector<256x1024xf32>, vector<8x1024xf32> -> vector<8x1024xf32>
    %12 = arith.addf %9, %11 : vector<8x1024xf32>
    %13 = vector.extract_strided_slice %12 {offsets = [0, 0], sizes = [8, 768], strides = [1, 1]} : vector<8x1024xf32> to vector<8x768xf32>
    %14 = arith.negf %13 : vector<8x768xf32>
    %15 = math.exp %14 : vector<8x768xf32>
    %cst_14 = arith.constant 1.000000e+00 : f32
    %16 = vector.broadcast %cst_14 : f32 to vector<8x768xf32>
    %17 = arith.addf %16, %15 : vector<8x768xf32>
    %18 = arith.divf %16, %17 : vector<8x768xf32>
    %19 = vector.extract_strided_slice %12 {offsets = [0, 768], sizes = [8, 256], strides = [1, 1]} : vector<8x1024xf32> to vector<8x256xf32>
    %20 = math.tanh %19 : vector<8x256xf32>
    %21 = vector.extract_strided_slice %18 {offsets = [0, 0], sizes = [8, 256], strides = [1, 1]} : vector<8x768xf32> to vector<8x256xf32>
    %22 = vector.extract_strided_slice %18 {offsets = [0, 256], sizes = [8, 256], strides = [1, 1]} : vector<8x768xf32> to vector<8x256xf32>
    %23 = vector.extract_strided_slice %18 {offsets = [0, 512], sizes = [8, 256], strides = [1, 1]} : vector<8x768xf32> to vector<8x256xf32>
    %24 = arith.mulf %22, %8 : vector<8x256xf32>
    %25 = arith.mulf %21, %20 : vector<8x256xf32>
    %26 = arith.addf %24, %25 : vector<8x256xf32>
    %27 = math.tanh %26 : vector<8x256xf32>
    %28 = arith.mulf %23, %27 : vector<8x256xf32>
    %c0_15 = arith.constant 0 : index
    %c0_16 = arith.constant 0 : index
    %29 = vector.load %arg8[%c0_15, %c0_16] : memref<64x256xf32, #tpu.memory_space<vmem>>, vector<8x256xf32>
    tpu.vector_store %arg8[%c0_15, %c0_16], %28 {strides = array<i32>} : memref<64x256xf32, #tpu.memory_space<vmem>>, vector<8x256xf32>,
    %c8 = arith.constant 8 : index
    %c0_17 = arith.constant 0 : index
    %30 = vector.load %arg7[%c8, %c0_17] : memref<64x1024xf32, #tpu.memory_space<vmem>>, vector<8x1024xf32>
    %c0_18 = arith.constant 0 : index
    %c0_19 = arith.constant 0 : index
    %31 = vector.load %arg3[%c0_18, %c0_19] : memref<256x1024xf32, #tpu.memory_space<vmem>>, vector<256x1024xf32>
    %cst_20 = arith.constant dense<0.000000e+00> : vector<8x1024xf32>
    %32 = tpu.matmul %28, %31, %cst_20 {dimension_numbers = #tpu.dot_dimension_numbers<[1], [0], [0], [1], [0, 0, 1, 1], [], []>} : vector<8x256xf32>, vector<256x1024xf32>, vector<8x1024xf32> -> vector<8x1024xf32>
    %33 = arith.addf %30, %32 : vector<8x1024xf32>
    %34 = vector.extract_strided_slice %33 {offsets = [0, 0], sizes = [8, 768], strides = [1, 1]} : vector<8x1024xf32> to vector<8x768xf32>
    %35 = arith.negf %34 : vector<8x768xf32>
    %36 = math.exp %35 : vector<8x768xf32>
    %cst_21 = arith.constant 1.000000e+00 : f32
    %37 = vector.broadcast %cst_21 : f32 to vector<8x768xf32>
    %38 = arith.addf %37, %36 : vector<8x768xf32>
    %39 = arith.divf %37, %38 : vector<8x768xf32>
    %40 = vector.extract_strided_slice %33 {offsets = [0, 768], sizes = [8, 256], strides = [1, 1]} : vector<8x1024xf32> to vector<8x256xf32>
    %41 = math.tanh %40 : vector<8x256xf32>
    %42 = vector.extract_strided_slice %39 {offsets = [0, 0], sizes = [8, 256], strides = [1, 1]} : vector<8x768xf32> to vector<8x256xf32>
    %43 = vector.extract_strided_slice %39 {offsets = [0, 256], sizes = [8, 256], strides = [1, 1]} : vector<8x768xf32> to vector<8x256xf32>
    %44 = vector.extract_strided_slice %39 {offsets = [0, 512], sizes = [8, 256], strides = [1, 1]} : vector<8x768xf32> to vector<8x256xf32>
    %45 = arith.mulf %43, %26 : vector<8x256xf32>
    %46 = arith.mulf %42, %41 : vector<8x256xf32>
    %47 = arith.addf %45, %46 : vector<8x256xf32>
    %48 = math.tanh %47 : vector<8x256xf32>
    %49 = arith.mulf %44, %48 : vector<8x256xf32>
    %c8_22 = arith.constant 8 : index
    %c0_23 = arith.constant 0 : index
    %50 = vector.load %arg8[%c8_22, %c0_23] : memref<64x256xf32, #tpu.memory_space<vmem>>, vector<8x256xf32>
    tpu.vector_store %arg8[%c8_22, %c0_23], %49 {strides = array<i32>} : memref<64x256xf32, #tpu.memory_space<vmem>>, vector<8x256xf32>,
    %c16 = arith.constant 16 : index
    %c0_24 = arith.constant 0 : index
    %51 = vector.load %arg7[%c16, %c0_24] : memref<64x1024xf32, #tpu.memory_space<vmem>>, vector<8x1024xf32>
    %c0_25 = arith.constant 0 : index
    %c0_26 = arith.constant 0 : index
    %52 = vector.load %arg3[%c0_25, %c0_26] : memref<256x1024xf32, #tpu.memory_space<vmem>>, vector<256x1024xf32>
    %cst_27 = arith.constant dense<0.000000e+00> : vector<8x1024xf32>
    %53 = tpu.matmul %49, %52, %cst_27 {dimension_numbers = #tpu.dot_dimension_numbers<[1], [0], [0], [1], [0, 0, 1, 1], [], []>} : vector<8x256xf32>, vector<256x1024xf32>, vector<8x1024xf32> -> vector<8x1024xf32>
    %54 = arith.addf %51, %53 : vector<8x1024xf32>
    %55 = vector.extract_strided_slice %54 {offsets = [0, 0], sizes = [8, 768], strides = [1, 1]} : vector<8x1024xf32> to vector<8x768xf32>
    %56 = arith.negf %55 : vector<8x768xf32>
    %57 = math.exp %56 : vector<8x768xf32>
    %cst_28 = arith.constant 1.000000e+00 : f32
    %58 = vector.broadcast %cst_28 : f32 to vector<8x768xf32>
    %59 = arith.addf %58, %57 : vector<8x768xf32>
    %60 = arith.divf %58, %59 : vector<8x768xf32>
    %61 = vector.extract_strided_slice %54 {offsets = [0, 768], sizes = [8, 256], strides = [1, 1]} : vector<8x1024xf32> to vector<8x256xf32>
    %62 = math.tanh %61 : vector<8x256xf32>
    %63 = vector.extract_strided_slice %60 {offsets = [0, 0], sizes = [8, 256], strides = [1, 1]} : vector<8x768xf32> to vector<8x256xf32>
    %64 = vector.extract_strided_slice %60 {offsets = [0, 256], sizes = [8, 256], strides = [1, 1]} : vector<8x768xf32> to vector<8x256xf32>
    %65 = vector.extract_strided_slice %60 {offsets = [0, 512], sizes = [8, 256], strides = [1, 1]} : vector<8x768xf32> to vector<8x256xf32>
    %66 = arith.mulf %64, %47 : vector<8x256xf32>
    %67 = arith.mulf %63, %62 : vector<8x256xf32>
    %68 = arith.addf %66, %67 : vector<8x256xf32>
    %69 = math.tanh %68 : vector<8x256xf32>
    %70 = arith.mulf %65, %69 : vector<8x256xf32>
    %c16_29 = arith.constant 16 : index
    %c0_30 = arith.constant 0 : index
    %71 = vector.load %arg8[%c16_29, %c0_30] : memref<64x256xf32, #tpu.memory_space<vmem>>, vector<8x256xf32>
    tpu.vector_store %arg8[%c16_29, %c0_30], %70 {strides = array<i32>} : memref<64x256xf32, #tpu.memory_space<vmem>>, vector<8x256xf32>,
    %c24 = arith.constant 24 : index
    %c0_31 = arith.constant 0 : index
    %72 = vector.load %arg7[%c24, %c0_31] : memref<64x1024xf32, #tpu.memory_space<vmem>>, vector<8x1024xf32>
    %c0_32 = arith.constant 0 : index
    %c0_33 = arith.constant 0 : index
    %73 = vector.load %arg3[%c0_32, %c0_33] : memref<256x1024xf32, #tpu.memory_space<vmem>>, vector<256x1024xf32>
    %cst_34 = arith.constant dense<0.000000e+00> : vector<8x1024xf32>
    %74 = tpu.matmul %70, %73, %cst_34 {dimension_numbers = #tpu.dot_dimension_numbers<[1], [0], [0], [1], [0, 0, 1, 1], [], []>} : vector<8x256xf32>, vector<256x1024xf32>, vector<8x1024xf32> -> vector<8x1024xf32>
    %75 = arith.addf %72, %74 : vector<8x1024xf32>
    %76 = vector.extract_strided_slice %75 {offsets = [0, 0], sizes = [8, 768], strides = [1, 1]} : vector<8x1024xf32> to vector<8x768xf32>
    %77 = arith.negf %76 : vector<8x768xf32>
    %78 = math.exp %77 : vector<8x768xf32>
    %cst_35 = arith.constant 1.000000e+00 : f32
    %79 = vector.broadcast %cst_35 : f32 to vector<8x768xf32>
    %80 = arith.addf %79, %78 : vector<8x768xf32>
    %81 = arith.divf %79, %80 : vector<8x768xf32>
    %82 = vector.extract_strided_slice %75 {offsets = [0, 768], sizes = [8, 256], strides = [1, 1]} : vector<8x1024xf32> to vector<8x256xf32>
    %83 = math.tanh %82 : vector<8x256xf32>
    %84 = vector.extract_strided_slice %81 {offsets = [0, 0], sizes = [8, 256], strides = [1, 1]} : vector<8x768xf32> to vector<8x256xf32>
    %85 = vector.extract_strided_slice %81 {offsets = [0, 256], sizes = [8, 256], strides = [1, 1]} : vector<8x768xf32> to vector<8x256xf32>
    %86 = vector.extract_strided_slice %81 {offsets = [0, 512], sizes = [8, 256], strides = [1, 1]} : vector<8x768xf32> to vector<8x256xf32>
    %87 = arith.mulf %85, %68 : vector<8x256xf32>
    %88 = arith.mulf %84, %83 : vector<8x256xf32>
    %89 = arith.addf %87, %88 : vector<8x256xf32>
    %90 = math.tanh %89 : vector<8x256xf32>
    %91 = arith.mulf %86, %90 : vector<8x256xf32>
    %c24_36 = arith.constant 24 : index
    %c0_37 = arith.constant 0 : index
    %92 = vector.load %arg8[%c24_36, %c0_37] : memref<64x256xf32, #tpu.memory_space<vmem>>, vector<8x256xf32>
    tpu.vector_store %arg8[%c24_36, %c0_37], %91 {strides = array<i32>} : memref<64x256xf32, #tpu.memory_space<vmem>>, vector<8x256xf32>,
    %c32 = arith.constant 32 : index
    %c0_38 = arith.constant 0 : index
    %93 = vector.load %arg7[%c32, %c0_38] : memref<64x1024xf32, #tpu.memory_space<vmem>>, vector<8x1024xf32>
    %c0_39 = arith.constant 0 : index
    %c0_40 = arith.constant 0 : index
    %94 = vector.load %arg3[%c0_39, %c0_40] : memref<256x1024xf32, #tpu.memory_space<vmem>>, vector<256x1024xf32>
    %cst_41 = arith.constant dense<0.000000e+00> : vector<8x1024xf32>
    %95 = tpu.matmul %91, %94, %cst_41 {dimension_numbers = #tpu.dot_dimension_numbers<[1], [0], [0], [1], [0, 0, 1, 1], [], []>} : vector<8x256xf32>, vector<256x1024xf32>, vector<8x1024xf32> -> vector<8x1024xf32>
    %96 = arith.addf %93, %95 : vector<8x1024xf32>
    %97 = vector.extract_strided_slice %96 {offsets = [0, 0], sizes = [8, 768], strides = [1, 1]} : vector<8x1024xf32> to vector<8x768xf32>
    %98 = arith.negf %97 : vector<8x768xf32>
    %99 = math.exp %98 : vector<8x768xf32>
    %cst_42 = arith.constant 1.000000e+00 : f32
    %100 = vector.broadcast %cst_42 : f32 to vector<8x768xf32>
    %101 = arith.addf %100, %99 : vector<8x768xf32>
    %102 = arith.divf %100, %101 : vector<8x768xf32>
    %103 = vector.extract_strided_slice %96 {offsets = [0, 768], sizes = [8, 256], strides = [1, 1]} : vector<8x1024xf32> to vector<8x256xf32>
    %104 = math.tanh %103 : vector<8x256xf32>
    %105 = vector.extract_strided_slice %102 {offsets = [0, 0], sizes = [8, 256], strides = [1, 1]} : vector<8x768xf32> to vector<8x256xf32>
    %106 = vector.extract_strided_slice %102 {offsets = [0, 256], sizes = [8, 256], strides = [1, 1]} : vector<8x768xf32> to vector<8x256xf32>
    %107 = vector.extract_strided_slice %102 {offsets = [0, 512], sizes = [8, 256], strides = [1, 1]} : vector<8x768xf32> to vector<8x256xf32>
    %108 = arith.mulf %106, %89 : vector<8x256xf32>
    %109 = arith.mulf %105, %104 : vector<8x256xf32>
    %110 = arith.addf %108, %109 : vector<8x256xf32>
    %111 = math.tanh %110 : vector<8x256xf32>
    %112 = arith.mulf %107, %111 : vector<8x256xf32>
    %c32_43 = arith.constant 32 : index
    %c0_44 = arith.constant 0 : index
    %113 = vector.load %arg8[%c32_43, %c0_44] : memref<64x256xf32, #tpu.memory_space<vmem>>, vector<8x256xf32>
    tpu.vector_store %arg8[%c32_43, %c0_44], %112 {strides = array<i32>} : memref<64x256xf32, #tpu.memory_space<vmem>>, vector<8x256xf32>,
    %c40 = arith.constant 40 : index
    %c0_45 = arith.constant 0 : index
    %114 = vector.load %arg7[%c40, %c0_45] : memref<64x1024xf32, #tpu.memory_space<vmem>>, vector<8x1024xf32>
    %c0_46 = arith.constant 0 : index
    %c0_47 = arith.constant 0 : index
    %115 = vector.load %arg3[%c0_46, %c0_47] : memref<256x1024xf32, #tpu.memory_space<vmem>>, vector<256x1024xf32>
    %cst_48 = arith.constant dense<0.000000e+00> : vector<8x1024xf32>
    %116 = tpu.matmul %112, %115, %cst_48 {dimension_numbers = #tpu.dot_dimension_numbers<[1], [0], [0], [1], [0, 0, 1, 1], [], []>} : vector<8x256xf32>, vector<256x1024xf32>, vector<8x1024xf32> -> vector<8x1024xf32>
    %117 = arith.addf %114, %116 : vector<8x1024xf32>
    %118 = vector.extract_strided_slice %117 {offsets = [0, 0], sizes = [8, 768], strides = [1, 1]} : vector<8x1024xf32> to vector<8x768xf32>
    %119 = arith.negf %118 : vector<8x768xf32>
    %120 = math.exp %119 : vector<8x768xf32>
    %cst_49 = arith.constant 1.000000e+00 : f32
    %121 = vector.broadcast %cst_49 : f32 to vector<8x768xf32>
    %122 = arith.addf %121, %120 : vector<8x768xf32>
    %123 = arith.divf %121, %122 : vector<8x768xf32>
    %124 = vector.extract_strided_slice %117 {offsets = [0, 768], sizes = [8, 256], strides = [1, 1]} : vector<8x1024xf32> to vector<8x256xf32>
    %125 = math.tanh %124 : vector<8x256xf32>
    %126 = vector.extract_strided_slice %123 {offsets = [0, 0], sizes = [8, 256], strides = [1, 1]} : vector<8x768xf32> to vector<8x256xf32>
    %127 = vector.extract_strided_slice %123 {offsets = [0, 256], sizes = [8, 256], strides = [1, 1]} : vector<8x768xf32> to vector<8x256xf32>
    %128 = vector.extract_strided_slice %123 {offsets = [0, 512], sizes = [8, 256], strides = [1, 1]} : vector<8x768xf32> to vector<8x256xf32>
    %129 = arith.mulf %127, %110 : vector<8x256xf32>
    %130 = arith.mulf %126, %125 : vector<8x256xf32>
    %131 = arith.addf %129, %130 : vector<8x256xf32>
    %132 = math.tanh %131 : vector<8x256xf32>
    %133 = arith.mulf %128, %132 : vector<8x256xf32>
    %c40_50 = arith.constant 40 : index
    %c0_51 = arith.constant 0 : index
    %134 = vector.load %arg8[%c40_50, %c0_51] : memref<64x256xf32, #tpu.memory_space<vmem>>, vector<8x256xf32>
    tpu.vector_store %arg8[%c40_50, %c0_51], %133 {strides = array<i32>} : memref<64x256xf32, #tpu.memory_space<vmem>>, vector<8x256xf32>,
    %c48 = arith.constant 48 : index
    %c0_52 = arith.constant 0 : index
    %135 = vector.load %arg7[%c48, %c0_52] : memref<64x1024xf32, #tpu.memory_space<vmem>>, vector<8x1024xf32>
    %c0_53 = arith.constant 0 : index
    %c0_54 = arith.constant 0 : index
    %136 = vector.load %arg3[%c0_53, %c0_54] : memref<256x1024xf32, #tpu.memory_space<vmem>>, vector<256x1024xf32>
    %cst_55 = arith.constant dense<0.000000e+00> : vector<8x1024xf32>
    %137 = tpu.matmul %133, %136, %cst_55 {dimension_numbers = #tpu.dot_dimension_numbers<[1], [0], [0], [1], [0, 0, 1, 1], [], []>} : vector<8x256xf32>, vector<256x1024xf32>, vector<8x1024xf32> -> vector<8x1024xf32>
    %138 = arith.addf %135, %137 : vector<8x1024xf32>
    %139 = vector.extract_strided_slice %138 {offsets = [0, 0], sizes = [8, 768], strides = [1, 1]} : vector<8x1024xf32> to vector<8x768xf32>
    %140 = arith.negf %139 : vector<8x768xf32>
    %141 = math.exp %140 : vector<8x768xf32>
    %cst_56 = arith.constant 1.000000e+00 : f32
    %142 = vector.broadcast %cst_56 : f32 to vector<8x768xf32>
    %143 = arith.addf %142, %141 : vector<8x768xf32>
    %144 = arith.divf %142, %143 : vector<8x768xf32>
    %145 = vector.extract_strided_slice %138 {offsets = [0, 768], sizes = [8, 256], strides = [1, 1]} : vector<8x1024xf32> to vector<8x256xf32>
    %146 = math.tanh %145 : vector<8x256xf32>
    %147 = vector.extract_strided_slice %144 {offsets = [0, 0], sizes = [8, 256], strides = [1, 1]} : vector<8x768xf32> to vector<8x256xf32>
    %148 = vector.extract_strided_slice %144 {offsets = [0, 256], sizes = [8, 256], strides = [1, 1]} : vector<8x768xf32> to vector<8x256xf32>
    %149 = vector.extract_strided_slice %144 {offsets = [0, 512], sizes = [8, 256], strides = [1, 1]} : vector<8x768xf32> to vector<8x256xf32>
    %150 = arith.mulf %148, %131 : vector<8x256xf32>
    %151 = arith.mulf %147, %146 : vector<8x256xf32>
    %152 = arith.addf %150, %151 : vector<8x256xf32>
    %153 = math.tanh %152 : vector<8x256xf32>
    %154 = arith.mulf %149, %153 : vector<8x256xf32>
    %c48_57 = arith.constant 48 : index
    %c0_58 = arith.constant 0 : index
    %155 = vector.load %arg8[%c48_57, %c0_58] : memref<64x256xf32, #tpu.memory_space<vmem>>, vector<8x256xf32>
    tpu.vector_store %arg8[%c48_57, %c0_58], %154 {strides = array<i32>} : memref<64x256xf32, #tpu.memory_space<vmem>>, vector<8x256xf32>,
    %c56 = arith.constant 56 : index
    %c0_59 = arith.constant 0 : index
    %156 = vector.load %arg7[%c56, %c0_59] : memref<64x1024xf32, #tpu.memory_space<vmem>>, vector<8x1024xf32>
    %c0_60 = arith.constant 0 : index
    %c0_61 = arith.constant 0 : index
    %157 = vector.load %arg3[%c0_60, %c0_61] : memref<256x1024xf32, #tpu.memory_space<vmem>>, vector<256x1024xf32>
    %cst_62 = arith.constant dense<0.000000e+00> : vector<8x1024xf32>
    %158 = tpu.matmul %154, %157, %cst_62 {dimension_numbers = #tpu.dot_dimension_numbers<[1], [0], [0], [1], [0, 0, 1, 1], [], []>} : vector<8x256xf32>, vector<256x1024xf32>, vector<8x1024xf32> -> vector<8x1024xf32>
    %159 = arith.addf %156, %158 : vector<8x1024xf32>
    %160 = vector.extract_strided_slice %159 {offsets = [0, 0], sizes = [8, 768], strides = [1, 1]} : vector<8x1024xf32> to vector<8x768xf32>
    %161 = arith.negf %160 : vector<8x768xf32>
    %162 = math.exp %161 : vector<8x768xf32>
    %cst_63 = arith.constant 1.000000e+00 : f32
    %163 = vector.broadcast %cst_63 : f32 to vector<8x768xf32>
    %164 = arith.addf %163, %162 : vector<8x768xf32>
    %165 = arith.divf %163, %164 : vector<8x768xf32>
    %166 = vector.extract_strided_slice %159 {offsets = [0, 768], sizes = [8, 256], strides = [1, 1]} : vector<8x1024xf32> to vector<8x256xf32>
    %167 = math.tanh %166 : vector<8x256xf32>
    %168 = vector.extract_strided_slice %165 {offsets = [0, 0], sizes = [8, 256], strides = [1, 1]} : vector<8x768xf32> to vector<8x256xf32>
    %169 = vector.extract_strided_slice %165 {offsets = [0, 256], sizes = [8, 256], strides = [1, 1]} : vector<8x768xf32> to vector<8x256xf32>
    %170 = vector.extract_strided_slice %165 {offsets = [0, 512], sizes = [8, 256], strides = [1, 1]} : vector<8x768xf32> to vector<8x256xf32>
    %171 = arith.mulf %169, %152 : vector<8x256xf32>
    %172 = arith.mulf %168, %167 : vector<8x256xf32>
    %173 = arith.addf %171, %172 : vector<8x256xf32>
    %174 = math.tanh %173 : vector<8x256xf32>
    %175 = arith.mulf %170, %174 : vector<8x256xf32>
    %c56_64 = arith.constant 56 : index
    %c0_65 = arith.constant 0 : index
    %176 = vector.load %arg8[%c56_64, %c0_65] : memref<64x256xf32, #tpu.memory_space<vmem>>, vector<8x256xf32>
    tpu.vector_store %arg8[%c56_64, %c0_65], %175 {strides = array<i32>} : memref<64x256xf32, #tpu.memory_space<vmem>>, vector<8x256xf32>,
    %c0_66 = arith.constant 0 : index
    %c0_67 = arith.constant 0 : index
    %177 = vector.load %arg8[%c0_66, %c0_67] : memref<64x256xf32, #tpu.memory_space<vmem>>, vector<64x256xf32>
    %cst_68 = arith.constant 0.000000e+00 : f32
    %178 = vector.broadcast %cst_68 : f32 to vector<64x256xf32>
    %179 = arith.maximumf %177, %178 : vector<64x256xf32>
    %c0_69 = arith.constant 0 : index
    %c0_70 = arith.constant 0 : index
    %180 = vector.load %arg4[%c0_69, %c0_70] : memref<256x4xf32, #tpu.memory_space<vmem>>, vector<256x4xf32>
    %cst_71 = arith.constant dense<0.000000e+00> : vector<64x4xf32>
    %181 = tpu.matmul %179, %180, %cst_71 {dimension_numbers = #tpu.dot_dimension_numbers<[1], [0], [0], [1], [0, 0, 1, 1], [], []>} : vector<64x256xf32>, vector<256x4xf32>, vector<64x4xf32> -> vector<64x4xf32>
    %c0_72 = arith.constant 0 : index
    %c0_73 = arith.constant 0 : index
    %182 = vector.load %arg5[%c0_72, %c0_73] : memref<1x4xf32, #tpu.memory_space<vmem>>, vector<1x4xf32>
    %183 = vector.broadcast %182 : vector<1x4xf32> to vector<64x4xf32>
    %184 = arith.addf %181, %183 : vector<64x4xf32>
    %185 = vector.shape_cast %184 : vector<64x4xf32> to vector<8x8x4xf32>
    %186 = vector.extract_strided_slice %185 {offsets = [0, 0, 0], sizes = [8, 2, 4], strides = [1, 1, 1]} : vector<8x8x4xf32> to vector<8x2x4xf32>
    %cst_74 = arith.constant dense<0xFF800000> : vector<8x4xf32>
    %187 = vector.multi_reduction <maximumf>, %186, %cst_74 [1] : vector<8x2x4xf32> to vector<8x4xf32>
    %188 = vector.shape_cast %187 : vector<8x4xf32> to vector<8x1x4xf32>
    %189 = vector.broadcast %188 : vector<8x1x4xf32> to vector<8x2x4xf32>
    %190 = arith.subf %186, %189 : vector<8x2x4xf32>
    %191 = math.exp %190 : vector<8x2x4xf32>
    %cst_75 = arith.constant dense<0.000000e+00> : vector<8x4xf32>
    %192 = vector.multi_reduction <add>, %191, %cst_75 [1] : vector<8x2x4xf32> to vector<8x4xf32>
    %193 = vector.shape_cast %192 : vector<8x4xf32> to vector<8x1x4xf32>
    %194 = math.log %193 : vector<8x1x4xf32>
    %195 = vector.broadcast %194 : vector<8x1x4xf32> to vector<8x2x4xf32>
    %196 = arith.subf %190, %195 : vector<8x2x4xf32>
    %c0_76 = arith.constant 0 : index
    %c0_77 = arith.constant 0 : index
    %c0_78 = arith.constant 0 : index
    %197 = vector.load %arg6[%c0_76, %c0_77, %c0_78] : memref<8x2x4xf32, #tpu.memory_space<vmem>>, vector<8x2x4xf32>
    tpu.vector_store %arg6[%c0_76, %c0_77, %c0_78], %196 {strides = array<i32>} : memref<8x2x4xf32, #tpu.memory_space<vmem>>, vector<8x2x4xf32>,
    return
  }
}

</mosaic_0001>

<bundles_post_ra>
// kernel: my_model_forward.1
= control target key start
LH: loop header
LB: loop body
LE: loop exit
PB: predicated region body
PF: predicated region fallthrough
CT: control target
= control target key end

     0   :  { %11 = vsyncpa [#allocation5], 0  ;;  %s6285_s21 = smov [#allocation4]   ;;  %s7129_s0 = inlined_call_operand.vmem [shape: f32[64,8], index: 0, kind: input, shape index: {}]   ;;  %s7130_s1 = inlined_call_operand.vmem [shape: f32[8,1024], index: 1, kind: input, shape index: {}]   ;;  %s7131_s2 = inlined_call_operand.vmem [shape: f32[1,1024], index: 2, kind: input, shape index: {}]   ;;  %s7132_s3 = inlined_call_operand.hbm [shape: f32[256,1024], index: 3, kind: input, shape index: {}]   ;;  %s7133_s4 = inlined_call_operand.vmem [shape: f32[256,4], index: 4, kind: input, shape index: {}]   ;;  %s7134_s5 = inlined_call_operand.vmem [shape: f32[1,4], index: 5, kind: input, shape index: {}]   ;;  %s7135_s6 = inlined_call_operand.vmem [shape: f32[8,2,4], index: 6, kind: output, shape index: {}]  }
   0x1   :  { %s23_s22 = sshll.u32 %s6285_s21, 4  ;;  %s24_s22 = int_to_ptr.vmem [resolvable:$true] %s23_s22 }
   0x2   :  { %s6271_s23 = scalar_lea.vmem %s24_s22, 32768  ;;  %p6276_p1 = scmp.lt.s32.totalorder %s24_s22, %s24_s22 }
   0x3   :  { %p6272_p0 = scmp.ne.s32.totalorder %s24_s22, %s6271_s23  ;;  %p6277_p2 = scmp.lt.s32.totalorder %s6271_s23, %s6271_s23 }
   0x5   :  { %p6278_p3 = por %p6277_p2, %p6276_p1 }
   0x7   :  { %p6279_p4 = pnand %p6278_p3, %p6272_p0 }
   0x9   :  { %6282 = shalt.err (!%p6279_p4)
}
   0xa   :  { %s6286_s24 = smov 1024   ;;  %s6287_s25 = smov 64  }
   0xb   :  { %29 = dma.hbm_to_vmem [thread:$0]  %s7132_s3, 32768, %s24_s22, [#allocation5], %s6286_s24, %s6286_s24, %s6287_s25  }
   0xc   :  { %6283 = dma.done.wait [#allocation5], 32768  }
   0xd   :  { %6284 = vsyncadd [#allocation5], 4294934528  ;;  %v6288_v0 = vmov 0.0   ;;  %v46_v1 = vld [vmem:[%s7130_s1 + $0x8] sm:$0xff]  ;;  %v45_v3 = vld [vmem:[%s7130_s1] sm:$0xff]  ;;  %vm95_vm0 = vcmask 64512  }
   0xe   :  { %184 = vmatprep.mubr.f32.mxu1 %v6288_v0  ;;  %410 = vmatprep.mubr.f32.mxu0 %v6288_v0  ;;  %v50_v2 = vld [vmem:[%s7130_s1 + $0x28] sm:$0xff]  ;;  %v49_v4 = vld [vmem:[%s7130_s1 + $0x20] sm:$0xff]  ;;  %v48_v6 = vld [vmem:[%s7130_s1 + $0x18] sm:$0xff]  ;;  %vm5660_vm1 = vcmask 25600  }
   0xf   :  { %150 = vmatprep.subr.mxu1 %v46_v1  ;;  %376 = vmatprep.subr.mxu0 %v50_v2  ;;  %v6344_v5 = vld [vmem:[%s7129_s0] sm:$0xff]  ;;  %v765_v7 = vld [vmem:[#allocation4 + $0x3c8] sm:$0xff]  ;;  %v47_v8 = vld [vmem:[%s7130_s1 + $0x10] sm:$0xff] }
  0x10   :  { %151 = vmatpush1.msra.mxu1 %v45_v3  ;;  %377 = vmatpush1.msra.mxu0 %v49_v4  ;;  %v764_v9 = vld [vmem:[#allocation4 + $0x3c0] sm:$0xff]  ;;  %v757_v10 = vld [vmem:[#allocation4 + $0x388] sm:$0xff]  ;;  %v6369_v16 = vld [vmem:[%s7129_s0 + $0x10] sm:$0xff] }
  0x11   :  { %5834 = vmatmul.mubr.msk.f32.vlgmr.msra.gmra.mxu1 %vm95_vm0, %v6344_v5  ;;  %263 = vmatprep.subr.mxu1 %v48_v6  ;;  %v6357_v11 = vld [vmem:[%s7129_s0 + $0x8] sm:$0xff]  ;;  %v756_v12 = vld [vmem:[#allocation4 + $0x380] sm:$0xff]  ;;  %v6380_v21 = vld [vmem:[%s7129_s0 + $0x18] sm:$0xff] }
  0x12   :  { %900 = vmatprep.subr.mxu0 %v765_v7  ;;  %264 = vmatpush1.msra.mxu1 %v47_v8  ;;  %v749_v13 = vld [vmem:[#allocation4 + $0x348] sm:$0xff]  ;;  %v748_v14 = vld [vmem:[#allocation4 + $0x340] sm:$0xff]  ;;  %v52_v25 = vld [vmem:[%s7130_s1 + $0x38] sm:$0xff] }
  0x13   :  { %5850 = vmatmul.mubr.msk.f32.vlgmr.msra.gmra.mxu0 %vm95_vm0, %v6344_v5  ;;  %190 = vmatprep.mubr.f32.mxu1 %v6288_v0  ;;  %v741_v15 = vld [vmem:[#allocation4 + $0x308] sm:$0xff]  ;;  %v740_v17 = vld [vmem:[#allocation4 + $0x300] sm:$0xff]  ;;  %v6413_v37 = vld [vmem:[%s7129_s0 + $0x30] sm:$0xff] }
  0x14   :  { %901 = vmatpush1.msra.mxu0 %v764_v9  ;;  %416 = vmatprep.mubr.f32.mxu0 %v6288_v0  ;;  %v733_v18 = vld [vmem:[#allocation4 + $0x2c8] sm:$0xff]  ;;  %v732_v19 = vld [vmem:[#allocation4 + $0x2c0] sm:$0xff]  ;;  %v6424_v42 = vld [vmem:[%s7129_s0 + $0x38] sm:$0xff] }
  0x15   :  { %902 = vmatprep.subr.mxu0 %v757_v10  ;;  %5835 = vmatmul.mubr.msk.f32.gmra.mxu1 %vm95_vm0, %v6357_v11  ;;  %v725_v20 = vld [vmem:[#allocation4 + $0x288] sm:$0xff]  ;;  %v724_v22 = vld [vmem:[#allocation4 + $0x280] sm:$0xff]  ;;  %v51_v48 = vld [vmem:[%s7130_s1 + $0x30] sm:$0xff] }
  0x16   :  { %903 = vmatpush1.msra.mxu0 %v756_v12  ;;  %196 = vmatprep.mubr.f32.mxu1 %v6288_v0  ;;  %v717_v23 = vld [vmem:[#allocation4 + $0x248] sm:$0xff]  ;;  %v716_v24 = vld [vmem:[#allocation4 + $0x240] sm:$0xff]  ;;  %v767_v51 = vld [vmem:[#allocation4 + $0x3d8] sm:$0xff] }
  0x17   :  { %904 = vmatprep.subr.mxu0 %v749_v13  ;;  %5851 = vmatmul.mubr.msk.f32.gmra.mxu0 %vm95_vm0, %v6357_v11  ;;  %v709_v26 = vld [vmem:[#allocation4 + $0x208] sm:$0xff]  ;;  %v6394_v27 = vld [vmem:[%s7129_s0 + $0x20] sm:$0xff] }
  0x18   :  { %905 = vmatpush1.msra.mxu0 %v748_v14  ;;  %422 = vmatprep.mubr.f32.mxu0 %v6288_v0  ;;  %v708_v28 = vld [vmem:[#allocation4 + $0x200] sm:$0xff]  ;;  %v701_v29 = vld [vmem:[#allocation4 + $0x1c8] sm:$0xff] }
  0x19   :  { %906 = vmatprep.subr.mxu0 %v741_v15  ;;  %5836 = vmatmul.mubr.msk.f32.gmra.mxu1 %vm95_vm0, %v6369_v16  ;;  %v700_v30 = vld [vmem:[#allocation4 + $0x1c0] sm:$0xff]  ;;  %v693_v31 = vld [vmem:[#allocation4 + $0x188] sm:$0xff] }
  0x1a   :  { %907 = vmatpush1.msra.mxu0 %v740_v17  ;;  %202 = vmatprep.mubr.f32.mxu1 %v6288_v0  ;;  %v6402_v32 = vld [vmem:[%s7129_s0 + $0x28] sm:$0xff]  ;;  %v692_v33 = vld [vmem:[#allocation4 + $0x180] sm:$0xff] }
  0x1b   :  { %908 = vmatprep.subr.mxu0 %v733_v18  ;;  %5852 = vmatmul.mubr.msk.f32.gmra.mxu0 %vm95_vm0, %v6369_v16  ;;  %v685_v34 = vld [vmem:[#allocation4 + $0x148] sm:$0xff]  ;;  %v684_v35 = vld [vmem:[#allocation4 + $0x140] sm:$0xff] }
  0x1c   :  { %909 = vmatpush1.msra.mxu0 %v732_v19  ;;  %428 = vmatprep.mubr.f32.mxu0 %v6288_v0  ;;  %v677_v36 = vld [vmem:[#allocation4 + $0x108] sm:$0xff]  ;;  %v676_v38 = vld [vmem:[#allocation4 + $0x100] sm:$0xff] }
  0x1d   :  { %910 = vmatprep.subr.mxu0 %v725_v20  ;;  %5837 = vmatmul.mubr.msk.f32.gmra.mxu1 %vm95_vm0, %v6380_v21  ;;  %v669_v39 = vld [vmem:[#allocation4 + $0xc8] sm:$0xff]  ;;  %v668_v40 = vld [vmem:[#allocation4 + $0xc0] sm:$0xff] }
  0x1e   :  { %911 = vmatpush1.msra.mxu0 %v724_v22  ;;  %208 = vmatprep.mubr.f32.mxu1 %v6288_v0  ;;  %v661_v41 = vld [vmem:[#allocation4 + $0x88] sm:$0xff]  ;;  %v660_v43 = vld [vmem:[#allocation4 + $0x80] sm:$0xff] }
  0x1f   :  { %912 = vmatprep.subr.mxu0 %v717_v23  ;;  %489 = vmatprep.subr.mxu1 %v52_v25  ;;  %v653_v44 = vld [vmem:[#allocation4 + $0x48] sm:$0xff]  ;;  %v652_v45 = vld [vmem:[#allocation4 + $0x40] sm:$0xff]  ;;  %v766_v23 = vld [vmem:[#allocation4 + $0x3d0] sm:$0xff] }
  0x20   :  { %913 = vmatpush1.msra.mxu0 %v716_v24  ;;  %v645_v46 = vld [vmem:[#allocation4 + $0x8] sm:$0xff]  ;;  %v644_v47 = vld [vmem:[#allocation4] sm:$0xff]  ;;  %v759_v25 = vld [vmem:[#allocation4 + $0x398] sm:$0xff] }
  0x21   :  { %914 = vmatprep.subr.mxu0 %v709_v26  ;;  %5838 = vmatmul.mubr.msk.f32.gmra.mxu1 %vm95_vm0, %v6394_v27  ;;  %v893_v49 = vld [vmem:[#allocation4 + $0x7c8] sm:$0xff]  ;;  %v892_v50 = vld [vmem:[#allocation4 + $0x7c0] sm:$0xff] }
  0x22   :  { %915 = vmatpush1.msra.mxu0 %v708_v28  ;;  %214 = vmatprep.mubr.f32.mxu1 %v6288_v0  ;;  %v885_v52 = vld [vmem:[#allocation4 + $0x788] sm:$0xff]  ;;  %v884_v53 = vld [vmem:[#allocation4 + $0x780] sm:$0xff]  ;;  %v758_v28 = vld [vmem:[#allocation4 + $0x390] sm:$0xff] }
  0x23   :  { %916 = vmatprep.subr.mxu0 %v701_v29  ;;  %5853 = vmatmul.mubr.msk.f32.gmra.mxu0 %vm95_vm0, %v6380_v21  ;;  %v877_v54 = vld [vmem:[#allocation4 + $0x748] sm:$0xff]  ;;  %v876_v55 = vld [vmem:[#allocation4 + $0x740] sm:$0xff] }
  0x24   :  { %917 = vmatpush1.msra.mxu0 %v700_v30  ;;  %434 = vmatprep.mubr.f32.mxu0 %v6288_v0  ;;  %v869_v56 = vld [vmem:[#allocation4 + $0x708] sm:$0xff]  ;;  %v868_v57 = vld [vmem:[#allocation4 + $0x700] sm:$0xff]  ;;  %v751_v30 = vld [vmem:[#allocation4 + $0x358] sm:$0xff] }
  0x25   :  { %918 = vmatprep.subr.mxu0 %v693_v31  ;;  %5839 = vmatmul.mubr.msk.f32.gmra.mxu1 %vm95_vm0, %v6402_v32  ;;  %v861_v58 = vld [vmem:[#allocation4 + $0x6c8] sm:$0xff]  ;;  %v860_v59 = vld [vmem:[#allocation4 + $0x6c0] sm:$0xff] }
  0x26   :  { %919 = vmatpush1.msra.mxu0 %v692_v33  ;;  %220 = vmatprep.mubr.f32.mxu1 %v6288_v0  ;;  %v853_v60 = vld [vmem:[#allocation4 + $0x688] sm:$0xff]  ;;  %v852_v61 = vld [vmem:[#allocation4 + $0x680] sm:$0xff]  ;;  %v750_v33 = vld [vmem:[#allocation4 + $0x350] sm:$0xff] }
  0x27   :  { %920 = vmatprep.subr.mxu0 %v685_v34  ;;  %5854 = vmatmul.mubr.msk.f32.gmra.mxu0 %vm95_vm0, %v6394_v27  ;;  %v845_v62 = vld [vmem:[#allocation4 + $0x648] sm:$0xff]  ;;  %v844_v63 = vld [vmem:[#allocation4 + $0x640] sm:$0xff] }
  0x28   :  { %921 = vmatpush1.msra.mxu0 %v684_v35  ;;  %440 = vmatprep.mubr.f32.mxu0 %v6288_v0  ;;  %v837_v1 = vld [vmem:[#allocation4 + $0x608] sm:$0xff]  ;;  %v836_v2 = vld [vmem:[#allocation4 + $0x600] sm:$0xff]  ;;  %v743_v35 = vld [vmem:[#allocation4 + $0x318] sm:$0xff] }
  0x29   :  { %922 = vmatprep.subr.mxu0 %v677_v36  ;;  %5840 = vmatmul.mubr.msk.f32.gmra.mxu1 %vm95_vm0, %v6413_v37  ;;  %v829_v3 = vld [vmem:[#allocation4 + $0x5c8] sm:$0xff]  ;;  %v828_v4 = vld [vmem:[#allocation4 + $0x5c0] sm:$0xff] }
  0x2a   :  { %923 = vmatpush1.msra.mxu0 %v676_v38  ;;  %226 = vmatprep.mubr.f32.mxu1 %v6288_v0  ;;  %v821_v6 = vld [vmem:[#allocation4 + $0x588] sm:$0xff]  ;;  %v820_v7 = vld [vmem:[#allocation4 + $0x580] sm:$0xff] }
  0x2b   :  { %924 = vmatprep.subr.mxu0 %v669_v39  ;;  %5855 = vmatmul.mubr.msk.f32.gmra.mxu0 %vm95_vm0, %v6402_v32  ;;  %v813_v8 = vld [vmem:[#allocation4 + $0x548] sm:$0xff]  ;;  %v812_v9 = vld [vmem:[#allocation4 + $0x540] sm:$0xff]  ;;  %v735_v39 = vld [vmem:[#allocation4 + $0x2d8] sm:$0xff] }
  0x2c   :  { %925 = vmatpush1.msra.mxu0 %v668_v40  ;;  %446 = vmatprep.mubr.f32.mxu0 %v6288_v0  ;;  %v805_v10 = vld [vmem:[#allocation4 + $0x508] sm:$0xff]  ;;  %v804_v12 = vld [vmem:[#allocation4 + $0x500] sm:$0xff] }
  0x2d   :  { %926 = vmatprep.subr.mxu0 %v661_v41  ;;  %5841 = vmatmul.mubr.msk.f32.gmra.mxu1 %vm95_vm0, %v6424_v42  ;;  %v797_v13 = vld [vmem:[#allocation4 + $0x4c8] sm:$0xff]  ;;  %v796_v14 = vld [vmem:[#allocation4 + $0x4c0] sm:$0xff]  ;;  %v734_v41 = vld [vmem:[#allocation4 + $0x2d0] sm:$0xff] }
  0x2e   :  { %927 = vmatpush1.msra.mxu0 %v660_v43  ;;  %297 = vmatprep.mubr.f32.mxu1 %v6288_v0  ;;  %v789_v15 = vld [vmem:[#allocation4 + $0x488] sm:$0xff]  ;;  %v788_v17 = vld [vmem:[#allocation4 + $0x480] sm:$0xff] }
  0x2f   :  { %928 = vmatprep.subr.mxu0 %v653_v44  ;;  %5856 = vmatmul.mubr.msk.f32.gmra.mxu0 %vm95_vm0, %v6413_v37  ;;  %v781_v18 = vld [vmem:[#allocation4 + $0x448] sm:$0xff]  ;;  %v780_v19 = vld [vmem:[#allocation4 + $0x440] sm:$0xff]  ;;  %v727_v44 = vld [vmem:[#allocation4 + $0x298] sm:$0xff] }
  0x30   :  { %929 = vmatpush1.msra.mxu0 %v652_v45  ;;  %452 = vmatprep.mubr.f32.mxu0 %v6288_v0  ;;  %v773_v20 = vld [vmem:[#allocation4 + $0x408] sm:$0xff]  ;;  %v772_v22 = vld [vmem:[#allocation4 + $0x400] sm:$0xff] }
  0x31   :  { %930 = vmatprep.subr.mxu0 %v645_v46  ;;  %5842 = vmatmul.mubr.msk.f32.vlgmr.msra.gmra.mxu1 %vm95_vm0, %v6344_v5  ;;  %v769_v24 = vld [vmem:[#allocation4 + $0x3e8] sm:$0xff]  ;;  %v768_v26 = vld [vmem:[#allocation4 + $0x3e0] sm:$0xff]  ;;  %v726_v46 = vld [vmem:[#allocation4 + $0x290] sm:$0xff] }
  0x32   :  { %931 = vmatpush1.msra.mxu0 %v644_v47  ;;  %490 = vmatpush1.msra.mxu1 %v51_v48  ;;  %v761_v29 = vld [vmem:[#allocation4 + $0x3a8] sm:$0xff]  ;;  %v760_v31 = vld [vmem:[#allocation4 + $0x3a0] sm:$0xff]  ;;  %v719_v48 = vld [vmem:[#allocation4 + $0x258] sm:$0xff] }
  0x33   :  { %932 = vmatprep.subr.mxu0 %v893_v49  ;;  %303 = vmatprep.mubr.f32.mxu1 %v6288_v0  ;;  %v753_v34 = vld [vmem:[#allocation4 + $0x368] sm:$0xff]  ;;  %v752_v36 = vld [vmem:[#allocation4 + $0x360] sm:$0xff] }
  0x34   :  { %933 = vmatpush2.msra.mxu0 %v892_v50  ;;  %971 = vmatprep.subr.mxu1 %v767_v51  ;;  %v745_v38 = vld [vmem:[#allocation4 + $0x328] sm:$0xff]  ;;  %v744_v40 = vld [vmem:[#allocation4 + $0x320] sm:$0xff]  ;;  %v718_v50 = vld [vmem:[#allocation4 + $0x250] sm:$0xff] }
  0x35   :  { %934 = vmatprep.subr.mxu0 %v885_v52  ;;  %5843 = vmatmul.mubr.msk.f32.gmra.mxu1 %vm95_vm0, %v6357_v11  ;;  %v737_v43 = vld [vmem:[#allocation4 + $0x2e8] sm:$0xff]  ;;  %v736_v45 = vld [vmem:[#allocation4 + $0x2e0] sm:$0xff]  ;;  %v711_v52 = vld [vmem:[#allocation4 + $0x218] sm:$0xff] }
  0x36   :  { %935 = vmatpush2.msra.mxu0 %v884_v53  ;;  %309 = vmatprep.mubr.f32.mxu1 %v6288_v0  ;;  %v729_v47 = vld [vmem:[#allocation4 + $0x2a8] sm:$0xff]  ;;  %v728_v49 = vld [vmem:[#allocation4 + $0x2a0] sm:$0xff] }
  0x37   :  { %936 = vmatprep.subr.mxu0 %v877_v54  ;;  %5857 = vmatmul.mubr.msk.f32.gmra.mxu0 %vm95_vm0, %v6424_v42  ;;  %v721_v51 = vld [vmem:[#allocation4 + $0x268] sm:$0xff]  ;;  %v720_v53 = vld [vmem:[#allocation4 + $0x260] sm:$0xff]  ;;  %v710_v54 = vld [vmem:[#allocation4 + $0x210] sm:$0xff] }
  0x38   :  { %937 = vmatpush2.msra.mxu0 %v876_v55  ;;  %964 = vmatprep.mubr.f32.mxu0 %v6288_v0  ;;  %v713_v55 = vld [vmem:[#allocation4 + $0x228] sm:$0xff] }
  0x39   :  { %938 = vmatprep.subr.mxu0 %v869_v56  ;;  %5844 = vmatmul.mubr.msk.f32.gmra.mxu1 %vm95_vm0, %v6369_v16  ;;  %v703_v56 = vld [vmem:[#allocation4 + $0x1d8] sm:$0xff] }
  0x3a   :  { %939 = vmatpush2.msra.mxu0 %v868_v57  ;;  %315 = vmatprep.mubr.f32.mxu1 %v6288_v0  ;;  %v712_v57 = vld [vmem:[#allocation4 + $0x220] sm:$0xff] }
  0x3b   :  { %940 = vmatprep.subr.mxu0 %v861_v58  ;;  %v702_v58 = vld [vmem:[#allocation4 + $0x1d0] sm:$0xff] }
  0x3c   :  { %941 = vmatpush2.msra.mxu0 %v860_v59  ;;  %v705_v59 = vld [vmem:[#allocation4 + $0x1e8] sm:$0xff] }
  0x3d   :  { %942 = vmatprep.subr.mxu0 %v853_v60  ;;  %5845 = vmatmul.mubr.msk.f32.gmra.mxu1 %vm95_vm0, %v6380_v21  ;;  %v695_v60 = vld [vmem:[#allocation4 + $0x198] sm:$0xff] }
  0x3e   :  { %943 = vmatpush2.msra.mxu0 %v852_v61  ;;  %321 = vmatprep.mubr.f32.mxu1 %v6288_v0  ;;  %v704_v61 = vld [vmem:[#allocation4 + $0x1e0] sm:$0xff] }
  0x3f   :  { %944 = vmatprep.subr.mxu0 %v845_v62  ;;  %v694_v62 = vld [vmem:[#allocation4 + $0x190] sm:$0xff] }
  0x40   :  { %945 = vmatpush2.msra.mxu0 %v844_v63  ;;  %v697_v63 = vld [vmem:[#allocation4 + $0x1a8] sm:$0xff] }
  0x41   :  { %946 = vmatprep.subr.mxu0 %v837_v1  ;;  %5846 = vmatmul.mubr.msk.f32.gmra.mxu1 %vm95_vm0, %v6394_v27  ;;  %v687_v1 = vld [vmem:[#allocation4 + $0x158] sm:$0xff] }
  0x42   :  { %947 = vmatpush2.msra.mxu0 %v836_v2  ;;  %327 = vmatprep.mubr.f32.mxu1 %v6288_v0  ;;  %v696_v2 = vld [vmem:[#allocation4 + $0x1a0] sm:$0xff] }
  0x43   :  { %948 = vmatprep.subr.mxu0 %v829_v3  ;;  %v686_v3 = vld [vmem:[#allocation4 + $0x150] sm:$0xff] }
  0x44   :  { %949 = vmatpush2.msra.mxu0 %v828_v4  ;;  %v689_v4 = vld [vmem:[#allocation4 + $0x168] sm:$0xff] }
  0x45   :  { %950 = vmatprep.subr.mxu0 %v821_v6  ;;  %5847 = vmatmul.mubr.msk.f32.gmra.mxu1 %vm95_vm0, %v6402_v32  ;;  %v679_v6 = vld [vmem:[#allocation4 + $0x118] sm:$0xff] }
  0x46   :  { %951 = vmatpush2.msra.mxu0 %v820_v7  ;;  %333 = vmatprep.mubr.f32.mxu1 %v6288_v0  ;;  %v688_v7 = vld [vmem:[#allocation4 + $0x160] sm:$0xff] }
  0x47   :  { %952 = vmatprep.subr.mxu0 %v813_v8  ;;  %v678_v8 = vld [vmem:[#allocation4 + $0x110] sm:$0xff] }
  0x48   :  { %953 = vmatpush2.msra.mxu0 %v812_v9  ;;  %v681_v9 = vld [vmem:[#allocation4 + $0x128] sm:$0xff] }
  0x49   :  { %954 = vmatprep.subr.mxu0 %v805_v10  ;;  %5848 = vmatmul.mubr.msk.f32.gmra.mxu1 %vm95_vm0, %v6413_v37  ;;  %v671_v10 = vld [vmem:[#allocation4 + $0xd8] sm:$0xff] }
  0x4a   :  { %955 = vmatpush2.msra.mxu0 %v804_v12  ;;  %339 = vmatprep.mubr.f32.mxu1 %v6288_v0  ;;  %v680_v12 = vld [vmem:[#allocation4 + $0x120] sm:$0xff] }
  0x4b   :  { %956 = vmatprep.subr.mxu0 %v797_v13  ;;  %v670_v13 = vld [vmem:[#allocation4 + $0xd0] sm:$0xff] }
  0x4c   :  { %957 = vmatpush2.msra.mxu0 %v796_v14  ;;  %v673_v14 = vld [vmem:[#allocation4 + $0xe8] sm:$0xff] }
  0x4d   :  { %958 = vmatprep.subr.mxu0 %v789_v15  ;;  %5849 = vmatmul.mubr.msk.f32.gmra.mxu1 %vm95_vm0, %v6424_v42  ;;  %v663_v15 = vld [vmem:[#allocation4 + $0x98] sm:$0xff] }
  0x4e   :  { %959 = vmatpush2.msra.mxu0 %v788_v17  ;;  %523 = vmatprep.mubr.f32.mxu1 %v6288_v0  ;;  %v672_v17 = vld [vmem:[#allocation4 + $0xe0] sm:$0xff] }
  0x4f   :  { %960 = vmatprep.subr.mxu0 %v781_v18  ;;  %v662_v18 = vld [vmem:[#allocation4 + $0x90] sm:$0xff] }
  0x50   :  { %961 = vmatpush2.msra.mxu0 %v780_v19  ;;  %v665_v19 = vld [vmem:[#allocation4 + $0xa8] sm:$0xff] }
  0x51   :  { %962 = vmatprep.subr.mxu0 %v773_v20  ;;  %5858 = vmatmul.mubr.msk.f32.vlgmr.msra.gmra.mxu1 %vm95_vm0, %v6344_v5  ;;  %v742_v5 = vld [vmem:[#allocation4 + $0x310] sm:$0xff]  ;;  %v655_v20 = vld [vmem:[#allocation4 + $0x58] sm:$0xff] }
  0x52   :  { %963 = vmatpush2.msra.mxu0 %v772_v22  ;;  %972 = vmatpush1.msra.mxu1 %v766_v23  ;;  %v664_v22 = vld [vmem:[#allocation4 + $0xa0] sm:$0xff]  ;;  %v654_v23 = vld [vmem:[#allocation4 + $0x50] sm:$0xff] }
  0x53   :  { %965 = vmatmul.mubr.f32.vlgmr.msra.gmra.mxu0 %v6288_v0  ;;  %1042 = vmatprep.subr.mxu0 %v769_v24  ;;  %v657_v24 = vld [vmem:[#allocation4 + $0x68] sm:$0xff] }
  0x54   :  { %973 = vmatprep.subr.mxu1 %v759_v25  ;;  %1043 = vmatpush1.msra.mxu0 %v768_v26  ;;  %v647_v25 = vld [vmem:[#allocation4 + $0x18] sm:$0xff]  ;;  %v656_v26 = vld [vmem:[#allocation4 + $0x60] sm:$0xff] }
  0x55   :  { %974 = vmatpush1.msra.mxu1 %v758_v28  ;;  %1044 = vmatprep.subr.mxu0 %v761_v29  ;;  %v646_v28 = vld [vmem:[#allocation4 + $0x10] sm:$0xff]  ;;  %v649_v29 = vld [vmem:[#allocation4 + $0x28] sm:$0xff] }
  0x56   :  { %975 = vmatprep.subr.mxu1 %v751_v30  ;;  %1045 = vmatpush1.msra.mxu0 %v760_v31  ;;  %v895_v30 = vld [vmem:[#allocation4 + $0x7d8] sm:$0xff]  ;;  %v648_v31 = vld [vmem:[#allocation4 + $0x20] sm:$0xff] }
  0x57   :  { %976 = vmatpush1.msra.mxu1 %v750_v33  ;;  %1046 = vmatprep.subr.mxu0 %v753_v34  ;;  %v894_v33 = vld [vmem:[#allocation4 + $0x7d0] sm:$0xff]  ;;  %v897_v34 = vld [vmem:[#allocation4 + $0x7e8] sm:$0xff] }
  0x58   :  { %977 = vmatprep.subr.mxu1 %v743_v35  ;;  %1047 = vmatpush1.msra.mxu0 %v752_v36  ;;  %v887_v35 = vld [vmem:[#allocation4 + $0x798] sm:$0xff]  ;;  %v896_v36 = vld [vmem:[#allocation4 + $0x7e0] sm:$0xff] }
  0x59   :  { %978 = vmatpush1.msra.mxu1 %v742_v5  ;;  %1048 = vmatprep.subr.mxu0 %v745_v38  ;;  %v886_v5 = vld [vmem:[#allocation4 + $0x790] sm:$0xff]  ;;  %v889_v38 = vld [vmem:[#allocation4 + $0x7a8] sm:$0xff] }
  0x5a   :  { %979 = vmatprep.subr.mxu1 %v735_v39  ;;  %1049 = vmatpush1.msra.mxu0 %v744_v40  ;;  %v879_v39 = vld [vmem:[#allocation4 + $0x758] sm:$0xff]  ;;  %v888_v40 = vld [vmem:[#allocation4 + $0x7a0] sm:$0xff] }
  0x5b   :  { %980 = vmatpush1.msra.mxu1 %v734_v41  ;;  %1050 = vmatprep.subr.mxu0 %v737_v43  ;;  %v878_v41 = vld [vmem:[#allocation4 + $0x750] sm:$0xff]  ;;  %v881_v43 = vld [vmem:[#allocation4 + $0x768] sm:$0xff] }
  0x5c   :  { %981 = vmatprep.subr.mxu1 %v727_v44  ;;  %1051 = vmatpush1.msra.mxu0 %v736_v45  ;;  %v871_v44 = vld [vmem:[#allocation4 + $0x718] sm:$0xff]  ;;  %v880_v45 = vld [vmem:[#allocation4 + $0x760] sm:$0xff] }
  0x5d   :  { %982 = vmatpush1.msra.mxu1 %v726_v46  ;;  %1052 = vmatprep.subr.mxu0 %v729_v47  ;;  %v870_v46 = vld [vmem:[#allocation4 + $0x710] sm:$0xff]  ;;  %v873_v47 = vld [vmem:[#allocation4 + $0x728] sm:$0xff] }
  0x5e   :  { %983 = vmatprep.subr.mxu1 %v719_v48  ;;  %1053 = vmatpush1.msra.mxu0 %v728_v49  ;;  %v863_v48 = vld [vmem:[#allocation4 + $0x6d8] sm:$0xff]  ;;  %v872_v49 = vld [vmem:[#allocation4 + $0x720] sm:$0xff] }
  0x5f   :  { %984 = vmatpush1.msra.mxu1 %v718_v50  ;;  %1054 = vmatprep.subr.mxu0 %v721_v51  ;;  %v862_v50 = vld [vmem:[#allocation4 + $0x6d0] sm:$0xff]  ;;  %v865_v51 = vld [vmem:[#allocation4 + $0x6e8] sm:$0xff] }
  0x60   :  { %985 = vmatprep.subr.mxu1 %v711_v52  ;;  %1055 = vmatpush1.msra.mxu0 %v720_v53  ;;  %v864_v52 = vld [vmem:[#allocation4 + $0x6e0] sm:$0xff]  ;;  %v854_v53 = vld [vmem:[#allocation4 + $0x690] sm:$0xff] }
  0x61   :  { %986 = vmatpush1.msra.mxu1 %v710_v54  ;;  %1056 = vmatprep.subr.mxu0 %v713_v55  ;;  %v857_v54 = vld [vmem:[#allocation4 + $0x6a8] sm:$0xff]  ;;  %v847_v55 = vld [vmem:[#allocation4 + $0x658] sm:$0xff] }
  0x62   :  { %987 = vmatprep.subr.mxu1 %v703_v56  ;;  %1057 = vmatpush1.msra.mxu0 %v712_v57  ;;  %v856_v56 = vld [vmem:[#allocation4 + $0x6a0] sm:$0xff]  ;;  %v846_v57 = vld [vmem:[#allocation4 + $0x650] sm:$0xff] }
  0x63   :  { %988 = vmatpush1.msra.mxu1 %v702_v58  ;;  %1058 = vmatprep.subr.mxu0 %v705_v59  ;;  %v849_v58 = vld [vmem:[#allocation4 + $0x668] sm:$0xff]  ;;  %v848_v59 = vld [vmem:[#allocation4 + $0x660] sm:$0xff] }
  0x64   :  { %989 = vmatprep.subr.mxu1 %v695_v60  ;;  %1059 = vmatpush1.msra.mxu0 %v704_v61  ;;  %v838_v60 = vld [vmem:[#allocation4 + $0x610] sm:$0xff]  ;;  %v841_v61 = vld [vmem:[#allocation4 + $0x628] sm:$0xff] }
  0x65   :  { %990 = vmatpush1.msra.mxu1 %v694_v62  ;;  %1060 = vmatprep.subr.mxu0 %v697_v63  ;;  %v831_v62 = vld [vmem:[#allocation4 + $0x5d8] sm:$0xff]  ;;  %v840_v63 = vld [vmem:[#allocation4 + $0x620] sm:$0xff] }
  0x66   :  { %991 = vmatprep.subr.mxu1 %v687_v1  ;;  %1061 = vmatpush1.msra.mxu0 %v696_v2  ;;  %v830_v1 = vld [vmem:[#allocation4 + $0x5d0] sm:$0xff]  ;;  %v833_v2 = vld [vmem:[#allocation4 + $0x5e8] sm:$0xff] }
  0x67   :  { %992 = vmatpush1.msra.mxu1 %v686_v3  ;;  %1062 = vmatprep.subr.mxu0 %v689_v4  ;;  %v832_v3 = vld [vmem:[#allocation4 + $0x5e0] sm:$0xff]  ;;  %v822_v4 = vld [vmem:[#allocation4 + $0x590] sm:$0xff] }
  0x68   :  { %993 = vmatprep.subr.mxu1 %v679_v6  ;;  %1063 = vmatpush1.msra.mxu0 %v688_v7  ;;  %v825_v6 = vld [vmem:[#allocation4 + $0x5a8] sm:$0xff]  ;;  %v815_v7 = vld [vmem:[#allocation4 + $0x558] sm:$0xff] }
  0x69   :  { %994 = vmatpush1.msra.mxu1 %v678_v8  ;;  %1064 = vmatprep.subr.mxu0 %v681_v9  ;;  %v824_v8 = vld [vmem:[#allocation4 + $0x5a0] sm:$0xff]  ;;  %v814_v9 = vld [vmem:[#allocation4 + $0x550] sm:$0xff] }
  0x6a   :  { %995 = vmatprep.subr.mxu1 %v671_v10  ;;  %1065 = vmatpush1.msra.mxu0 %v680_v12  ;;  %v817_v10 = vld [vmem:[#allocation4 + $0x568] sm:$0xff]  ;;  %v816_v12 = vld [vmem:[#allocation4 + $0x560] sm:$0xff] }
  0x6b   :  { %996 = vmatpush1.msra.mxu1 %v670_v13  ;;  %1066 = vmatprep.subr.mxu0 %v673_v14  ;;  %v806_v13 = vld [vmem:[#allocation4 + $0x510] sm:$0xff]  ;;  %v809_v14 = vld [vmem:[#allocation4 + $0x528] sm:$0xff] }
  0x6c   :  { %997 = vmatprep.subr.mxu1 %v663_v15  ;;  %1067 = vmatpush1.msra.mxu0 %v672_v17  ;;  %v799_v15 = vld [vmem:[#allocation4 + $0x4d8] sm:$0xff]  ;;  %v808_v17 = vld [vmem:[#allocation4 + $0x520] sm:$0xff] }
  0x6d   :  { %998 = vmatpush1.msra.mxu1 %v662_v18  ;;  %1068 = vmatprep.subr.mxu0 %v665_v19  ;;  %v798_v18 = vld [vmem:[#allocation4 + $0x4d0] sm:$0xff]  ;;  %v801_v19 = vld [vmem:[#allocation4 + $0x4e8] sm:$0xff] }
  0x6e   :  { %999 = vmatprep.subr.mxu1 %v655_v20  ;;  %1069 = vmatpush1.msra.mxu0 %v664_v22  ;;  %v800_v20 = vld [vmem:[#allocation4 + $0x4e0] sm:$0xff]  ;;  %v790_v22 = vld [vmem:[#allocation4 + $0x490] sm:$0xff] }
  0x6f   :  { %1000 = vmatpush1.msra.mxu1 %v654_v23  ;;  %1070 = vmatprep.subr.mxu0 %v657_v24  ;;  %v793_v23 = vld [vmem:[#allocation4 + $0x4a8] sm:$0xff]  ;;  %v783_v24 = vld [vmem:[#allocation4 + $0x458] sm:$0xff] }
  0x70   :  { %1001 = vmatprep.subr.mxu1 %v647_v25  ;;  %1071 = vmatpush1.msra.mxu0 %v656_v26  ;;  %v792_v25 = vld [vmem:[#allocation4 + $0x4a0] sm:$0xff]  ;;  %v782_v26 = vld [vmem:[#allocation4 + $0x450] sm:$0xff] }
  0x71   :  { %1002 = vmatpush1.msra.mxu1 %v646_v28  ;;  %1072 = vmatprep.subr.mxu0 %v649_v29  ;;  %v785_v28 = vld [vmem:[#allocation4 + $0x468] sm:$0xff]  ;;  %v784_v29 = vld [vmem:[#allocation4 + $0x460] sm:$0xff] }
  0x72   :  { %1003 = vmatprep.subr.mxu1 %v895_v30  ;;  %1073 = vmatpush1.msra.mxu0 %v648_v31  ;;  %v774_v30 = vld [vmem:[#allocation4 + $0x410] sm:$0xff]  ;;  %v777_v31 = vld [vmem:[#allocation4 + $0x428] sm:$0xff] }
  0x73   :  { %1004 = vmatpush2.msra.mxu1 %v894_v33  ;;  %1074 = vmatprep.subr.mxu0 %v897_v34  ;;  %v776_v33 = vld [vmem:[#allocation4 + $0x420] sm:$0xff]  ;;  %v771_v34 = vld [vmem:[#allocation4 + $0x3f8] sm:$0xff] }
  0x74   :  { %1005 = vmatprep.subr.mxu1 %v887_v35  ;;  %1075 = vmatpush2.msra.mxu0 %v896_v36  ;;  %v770_v35 = vld [vmem:[#allocation4 + $0x3f0] sm:$0xff] }
  0x75   :  { %529 = vmatprep.mubr.f32.mxu1 %v6288_v0  ;;  %1006 = vmatpush2.msra.mxu1 %v886_v5  ;;  %v762_v36 = vld [vmem:[#allocation4 + $0x3b0] sm:$0xff]  ;;  %v755_v5 = vld [vmem:[#allocation4 + $0x378] sm:$0xff] }
  0x76   :  { %1076 = vmatprep.subr.mxu0 %v889_v38  ;;  %5859 = vmatmul.mubr.msk.f32.gmra.mxu1 %vm95_vm0, %v6357_v11  ;;  %v855_v11 = vld [vmem:[#allocation4 + $0x698] sm:$0xff]  ;;  %v754_v38 = vld [vmem:[#allocation4 + $0x370] sm:$0xff] }
  0x77   :  { %1007 = vmatprep.subr.mxu1 %v879_v39  ;;  %1077 = vmatpush2.msra.mxu0 %v888_v40  ;;  %v747_v39 = vld [vmem:[#allocation4 + $0x338] sm:$0xff]  ;;  %v746_v40 = vld [vmem:[#allocation4 + $0x330] sm:$0xff] }
  0x78   :  { %1008 = vmatpush2.msra.mxu1 %v878_v41  ;;  %1078 = vmatprep.subr.mxu0 %v881_v43  ;;  %v739_v41 = vld [vmem:[#allocation4 + $0x2f8] sm:$0xff]  ;;  %v738_v43 = vld [vmem:[#allocation4 + $0x2f0] sm:$0xff] }
  0x79   :  { %1009 = vmatprep.subr.mxu1 %v871_v44  ;;  %1079 = vmatpush2.msra.mxu0 %v880_v45  ;;  %v731_v44 = vld [vmem:[#allocation4 + $0x2b8] sm:$0xff]  ;;  %v730_v45 = vld [vmem:[#allocation4 + $0x2b0] sm:$0xff] }
  0x7a   :  { %535 = vmatprep.mubr.f32.mxu1 %v6288_v0  ;;  %1010 = vmatpush2.msra.mxu1 %v870_v46  ;;  %v723_v46 = vld [vmem:[#allocation4 + $0x278] sm:$0xff] }
  0x7b   :  { %1080 = vmatprep.subr.mxu0 %v873_v47  ;;  %5860 = vmatmul.mubr.msk.f32.gmra.mxu1 %vm95_vm0, %v6369_v16  ;;  %v839_v16 = vld [vmem:[#allocation4 + $0x618] sm:$0xff]  ;;  %v722_v47 = vld [vmem:[#allocation4 + $0x270] sm:$0xff] }
  0x7c   :  { %1011 = vmatprep.subr.mxu1 %v863_v48  ;;  %1081 = vmatpush2.msra.mxu0 %v872_v49  ;;  %v715_v48 = vld [vmem:[#allocation4 + $0x238] sm:$0xff]  ;;  %v714_v49 = vld [vmem:[#allocation4 + $0x230] sm:$0xff] }
  0x7d   :  { %1012 = vmatpush2.msra.mxu1 %v862_v50  ;;  %1082 = vmatprep.subr.mxu0 %v865_v51  ;;  %v707_v50 = vld [vmem:[#allocation4 + $0x1f8] sm:$0xff]  ;;  %v706_v51 = vld [vmem:[#allocation4 + $0x1f0] sm:$0xff] }
  0x7e   :  { %1013 = vmatprep.subr.mxu1 %v855_v11  ;;  %1083 = vmatpush2.msra.mxu0 %v864_v52  ;;  %v699_v11 = vld [vmem:[#allocation4 + $0x1b8] sm:$0xff]  ;;  %v698_v52 = vld [vmem:[#allocation4 + $0x1b0] sm:$0xff] }
  0x7f   :  { %541 = vmatprep.mubr.f32.mxu1 %v6288_v0  ;;  %1014 = vmatpush2.msra.mxu1 %v854_v53  ;;  %v691_v53 = vld [vmem:[#allocation4 + $0x178] sm:$0xff] }
  0x80   :  { %1084 = vmatprep.subr.mxu0 %v857_v54  ;;  %5861 = vmatmul.mubr.msk.f32.gmra.mxu1 %vm95_vm0, %v6380_v21  ;;  %v823_v21 = vld [vmem:[#allocation4 + $0x598] sm:$0xff]  ;;  %v690_v54 = vld [vmem:[#allocation4 + $0x170] sm:$0xff] }
  0x81   :  { %1015 = vmatprep.subr.mxu1 %v847_v55  ;;  %1085 = vmatpush2.msra.mxu0 %v856_v56  ;;  %v683_v55 = vld [vmem:[#allocation4 + $0x138] sm:$0xff]  ;;  %v682_v56 = vld [vmem:[#allocation4 + $0x130] sm:$0xff] }
  0x82   :  { %1016 = vmatpush2.msra.mxu1 %v846_v57  ;;  %1086 = vmatprep.subr.mxu0 %v849_v58  ;;  %v675_v57 = vld [vmem:[#allocation4 + $0xf8] sm:$0xff]  ;;  %v674_v58 = vld [vmem:[#allocation4 + $0xf0] sm:$0xff] }
  0x83   :  { %1017 = vmatprep.subr.mxu1 %v839_v16  ;;  %1087 = vmatpush2.msra.mxu0 %v848_v59  ;;  %v667_v16 = vld [vmem:[#allocation4 + $0xb8] sm:$0xff]  ;;  %v666_v59 = vld [vmem:[#allocation4 + $0xb0] sm:$0xff] }
  0x84   :  { %547 = vmatprep.mubr.f32.mxu1 %v6288_v0  ;;  %1018 = vmatpush2.msra.mxu1 %v838_v60  ;;  %v659_v60 = vld [vmem:[#allocation4 + $0x78] sm:$0xff] }
  0x85   :  { %1088 = vmatprep.subr.mxu0 %v841_v61  ;;  %5862 = vmatmul.mubr.msk.f32.gmra.mxu1 %vm95_vm0, %v6394_v27  ;;  %v807_v27 = vld [vmem:[#allocation4 + $0x518] sm:$0xff]  ;;  %v658_v61 = vld [vmem:[#allocation4 + $0x70] sm:$0xff] }
  0x86   :  { %1019 = vmatprep.subr.mxu1 %v831_v62  ;;  %1089 = vmatpush2.msra.mxu0 %v840_v63  ;;  %v651_v62 = vld [vmem:[#allocation4 + $0x38] sm:$0xff]  ;;  %v650_v63 = vld [vmem:[#allocation4 + $0x30] sm:$0xff] }
  0x87   :  { %1020 = vmatpush2.msra.mxu1 %v830_v1  ;;  %1090 = vmatprep.subr.mxu0 %v833_v2  ;;  %v899_v1 = vld [vmem:[#allocation4 + $0x7f8] sm:$0xff]  ;;  %v898_v2 = vld [vmem:[#allocation4 + $0x7f0] sm:$0xff] }
  0x88   :  { %1021 = vmatprep.subr.mxu1 %v823_v21  ;;  %1091 = vmatpush2.msra.mxu0 %v832_v3  ;;  %v891_v21 = vld [vmem:[#allocation4 + $0x7b8] sm:$0xff]  ;;  %v890_v3 = vld [vmem:[#allocation4 + $0x7b0] sm:$0xff] }
  0x89   :  { %553 = vmatprep.mubr.f32.mxu1 %v6288_v0  ;;  %1022 = vmatpush2.msra.mxu1 %v822_v4  ;;  %v883_v4 = vld [vmem:[#allocation4 + $0x778] sm:$0xff] }
  0x8a   :  { %1092 = vmatprep.subr.mxu0 %v825_v6  ;;  %5863 = vmatmul.mubr.msk.f32.gmra.mxu1 %vm95_vm0, %v6402_v32  ;;  %v791_v32 = vld [vmem:[#allocation4 + $0x498] sm:$0xff]  ;;  %v882_v6 = vld [vmem:[#allocation4 + $0x770] sm:$0xff] }
  0x8b   :  { %1023 = vmatprep.subr.mxu1 %v815_v7  ;;  %1093 = vmatpush2.msra.mxu0 %v824_v8  ;;  %v875_v7 = vld [vmem:[#allocation4 + $0x738] sm:$0xff]  ;;  %v874_v8 = vld [vmem:[#allocation4 + $0x730] sm:$0xff] }
  0x8c   :  { %1024 = vmatpush2.msra.mxu1 %v814_v9  ;;  %1094 = vmatprep.subr.mxu0 %v817_v10  ;;  %v867_v9 = vld [vmem:[#allocation4 + $0x6f8] sm:$0xff]  ;;  %v866_v10 = vld [vmem:[#allocation4 + $0x6f0] sm:$0xff] }
  0x8d   :  { %1025 = vmatprep.subr.mxu1 %v807_v27  ;;  %1095 = vmatpush2.msra.mxu0 %v816_v12  ;;  %v859_v27 = vld [vmem:[#allocation4 + $0x6b8] sm:$0xff]  ;;  %v858_v12 = vld [vmem:[#allocation4 + $0x6b0] sm:$0xff] }
  0x8e   :  { %559 = vmatprep.mubr.f32.mxu1 %v6288_v0  ;;  %1026 = vmatpush2.msra.mxu1 %v806_v13  ;;  %v851_v13 = vld [vmem:[#allocation4 + $0x678] sm:$0xff] }
  0x8f   :  { %1096 = vmatprep.subr.mxu0 %v809_v14  ;;  %5864 = vmatmul.mubr.msk.f32.gmra.mxu1 %vm95_vm0, %v6413_v37  ;;  %v775_v37 = vld [vmem:[#allocation4 + $0x418] sm:$0xff]  ;;  %v850_v14 = vld [vmem:[#allocation4 + $0x670] sm:$0xff] }
  0x90   :  { %1027 = vmatprep.subr.mxu1 %v799_v15  ;;  %1097 = vmatpush2.msra.mxu0 %v808_v17  ;;  %v843_v15 = vld [vmem:[#allocation4 + $0x638] sm:$0xff]  ;;  %v842_v17 = vld [vmem:[#allocation4 + $0x630] sm:$0xff] }
  0x91   :  { %1028 = vmatpush2.msra.mxu1 %v798_v18  ;;  %1098 = vmatprep.subr.mxu0 %v801_v19  ;;  %v835_v18 = vld [vmem:[#allocation4 + $0x5f8] sm:$0xff]  ;;  %v55_v19 = vlaneseq }
  0x92   :  { %1029 = vmatprep.subr.mxu1 %v791_v32  ;;  %1099 = vmatpush2.msra.mxu0 %v800_v20  ;;  %v834_v32 = vld [vmem:[#allocation4 + $0x5f0] sm:$0xff]  ;;  %v827_v20 = vld [vmem:[#allocation4 + $0x5b8] sm:$0xff] }
  0x93   :  { %565 = vmatprep.mubr.f32.mxu1 %v6288_v0  ;;  %1030 = vmatpush2.msra.mxu1 %v790_v22  ;;  %v826_v22 = vld [vmem:[#allocation4 + $0x5b0] sm:$0xff] }
  0x94   :  { %1100 = vmatprep.subr.mxu0 %v793_v23  ;;  %5865 = vmatmul.mubr.msk.f32.gmra.mxu1 %vm95_vm0, %v6424_v42  ;;  %v763_v42 = vld [vmem:[#allocation4 + $0x3b8] sm:$0xff] }
  0x95   :  { %1031 = vmatprep.subr.mxu1 %v783_v24  ;;  %1101 = vmatpush2.msra.mxu0 %v792_v25  ;;  %v819_v23 = vld [vmem:[#allocation4 + $0x578] sm:$0xff]  ;;  %v6494_v24 = vshrl.u32 %v55_v19, 7  ;;  %v818_v25 = vld [vmem:[#allocation4 + $0x570] sm:$0xff] }
  0x96   :  { %1032 = vmatpush2.msra.mxu1 %v782_v26  ;;  %1102 = vmatprep.subr.mxu0 %v785_v28  ;;  %v811_v26 = vld [vmem:[#allocation4 + $0x538] sm:$0xff]  ;;  %v810_v28 = vld [vmem:[#allocation4 + $0x530] sm:$0xff] }
  0x97   :  { %1033 = vmatprep.subr.mxu1 %v775_v37  ;;  %1103 = vmatpush2.msra.mxu0 %v784_v29  ;;  %v803_v37 = vld [vmem:[#allocation4 + $0x4f8] sm:$0xff]  ;;  %v57_v29 = vsub.s32 0, %v6494_v24 }
  0x98   :  { %1034 = vmatpush2.msra.mxu1 %v774_v30  ;;  %1035 = vmatprep.mubr.f32.mxu1 %v6288_v0  ;;  %v802_v30 = vld [vmem:[#allocation4 + $0x4f0] sm:$0xff] }
  0x99   :  { %1104 = vmatprep.subr.mxu0 %v777_v31  ;;  %1036 = vmatmul.mubr.f32.vlgmr.msra.gmra.mxu1 %v6288_v0  ;;  %v6500_v31 = vld [vmem:[%s7131_s2] sm:$0xff] }
  0x9a   :  { %1105 = vmatpush2.msra.mxu0 %v776_v33  ;;  %1106 = vmatprep.mubr.f32.mxu0 %v6288_v0 }
  0x9b   :  { %1113 = vmatprep.subr.mxu1 %v771_v34  ;;  %1107 = vmatmul.mubr.f32.vlgmr.msra.gmra.mxu0 %v6288_v0  ;;  %v795_v34 = vld [vmem:[#allocation4 + $0x4b8] sm:$0xff] }
  0x9c   :  { %1114 = vmatpush1.msra.mxu1 %v770_v35  ;;  %1177 = vmatprep.mubr.f32.mxu1 %v6288_v0  ;;  %v61_v35 = vsub.s32 1, %v6494_v24 }
  0x9d   :  { %1115 = vmatprep.subr.mxu1 %v763_v42  ;;  %v73_v42 = vsub.s32 4, %v6494_v24 }
  0x9e   :  { %1116 = vmatpush1.msra.mxu1 %v762_v36  ;;  %v794_v36 = vld [vmem:[#allocation4 + $0x4b0] sm:$0xff] }
  0x9f   :  { %1117 = vmatprep.subr.mxu1 %v755_v5 }
  0xa0   :  { %1118 = vmatpush1.msra.mxu1 %v754_v38 }
  0xa1   :  { %1119 = vmatprep.subr.mxu1 %v747_v39  ;;  %v787_v39 = vld [vmem:[#allocation4 + $0x478] sm:$0xff] }
  0xa2   :  { %1120 = vmatpush1.msra.mxu1 %v746_v40  ;;  %v6511_v40 = vrot.slane %v6500_v31, %v57_v29 }
  0xa3   :  { %1121 = vmatprep.subr.mxu1 %v739_v41  ;;  %v77_v41 = vsub.s32 5, %v6494_v24 }
  0xa4   :  { %1122 = vmatpush1.msra.mxu1 %v738_v43  ;;  %v786_v43 = vld [vmem:[#allocation4 + $0x470] sm:$0xff] }
  0xa5   :  { %1123 = vmatprep.subr.mxu1 %v731_v44 }
  0xa6   :  { %1124 = vmatpush1.msra.mxu1 %v730_v45 }
  0xa7   :  { %1125 = vmatprep.subr.mxu1 %v723_v46  ;;  %v779_v46 = vld [vmem:[#allocation4 + $0x438] sm:$0xff] }
  0xa8   :  { %1126 = vmatpush1.msra.mxu1 %v722_v47  ;;  %v6517_v47 = vrot.slane %v6500_v31, %v61_v35 }
  0xa9   :  { %1127 = vmatprep.subr.mxu1 %v715_v48 }
  0xaa   :  { %1128 = vmatpush1.msra.mxu1 %v714_v49  ;;  %v6523_v49 = vrot.slane %v6500_v31, %v73_v42 }
  0xab   :  { %1129 = vmatprep.subr.mxu1 %v707_v50  ;;  %v778_v50 = vld [vmem:[#allocation4 + $0x430] sm:$0xff] }
  0xac   :  { %1130 = vmatpush1.msra.mxu1 %v706_v51 }
  0xad   :  { %1131 = vmatprep.subr.mxu1 %v699_v11 }
  0xae   :  { %1132 = vmatpush1.msra.mxu1 %v698_v52 }
  0xaf   :  { %1133 = vmatprep.subr.mxu1 %v691_v53  ;;  %v6529_v53 = vrot.slane %v6500_v31, %v77_v41 }
  0xb0   :  { %1134 = vmatpush1.msra.mxu1 %v690_v54 }
  0xb1   :  { %1135 = vmatprep.subr.mxu1 %v683_v55 }
  0xb2   :  { %1136 = vmatpush1.msra.mxu1 %v682_v56 }
  0xb3   :  { %1137 = vmatprep.subr.mxu1 %v675_v57 }
  0xb4   :  { %1138 = vmatpush1.msra.mxu1 %v674_v58 }
  0xb5   :  { %1139 = vmatprep.subr.mxu1 %v667_v16 }
  0xb6   :  { %1140 = vmatpush1.msra.mxu1 %v666_v59 }
  0xb7   :  { %1141 = vmatprep.subr.mxu1 %v659_v60 }
  0xb8   :  { %1142 = vmatpush1.msra.mxu1 %v658_v61 }
  0xb9   :  { %1143 = vmatprep.subr.mxu1 %v651_v62 }
  0xba   :  { %1144 = vmatpush1.msra.mxu1 %v650_v63 }
  0xbb   :  { %1145 = vmatprep.subr.mxu1 %v899_v1 }
  0xbc   :  { %1146 = vmatpush2.msra.mxu1 %v898_v2 }
  0xbd   :  { %1147 = vmatprep.subr.mxu1 %v891_v21 }
  0xbe   :  { %1148 = vmatpush2.msra.mxu1 %v890_v3 }
  0xbf   :  { %1149 = vmatprep.subr.mxu1 %v883_v4 }
  0xc0   :  { %1150 = vmatpush2.msra.mxu1 %v882_v6 }
  0xc1   :  { %1151 = vmatprep.subr.mxu1 %v875_v7 }
  0xc2   :  { %1152 = vmatpush2.msra.mxu1 %v874_v8 }
  0xc3   :  { %1153 = vmatprep.subr.mxu1 %v867_v9 }
  0xc4   :  { %1154 = vmatpush2.msra.mxu1 %v866_v10 }
  0xc5   :  { %1155 = vmatprep.subr.mxu1 %v859_v27 }
  0xc6   :  { %1156 = vmatpush2.msra.mxu1 %v858_v12 }
  0xc7   :  { %1157 = vmatprep.subr.mxu1 %v851_v13 }
  0xc8   :  { %1158 = vmatpush2.msra.mxu1 %v850_v14 }
  0xc9   :  { %1159 = vmatprep.subr.mxu1 %v843_v15 }
  0xca   :  { %1160 = vmatpush2.msra.mxu1 %v842_v17 }
  0xcb   :  { %1161 = vmatprep.subr.mxu1 %v835_v18 }
  0xcc   :  { %1162 = vmatpush2.msra.mxu1 %v834_v32 }
  0xcd   :  { %1163 = vmatprep.subr.mxu1 %v827_v20 }
  0xce   :  { %1164 = vmatpush2.msra.mxu1 %v826_v22 }
  0xcf   :  { %1165 = vmatprep.subr.mxu1 %v819_v23 }
  0xd0   :  { %1166 = vmatpush2.msra.mxu1 %v818_v25 }
  0xd1   :  { %1167 = vmatprep.subr.mxu1 %v811_v26  ;;  %v6502_v33 = vpop.f32.mrf.mxu1 }
  0xd2   :  { %1168 = vmatpush2.msra.mxu1 %v810_v28 }
  0xd3   :  { %1169 = vmatprep.subr.mxu1 %v803_v37  ;;  %v6506_v5 = vpop.f32.mrf.mxu1  ;;  %v6508_v38 = vpop.f32.mrf.mxu0 }
  0xd4   :  { %1170 = vmatpush2.msra.mxu1 %v802_v30 }
  0xd5   :  { %1171 = vmatprep.subr.mxu1 %v795_v34  ;;  %v192_v44 = vpop.f32.mrf.mxu1  ;;  %v6514_v45 = vpop.f32.mrf.mxu0 }
  0xd6   :  { %1172 = vmatpush2.msra.mxu1 %v794_v36  ;;  %v6520_v48 = vadd.f32 %v192_v44, %v6511_v40 }
  0xd7   :  { %1173 = vmatprep.subr.mxu1 %v787_v39  ;;  %v194_v51 = vpop.f32.mrf.mxu1  ;;  %v418_v11 = vpop.f32.mrf.mxu0  ;;  %v65_v39 = vsub.s32 2, %v6494_v24 }
  0xd8   :  { %1174 = vmatpush2.msra.mxu1 %v786_v43  ;;  %v6526_v52 = vadd.f32 %v194_v51, %v6517_v47  ;;  %v6532_v54 = vadd.f32 %v418_v11, %v6523_v49 }
  0xd9   :  { %1175 = vmatprep.subr.mxu1 %v779_v46  ;;  %v198_v55 = vpop.f32.mrf.mxu1  ;;  %v420_v56 = vpop.f32.mrf.mxu0  ;;  %v69_v46 = vsub.s32 3, %v6494_v24  ;;  %v6611_v11 = vrot.slane %v6500_v31, %v65_v39  ;;  %v1365_v39 = vld [vmem:[#allocation4 + $0x398] sm:$0xff] }
  0xda   :  { %1176 = vmatpush2.msra.mxu1 %v778_v50  ;;  %v6535_v57 = vadd.f32 %v198_v55, %v6511_v40  ;;  %v6538_v58 = vadd.f32 %v420_v56, %v6529_v53 }
  0xdb   :  { %1178 = vmatmul.mubr.f32.vlgmr.msra.gmra.mxu1 %v6288_v0  ;;  %v200_v16 = vpop.f32.mrf.mxu1  ;;  %v424_v59 = vpop.f32.mrf.mxu0  ;;  %v6614_v56 = vrot.slane %v6500_v31, %v69_v46  ;;  %v1362_v46 = vld [vmem:[#allocation4 + $0x380] sm:$0xff] }
  0xdc   :  { %v6542_v60 = vadd.f32 %v200_v16, %v6517_v47  ;;  %v6545_v61 = vadd.f32 %v424_v59, %v6523_v49 }
  0xdd   :  { %v204_v62 = vpop.f32.mrf.mxu1  ;;  %v426_v63 = vpop.f32.mrf.mxu0 }
  0xde   :  { %v6548_v1 = vadd.f32 %v204_v62, %v6511_v40  ;;  %v6551_v2 = vadd.f32 %v426_v63, %v6529_v53 }
  0xdf   :  { %v206_v21 = vpop.f32.mrf.mxu1 }
  0xe0   :  { %v6554_v3 = vadd.f32 %v206_v21, %v6517_v47 }
  0xe1   :  { %v210_v0 = vpop.f32.mrf.mxu1 }
  0xe2   :  { %v6557_v4 = vadd.f32 %v210_v0, %v6511_v40 }
  0xe3   :  { %v212_v6 = vpop.f32.mrf.mxu1  ;;  %v430_v7 = vpop.f32.mrf.mxu0 }
  0xe4   :  { %v6560_v8 = vadd.f32 %v212_v6, %v6517_v47  ;;  %v6563_v9 = vadd.f32 %v430_v7, %v6523_v49 }
  0xe5   :  { %v216_v10 = vpop.f32.mrf.mxu1  ;;  %v432_v27 = vpop.f32.mrf.mxu0 }
  0xe6   :  { %v6566_v12 = vadd.f32 %v216_v10, %v6511_v40  ;;  %v6569_v13 = vadd.f32 %v432_v27, %v6529_v53 }
  0xe7   :  { %v218_v14 = vpop.f32.mrf.mxu1  ;;  %v436_v15 = vpop.f32.mrf.mxu0 }
  0xe8   :  { %v6572_v17 = vadd.f32 %v218_v14, %v6517_v47  ;;  %v6575_v18 = vadd.f32 %v436_v15, %v6523_v49 }
  0xe9   :  { %v222_v19 = vpop.f32.mrf.mxu1  ;;  %v438_v32 = vpop.f32.mrf.mxu0 }
  0xea   :  { %7136 = vst [vmem:[#allocation7_spill] sm:$0xff] %v6572_v17  ;;  %v6578_v20 = vadd.f32 %v222_v19, %v6511_v40  ;;  %v6581_v22 = vadd.f32 %v438_v32, %v6529_v53 }
  0xeb   :  { %v224_v23 = vpop.f32.mrf.mxu1  ;;  %v442_v25 = vpop.f32.mrf.mxu0 }
  0xec   :  { %7137 = vst [vmem:[#allocation8_spill] sm:$0xff] %v6578_v20  ;;  %v6584_v26 = vadd.f32 %v224_v23, %v6517_v47  ;;  %v6587_v28 = vadd.f32 %v442_v25, %v6523_v49  ;;  %v1371_v23 = vld [vmem:[#allocation4 + $0x3c8] sm:$0xff]  ;;  %v1373_v25 = vld [vmem:[#allocation4 + $0x3d8] sm:$0xff] }
  0xed   :  { %v228_v37 = vpop.f32.mrf.mxu1  ;;  %v444_v29 = vpop.f32.mrf.mxu0  ;;  %1506 = vmatprep.subr.mxu0 %v1371_v23  ;;  %1577 = vmatprep.subr.mxu1 %v1373_v25  ;;  %v1349_v23 = vld [vmem:[#allocation4 + $0x318] sm:$0xff] }
  0xee   :  { %7138 = vst [vmem:[#allocation9_spill] sm:$0xff] %v6584_v26  ;;  %7139 = vst [vmem:[#allocation10_spill] sm:$0xff] %v6587_v28  ;;  %v6590_v30 = vadd.f32 %v228_v37, %v6511_v40  ;;  %v6593_v34 = vadd.f32 %v444_v29, %v6529_v53  ;;  %v1370_v37 = vld [vmem:[#allocation4 + $0x3c0] sm:$0xff] }
  0xef   :  { %v230_v35 = vpop.f32.mrf.mxu1  ;;  %v448_v42 = vpop.f32.mrf.mxu0  ;;  %1507 = vmatpush1.msra.mxu0 %v1370_v37  ;;  %v1346_v37 = vld [vmem:[#allocation4 + $0x300] sm:$0xff] }
  0xf0   :  { %7140 = vst [vmem:[#allocation11_spill] sm:$0xff] %v6590_v30  ;;  %7141 = vst [vmem:[#allocation12_spill] sm:$0xff] %v6593_v34  ;;  %v6596_v36 = vadd.f32 %v230_v35, %v6517_v47  ;;  %v6600_v41 = vadd.f32 %v448_v42, %v6523_v49  ;;  %v1372_v35 = vld [vmem:[#allocation4 + $0x3d0] sm:$0xff]  ;;  %v1363_v42 = vld [vmem:[#allocation4 + $0x388] sm:$0xff]  ;;  %v189_v34 = vadd.f32 %v6506_v5, %v6517_v47 }
  0xf1   :  { %v6602_v43 = vpop.f32.mrf.mxu1  ;;  %v450_v44 = vpop.f32.mrf.mxu0  ;;  %1578 = vmatpush1.msra.mxu1 %v1372_v35  ;;  %1508 = vmatprep.subr.mxu0 %v1363_v42  ;;  %v1348_v35 = vld [vmem:[#allocation4 + $0x310] sm:$0xff]  ;;  %v1339_v42 = vld [vmem:[#allocation4 + $0x2c8] sm:$0xff]  ;;  %v415_v47 = vadd.f32 %v6514_v45, %v6529_v53 }
  0xf2   :  { %7142 = vst [vmem:[#allocation13_spill] sm:$0xff] %v6596_v36  ;;  %7143 = vst [vmem:[#allocation14_spill] sm:$0xff] %v6600_v41  ;;  %v6606_v50 = vadd.f32 %v450_v44, %v6529_v53  ;;  %1579 = vmatprep.subr.mxu1 %v1365_v39  ;;  %1509 = vmatpush1.msra.mxu0 %v1362_v46  ;;  %v1341_v39 = vld [vmem:[#allocation4 + $0x2d8] sm:$0xff]  ;;  %v1338_v46 = vld [vmem:[#allocation4 + $0x2c0] sm:$0xff] }
  0xf3   :  { %v6608_v51 = vpop.f32.mrf.mxu1 }
  0xf4   :  { %7144 = vst [vmem:[#allocation15_spill] sm:$0xff] %v6606_v50 }
  0xf5   :  { %v305_v55 = vpop.f32.mrf.mxu1 }
  0xf6   :  { %v6617_v16 = vadd.f32 %v305_v55, %v6611_v11  ;;  %v1364_v55 = vld [vmem:[#allocation4 + $0x390] sm:$0xff] }
  0xf7   :  { %v307_v59 = vpop.f32.mrf.mxu1  ;;  %v454_v62 = vpop.f32.mrf.mxu0  ;;  %1580 = vmatpush1.msra.mxu1 %v1364_v55  ;;  %v1340_v55 = vld [vmem:[#allocation4 + $0x2d0] sm:$0xff] }
  0xf8   :  { %v6620_v63 = vadd.f32 %v307_v59, %v6614_v56  ;;  %v6623_v21 = vadd.f32 %v454_v62, %v6523_v49  ;;  %v1355_v59 = vld [vmem:[#allocation4 + $0x348] sm:$0xff] }
  0xf9   :  { %v311_v0 = vpop.f32.mrf.mxu1  ;;  %v456_v6 = vpop.f32.mrf.mxu0  ;;  %1510 = vmatprep.subr.mxu0 %v1355_v59  ;;  %v1333_v59 = vld [vmem:[#allocation4 + $0x298] sm:$0xff] }
  0xfa   :  { %7145 = vst [vmem:[#allocation16_spill] sm:$0xff] %v6623_v21  ;;  %v6626_v7 = vadd.f32 %v311_v0, %v6611_v11  ;;  %v6629_v10 = vadd.f32 %v456_v6, %v6529_v53  ;;  %v1357_v0 = vld [vmem:[#allocation4 + $0x358] sm:$0xff]  ;;  %v1354_v6 = vld [vmem:[#allocation4 + $0x340] sm:$0xff] }
  0xfb   :  { %v313_v27 = vpop.f32.mrf.mxu1  ;;  %1581 = vmatprep.subr.mxu1 %v1357_v0  ;;  %1511 = vmatpush1.msra.mxu0 %v1354_v6  ;;  %v1330_v6 = vld [vmem:[#allocation4 + $0x280] sm:$0xff] }
  0xfc   :  { %7146 = vst [vmem:[#allocation17_spill] sm:$0xff] %v6629_v10  ;;  %v6632_v14 = vadd.f32 %v313_v27, %v6614_v56  ;;  %v1356_v27 = vld [vmem:[#allocation4 + $0x350] sm:$0xff] }
  0xfd   :  { %v317_v15 = vpop.f32.mrf.mxu1  ;;  %1582 = vmatpush1.msra.mxu1 %v1356_v27  ;;  %v1332_v27 = vld [vmem:[#allocation4 + $0x290] sm:$0xff] }
  0xfe   :  { %v6635_v19 = vadd.f32 %v317_v15, %v6611_v11  ;;  %1583 = vmatprep.subr.mxu1 %v1349_v23 }
  0xff   :  { %v319_v32 = vpop.f32.mrf.mxu1  ;;  %1584 = vmatpush1.msra.mxu1 %v1348_v35  ;;  %v1324_v35 = vld [vmem:[#allocation4 + $0x250] sm:$0xff] }
 0x100   :  { %v6638_v29 = vadd.f32 %v319_v32, %v6614_v56  ;;  %v1347_v32 = vld [vmem:[#allocation4 + $0x308] sm:$0xff]  ;;  %1585 = vmatprep.subr.mxu1 %v1341_v39 }
 0x101   :  { %v323_v44 = vpop.f32.mrf.mxu1  ;;  %1512 = vmatprep.subr.mxu0 %v1347_v32  ;;  %1586 = vmatpush1.msra.mxu1 %v1340_v55  ;;  %v1325_v32 = vld [vmem:[#allocation4 + $0x258] sm:$0xff]  ;;  %v1316_v55 = vld [vmem:[#allocation4 + $0x210] sm:$0xff] }
 0x102   :  { %v6641_v62 = vadd.f32 %v323_v44, %v6611_v11  ;;  %1513 = vmatpush1.msra.mxu0 %v1346_v37  ;;  %1587 = vmatprep.subr.mxu1 %v1333_v59  ;;  %v1322_v37 = vld [vmem:[#allocation4 + $0x240] sm:$0xff] }
 0x103   :  { %v325_v15 = vpop.f32.mrf.mxu1  ;;  %1514 = vmatprep.subr.mxu0 %v1339_v42  ;;  %1588 = vmatpush1.msra.mxu1 %v1332_v27  ;;  %v1317_v42 = vld [vmem:[#allocation4 + $0x218] sm:$0xff]  ;;  %v1308_v27 = vld [vmem:[#allocation4 + $0x1d0] sm:$0xff] }
 0x104   :  { %v6644_v25 = vadd.f32 %v325_v15, %v6614_v56  ;;  %v1331_v15 = vld [vmem:[#allocation4 + $0x288] sm:$0xff]  ;;  %1515 = vmatpush1.msra.mxu0 %v1338_v46  ;;  %1589 = vmatprep.subr.mxu1 %v1325_v32  ;;  %v1314_v46 = vld [vmem:[#allocation4 + $0x200] sm:$0xff] }
 0x105   :  { %v329_v10 = vpop.f32.mrf.mxu1  ;;  %1516 = vmatprep.subr.mxu0 %v1331_v15  ;;  %1590 = vmatpush1.msra.mxu1 %v1324_v35  ;;  %v1309_v15 = vld [vmem:[#allocation4 + $0x1d8] sm:$0xff]  ;;  %v1300_v35 = vld [vmem:[#allocation4 + $0x190] sm:$0xff] }
 0x106   :  { %v6647_v44 = vadd.f32 %v329_v10, %v6611_v11  ;;  %v1323_v10 = vld [vmem:[#allocation4 + $0x248] sm:$0xff]  ;;  %1517 = vmatpush1.msra.mxu0 %v1330_v6  ;;  %1591 = vmatprep.subr.mxu1 %v1317_v42  ;;  %v1306_v6 = vld [vmem:[#allocation4 + $0x1c0] sm:$0xff]  ;;  %v1292_v42 = vld [vmem:[#allocation4 + $0x150] sm:$0xff] }
 0x107   :  { %v331_v21 = vpop.f32.mrf.mxu1  ;;  %1518 = vmatprep.subr.mxu0 %v1323_v10  ;;  %1592 = vmatpush1.msra.mxu1 %v1316_v55  ;;  %v1301_v10 = vld [vmem:[#allocation4 + $0x198] sm:$0xff] }
 0x108   :  { %7147 = vst [vmem:[#allocation18_spill] sm:$0xff] %v6647_v44  ;;  %v6650_v0 = vadd.f32 %v331_v21, %v6614_v56  ;;  %v1315_v21 = vld [vmem:[#allocation4 + $0x208] sm:$0xff]  ;;  %1519 = vmatpush1.msra.mxu0 %v1322_v37  ;;  %1593 = vmatprep.subr.mxu1 %v1309_v15  ;;  %v1298_v37 = vld [vmem:[#allocation4 + $0x180] sm:$0xff]  ;;  %v1285_v55 = vld [vmem:[#allocation4 + $0x118] sm:$0xff] }
 0x109   :  { %v335_v36 = vpop.f32.mrf.mxu1  ;;  %1520 = vmatprep.subr.mxu0 %v1315_v21  ;;  %1594 = vmatpush1.msra.mxu1 %v1308_v27  ;;  %v1290_v21 = vld [vmem:[#allocation4 + $0x140] sm:$0xff]  ;;  %v1277_v15 = vld [vmem:[#allocation4 + $0xd8] sm:$0xff]  ;;  %v1276_v27 = vld [vmem:[#allocation4 + $0xd0] sm:$0xff] }
 0x10a   :  { %7148 = vst [vmem:[#allocation19_spill] sm:$0xff] %v6650_v0  ;;  %v6653_v23 = vadd.f32 %v335_v36, %v6611_v11  ;;  %v1307_v36 = vld [vmem:[#allocation4 + $0x1c8] sm:$0xff]  ;;  %1521 = vmatpush1.msra.mxu0 %v1314_v46  ;;  %1595 = vmatprep.subr.mxu1 %v1301_v10  ;;  %v1269_v10 = vld [vmem:[#allocation4 + $0x98] sm:$0xff] }
 0x10b   :  { %v337_v30 = vpop.f32.mrf.mxu1  ;;  %1522 = vmatprep.subr.mxu0 %v1307_v36  ;;  %1596 = vmatpush1.msra.mxu1 %v1300_v35  ;;  %v1283_v46 = vld [vmem:[#allocation4 + $0x108] sm:$0xff] }
 0x10c   :  { %7149 = vst [vmem:[#allocation20_spill] sm:$0xff] %v6653_v23  ;;  %v6656_v39 = vadd.f32 %v337_v30, %v6614_v56  ;;  %v1299_v30 = vld [vmem:[#allocation4 + $0x188] sm:$0xff]  ;;  %1523 = vmatpush1.msra.mxu0 %v1306_v6  ;;  %v1274_v6 = vld [vmem:[#allocation4 + $0xc0] sm:$0xff]  ;;  %v187_v23 = vadd.f32 %v6502_v33, %v6511_v40 }
 0x10d   :  { %v341_v50 = vpop.f32.mrf.mxu1  ;;  %1524 = vmatprep.subr.mxu0 %v1299_v30  ;;  %v1275_v36 = vld [vmem:[#allocation4 + $0xc8] sm:$0xff] }
 0x10e   :  { %7150 = vst [vmem:[#allocation21_spill] sm:$0xff] %v6656_v39  ;;  %v6659_v59 = vadd.f32 %v341_v50, %v6611_v11  ;;  %v1291_v50 = vld [vmem:[#allocation4 + $0x148] sm:$0xff]  ;;  %1525 = vmatpush1.msra.mxu0 %v1298_v37  ;;  %v1268_v37 = vld [vmem:[#allocation4 + $0x90] sm:$0xff] }
 0x10f   :  { %v343_v41 = vpop.f32.mrf.mxu1  ;;  %1526 = vmatprep.subr.mxu0 %v1291_v50  ;;  %v1267_v30 = vld [vmem:[#allocation4 + $0x88] sm:$0xff]  ;;  %v1261_v50 = vld [vmem:[#allocation4 + $0x58] sm:$0xff] }
 0x110   :  { %7151 = vst [vmem:[#allocation22_spill] sm:$0xff] %v6659_v59  ;;  %v6662_v32 = vadd.f32 %v343_v41, %v6614_v56  ;;  %v1293_v59 = vld [vmem:[#allocation4 + $0x158] sm:$0xff]  ;;  %v1282_v41 = vld [vmem:[#allocation4 + $0x100] sm:$0xff]  ;;  %1527 = vmatpush1.msra.mxu0 %v1290_v21  ;;  %v1259_v35 = vld [vmem:[#allocation4 + $0x48] sm:$0xff] }
 0x111   :  { %1597 = vmatprep.subr.mxu1 %v1293_v59  ;;  %1528 = vmatprep.subr.mxu0 %v1283_v46  ;;  %v1266_v59 = vld [vmem:[#allocation4 + $0x80] sm:$0xff]  ;;  %v1253_v46 = vld [vmem:[#allocation4 + $0x18] sm:$0xff] }
 0x112   :  { %7152 = vst [vmem:[#allocation23_spill] sm:$0xff] %v6662_v32  ;;  %v1284_v32 = vld [vmem:[#allocation4 + $0x110] sm:$0xff]  ;;  %1598 = vmatpush1.msra.mxu1 %v1292_v42  ;;  %1529 = vmatpush1.msra.mxu0 %v1282_v41  ;;  %v1258_v21 = vld [vmem:[#allocation4 + $0x40] sm:$0xff]  ;;  %v1251_v42 = vld [vmem:[#allocation4 + $0x8] sm:$0xff] }
 0x113   :  { %1599 = vmatprep.subr.mxu1 %v1285_v55  ;;  %1530 = vmatprep.subr.mxu0 %v1275_v36  ;;  %v1250_v55 = vld [vmem:[#allocation4] sm:$0xff]  ;;  %v1252_v41 = vld [vmem:[#allocation4 + $0x10] sm:$0xff]  ;;  %v1499_v36 = vld [vmem:[#allocation4 + $0x7c8] sm:$0xff]  ;;  %v966_v39 = vpop.f32.mrf.mxu0 }
 0x114   :  { %1600 = vmatpush1.msra.mxu1 %v1284_v32  ;;  %1531 = vmatpush1.msra.mxu0 %v1274_v6  ;;  %v1260_v32 = vld [vmem:[#allocation4 + $0x50] sm:$0xff]  ;;  %v1498_v6 = vld [vmem:[#allocation4 + $0x7c0] sm:$0xff]  ;;  %v1184_v28 = vadd.f32 %v966_v39, %v187_v23 }
 0x115   :  { %1601 = vmatprep.subr.mxu1 %v1277_v15  ;;  %1532 = vmatprep.subr.mxu0 %v1267_v30  ;;  %v1501_v15 = vld [vmem:[#allocation4 + $0x7d8] sm:$0xff]  ;;  %v1491_v30 = vld [vmem:[#allocation4 + $0x788] sm:$0xff]  ;;  %v968_v20 = vpop.f32.mrf.mxu0 }
 0x116   :  { %1602 = vmatpush1.msra.mxu1 %v1276_v27  ;;  %1533 = vmatpush1.msra.mxu0 %v1266_v59  ;;  %v1500_v27 = vld [vmem:[#allocation4 + $0x7d0] sm:$0xff]  ;;  %v1490_v59 = vld [vmem:[#allocation4 + $0x780] sm:$0xff] }
 0x117   :  { %1603 = vmatprep.subr.mxu1 %v1269_v10  ;;  %1534 = vmatprep.subr.mxu0 %v1259_v35  ;;  %v1493_v10 = vld [vmem:[#allocation4 + $0x798] sm:$0xff]  ;;  %v1483_v35 = vld [vmem:[#allocation4 + $0x748] sm:$0xff] }
 0x118   :  { %1604 = vmatpush1.msra.mxu1 %v1268_v37  ;;  %1535 = vmatpush1.msra.mxu0 %v1258_v21  ;;  %v1492_v37 = vld [vmem:[#allocation4 + $0x790] sm:$0xff]  ;;  %v1482_v21 = vld [vmem:[#allocation4 + $0x740] sm:$0xff] }
 0x119   :  { %1605 = vmatprep.subr.mxu1 %v1261_v50  ;;  %1536 = vmatprep.subr.mxu0 %v1251_v42  ;;  %v1485_v50 = vld [vmem:[#allocation4 + $0x758] sm:$0xff]  ;;  %v1475_v42 = vld [vmem:[#allocation4 + $0x708] sm:$0xff] }
 0x11a   :  { %1606 = vmatpush1.msra.mxu1 %v1260_v32  ;;  %1537 = vmatpush1.msra.mxu0 %v1250_v55  ;;  %v1484_v32 = vld [vmem:[#allocation4 + $0x750] sm:$0xff]  ;;  %v1474_v55 = vld [vmem:[#allocation4 + $0x700] sm:$0xff] }
 0x11b   :  { %1607 = vmatprep.subr.mxu1 %v1253_v46  ;;  %1538 = vmatprep.subr.mxu0 %v1499_v36  ;;  %v1477_v46 = vld [vmem:[#allocation4 + $0x718] sm:$0xff]  ;;  %v1467_v36 = vld [vmem:[#allocation4 + $0x6c8] sm:$0xff] }
 0x11c   :  { %1608 = vmatpush1.msra.mxu1 %v1252_v41  ;;  %1539 = vmatpush2.msra.mxu0 %v1498_v6  ;;  %v1476_v41 = vld [vmem:[#allocation4 + $0x710] sm:$0xff]  ;;  %v1466_v6 = vld [vmem:[#allocation4 + $0x6c0] sm:$0xff] }
 0x11d   :  { %1609 = vmatprep.subr.mxu1 %v1501_v15  ;;  %1540 = vmatprep.subr.mxu0 %v1491_v30  ;;  %v1469_v15 = vld [vmem:[#allocation4 + $0x6d8] sm:$0xff]  ;;  %v1459_v30 = vld [vmem:[#allocation4 + $0x688] sm:$0xff] }
 0x11e   :  { %1610 = vmatpush2.msra.mxu1 %v1500_v27  ;;  %1541 = vmatpush2.msra.mxu0 %v1490_v59  ;;  %v1468_v27 = vld [vmem:[#allocation4 + $0x6d0] sm:$0xff]  ;;  %v1458_v59 = vld [vmem:[#allocation4 + $0x680] sm:$0xff] }
 0x11f   :  { %1611 = vmatprep.subr.mxu1 %v1493_v10  ;;  %1542 = vmatprep.subr.mxu0 %v1483_v35  ;;  %v1461_v10 = vld [vmem:[#allocation4 + $0x698] sm:$0xff]  ;;  %v1451_v35 = vld [vmem:[#allocation4 + $0x648] sm:$0xff] }
 0x120   :  { %1612 = vmatpush2.msra.mxu1 %v1492_v37  ;;  %1543 = vmatpush2.msra.mxu0 %v1482_v21  ;;  %v1460_v37 = vld [vmem:[#allocation4 + $0x690] sm:$0xff]  ;;  %v1450_v21 = vld [vmem:[#allocation4 + $0x640] sm:$0xff] }
 0x121   :  { %1613 = vmatprep.subr.mxu1 %v1485_v50  ;;  %1544 = vmatprep.subr.mxu0 %v1475_v42  ;;  %v1453_v50 = vld [vmem:[#allocation4 + $0x658] sm:$0xff]  ;;  %v1443_v42 = vld [vmem:[#allocation4 + $0x608] sm:$0xff] }
 0x122   :  { %1614 = vmatpush2.msra.mxu1 %v1484_v32  ;;  %1545 = vmatpush2.msra.mxu0 %v1474_v55  ;;  %v1452_v32 = vld [vmem:[#allocation4 + $0x650] sm:$0xff]  ;;  %v1442_v55 = vld [vmem:[#allocation4 + $0x600] sm:$0xff] }
 0x123   :  { %1615 = vmatprep.subr.mxu1 %v1477_v46  ;;  %1546 = vmatprep.subr.mxu0 %v1467_v36  ;;  %v1445_v46 = vld [vmem:[#allocation4 + $0x618] sm:$0xff]  ;;  %v1435_v36 = vld [vmem:[#allocation4 + $0x5c8] sm:$0xff] }
 0x124   :  { %1616 = vmatpush2.msra.mxu1 %v1476_v41  ;;  %1547 = vmatpush2.msra.mxu0 %v1466_v6  ;;  %v1444_v41 = vld [vmem:[#allocation4 + $0x610] sm:$0xff]  ;;  %v1434_v6 = vld [vmem:[#allocation4 + $0x5c0] sm:$0xff] }
 0x125   :  { %1617 = vmatprep.subr.mxu1 %v1469_v15  ;;  %1548 = vmatprep.subr.mxu0 %v1459_v30  ;;  %v1437_v15 = vld [vmem:[#allocation4 + $0x5d8] sm:$0xff]  ;;  %v1427_v30 = vld [vmem:[#allocation4 + $0x588] sm:$0xff] }
 0x126   :  { %1618 = vmatpush2.msra.mxu1 %v1468_v27  ;;  %1549 = vmatpush2.msra.mxu0 %v1458_v59  ;;  %v1436_v27 = vld [vmem:[#allocation4 + $0x5d0] sm:$0xff]  ;;  %v1426_v59 = vld [vmem:[#allocation4 + $0x580] sm:$0xff] }
 0x127   :  { %1619 = vmatprep.subr.mxu1 %v1461_v10  ;;  %1550 = vmatprep.subr.mxu0 %v1451_v35  ;;  %v1429_v10 = vld [vmem:[#allocation4 + $0x598] sm:$0xff]  ;;  %v1419_v35 = vld [vmem:[#allocation4 + $0x548] sm:$0xff] }
 0x128   :  { %1620 = vmatpush2.msra.mxu1 %v1460_v37  ;;  %1551 = vmatpush2.msra.mxu0 %v1450_v21  ;;  %v1428_v37 = vld [vmem:[#allocation4 + $0x590] sm:$0xff]  ;;  %v1418_v21 = vld [vmem:[#allocation4 + $0x540] sm:$0xff] }
 0x129   :  { %1621 = vmatprep.subr.mxu1 %v1453_v50  ;;  %1552 = vmatprep.subr.mxu0 %v1443_v42  ;;  %v1421_v50 = vld [vmem:[#allocation4 + $0x558] sm:$0xff]  ;;  %v1411_v42 = vld [vmem:[#allocation4 + $0x508] sm:$0xff] }
 0x12a   :  { %1622 = vmatpush2.msra.mxu1 %v1452_v32  ;;  %1553 = vmatpush2.msra.mxu0 %v1442_v55  ;;  %v1420_v32 = vld [vmem:[#allocation4 + $0x550] sm:$0xff]  ;;  %v1410_v55 = vld [vmem:[#allocation4 + $0x500] sm:$0xff] }
 0x12b   :  { %1623 = vmatprep.subr.mxu1 %v1445_v46  ;;  %1554 = vmatprep.subr.mxu0 %v1435_v36  ;;  %v1413_v46 = vld [vmem:[#allocation4 + $0x518] sm:$0xff]  ;;  %v1403_v36 = vld [vmem:[#allocation4 + $0x4c8] sm:$0xff] }
 0x12c   :  { %1624 = vmatpush2.msra.mxu1 %v1444_v41  ;;  %1555 = vmatpush2.msra.mxu0 %v1434_v6  ;;  %v1412_v41 = vld [vmem:[#allocation4 + $0x510] sm:$0xff]  ;;  %v1402_v6 = vld [vmem:[#allocation4 + $0x4c0] sm:$0xff] }
 0x12d   :  { %1625 = vmatprep.subr.mxu1 %v1437_v15  ;;  %1556 = vmatprep.subr.mxu0 %v1427_v30  ;;  %v1405_v15 = vld [vmem:[#allocation4 + $0x4d8] sm:$0xff]  ;;  %v1395_v30 = vld [vmem:[#allocation4 + $0x488] sm:$0xff] }
 0x12e   :  { %1626 = vmatpush2.msra.mxu1 %v1436_v27  ;;  %1557 = vmatpush2.msra.mxu0 %v1426_v59  ;;  %v1404_v27 = vld [vmem:[#allocation4 + $0x4d0] sm:$0xff]  ;;  %v1394_v59 = vld [vmem:[#allocation4 + $0x480] sm:$0xff] }
 0x12f   :  { %1627 = vmatprep.subr.mxu1 %v1429_v10  ;;  %1558 = vmatprep.subr.mxu0 %v1419_v35  ;;  %v1397_v10 = vld [vmem:[#allocation4 + $0x498] sm:$0xff]  ;;  %v1387_v35 = vld [vmem:[#allocation4 + $0x448] sm:$0xff] }
 0x130   :  { %1628 = vmatpush2.msra.mxu1 %v1428_v37  ;;  %1559 = vmatpush2.msra.mxu0 %v1418_v21  ;;  %v1396_v37 = vld [vmem:[#allocation4 + $0x490] sm:$0xff]  ;;  %v6664_v21 = vpop.f32.mrf.mxu1 }
 0x131   :  { %1629 = vmatprep.subr.mxu1 %v1421_v50  ;;  %1560 = vmatprep.subr.mxu0 %v1411_v42  ;;  %v1389_v50 = vld [vmem:[#allocation4 + $0x458] sm:$0xff]  ;;  %v1388_v42 = vld [vmem:[#allocation4 + $0x450] sm:$0xff] }
 0x132   :  { %1630 = vmatpush2.msra.mxu1 %v1420_v32  ;;  %1561 = vmatpush2.msra.mxu0 %v1410_v55  ;;  %v1386_v32 = vld [vmem:[#allocation4 + $0x440] sm:$0xff]  ;;  %v1381_v55 = vld [vmem:[#allocation4 + $0x418] sm:$0xff] }
 0x133   :  { %1631 = vmatprep.subr.mxu1 %v1413_v46  ;;  %1562 = vmatprep.subr.mxu0 %v1403_v36  ;;  %v1379_v46 = vld [vmem:[#allocation4 + $0x408] sm:$0xff]  ;;  %v1380_v36 = vld [vmem:[#allocation4 + $0x410] sm:$0xff] }
 0x134   :  { %1632 = vmatpush2.msra.mxu1 %v1412_v41  ;;  %1563 = vmatpush2.msra.mxu0 %v1402_v6  ;;  %v1378_v41 = vld [vmem:[#allocation4 + $0x400] sm:$0xff]  ;;  %v1375_v6 = vld [vmem:[#allocation4 + $0x3e8] sm:$0xff] }
 0x135   :  { %1633 = vmatprep.subr.mxu1 %v1405_v15  ;;  %1564 = vmatprep.subr.mxu0 %v1395_v30  ;;  %v6666_v15 = vpop.f32.mrf.mxu1 }
 0x136   :  { %1634 = vmatpush2.msra.mxu1 %v1404_v27  ;;  %1565 = vmatpush2.msra.mxu0 %v1394_v59  ;;  %v1377_v27 = vld [vmem:[#allocation4 + $0x3f8] sm:$0xff] }
 0x137   :  { %1635 = vmatprep.subr.mxu1 %v1397_v10  ;;  %1566 = vmatprep.subr.mxu0 %v1387_v35  ;;  %v6668_v30 = vpop.f32.mrf.mxu1 }
 0x138   :  { %1636 = vmatpush2.msra.mxu1 %v1396_v37  ;;  %1567 = vmatpush2.msra.mxu0 %v1386_v32 }
 0x139   :  { %1637 = vmatprep.subr.mxu1 %v1389_v50  ;;  %1568 = vmatprep.subr.mxu0 %v1379_v46  ;;  %v6670_v10 = vpop.f32.mrf.mxu1 }
 0x13a   :  { %1638 = vmatpush2.msra.mxu1 %v1388_v42  ;;  %1569 = vmatpush2.msra.mxu0 %v1378_v41 }
 0x13b   :  { %1639 = vmatprep.subr.mxu1 %v1381_v55  ;;  %1648 = vmatprep.subr.mxu0 %v1375_v6  ;;  %v6672_v59 = vpop.f32.mrf.mxu1 }
 0x13c   :  { %1640 = vmatpush2.msra.mxu1 %v1380_v36 }
 0x13d   :  { %1719 = vmatprep.subr.mxu1 %v1377_v27  ;;  %v6674_v37 = vpop.f32.mrf.mxu1 }
 0x140   :  { %v6676_v35 = vpop.f32.mrf.mxu1 }
 0x142   :  { %v6678_v50 = vpop.f32.mrf.mxu1 }
 0x145   :  { %v6680_v32 = vpop.f32.mrf.mxu1 }
 0x147   :  { %v6682_v42 = vpop.f32.mrf.mxu1 }
 0x14a   :  { %v6684_v46 = vpop.f32.mrf.mxu1 }
 0x14b   :  { %7153 = vst [vmem:[#allocation24_spill] sm:$0xff] %v6684_v46 }
 0x14c   :  { %v6686_v55 = vpop.f32.mrf.mxu1 }
 0x14d   :  { %7154 = vst [vmem:[#allocation25_spill] sm:$0xff] %v6686_v55  ;;  %v300_v55 = vadd.f32 %v6602_v43, %v6611_v11  ;;  %v413_v11 = vadd.f32 %v6508_v38, %v6523_v49 }
 0x14f   :  { %v6688_v41 = vpop.f32.mrf.mxu1 }
 0x150   :  { %7155 = vst [vmem:[#allocation26_spill] sm:$0xff] %v6688_v41  ;;  %v1185_v41 = vadd.f32 %v968_v20, %v189_v34  ;;  %v81_v34 = vsub.s32 6, %v6494_v24 }
 0x151   :  { %v6690_v36 = vpop.f32.mrf.mxu1 }
 0x152   :  { %7156 = vst [vmem:[#allocation27_spill] sm:$0xff] %v6690_v36  ;;  %v5867_v17 = vmul.f32 -1.442695, %v1185_v41 }
 0x154   :  { %v6692_v6 = vpop.f32.mrf.mxu1 }
 0x155   :  { %7157 = vst [vmem:[#allocation28_spill] sm:$0xff] %v6692_v6  ;;  %v302_v6 = vadd.f32 %v6608_v51, %v6614_v56 }
 0x156   :  { %v6694_v27 = vpop.f32.mrf.mxu1 }
 0x157   :  { %7158 = vst [vmem:[#allocation29_spill] sm:$0xff] %v6694_v27  ;;  %v5866_v27 = vmul.f32 -1.442695, %v1184_v28 }
 0x159   :  { %v1037_v26 = vpop.f32.mrf.mxu1  ;;  %5975 = vpow2.f32 %v5866_v27 }
 0x15a   :  { %v1186_v36 = vadd.f32 %v1037_v26, %v300_v55  ;;  %5977 = vpow2.f32 %v5867_v17  ;;  %v85_v26 = vsub.s32 7, %v6494_v24 }
 0x15b   :  { %v1039_v46 = vpop.f32.mrf.mxu1  ;;  %v1108_v5 = vpop.f32.mrf.mxu0 }
 0x15c   :  { %v1187_v0 = vadd.f32 %v1039_v46, %v302_v6  ;;  %v5868_v44 = vmul.f32 -1.442695, %v1186_v36  ;;  %v1188_v23 = vadd.f32 %v1108_v5, %v413_v11  ;;  %v6714_v45 = vrot.slane %v6500_v31, %v85_v26 }
 0x15d   :  { %v1110_v40 = vpop.f32.mrf.mxu0 }
 0x15e   :  { %v5869_v33 = vmul.f32 -1.442695, %v1187_v0  ;;  %5979 = vpow2.f32 %v5868_v44  ;;  %v1189_v51 = vadd.f32 %v1110_v40, %v415_v47  ;;  %v6711_v44 = vrot.slane %v6500_v31, %v81_v34 }
 0x15f   :  { %v5870_v55 = vmul.f32 -1.442695, %v1188_v23  ;;  %v528_v49 = vadd.f32 %v6666_v15, %v6714_v45 }
 0x160   :  { %5981 = vpow2.f32 %v5869_v33  ;;  %v5871_v39 = vmul.f32 -1.442695, %v1189_v51  ;;  %v526_v24 = vadd.f32 %v6664_v21, %v6711_v44 }
 0x166   :  { %v5976_v20 = vpop.eup %5975 }
 0x167   :  { %v5978_v43 = vpop.eup %5977  ;;  %v1210_v56 = vadd.f32 1.0, %v5976_v20 }
 0x168   :  { %v1211_v0 = vadd.f32 1.0, %v5978_v43 }
 0x169   :  { %5983 = vrcp.f32 %v1210_v56 }
 0x16a   :  { %5985 = vrcp.f32 %v1211_v0 }
 0x16b   :  { %v5980_v28 = vpop.eup %5979  ;;  %5987 = vpow2.f32 %v5871_v39 }
 0x16c   :  { %v1212_v53 = vadd.f32 1.0, %v5980_v28 }
 0x16d   :  { %v5982_v17 = vpop.eup %5981 }
 0x16e   :  { %v1213_v46 = vadd.f32 1.0, %v5982_v17  ;;  %5989 = vrcp.f32 %v1212_v53 }
 0x170   :  { %5991 = vrcp.f32 %v1213_v46 }
 0x176   :  { %v5984_v6 = vpop.eup %5983 }
 0x177   :  { %v5986_v27 = vpop.eup %5985 }
 0x178   :  { %v5988_v33 = vpop.eup %5987 }
 0x179   :  { %v1215_v34 = vadd.f32 1.0, %v5988_v33  ;;  %v1360_v33 = vld [vmem:[#allocation4 + $0x370] sm:$0xff] }
 0x17b   :  { %v5990_v5 = vpop.eup %5989 }
 0x17c   :  { %v1230_v20 = vmul.f32 0.0, %v5990_v5  ;;  %v1351_v5 = vld [vmem:[#allocation4 + $0x328] sm:$0xff] }
 0x17d   :  { %v5992_v21 = vpop.eup %5991 }
 0x17e   :  { %v1231_v15 = vmul.f32 0.0, %v5992_v21  ;;  %v1353_v21 = vld [vmem:[#allocation4 + $0x338] sm:$0xff] }
 0x19b   :  { %v1179_v38 = vpop.f32.mrf.mxu1 }
 0x19c   :  { %v1190_v41 = vadd.f32 %v1179_v38, %v526_v24  ;;  %v1374_v24 = vld [vmem:[#allocation4 + $0x3e0] sm:$0xff]  ;;  %v1367_v38 = vld [vmem:[#allocation4 + $0x3a8] sm:$0xff] }
 0x19d   :  { %v1181_v36 = vpop.f32.mrf.mxu1 }
 0x19e   :  { %5993 = vtanh.f32 %v1190_v41  ;;  %v1191_v31 = vadd.f32 %v1181_v36, %v528_v49  ;;  %v1369_v49 = vld [vmem:[#allocation4 + $0x3b8] sm:$0xff]  ;;  %v1366_v41 = vld [vmem:[#allocation4 + $0x3a0] sm:$0xff]  ;;  %v1368_v36 = vld [vmem:[#allocation4 + $0x3b0] sm:$0xff] }
 0x19f   :  { %5995 = vpow2.f32 %v5870_v55  ;;  %v1376_v55 = vld [vmem:[#allocation4 + $0x3f0] sm:$0xff] }
 0x1a0   :  { %5997 = vtanh.f32 %v1191_v31  ;;  %v1359_v31 = vld [vmem:[#allocation4 + $0x368] sm:$0xff] }
 0x1a1   :  { %5999 = vrcp.f32 %v1215_v34  ;;  %v1345_v34 = vld [vmem:[#allocation4 + $0x2f8] sm:$0xff] }
 0x1ab   :  { %v5994_v40 = vpop.eup %5993 }
 0x1ac   :  { %v5996_v47 = vpop.eup %5995  ;;  %v1232_v43 = vmul.f32 %v5994_v40, %v5984_v6  ;;  %v1361_v6 = vld [vmem:[#allocation4 + $0x378] sm:$0xff]  ;;  %v1350_v40 = vld [vmem:[#allocation4 + $0x320] sm:$0xff] }
 0x1ad   :  { %v5998_v51 = vpop.eup %5997  ;;  %v1214_v11 = vadd.f32 1.0, %v5996_v47  ;;  %v1352_v47 = vld [vmem:[#allocation4 + $0x330] sm:$0xff] }
 0x1ae   :  { %v6720_v26 = vadd.f32 %v1232_v43, %v1230_v20  ;;  %v1233_v28 = vmul.f32 %v5998_v51, %v5986_v27  ;;  %v6000_v17 = vpop.eup %5999  ;;  %v1358_v27 = vld [vmem:[#allocation4 + $0x360] sm:$0xff]  ;;  %v1343_v20 = vld [vmem:[#allocation4 + $0x2e8] sm:$0xff]  ;;  %v1344_v51 = vld [vmem:[#allocation4 + $0x2f0] sm:$0xff] }
 0x1af   :  { %v1342_v43 = vld [vmem:[#allocation4 + $0x2e0] sm:$0xff] }
 0x1b0   :  { %v6722_v56 = vadd.f32 %v1233_v28, %v1231_v15  ;;  %6001 = vtanh.f32 %v6720_v26  ;;  %v1335_v15 = vld [vmem:[#allocation4 + $0x2a8] sm:$0xff]  ;;  %v1337_v28 = vld [vmem:[#allocation4 + $0x2b8] sm:$0xff] }
 0x1b2   :  { %6003 = vtanh.f32 %v6722_v56 }
 0x1b3   :  { %6005 = vrcp.f32 %v1214_v11  ;;  %v1334_v11 = vld [vmem:[#allocation4 + $0x2a0] sm:$0xff] }
 0x1bd   :  { %v6002_v0 = vpop.eup %6001 }
 0x1bf   :  { %v6004_v23 = vpop.eup %6003 }
 0x1c0   :  { %v6006_v39 = vpop.eup %6005  ;;  %v6726_v53 = vmul.f32 %v6004_v23, %v6000_v17  ;;  %v1336_v17 = vld [vmem:[#allocation4 + $0x2b0] sm:$0xff]  ;;  %v1329_v23 = vld [vmem:[#allocation4 + $0x278] sm:$0xff] }
 0x1c1   :  { %v6728_v46 = vmul.f32 %v6006_v39, %v6002_v0  ;;  %v1327_v0 = vld [vmem:[#allocation4 + $0x268] sm:$0xff]  ;;  %v1326_v39 = vld [vmem:[#allocation4 + $0x260] sm:$0xff] }
 0x1c2   :  { %1570 = vmatprep.mubr.f32.mxu0 %v6726_v53  ;;  %1641 = vmatprep.mubr.f32.mxu1 %v6726_v53 }
 0x1c3   :  { %1571 = vmatmul.mubr.f32.vlgmr.msra.gmra.mxu0 %v6728_v46  ;;  %1642 = vmatmul.mubr.f32.vlgmr.msra.gmra.mxu1 %v6728_v46 }
 0x1c4   :  { %1649 = vmatpush1.msra.mxu0 %v1374_v24  ;;  %1720 = vmatpush1.msra.mxu1 %v1376_v55  ;;  %v1328_v24 = vld [vmem:[#allocation4 + $0x270] sm:$0xff]  ;;  %v1319_v55 = vld [vmem:[#allocation4 + $0x228] sm:$0xff] }
 0x1c5   :  { %1650 = vmatprep.subr.mxu0 %v1367_v38  ;;  %1712 = vmatprep.mubr.f32.mxu0 %v6726_v53  ;;  %v1321_v38 = vld [vmem:[#allocation4 + $0x238] sm:$0xff] }
 0x1c6   :  { %1721 = vmatprep.subr.mxu1 %v1369_v49  ;;  %1783 = vmatprep.mubr.f32.mxu1 %v6726_v53  ;;  %v1318_v49 = vld [vmem:[#allocation4 + $0x220] sm:$0xff] }
 0x1c7   :  { %1651 = vmatpush1.msra.mxu0 %v1366_v41  ;;  %1722 = vmatpush1.msra.mxu1 %v1368_v36  ;;  %v1320_v41 = vld [vmem:[#allocation4 + $0x230] sm:$0xff]  ;;  %v1311_v36 = vld [vmem:[#allocation4 + $0x1e8] sm:$0xff] }
 0x1c8   :  { %1652 = vmatprep.subr.mxu0 %v1359_v31  ;;  %1723 = vmatprep.subr.mxu1 %v1361_v6  ;;  %v1313_v31 = vld [vmem:[#allocation4 + $0x1f8] sm:$0xff]  ;;  %v1310_v6 = vld [vmem:[#allocation4 + $0x1e0] sm:$0xff] }
 0x1c9   :  { %1653 = vmatpush1.msra.mxu0 %v1358_v27  ;;  %1724 = vmatpush1.msra.mxu1 %v1360_v33  ;;  %v1312_v27 = vld [vmem:[#allocation4 + $0x1f0] sm:$0xff]  ;;  %v1303_v33 = vld [vmem:[#allocation4 + $0x1a8] sm:$0xff] }
 0x1ca   :  { %1654 = vmatprep.subr.mxu0 %v1351_v5  ;;  %1725 = vmatprep.subr.mxu1 %v1353_v21  ;;  %v1305_v5 = vld [vmem:[#allocation4 + $0x1b8] sm:$0xff]  ;;  %v1302_v21 = vld [vmem:[#allocation4 + $0x1a0] sm:$0xff] }
 0x1cb   :  { %1655 = vmatpush1.msra.mxu0 %v1350_v40  ;;  %1726 = vmatpush1.msra.mxu1 %v1352_v47  ;;  %v1304_v40 = vld [vmem:[#allocation4 + $0x1b0] sm:$0xff]  ;;  %v1295_v47 = vld [vmem:[#allocation4 + $0x168] sm:$0xff] }
 0x1cc   :  { %1656 = vmatprep.subr.mxu0 %v1343_v20  ;;  %1727 = vmatprep.subr.mxu1 %v1345_v34  ;;  %v1297_v20 = vld [vmem:[#allocation4 + $0x178] sm:$0xff]  ;;  %v1294_v34 = vld [vmem:[#allocation4 + $0x160] sm:$0xff] }
 0x1cd   :  { %1657 = vmatpush1.msra.mxu0 %v1342_v43  ;;  %1728 = vmatpush1.msra.mxu1 %v1344_v51  ;;  %v1296_v43 = vld [vmem:[#allocation4 + $0x170] sm:$0xff]  ;;  %v1287_v51 = vld [vmem:[#allocation4 + $0x128] sm:$0xff] }
 0x1ce   :  { %1658 = vmatprep.subr.mxu0 %v1335_v15  ;;  %1729 = vmatprep.subr.mxu1 %v1337_v28  ;;  %v1289_v15 = vld [vmem:[#allocation4 + $0x138] sm:$0xff]  ;;  %v1286_v28 = vld [vmem:[#allocation4 + $0x120] sm:$0xff] }
 0x1cf   :  { %1659 = vmatpush1.msra.mxu0 %v1334_v11  ;;  %1730 = vmatpush1.msra.mxu1 %v1336_v17  ;;  %v1288_v11 = vld [vmem:[#allocation4 + $0x130] sm:$0xff]  ;;  %v1279_v17 = vld [vmem:[#allocation4 + $0xe8] sm:$0xff] }
 0x1d0   :  { %1660 = vmatprep.subr.mxu0 %v1327_v0  ;;  %1731 = vmatprep.subr.mxu1 %v1329_v23  ;;  %v1281_v0 = vld [vmem:[#allocation4 + $0xf8] sm:$0xff]  ;;  %v1278_v23 = vld [vmem:[#allocation4 + $0xe0] sm:$0xff] }
 0x1d1   :  { %1661 = vmatpush1.msra.mxu0 %v1326_v39  ;;  %1732 = vmatpush1.msra.mxu1 %v1328_v24  ;;  %v1280_v39 = vld [vmem:[#allocation4 + $0xf0] sm:$0xff]  ;;  %v1271_v24 = vld [vmem:[#allocation4 + $0xa8] sm:$0xff] }
 0x1d2   :  { %1662 = vmatprep.subr.mxu0 %v1319_v55  ;;  %1733 = vmatprep.subr.mxu1 %v1321_v38  ;;  %v1273_v55 = vld [vmem:[#allocation4 + $0xb8] sm:$0xff]  ;;  %v1270_v38 = vld [vmem:[#allocation4 + $0xa0] sm:$0xff] }
 0x1d3   :  { %1663 = vmatpush1.msra.mxu0 %v1318_v49  ;;  %1734 = vmatpush1.msra.mxu1 %v1320_v41  ;;  %v1272_v49 = vld [vmem:[#allocation4 + $0xb0] sm:$0xff]  ;;  %v1263_v41 = vld [vmem:[#allocation4 + $0x68] sm:$0xff] }
 0x1d4   :  { %1664 = vmatprep.subr.mxu0 %v1311_v36  ;;  %1735 = vmatprep.subr.mxu1 %v1313_v31  ;;  %v1265_v36 = vld [vmem:[#allocation4 + $0x78] sm:$0xff]  ;;  %v1262_v31 = vld [vmem:[#allocation4 + $0x60] sm:$0xff] }
 0x1d5   :  { %1665 = vmatpush1.msra.mxu0 %v1310_v6  ;;  %1736 = vmatpush1.msra.mxu1 %v1312_v27  ;;  %v1264_v6 = vld [vmem:[#allocation4 + $0x70] sm:$0xff]  ;;  %v1255_v27 = vld [vmem:[#allocation4 + $0x28] sm:$0xff] }
 0x1d6   :  { %1666 = vmatprep.subr.mxu0 %v1303_v33  ;;  %1737 = vmatprep.subr.mxu1 %v1305_v5  ;;  %v1257_v33 = vld [vmem:[#allocation4 + $0x38] sm:$0xff]  ;;  %v1254_v5 = vld [vmem:[#allocation4 + $0x20] sm:$0xff] }
 0x1d7   :  { %1667 = vmatpush1.msra.mxu0 %v1302_v21  ;;  %1738 = vmatpush1.msra.mxu1 %v1304_v40  ;;  %v1256_v21 = vld [vmem:[#allocation4 + $0x30] sm:$0xff]  ;;  %v1503_v40 = vld [vmem:[#allocation4 + $0x7e8] sm:$0xff] }
 0x1d8   :  { %1668 = vmatprep.subr.mxu0 %v1295_v47  ;;  %1739 = vmatprep.subr.mxu1 %v1297_v20  ;;  %v1505_v47 = vld [vmem:[#allocation4 + $0x7f8] sm:$0xff]  ;;  %v1502_v20 = vld [vmem:[#allocation4 + $0x7e0] sm:$0xff] }
 0x1d9   :  { %1669 = vmatpush1.msra.mxu0 %v1294_v34  ;;  %1740 = vmatpush1.msra.mxu1 %v1296_v43  ;;  %v1504_v34 = vld [vmem:[#allocation4 + $0x7f0] sm:$0xff]  ;;  %v1495_v43 = vld [vmem:[#allocation4 + $0x7a8] sm:$0xff] }
 0x1da   :  { %1670 = vmatprep.subr.mxu0 %v1287_v51  ;;  %1741 = vmatprep.subr.mxu1 %v1289_v15  ;;  %v1497_v51 = vld [vmem:[#allocation4 + $0x7b8] sm:$0xff]  ;;  %v1494_v15 = vld [vmem:[#allocation4 + $0x7a0] sm:$0xff] }
 0x1db   :  { %1671 = vmatpush1.msra.mxu0 %v1286_v28  ;;  %1742 = vmatpush1.msra.mxu1 %v1288_v11  ;;  %v1496_v28 = vld [vmem:[#allocation4 + $0x7b0] sm:$0xff]  ;;  %v1487_v11 = vld [vmem:[#allocation4 + $0x768] sm:$0xff] }
 0x1dc   :  { %1672 = vmatprep.subr.mxu0 %v1279_v17  ;;  %1743 = vmatprep.subr.mxu1 %v1281_v0  ;;  %v1489_v17 = vld [vmem:[#allocation4 + $0x778] sm:$0xff]  ;;  %v1486_v0 = vld [vmem:[#allocation4 + $0x760] sm:$0xff] }
 0x1dd   :  { %1673 = vmatpush1.msra.mxu0 %v1278_v23  ;;  %1744 = vmatpush1.msra.mxu1 %v1280_v39  ;;  %v1488_v23 = vld [vmem:[#allocation4 + $0x770] sm:$0xff]  ;;  %v1479_v39 = vld [vmem:[#allocation4 + $0x728] sm:$0xff] }
 0x1de   :  { %1674 = vmatprep.subr.mxu0 %v1271_v24  ;;  %1745 = vmatprep.subr.mxu1 %v1273_v55  ;;  %v1481_v24 = vld [vmem:[#allocation4 + $0x738] sm:$0xff]  ;;  %v1478_v55 = vld [vmem:[#allocation4 + $0x720] sm:$0xff] }
 0x1df   :  { %1675 = vmatpush1.msra.mxu0 %v1270_v38  ;;  %1746 = vmatpush1.msra.mxu1 %v1272_v49  ;;  %v1480_v38 = vld [vmem:[#allocation4 + $0x730] sm:$0xff]  ;;  %v1471_v49 = vld [vmem:[#allocation4 + $0x6e8] sm:$0xff] }
 0x1e0   :  { %1676 = vmatprep.subr.mxu0 %v1263_v41  ;;  %1747 = vmatprep.subr.mxu1 %v1265_v36  ;;  %v1473_v41 = vld [vmem:[#allocation4 + $0x6f8] sm:$0xff]  ;;  %v1470_v36 = vld [vmem:[#allocation4 + $0x6e0] sm:$0xff] }
 0x1e1   :  { %1677 = vmatpush1.msra.mxu0 %v1262_v31  ;;  %1748 = vmatpush1.msra.mxu1 %v1264_v6  ;;  %v1472_v31 = vld [vmem:[#allocation4 + $0x6f0] sm:$0xff]  ;;  %v1463_v6 = vld [vmem:[#allocation4 + $0x6a8] sm:$0xff] }
 0x1e2   :  { %1678 = vmatprep.subr.mxu0 %v1255_v27  ;;  %1749 = vmatprep.subr.mxu1 %v1257_v33  ;;  %v1465_v27 = vld [vmem:[#allocation4 + $0x6b8] sm:$0xff]  ;;  %v1462_v33 = vld [vmem:[#allocation4 + $0x6a0] sm:$0xff] }
 0x1e3   :  { %1679 = vmatpush1.msra.mxu0 %v1254_v5  ;;  %1750 = vmatpush1.msra.mxu1 %v1256_v21  ;;  %v1464_v5 = vld [vmem:[#allocation4 + $0x6b0] sm:$0xff]  ;;  %v1455_v21 = vld [vmem:[#allocation4 + $0x668] sm:$0xff] }
 0x1e4   :  { %1680 = vmatprep.subr.mxu0 %v1503_v40  ;;  %1751 = vmatprep.subr.mxu1 %v1505_v47  ;;  %v1457_v40 = vld [vmem:[#allocation4 + $0x678] sm:$0xff]  ;;  %v1454_v47 = vld [vmem:[#allocation4 + $0x660] sm:$0xff] }
 0x1e5   :  { %1681 = vmatpush2.msra.mxu0 %v1502_v20  ;;  %1752 = vmatpush2.msra.mxu1 %v1504_v34  ;;  %v1456_v20 = vld [vmem:[#allocation4 + $0x670] sm:$0xff]  ;;  %v1447_v34 = vld [vmem:[#allocation4 + $0x628] sm:$0xff] }
 0x1e6   :  { %1682 = vmatprep.subr.mxu0 %v1495_v43  ;;  %1753 = vmatprep.subr.mxu1 %v1497_v51  ;;  %v1449_v43 = vld [vmem:[#allocation4 + $0x638] sm:$0xff]  ;;  %v1446_v51 = vld [vmem:[#allocation4 + $0x620] sm:$0xff] }
 0x1e7   :  { %1683 = vmatpush2.msra.mxu0 %v1494_v15  ;;  %1754 = vmatpush2.msra.mxu1 %v1496_v28  ;;  %v1448_v15 = vld [vmem:[#allocation4 + $0x630] sm:$0xff]  ;;  %v1439_v28 = vld [vmem:[#allocation4 + $0x5e8] sm:$0xff] }
 0x1e8   :  { %1684 = vmatprep.subr.mxu0 %v1487_v11  ;;  %1755 = vmatprep.subr.mxu1 %v1489_v17  ;;  %v1441_v11 = vld [vmem:[#allocation4 + $0x5f8] sm:$0xff]  ;;  %v1438_v17 = vld [vmem:[#allocation4 + $0x5e0] sm:$0xff] }
 0x1e9   :  { %1685 = vmatpush2.msra.mxu0 %v1486_v0  ;;  %1756 = vmatpush2.msra.mxu1 %v1488_v23  ;;  %v1440_v0 = vld [vmem:[#allocation4 + $0x5f0] sm:$0xff]  ;;  %v1431_v23 = vld [vmem:[#allocation4 + $0x5a8] sm:$0xff] }
 0x1ea   :  { %1686 = vmatprep.subr.mxu0 %v1479_v39  ;;  %1757 = vmatprep.subr.mxu1 %v1481_v24  ;;  %v1433_v39 = vld [vmem:[#allocation4 + $0x5b8] sm:$0xff]  ;;  %v1430_v24 = vld [vmem:[#allocation4 + $0x5a0] sm:$0xff] }
 0x1eb   :  { %1687 = vmatpush2.msra.mxu0 %v1478_v55  ;;  %1758 = vmatpush2.msra.mxu1 %v1480_v38  ;;  %v1432_v55 = vld [vmem:[#allocation4 + $0x5b0] sm:$0xff]  ;;  %v1423_v38 = vld [vmem:[#allocation4 + $0x568] sm:$0xff] }
 0x1ec   :  { %1688 = vmatprep.subr.mxu0 %v1471_v49  ;;  %1759 = vmatprep.subr.mxu1 %v1473_v41  ;;  %v1425_v49 = vld [vmem:[#allocation4 + $0x578] sm:$0xff]  ;;  %v1422_v41 = vld [vmem:[#allocation4 + $0x560] sm:$0xff] }
 0x1ed   :  { %1689 = vmatpush2.msra.mxu0 %v1470_v36  ;;  %1760 = vmatpush2.msra.mxu1 %v1472_v31  ;;  %v1424_v36 = vld [vmem:[#allocation4 + $0x570] sm:$0xff]  ;;  %v1415_v31 = vld [vmem:[#allocation4 + $0x528] sm:$0xff] }
 0x1ee   :  { %1690 = vmatprep.subr.mxu0 %v1463_v6  ;;  %1761 = vmatprep.subr.mxu1 %v1465_v27  ;;  %v1417_v6 = vld [vmem:[#allocation4 + $0x538] sm:$0xff]  ;;  %v1414_v27 = vld [vmem:[#allocation4 + $0x520] sm:$0xff] }
 0x1ef   :  { %1691 = vmatpush2.msra.mxu0 %v1462_v33  ;;  %1762 = vmatpush2.msra.mxu1 %v1464_v5  ;;  %v1416_v33 = vld [vmem:[#allocation4 + $0x530] sm:$0xff]  ;;  %v1407_v5 = vld [vmem:[#allocation4 + $0x4e8] sm:$0xff] }
 0x1f0   :  { %1692 = vmatprep.subr.mxu0 %v1455_v21  ;;  %1763 = vmatprep.subr.mxu1 %v1457_v40  ;;  %v1409_v21 = vld [vmem:[#allocation4 + $0x4f8] sm:$0xff]  ;;  %v1406_v40 = vld [vmem:[#allocation4 + $0x4e0] sm:$0xff] }
 0x1f1   :  { %1693 = vmatpush2.msra.mxu0 %v1454_v47  ;;  %1764 = vmatpush2.msra.mxu1 %v1456_v20  ;;  %v1408_v47 = vld [vmem:[#allocation4 + $0x4f0] sm:$0xff]  ;;  %v1399_v20 = vld [vmem:[#allocation4 + $0x4a8] sm:$0xff] }
 0x1f2   :  { %1694 = vmatprep.subr.mxu0 %v1447_v34  ;;  %1765 = vmatprep.subr.mxu1 %v1449_v43  ;;  %v1401_v34 = vld [vmem:[#allocation4 + $0x4b8] sm:$0xff]  ;;  %v1398_v43 = vld [vmem:[#allocation4 + $0x4a0] sm:$0xff] }
 0x1f3   :  { %1695 = vmatpush2.msra.mxu0 %v1446_v51  ;;  %1766 = vmatpush2.msra.mxu1 %v1448_v15  ;;  %v1400_v51 = vld [vmem:[#allocation4 + $0x4b0] sm:$0xff]  ;;  %v1391_v15 = vld [vmem:[#allocation4 + $0x468] sm:$0xff] }
 0x1f4   :  { %1696 = vmatprep.subr.mxu0 %v1439_v28  ;;  %1767 = vmatprep.subr.mxu1 %v1441_v11  ;;  %v1393_v28 = vld [vmem:[#allocation4 + $0x478] sm:$0xff]  ;;  %v1390_v11 = vld [vmem:[#allocation4 + $0x460] sm:$0xff] }
 0x1f5   :  { %1697 = vmatpush2.msra.mxu0 %v1438_v17  ;;  %1768 = vmatpush2.msra.mxu1 %v1440_v0  ;;  %v1392_v17 = vld [vmem:[#allocation4 + $0x470] sm:$0xff]  ;;  %v1383_v0 = vld [vmem:[#allocation4 + $0x428] sm:$0xff] }
 0x1f6   :  { %1698 = vmatprep.subr.mxu0 %v1431_v23  ;;  %1769 = vmatprep.subr.mxu1 %v1433_v39  ;;  %v1385_v23 = vld [vmem:[#allocation4 + $0x438] sm:$0xff]  ;;  %v1382_v39 = vld [vmem:[#allocation4 + $0x420] sm:$0xff] }
 0x1f7   :  { %1699 = vmatpush2.msra.mxu0 %v1430_v24  ;;  %1770 = vmatpush2.msra.mxu1 %v1432_v55  ;;  %v1384_v24 = vld [vmem:[#allocation4 + $0x430] sm:$0xff]  ;;  %v1977_v55 = vld [vmem:[#allocation4 + $0x3c8] sm:$0xff] }
 0x1f8   :  { %1700 = vmatprep.subr.mxu0 %v1423_v38  ;;  %1771 = vmatprep.subr.mxu1 %v1425_v49  ;;  %v1979_v38 = vld [vmem:[#allocation4 + $0x3d8] sm:$0xff]  ;;  %v1976_v49 = vld [vmem:[#allocation4 + $0x3c0] sm:$0xff] }
 0x1f9   :  { %1701 = vmatpush2.msra.mxu0 %v1422_v41  ;;  %1772 = vmatpush2.msra.mxu1 %v1424_v36  ;;  %v1978_v41 = vld [vmem:[#allocation4 + $0x3d0] sm:$0xff]  ;;  %v1969_v36 = vld [vmem:[#allocation4 + $0x388] sm:$0xff] }
 0x1fa   :  { %1702 = vmatprep.subr.mxu0 %v1415_v31  ;;  %1773 = vmatprep.subr.mxu1 %v1417_v6  ;;  %v1971_v31 = vld [vmem:[#allocation4 + $0x398] sm:$0xff]  ;;  %v1968_v6 = vld [vmem:[#allocation4 + $0x380] sm:$0xff] }
 0x1fb   :  { %1703 = vmatpush2.msra.mxu0 %v1414_v27  ;;  %1774 = vmatpush2.msra.mxu1 %v1416_v33  ;;  %v1970_v27 = vld [vmem:[#allocation4 + $0x390] sm:$0xff]  ;;  %v1961_v33 = vld [vmem:[#allocation4 + $0x348] sm:$0xff] }
 0x1fc   :  { %1704 = vmatprep.subr.mxu0 %v1407_v5  ;;  %1775 = vmatprep.subr.mxu1 %v1409_v21  ;;  %v1963_v5 = vld [vmem:[#allocation4 + $0x358] sm:$0xff]  ;;  %v1960_v21 = vld [vmem:[#allocation4 + $0x340] sm:$0xff] }
 0x1fd   :  { %1705 = vmatpush2.msra.mxu0 %v1406_v40  ;;  %1776 = vmatpush2.msra.mxu1 %v1408_v47  ;;  %v1962_v40 = vld [vmem:[#allocation4 + $0x350] sm:$0xff]  ;;  %v1953_v47 = vld [vmem:[#allocation4 + $0x308] sm:$0xff] }
 0x1fe   :  { %1706 = vmatprep.subr.mxu0 %v1399_v20  ;;  %1777 = vmatprep.subr.mxu1 %v1401_v34  ;;  %v1955_v20 = vld [vmem:[#allocation4 + $0x318] sm:$0xff]  ;;  %v1952_v34 = vld [vmem:[#allocation4 + $0x300] sm:$0xff] }
 0x1ff   :  { %1707 = vmatpush2.msra.mxu0 %v1398_v43  ;;  %1778 = vmatpush2.msra.mxu1 %v1400_v51  ;;  %v1954_v43 = vld [vmem:[#allocation4 + $0x310] sm:$0xff]  ;;  %v1945_v51 = vld [vmem:[#allocation4 + $0x2c8] sm:$0xff] }
 0x200   :  { %1708 = vmatprep.subr.mxu0 %v1391_v15  ;;  %1779 = vmatprep.subr.mxu1 %v1393_v28  ;;  %v1947_v15 = vld [vmem:[#allocation4 + $0x2d8] sm:$0xff]  ;;  %v1944_v28 = vld [vmem:[#allocation4 + $0x2c0] sm:$0xff] }
 0x201   :  { %1709 = vmatpush2.msra.mxu0 %v1390_v11  ;;  %1780 = vmatpush2.msra.mxu1 %v1392_v17  ;;  %v1946_v11 = vld [vmem:[#allocation4 + $0x2d0] sm:$0xff]  ;;  %v1937_v17 = vld [vmem:[#allocation4 + $0x288] sm:$0xff] }
 0x202   :  { %1710 = vmatprep.subr.mxu0 %v1383_v0  ;;  %1781 = vmatprep.subr.mxu1 %v1385_v23  ;;  %v1939_v0 = vld [vmem:[#allocation4 + $0x298] sm:$0xff]  ;;  %v1936_v23 = vld [vmem:[#allocation4 + $0x280] sm:$0xff] }
 0x203   :  { %1711 = vmatpush2.msra.mxu0 %v1382_v39  ;;  %1782 = vmatpush2.msra.mxu1 %v1384_v24  ;;  %v1938_v39 = vld [vmem:[#allocation4 + $0x290] sm:$0xff]  ;;  %v1929_v24 = vld [vmem:[#allocation4 + $0x248] sm:$0xff] }
 0x204   :  { %1713 = vmatmul.mubr.f32.vlgmr.msra.gmra.mxu0 %v6728_v46  ;;  %1784 = vmatmul.mubr.f32.vlgmr.msra.gmra.mxu1 %v6728_v46 }
 0x205   :  { %2112 = vmatprep.subr.mxu0 %v1977_v55  ;;  %2183 = vmatprep.subr.mxu1 %v1979_v38  ;;  %v1931_v55 = vld [vmem:[#allocation4 + $0x258] sm:$0xff]  ;;  %v1928_v38 = vld [vmem:[#allocation4 + $0x240] sm:$0xff] }
 0x206   :  { %2113 = vmatpush1.msra.mxu0 %v1976_v49  ;;  %2184 = vmatpush1.msra.mxu1 %v1978_v41  ;;  %v1930_v49 = vld [vmem:[#allocation4 + $0x250] sm:$0xff]  ;;  %v1921_v41 = vld [vmem:[#allocation4 + $0x208] sm:$0xff] }
 0x207   :  { %2114 = vmatprep.subr.mxu0 %v1969_v36  ;;  %2185 = vmatprep.subr.mxu1 %v1971_v31  ;;  %v1923_v36 = vld [vmem:[#allocation4 + $0x218] sm:$0xff]  ;;  %v1920_v31 = vld [vmem:[#allocation4 + $0x200] sm:$0xff] }
 0x208   :  { %2115 = vmatpush1.msra.mxu0 %v1968_v6  ;;  %2186 = vmatpush1.msra.mxu1 %v1970_v27  ;;  %v1922_v6 = vld [vmem:[#allocation4 + $0x210] sm:$0xff]  ;;  %v1913_v27 = vld [vmem:[#allocation4 + $0x1c8] sm:$0xff] }
 0x209   :  { %2116 = vmatprep.subr.mxu0 %v1961_v33  ;;  %2187 = vmatprep.subr.mxu1 %v1963_v5  ;;  %v1915_v33 = vld [vmem:[#allocation4 + $0x1d8] sm:$0xff]  ;;  %v1912_v5 = vld [vmem:[#allocation4 + $0x1c0] sm:$0xff] }
 0x20a   :  { %2117 = vmatpush1.msra.mxu0 %v1960_v21  ;;  %2188 = vmatpush1.msra.mxu1 %v1962_v40  ;;  %v1914_v21 = vld [vmem:[#allocation4 + $0x1d0] sm:$0xff]  ;;  %v1905_v40 = vld [vmem:[#allocation4 + $0x188] sm:$0xff] }
 0x20b   :  { %2118 = vmatprep.subr.mxu0 %v1953_v47  ;;  %2189 = vmatprep.subr.mxu1 %v1955_v20  ;;  %v1907_v47 = vld [vmem:[#allocation4 + $0x198] sm:$0xff]  ;;  %v1904_v20 = vld [vmem:[#allocation4 + $0x180] sm:$0xff] }
 0x20c   :  { %2119 = vmatpush1.msra.mxu0 %v1952_v34  ;;  %2190 = vmatpush1.msra.mxu1 %v1954_v43  ;;  %v1906_v34 = vld [vmem:[#allocation4 + $0x190] sm:$0xff]  ;;  %v1897_v43 = vld [vmem:[#allocation4 + $0x148] sm:$0xff] }
 0x20d   :  { %2120 = vmatprep.subr.mxu0 %v1945_v51  ;;  %2191 = vmatprep.subr.mxu1 %v1947_v15  ;;  %v1899_v51 = vld [vmem:[#allocation4 + $0x158] sm:$0xff]  ;;  %v1896_v15 = vld [vmem:[#allocation4 + $0x140] sm:$0xff] }
 0x20e   :  { %2121 = vmatpush1.msra.mxu0 %v1944_v28  ;;  %2192 = vmatpush1.msra.mxu1 %v1946_v11  ;;  %v1898_v28 = vld [vmem:[#allocation4 + $0x150] sm:$0xff]  ;;  %v1889_v11 = vld [vmem:[#allocation4 + $0x108] sm:$0xff] }
 0x20f   :  { %2122 = vmatprep.subr.mxu0 %v1937_v17  ;;  %2193 = vmatprep.subr.mxu1 %v1939_v0  ;;  %v1891_v17 = vld [vmem:[#allocation4 + $0x118] sm:$0xff]  ;;  %v1888_v0 = vld [vmem:[#allocation4 + $0x100] sm:$0xff] }
 0x210   :  { %2123 = vmatpush1.msra.mxu0 %v1936_v23  ;;  %2194 = vmatpush1.msra.mxu1 %v1938_v39  ;;  %v1890_v23 = vld [vmem:[#allocation4 + $0x110] sm:$0xff]  ;;  %v1881_v39 = vld [vmem:[#allocation4 + $0xc8] sm:$0xff] }
 0x211   :  { %2124 = vmatprep.subr.mxu0 %v1929_v24  ;;  %2195 = vmatprep.subr.mxu1 %v1931_v55  ;;  %v1883_v24 = vld [vmem:[#allocation4 + $0xd8] sm:$0xff]  ;;  %v1880_v55 = vld [vmem:[#allocation4 + $0xc0] sm:$0xff] }
 0x212   :  { %2125 = vmatpush1.msra.mxu0 %v1928_v38  ;;  %2196 = vmatpush1.msra.mxu1 %v1930_v49  ;;  %v1882_v38 = vld [vmem:[#allocation4 + $0xd0] sm:$0xff]  ;;  %v1873_v49 = vld [vmem:[#allocation4 + $0x88] sm:$0xff] }
 0x213   :  { %2126 = vmatprep.subr.mxu0 %v1921_v41  ;;  %2197 = vmatprep.subr.mxu1 %v1923_v36  ;;  %v1875_v41 = vld [vmem:[#allocation4 + $0x98] sm:$0xff]  ;;  %v1872_v36 = vld [vmem:[#allocation4 + $0x80] sm:$0xff] }
 0x214   :  { %2127 = vmatpush1.msra.mxu0 %v1920_v31  ;;  %2198 = vmatpush1.msra.mxu1 %v1922_v6  ;;  %v1874_v31 = vld [vmem:[#allocation4 + $0x90] sm:$0xff]  ;;  %v1865_v6 = vld [vmem:[#allocation4 + $0x48] sm:$0xff] }
 0x215   :  { %2128 = vmatprep.subr.mxu0 %v1913_v27  ;;  %2199 = vmatprep.subr.mxu1 %v1915_v33  ;;  %v1867_v27 = vld [vmem:[#allocation4 + $0x58] sm:$0xff]  ;;  %v1864_v33 = vld [vmem:[#allocation4 + $0x40] sm:$0xff] }
 0x216   :  { %2129 = vmatpush1.msra.mxu0 %v1912_v5  ;;  %2200 = vmatpush1.msra.mxu1 %v1914_v21  ;;  %v1866_v5 = vld [vmem:[#allocation4 + $0x50] sm:$0xff]  ;;  %v1857_v21 = vld [vmem:[#allocation4 + $0x8] sm:$0xff] }
 0x217   :  { %2130 = vmatprep.subr.mxu0 %v1905_v40  ;;  %2201 = vmatprep.subr.mxu1 %v1907_v47  ;;  %v1859_v40 = vld [vmem:[#allocation4 + $0x18] sm:$0xff]  ;;  %v1856_v47 = vld [vmem:[#allocation4] sm:$0xff] }
 0x218   :  { %2131 = vmatpush1.msra.mxu0 %v1904_v20  ;;  %2202 = vmatpush1.msra.mxu1 %v1906_v34  ;;  %v1858_v20 = vld [vmem:[#allocation4 + $0x10] sm:$0xff]  ;;  %v2105_v34 = vld [vmem:[#allocation4 + $0x7c8] sm:$0xff] }
 0x219   :  { %2132 = vmatprep.subr.mxu0 %v1897_v43  ;;  %2203 = vmatprep.subr.mxu1 %v1899_v51  ;;  %v2107_v43 = vld [vmem:[#allocation4 + $0x7d8] sm:$0xff]  ;;  %v2104_v51 = vld [vmem:[#allocation4 + $0x7c0] sm:$0xff] }
 0x21a   :  { %2133 = vmatpush1.msra.mxu0 %v1896_v15  ;;  %2204 = vmatpush1.msra.mxu1 %v1898_v28  ;;  %v2106_v15 = vld [vmem:[#allocation4 + $0x7d0] sm:$0xff]  ;;  %v2097_v28 = vld [vmem:[#allocation4 + $0x788] sm:$0xff] }
 0x21b   :  { %2134 = vmatprep.subr.mxu0 %v1889_v11  ;;  %2205 = vmatprep.subr.mxu1 %v1891_v17  ;;  %v2099_v11 = vld [vmem:[#allocation4 + $0x798] sm:$0xff]  ;;  %v2096_v17 = vld [vmem:[#allocation4 + $0x780] sm:$0xff] }
 0x21c   :  { %2135 = vmatpush1.msra.mxu0 %v1888_v0  ;;  %2206 = vmatpush1.msra.mxu1 %v1890_v23  ;;  %v2098_v0 = vld [vmem:[#allocation4 + $0x790] sm:$0xff]  ;;  %v2089_v23 = vld [vmem:[#allocation4 + $0x748] sm:$0xff] }
 0x21d   :  { %2136 = vmatprep.subr.mxu0 %v1881_v39  ;;  %2207 = vmatprep.subr.mxu1 %v1883_v24  ;;  %v2091_v39 = vld [vmem:[#allocation4 + $0x758] sm:$0xff]  ;;  %v2088_v24 = vld [vmem:[#allocation4 + $0x740] sm:$0xff] }
 0x21e   :  { %2137 = vmatpush1.msra.mxu0 %v1880_v55  ;;  %2208 = vmatpush1.msra.mxu1 %v1882_v38  ;;  %v2090_v55 = vld [vmem:[#allocation4 + $0x750] sm:$0xff]  ;;  %v2081_v38 = vld [vmem:[#allocation4 + $0x708] sm:$0xff] }
 0x21f   :  { %2138 = vmatprep.subr.mxu0 %v1873_v49  ;;  %2209 = vmatprep.subr.mxu1 %v1875_v41  ;;  %v2083_v49 = vld [vmem:[#allocation4 + $0x718] sm:$0xff]  ;;  %v2080_v41 = vld [vmem:[#allocation4 + $0x700] sm:$0xff] }
 0x220   :  { %2139 = vmatpush1.msra.mxu0 %v1872_v36  ;;  %2210 = vmatpush1.msra.mxu1 %v1874_v31  ;;  %v2082_v36 = vld [vmem:[#allocation4 + $0x710] sm:$0xff]  ;;  %v2073_v31 = vld [vmem:[#allocation4 + $0x6c8] sm:$0xff] }
 0x221   :  { %2140 = vmatprep.subr.mxu0 %v1865_v6  ;;  %2211 = vmatprep.subr.mxu1 %v1867_v27  ;;  %v2075_v6 = vld [vmem:[#allocation4 + $0x6d8] sm:$0xff]  ;;  %v2072_v27 = vld [vmem:[#allocation4 + $0x6c0] sm:$0xff] }
 0x222   :  { %2141 = vmatpush1.msra.mxu0 %v1864_v33  ;;  %2212 = vmatpush1.msra.mxu1 %v1866_v5  ;;  %v2074_v33 = vld [vmem:[#allocation4 + $0x6d0] sm:$0xff]  ;;  %v2065_v5 = vld [vmem:[#allocation4 + $0x688] sm:$0xff] }
 0x223   :  { %2142 = vmatprep.subr.mxu0 %v1857_v21  ;;  %2213 = vmatprep.subr.mxu1 %v1859_v40  ;;  %v2067_v21 = vld [vmem:[#allocation4 + $0x698] sm:$0xff]  ;;  %v2064_v40 = vld [vmem:[#allocation4 + $0x680] sm:$0xff] }
 0x224   :  { %2143 = vmatpush1.msra.mxu0 %v1856_v47  ;;  %2214 = vmatpush1.msra.mxu1 %v1858_v20  ;;  %v2066_v47 = vld [vmem:[#allocation4 + $0x690] sm:$0xff]  ;;  %v2057_v20 = vld [vmem:[#allocation4 + $0x648] sm:$0xff] }
 0x225   :  { %2144 = vmatprep.subr.mxu0 %v2105_v34  ;;  %2215 = vmatprep.subr.mxu1 %v2107_v43  ;;  %v2059_v34 = vld [vmem:[#allocation4 + $0x658] sm:$0xff]  ;;  %v2056_v43 = vld [vmem:[#allocation4 + $0x640] sm:$0xff] }
 0x226   :  { %2145 = vmatpush2.msra.mxu0 %v2104_v51  ;;  %2216 = vmatpush2.msra.mxu1 %v2106_v15  ;;  %v2058_v51 = vld [vmem:[#allocation4 + $0x650] sm:$0xff]  ;;  %v2049_v15 = vld [vmem:[#allocation4 + $0x608] sm:$0xff] }
 0x227   :  { %2146 = vmatprep.subr.mxu0 %v2097_v28  ;;  %2217 = vmatprep.subr.mxu1 %v2099_v11  ;;  %v2051_v28 = vld [vmem:[#allocation4 + $0x618] sm:$0xff]  ;;  %v2048_v11 = vld [vmem:[#allocation4 + $0x600] sm:$0xff] }
 0x228   :  { %2147 = vmatpush2.msra.mxu0 %v2096_v17  ;;  %2218 = vmatpush2.msra.mxu1 %v2098_v0  ;;  %v2050_v17 = vld [vmem:[#allocation4 + $0x610] sm:$0xff]  ;;  %v2041_v0 = vld [vmem:[#allocation4 + $0x5c8] sm:$0xff] }
 0x229   :  { %2148 = vmatprep.subr.mxu0 %v2089_v23  ;;  %2219 = vmatprep.subr.mxu1 %v2091_v39  ;;  %v2043_v23 = vld [vmem:[#allocation4 + $0x5d8] sm:$0xff]  ;;  %v2040_v39 = vld [vmem:[#allocation4 + $0x5c0] sm:$0xff] }
 0x22a   :  { %2149 = vmatpush2.msra.mxu0 %v2088_v24  ;;  %2220 = vmatpush2.msra.mxu1 %v2090_v55  ;;  %v2042_v24 = vld [vmem:[#allocation4 + $0x5d0] sm:$0xff]  ;;  %v2033_v55 = vld [vmem:[#allocation4 + $0x588] sm:$0xff] }
 0x22b   :  { %2150 = vmatprep.subr.mxu0 %v2081_v38  ;;  %2221 = vmatprep.subr.mxu1 %v2083_v49  ;;  %v2035_v38 = vld [vmem:[#allocation4 + $0x598] sm:$0xff]  ;;  %v2032_v49 = vld [vmem:[#allocation4 + $0x580] sm:$0xff] }
 0x22c   :  { %2151 = vmatpush2.msra.mxu0 %v2080_v41  ;;  %2222 = vmatpush2.msra.mxu1 %v2082_v36  ;;  %v2034_v41 = vld [vmem:[#allocation4 + $0x590] sm:$0xff]  ;;  %v2025_v36 = vld [vmem:[#allocation4 + $0x548] sm:$0xff] }
 0x22d   :  { %2152 = vmatprep.subr.mxu0 %v2073_v31  ;;  %2223 = vmatprep.subr.mxu1 %v2075_v6  ;;  %v2027_v31 = vld [vmem:[#allocation4 + $0x558] sm:$0xff]  ;;  %v2024_v6 = vld [vmem:[#allocation4 + $0x540] sm:$0xff] }
 0x22e   :  { %2153 = vmatpush2.msra.mxu0 %v2072_v27  ;;  %2224 = vmatpush2.msra.mxu1 %v2074_v33  ;;  %v2026_v27 = vld [vmem:[#allocation4 + $0x550] sm:$0xff]  ;;  %v2017_v33 = vld [vmem:[#allocation4 + $0x508] sm:$0xff] }
 0x22f   :  { %2154 = vmatprep.subr.mxu0 %v2065_v5  ;;  %2225 = vmatprep.subr.mxu1 %v2067_v21  ;;  %v2019_v5 = vld [vmem:[#allocation4 + $0x518] sm:$0xff]  ;;  %v2016_v21 = vld [vmem:[#allocation4 + $0x500] sm:$0xff] }
 0x230   :  { %2155 = vmatpush2.msra.mxu0 %v2064_v40  ;;  %2226 = vmatpush2.msra.mxu1 %v2066_v47  ;;  %v2018_v40 = vld [vmem:[#allocation4 + $0x510] sm:$0xff]  ;;  %v2009_v47 = vld [vmem:[#allocation4 + $0x4c8] sm:$0xff] }
 0x231   :  { %2156 = vmatprep.subr.mxu0 %v2057_v20  ;;  %2227 = vmatprep.subr.mxu1 %v2059_v34  ;;  %v2011_v20 = vld [vmem:[#allocation4 + $0x4d8] sm:$0xff]  ;;  %v2008_v34 = vld [vmem:[#allocation4 + $0x4c0] sm:$0xff] }
 0x232   :  { %2157 = vmatpush2.msra.mxu0 %v2056_v43  ;;  %2228 = vmatpush2.msra.mxu1 %v2058_v51  ;;  %v2010_v43 = vld [vmem:[#allocation4 + $0x4d0] sm:$0xff]  ;;  %v2001_v51 = vld [vmem:[#allocation4 + $0x488] sm:$0xff] }
 0x233   :  { %2158 = vmatprep.subr.mxu0 %v2049_v15  ;;  %2229 = vmatprep.subr.mxu1 %v2051_v28  ;;  %v2003_v15 = vld [vmem:[#allocation4 + $0x498] sm:$0xff]  ;;  %v2000_v28 = vld [vmem:[#allocation4 + $0x480] sm:$0xff] }
 0x234   :  { %2159 = vmatpush2.msra.mxu0 %v2048_v11  ;;  %2230 = vmatpush2.msra.mxu1 %v2050_v17  ;;  %v2002_v11 = vld [vmem:[#allocation4 + $0x490] sm:$0xff]  ;;  %v1993_v17 = vld [vmem:[#allocation4 + $0x448] sm:$0xff] }
 0x235   :  { %2160 = vmatprep.subr.mxu0 %v2041_v0  ;;  %2231 = vmatprep.subr.mxu1 %v2043_v23  ;;  %v1995_v0 = vld [vmem:[#allocation4 + $0x458] sm:$0xff]  ;;  %v1992_v23 = vld [vmem:[#allocation4 + $0x440] sm:$0xff] }
 0x236   :  { %2161 = vmatpush2.msra.mxu0 %v2040_v39  ;;  %2232 = vmatpush2.msra.mxu1 %v2042_v24  ;;  %v1994_v39 = vld [vmem:[#allocation4 + $0x450] sm:$0xff]  ;;  %v1985_v24 = vld [vmem:[#allocation4 + $0x408] sm:$0xff] }
 0x237   :  { %2162 = vmatprep.subr.mxu0 %v2033_v55  ;;  %2233 = vmatprep.subr.mxu1 %v2035_v38  ;;  %v1987_v55 = vld [vmem:[#allocation4 + $0x418] sm:$0xff]  ;;  %v1984_v38 = vld [vmem:[#allocation4 + $0x400] sm:$0xff] }
 0x238   :  { %2163 = vmatpush2.msra.mxu0 %v2032_v49  ;;  %2234 = vmatpush2.msra.mxu1 %v2034_v41  ;;  %v1986_v49 = vld [vmem:[#allocation4 + $0x410] sm:$0xff]  ;;  %v1981_v41 = vld [vmem:[#allocation4 + $0x3e8] sm:$0xff] }
 0x239   :  { %2164 = vmatprep.subr.mxu0 %v2025_v36  ;;  %2235 = vmatprep.subr.mxu1 %v2027_v31  ;;  %v1983_v36 = vld [vmem:[#allocation4 + $0x3f8] sm:$0xff] }
 0x23a   :  { %2165 = vmatpush2.msra.mxu0 %v2024_v6  ;;  %2236 = vmatpush2.msra.mxu1 %v2026_v27 }
 0x23b   :  { %2166 = vmatprep.subr.mxu0 %v2017_v33  ;;  %2237 = vmatprep.subr.mxu1 %v2019_v5 }
 0x23c   :  { %2167 = vmatpush2.msra.mxu0 %v2016_v21  ;;  %2238 = vmatpush2.msra.mxu1 %v2018_v40 }
 0x23d   :  { %2168 = vmatprep.subr.mxu0 %v2009_v47  ;;  %2239 = vmatprep.subr.mxu1 %v2011_v20 }
 0x23e   :  { %2169 = vmatpush2.msra.mxu0 %v2008_v34  ;;  %2240 = vmatpush2.msra.mxu1 %v2010_v43 }
 0x23f   :  { %2170 = vmatprep.subr.mxu0 %v2001_v51  ;;  %2241 = vmatprep.subr.mxu1 %v2003_v15 }
 0x240   :  { %2171 = vmatpush2.msra.mxu0 %v2000_v28  ;;  %2242 = vmatpush2.msra.mxu1 %v2002_v11 }
 0x241   :  { %2172 = vmatprep.subr.mxu0 %v1993_v17  ;;  %2243 = vmatprep.subr.mxu1 %v1995_v0 }
 0x242   :  { %2173 = vmatpush2.msra.mxu0 %v1992_v23  ;;  %2244 = vmatpush2.msra.mxu1 %v1994_v39 }
 0x243   :  { %2174 = vmatprep.subr.mxu0 %v1985_v24  ;;  %2245 = vmatprep.subr.mxu1 %v1987_v55  ;;  %v534_v24 = vadd.f32 %v6670_v10, %v6714_v45 }
 0x244   :  { %2175 = vmatpush2.msra.mxu0 %v1984_v38  ;;  %2246 = vmatpush2.msra.mxu1 %v1986_v49 }
 0x245   :  { %2254 = vmatprep.subr.mxu0 %v1981_v41  ;;  %2325 = vmatprep.subr.mxu1 %v1983_v36 }
 0x283   :  { %v1572_v31 = vpop.f32.mrf.mxu0  ;;  %v1643_v6 = vpop.f32.mrf.mxu1 }
 0x284   :  { %v1790_v33 = vadd.f32 %v1572_v31, %v6520_v48  ;;  %v1792_v5 = vadd.f32 %v1643_v6, %v6617_v16 }
 0x285   :  { %v1574_v27 = vpop.f32.mrf.mxu0  ;;  %v1645_v21 = vpop.f32.mrf.mxu1 }
 0x286   :  { %v1791_v40 = vadd.f32 %v1574_v27, %v6526_v52  ;;  %v5872_v47 = vmul.f32 -1.442695, %v1790_v33  ;;  %v1793_v20 = vadd.f32 %v1645_v21, %v6620_v63  ;;  %v5874_v34 = vmul.f32 -1.442695, %v1792_v5 }
 0x287   :  { %v532_v52 = vadd.f32 %v6668_v30, %v6711_v44 }
 0x288   :  { %v5873_v43 = vmul.f32 -1.442695, %v1791_v40  ;;  %6007 = vpow2.f32 %v5872_v47  ;;  %v5875_v51 = vmul.f32 -1.442695, %v1793_v20 }
 0x289   :  { %6009 = vpow2.f32 %v5874_v34 }
 0x28a   :  { %6011 = vpow2.f32 %v5873_v43 }
 0x28b   :  { %6013 = vpow2.f32 %v5875_v51 }
 0x295   :  { %v6008_v15 = vpop.eup %6007 }
 0x296   :  { %v6010_v28 = vpop.eup %6009  ;;  %v1816_v17 = vadd.f32 1.0, %v6008_v15 }
 0x297   :  { %v6012_v11 = vpop.eup %6011  ;;  %v1818_v0 = vadd.f32 1.0, %v6010_v28 }
 0x298   :  { %v6014_v48 = vpop.eup %6013  ;;  %v1817_v16 = vadd.f32 1.0, %v6012_v11  ;;  %6015 = vrcp.f32 %v1816_v17 }
 0x299   :  { %v1819_v23 = vadd.f32 1.0, %v6014_v48  ;;  %6017 = vrcp.f32 %v1818_v0 }
 0x29a   :  { %6019 = vrcp.f32 %v1817_v16 }
 0x2a5   :  { %v6016_v27 = vpop.eup %6015 }
 0x2a6   :  { %v6018_v33 = vpop.eup %6017 }
 0x2a7   :  { %v6020_v10 = vpop.eup %6019 }
 0x2c4   :  { %v1714_v63 = vpop.f32.mrf.mxu0  ;;  %v1785_v39 = vpop.f32.mrf.mxu1 }
 0x2c5   :  { %v1794_v55 = vadd.f32 %v1714_v63, %v6532_v54  ;;  %v1796_v38 = vadd.f32 %v1785_v39, %v532_v52  ;;  %v1836_v54 = vmul.f32 %v6018_v33, %v6720_v26  ;;  %v1973_v63 = vld [vmem:[#allocation4 + $0x3a8] sm:$0xff]  ;;  %v1975_v39 = vld [vmem:[#allocation4 + $0x3b8] sm:$0xff] }
 0x2c6   :  { %v1716_v49 = vpop.f32.mrf.mxu0  ;;  %v1787_v41 = vpop.f32.mrf.mxu1  ;;  %v1949_v33 = vld [vmem:[#allocation4 + $0x2e8] sm:$0xff] }
 0x2c7   :  { %v5876_v36 = vmul.f32 -1.442695, %v1794_v55  ;;  %6021 = vtanh.f32 %v1796_v38  ;;  %v1795_v31 = vadd.f32 %v1716_v49, %v6538_v58  ;;  %v1797_v6 = vadd.f32 %v1787_v41, %v534_v24  ;;  %v1972_v24 = vld [vmem:[#allocation4 + $0x3a0] sm:$0xff]  ;;  %v1974_v55 = vld [vmem:[#allocation4 + $0x3b0] sm:$0xff]  ;;  %v1965_v38 = vld [vmem:[#allocation4 + $0x368] sm:$0xff] }
 0x2c8   :  { %6023 = vrcp.f32 %v1819_v23  ;;  %v1980_v23 = vld [vmem:[#allocation4 + $0x3e0] sm:$0xff]  ;;  %v1967_v49 = vld [vmem:[#allocation4 + $0x378] sm:$0xff] }
 0x2c9   :  { %6025 = vpow2.f32 %v5876_v36  ;;  %v5877_v30 = vmul.f32 -1.442695, %v1795_v31  ;;  %v1964_v41 = vld [vmem:[#allocation4 + $0x360] sm:$0xff]  ;;  %v1966_v36 = vld [vmem:[#allocation4 + $0x370] sm:$0xff]  ;;  %v1957_v31 = vld [vmem:[#allocation4 + $0x328] sm:$0xff] }
 0x2ca   :  { %6027 = vtanh.f32 %v1797_v6  ;;  %v1959_v6 = vld [vmem:[#allocation4 + $0x338] sm:$0xff] }
 0x2cb   :  { %6029 = vpow2.f32 %v5877_v30  ;;  %v1956_v30 = vld [vmem:[#allocation4 + $0x320] sm:$0xff] }
 0x2d4   :  { %v6022_v5 = vpop.eup %6021 }
 0x2d5   :  { %v6024_v21 = vpop.eup %6023  ;;  %v1838_v40 = vmul.f32 %v6022_v5, %v6016_v27  ;;  %v1958_v27 = vld [vmem:[#allocation4 + $0x330] sm:$0xff]  ;;  %v1948_v5 = vld [vmem:[#allocation4 + $0x2e0] sm:$0xff] }
 0x2d6   :  { %v6026_v47 = vpop.eup %6025  ;;  %v1837_v51 = vmul.f32 %v6024_v21, %v6722_v56  ;;  %v1982_v56 = vld [vmem:[#allocation4 + $0x3f0] sm:$0xff] }
 0x2d7   :  { %v6028_v20 = vpop.eup %6027  ;;  %v1820_v34 = vadd.f32 1.0, %v6026_v47  ;;  %v6749_v43 = vadd.f32 %v1838_v40, %v1836_v54  ;;  %v1950_v21 = vld [vmem:[#allocation4 + $0x2f0] sm:$0xff]  ;;  %v1941_v54 = vld [vmem:[#allocation4 + $0x2a8] sm:$0xff]  ;;  %v1943_v40 = vld [vmem:[#allocation4 + $0x2b8] sm:$0xff] }
 0x2d8   :  { %v6030_v58 = vpop.eup %6029  ;;  %v1839_v15 = vmul.f32 %v6028_v20, %v6020_v10  ;;  %v1951_v10 = vld [vmem:[#allocation4 + $0x2f8] sm:$0xff]  ;;  %v1940_v47 = vld [vmem:[#allocation4 + $0x2a0] sm:$0xff]  ;;  %v1942_v20 = vld [vmem:[#allocation4 + $0x2b0] sm:$0xff] }
 0x2d9   :  { %6031 = vrcp.f32 %v1820_v34  ;;  %v1821_v28 = vadd.f32 1.0, %v6030_v58  ;;  %v1933_v34 = vld [vmem:[#allocation4 + $0x268] sm:$0xff]  ;;  %v1935_v58 = vld [vmem:[#allocation4 + $0x278] sm:$0xff] }
 0x2da   :  { %6033 = vtanh.f32 %v6749_v43  ;;  %v6753_v11 = vadd.f32 %v1839_v15, %v1837_v51  ;;  %v1932_v51 = vld [vmem:[#allocation4 + $0x260] sm:$0xff]  ;;  %v1934_v15 = vld [vmem:[#allocation4 + $0x270] sm:$0xff] }
 0x2db   :  { %6035 = vrcp.f32 %v1821_v28  ;;  %v1925_v28 = vld [vmem:[#allocation4 + $0x228] sm:$0xff] }
 0x2dc   :  { %6037 = vtanh.f32 %v6753_v11 }
 0x2e6   :  { %v6032_v26 = vpop.eup %6031 }
 0x2e7   :  { %v6034_v17 = vpop.eup %6033 }
 0x2e8   :  { %v6036_v48 = vpop.eup %6035  ;;  %v6758_v52 = vmul.f32 %v6034_v17, %v6032_v26  ;;  %v1927_v26 = vld [vmem:[#allocation4 + $0x238] sm:$0xff]  ;;  %v1924_v17 = vld [vmem:[#allocation4 + $0x220] sm:$0xff] }
 0x2e9   :  { %v6038_v0 = vpop.eup %6037 }
 0x2ea   :  { %v6756_v16 = vmul.f32 %v6038_v0, %v6036_v48  ;;  %v1926_v48 = vld [vmem:[#allocation4 + $0x230] sm:$0xff]  ;;  %v1917_v0 = vld [vmem:[#allocation4 + $0x1e8] sm:$0xff] }
 0x2ec   :  { %2176 = vmatprep.mubr.f32.mxu0 %v6756_v16  ;;  %2247 = vmatprep.mubr.f32.mxu1 %v6756_v16 }
 0x2ed   :  { %2177 = vmatmul.mubr.f32.vlgmr.msra.gmra.mxu0 %v6758_v52  ;;  %2248 = vmatmul.mubr.f32.vlgmr.msra.gmra.mxu1 %v6758_v52 }
 0x2ee   :  { %2255 = vmatpush1.msra.mxu0 %v1980_v23  ;;  %2326 = vmatpush1.msra.mxu1 %v1982_v56  ;;  %v1919_v23 = vld [vmem:[#allocation4 + $0x1f8] sm:$0xff]  ;;  %v1916_v56 = vld [vmem:[#allocation4 + $0x1e0] sm:$0xff] }
 0x2ef   :  { %2256 = vmatprep.subr.mxu0 %v1973_v63  ;;  %2318 = vmatprep.mubr.f32.mxu0 %v6756_v16  ;;  %v1918_v63 = vld [vmem:[#allocation4 + $0x1f0] sm:$0xff] }
 0x2f0   :  { %2327 = vmatprep.subr.mxu1 %v1975_v39  ;;  %2389 = vmatprep.mubr.f32.mxu1 %v6756_v16  ;;  %v1909_v39 = vld [vmem:[#allocation4 + $0x1a8] sm:$0xff] }
 0x2f1   :  { %2257 = vmatpush1.msra.mxu0 %v1972_v24  ;;  %2328 = vmatpush1.msra.mxu1 %v1974_v55  ;;  %v1911_v24 = vld [vmem:[#allocation4 + $0x1b8] sm:$0xff]  ;;  %v1908_v55 = vld [vmem:[#allocation4 + $0x1a0] sm:$0xff] }
 0x2f2   :  { %2258 = vmatprep.subr.mxu0 %v1965_v38  ;;  %2329 = vmatprep.subr.mxu1 %v1967_v49  ;;  %v1910_v38 = vld [vmem:[#allocation4 + $0x1b0] sm:$0xff]  ;;  %v1901_v49 = vld [vmem:[#allocation4 + $0x168] sm:$0xff] }
 0x2f3   :  { %2259 = vmatpush1.msra.mxu0 %v1964_v41  ;;  %2330 = vmatpush1.msra.mxu1 %v1966_v36  ;;  %v1903_v41 = vld [vmem:[#allocation4 + $0x178] sm:$0xff]  ;;  %v1900_v36 = vld [vmem:[#allocation4 + $0x160] sm:$0xff] }
 0x2f4   :  { %2260 = vmatprep.subr.mxu0 %v1957_v31  ;;  %2331 = vmatprep.subr.mxu1 %v1959_v6  ;;  %v1902_v31 = vld [vmem:[#allocation4 + $0x170] sm:$0xff]  ;;  %v1893_v6 = vld [vmem:[#allocation4 + $0x128] sm:$0xff] }
 0x2f5   :  { %2261 = vmatpush1.msra.mxu0 %v1956_v30  ;;  %2332 = vmatpush1.msra.mxu1 %v1958_v27  ;;  %v1895_v30 = vld [vmem:[#allocation4 + $0x138] sm:$0xff]  ;;  %v1892_v27 = vld [vmem:[#allocation4 + $0x120] sm:$0xff] }
 0x2f6   :  { %2262 = vmatprep.subr.mxu0 %v1949_v33  ;;  %2333 = vmatprep.subr.mxu1 %v1951_v10  ;;  %v1894_v33 = vld [vmem:[#allocation4 + $0x130] sm:$0xff]  ;;  %v1885_v10 = vld [vmem:[#allocation4 + $0xe8] sm:$0xff] }
 0x2f7   :  { %2263 = vmatpush1.msra.mxu0 %v1948_v5  ;;  %2334 = vmatpush1.msra.mxu1 %v1950_v21  ;;  %v1887_v5 = vld [vmem:[#allocation4 + $0xf8] sm:$0xff]  ;;  %v1884_v21 = vld [vmem:[#allocation4 + $0xe0] sm:$0xff] }
 0x2f8   :  { %2264 = vmatprep.subr.mxu0 %v1941_v54  ;;  %2335 = vmatprep.subr.mxu1 %v1943_v40  ;;  %v1886_v54 = vld [vmem:[#allocation4 + $0xf0] sm:$0xff]  ;;  %v1877_v40 = vld [vmem:[#allocation4 + $0xa8] sm:$0xff] }
 0x2f9   :  { %2265 = vmatpush1.msra.mxu0 %v1940_v47  ;;  %2336 = vmatpush1.msra.mxu1 %v1942_v20  ;;  %v1879_v47 = vld [vmem:[#allocation4 + $0xb8] sm:$0xff]  ;;  %v1876_v20 = vld [vmem:[#allocation4 + $0xa0] sm:$0xff] }
 0x2fa   :  { %2266 = vmatprep.subr.mxu0 %v1933_v34  ;;  %2337 = vmatprep.subr.mxu1 %v1935_v58  ;;  %v1878_v34 = vld [vmem:[#allocation4 + $0xb0] sm:$0xff]  ;;  %v1869_v58 = vld [vmem:[#allocation4 + $0x68] sm:$0xff] }
 0x2fb   :  { %2267 = vmatpush1.msra.mxu0 %v1932_v51  ;;  %2338 = vmatpush1.msra.mxu1 %v1934_v15  ;;  %v1871_v51 = vld [vmem:[#allocation4 + $0x78] sm:$0xff]  ;;  %v1868_v15 = vld [vmem:[#allocation4 + $0x60] sm:$0xff] }
 0x2fc   :  { %2268 = vmatprep.subr.mxu0 %v1925_v28  ;;  %2339 = vmatprep.subr.mxu1 %v1927_v26  ;;  %v1870_v28 = vld [vmem:[#allocation4 + $0x70] sm:$0xff]  ;;  %v1861_v26 = vld [vmem:[#allocation4 + $0x28] sm:$0xff] }
 0x2fd   :  { %2269 = vmatpush1.msra.mxu0 %v1924_v17  ;;  %2340 = vmatpush1.msra.mxu1 %v1926_v48  ;;  %v1863_v17 = vld [vmem:[#allocation4 + $0x38] sm:$0xff]  ;;  %v1860_v48 = vld [vmem:[#allocation4 + $0x20] sm:$0xff] }
 0x2fe   :  { %2270 = vmatprep.subr.mxu0 %v1917_v0  ;;  %2341 = vmatprep.subr.mxu1 %v1919_v23  ;;  %v1862_v0 = vld [vmem:[#allocation4 + $0x30] sm:$0xff]  ;;  %v2109_v23 = vld [vmem:[#allocation4 + $0x7e8] sm:$0xff] }
 0x2ff   :  { %2271 = vmatpush1.msra.mxu0 %v1916_v56  ;;  %2342 = vmatpush1.msra.mxu1 %v1918_v63  ;;  %v2111_v56 = vld [vmem:[#allocation4 + $0x7f8] sm:$0xff]  ;;  %v2108_v63 = vld [vmem:[#allocation4 + $0x7e0] sm:$0xff] }
 0x300   :  { %2272 = vmatprep.subr.mxu0 %v1909_v39  ;;  %2343 = vmatprep.subr.mxu1 %v1911_v24  ;;  %v2110_v39 = vld [vmem:[#allocation4 + $0x7f0] sm:$0xff]  ;;  %v2101_v24 = vld [vmem:[#allocation4 + $0x7a8] sm:$0xff] }
 0x301   :  { %2273 = vmatpush1.msra.mxu0 %v1908_v55  ;;  %2344 = vmatpush1.msra.mxu1 %v1910_v38  ;;  %v2103_v55 = vld [vmem:[#allocation4 + $0x7b8] sm:$0xff]  ;;  %v2100_v38 = vld [vmem:[#allocation4 + $0x7a0] sm:$0xff] }
 0x302   :  { %2274 = vmatprep.subr.mxu0 %v1901_v49  ;;  %2345 = vmatprep.subr.mxu1 %v1903_v41  ;;  %v2102_v49 = vld [vmem:[#allocation4 + $0x7b0] sm:$0xff]  ;;  %v2093_v41 = vld [vmem:[#allocation4 + $0x768] sm:$0xff] }
 0x303   :  { %2275 = vmatpush1.msra.mxu0 %v1900_v36  ;;  %2346 = vmatpush1.msra.mxu1 %v1902_v31  ;;  %v2095_v36 = vld [vmem:[#allocation4 + $0x778] sm:$0xff]  ;;  %v2092_v31 = vld [vmem:[#allocation4 + $0x760] sm:$0xff] }
 0x304   :  { %2276 = vmatprep.subr.mxu0 %v1893_v6  ;;  %2347 = vmatprep.subr.mxu1 %v1895_v30  ;;  %v2094_v6 = vld [vmem:[#allocation4 + $0x770] sm:$0xff]  ;;  %v2085_v30 = vld [vmem:[#allocation4 + $0x728] sm:$0xff] }
 0x305   :  { %2277 = vmatpush1.msra.mxu0 %v1892_v27  ;;  %2348 = vmatpush1.msra.mxu1 %v1894_v33  ;;  %v2087_v27 = vld [vmem:[#allocation4 + $0x738] sm:$0xff]  ;;  %v2084_v33 = vld [vmem:[#allocation4 + $0x720] sm:$0xff] }
 0x306   :  { %2278 = vmatprep.subr.mxu0 %v1885_v10  ;;  %2349 = vmatprep.subr.mxu1 %v1887_v5  ;;  %v2086_v10 = vld [vmem:[#allocation4 + $0x730] sm:$0xff]  ;;  %v2077_v5 = vld [vmem:[#allocation4 + $0x6e8] sm:$0xff] }
 0x307   :  { %2279 = vmatpush1.msra.mxu0 %v1884_v21  ;;  %2350 = vmatpush1.msra.mxu1 %v1886_v54  ;;  %v2079_v21 = vld [vmem:[#allocation4 + $0x6f8] sm:$0xff]  ;;  %v2076_v54 = vld [vmem:[#allocation4 + $0x6e0] sm:$0xff] }
 0x308   :  { %2280 = vmatprep.subr.mxu0 %v1877_v40  ;;  %2351 = vmatprep.subr.mxu1 %v1879_v47  ;;  %v2078_v40 = vld [vmem:[#allocation4 + $0x6f0] sm:$0xff]  ;;  %v2069_v47 = vld [vmem:[#allocation4 + $0x6a8] sm:$0xff] }
 0x309   :  { %2281 = vmatpush1.msra.mxu0 %v1876_v20  ;;  %2352 = vmatpush1.msra.mxu1 %v1878_v34  ;;  %v2071_v20 = vld [vmem:[#allocation4 + $0x6b8] sm:$0xff]  ;;  %v2068_v34 = vld [vmem:[#allocation4 + $0x6a0] sm:$0xff] }
 0x30a   :  { %2282 = vmatprep.subr.mxu0 %v1869_v58  ;;  %2353 = vmatprep.subr.mxu1 %v1871_v51  ;;  %v2070_v58 = vld [vmem:[#allocation4 + $0x6b0] sm:$0xff]  ;;  %v2061_v51 = vld [vmem:[#allocation4 + $0x668] sm:$0xff] }
 0x30b   :  { %2283 = vmatpush1.msra.mxu0 %v1868_v15  ;;  %2354 = vmatpush1.msra.mxu1 %v1870_v28  ;;  %v2063_v15 = vld [vmem:[#allocation4 + $0x678] sm:$0xff]  ;;  %v2060_v28 = vld [vmem:[#allocation4 + $0x660] sm:$0xff] }
 0x30c   :  { %2284 = vmatprep.subr.mxu0 %v1861_v26  ;;  %2355 = vmatprep.subr.mxu1 %v1863_v17  ;;  %v2062_v26 = vld [vmem:[#allocation4 + $0x670] sm:$0xff]  ;;  %v2053_v17 = vld [vmem:[#allocation4 + $0x628] sm:$0xff] }
 0x30d   :  { %2285 = vmatpush1.msra.mxu0 %v1860_v48  ;;  %2356 = vmatpush1.msra.mxu1 %v1862_v0  ;;  %v2055_v48 = vld [vmem:[#allocation4 + $0x638] sm:$0xff]  ;;  %v2052_v0 = vld [vmem:[#allocation4 + $0x620] sm:$0xff] }
 0x30e   :  { %2286 = vmatprep.subr.mxu0 %v2109_v23  ;;  %2357 = vmatprep.subr.mxu1 %v2111_v56  ;;  %v2054_v23 = vld [vmem:[#allocation4 + $0x630] sm:$0xff]  ;;  %v2045_v56 = vld [vmem:[#allocation4 + $0x5e8] sm:$0xff] }
 0x30f   :  { %2287 = vmatpush2.msra.mxu0 %v2108_v63  ;;  %2358 = vmatpush2.msra.mxu1 %v2110_v39  ;;  %v2047_v63 = vld [vmem:[#allocation4 + $0x5f8] sm:$0xff]  ;;  %v2044_v39 = vld [vmem:[#allocation4 + $0x5e0] sm:$0xff] }
 0x310   :  { %2288 = vmatprep.subr.mxu0 %v2101_v24  ;;  %2359 = vmatprep.subr.mxu1 %v2103_v55  ;;  %v2046_v24 = vld [vmem:[#allocation4 + $0x5f0] sm:$0xff]  ;;  %v2037_v55 = vld [vmem:[#allocation4 + $0x5a8] sm:$0xff] }
 0x311   :  { %2289 = vmatpush2.msra.mxu0 %v2100_v38  ;;  %2360 = vmatpush2.msra.mxu1 %v2102_v49  ;;  %v2039_v38 = vld [vmem:[#allocation4 + $0x5b8] sm:$0xff]  ;;  %v2036_v49 = vld [vmem:[#allocation4 + $0x5a0] sm:$0xff] }
 0x312   :  { %2290 = vmatprep.subr.mxu0 %v2093_v41  ;;  %2361 = vmatprep.subr.mxu1 %v2095_v36  ;;  %v2038_v41 = vld [vmem:[#allocation4 + $0x5b0] sm:$0xff]  ;;  %v2029_v36 = vld [vmem:[#allocation4 + $0x568] sm:$0xff] }
 0x313   :  { %2291 = vmatpush2.msra.mxu0 %v2092_v31  ;;  %2362 = vmatpush2.msra.mxu1 %v2094_v6  ;;  %v2031_v31 = vld [vmem:[#allocation4 + $0x578] sm:$0xff]  ;;  %v2028_v6 = vld [vmem:[#allocation4 + $0x560] sm:$0xff] }
 0x314   :  { %2292 = vmatprep.subr.mxu0 %v2085_v30  ;;  %2363 = vmatprep.subr.mxu1 %v2087_v27  ;;  %v2030_v30 = vld [vmem:[#allocation4 + $0x570] sm:$0xff]  ;;  %v2021_v27 = vld [vmem:[#allocation4 + $0x528] sm:$0xff] }
 0x315   :  { %2293 = vmatpush2.msra.mxu0 %v2084_v33  ;;  %2364 = vmatpush2.msra.mxu1 %v2086_v10  ;;  %v2023_v33 = vld [vmem:[#allocation4 + $0x538] sm:$0xff]  ;;  %v2020_v10 = vld [vmem:[#allocation4 + $0x520] sm:$0xff] }
 0x316   :  { %2294 = vmatprep.subr.mxu0 %v2077_v5  ;;  %2365 = vmatprep.subr.mxu1 %v2079_v21  ;;  %v2022_v5 = vld [vmem:[#allocation4 + $0x530] sm:$0xff]  ;;  %v2013_v21 = vld [vmem:[#allocation4 + $0x4e8] sm:$0xff] }
 0x317   :  { %2295 = vmatpush2.msra.mxu0 %v2076_v54  ;;  %2366 = vmatpush2.msra.mxu1 %v2078_v40  ;;  %v2015_v54 = vld [vmem:[#allocation4 + $0x4f8] sm:$0xff]  ;;  %v2012_v40 = vld [vmem:[#allocation4 + $0x4e0] sm:$0xff] }
 0x318   :  { %2296 = vmatprep.subr.mxu0 %v2069_v47  ;;  %2367 = vmatprep.subr.mxu1 %v2071_v20  ;;  %v2014_v47 = vld [vmem:[#allocation4 + $0x4f0] sm:$0xff]  ;;  %v2005_v20 = vld [vmem:[#allocation4 + $0x4a8] sm:$0xff] }
 0x319   :  { %2297 = vmatpush2.msra.mxu0 %v2068_v34  ;;  %2368 = vmatpush2.msra.mxu1 %v2070_v58  ;;  %v2007_v34 = vld [vmem:[#allocation4 + $0x4b8] sm:$0xff]  ;;  %v2004_v58 = vld [vmem:[#allocation4 + $0x4a0] sm:$0xff] }
 0x31a   :  { %2298 = vmatprep.subr.mxu0 %v2061_v51  ;;  %2369 = vmatprep.subr.mxu1 %v2063_v15  ;;  %v2006_v51 = vld [vmem:[#allocation4 + $0x4b0] sm:$0xff]  ;;  %v1997_v15 = vld [vmem:[#allocation4 + $0x468] sm:$0xff] }
 0x31b   :  { %2299 = vmatpush2.msra.mxu0 %v2060_v28  ;;  %2370 = vmatpush2.msra.mxu1 %v2062_v26  ;;  %v1999_v28 = vld [vmem:[#allocation4 + $0x478] sm:$0xff]  ;;  %v1996_v26 = vld [vmem:[#allocation4 + $0x460] sm:$0xff] }
 0x31c   :  { %2300 = vmatprep.subr.mxu0 %v2053_v17  ;;  %2371 = vmatprep.subr.mxu1 %v2055_v48  ;;  %v1998_v17 = vld [vmem:[#allocation4 + $0x470] sm:$0xff]  ;;  %v1989_v48 = vld [vmem:[#allocation4 + $0x428] sm:$0xff] }
 0x31d   :  { %2301 = vmatpush2.msra.mxu0 %v2052_v0  ;;  %2372 = vmatpush2.msra.mxu1 %v2054_v23  ;;  %v1991_v0 = vld [vmem:[#allocation4 + $0x438] sm:$0xff]  ;;  %v1988_v23 = vld [vmem:[#allocation4 + $0x420] sm:$0xff] }
 0x31e   :  { %2302 = vmatprep.subr.mxu0 %v2045_v56  ;;  %2373 = vmatprep.subr.mxu1 %v2047_v63  ;;  %v1990_v56 = vld [vmem:[#allocation4 + $0x430] sm:$0xff]  ;;  %v2583_v63 = vld [vmem:[#allocation4 + $0x3c8] sm:$0xff] }
 0x31f   :  { %2303 = vmatpush2.msra.mxu0 %v2044_v39  ;;  %2374 = vmatpush2.msra.mxu1 %v2046_v24  ;;  %v2585_v39 = vld [vmem:[#allocation4 + $0x3d8] sm:$0xff]  ;;  %v2582_v24 = vld [vmem:[#allocation4 + $0x3c0] sm:$0xff] }
 0x320   :  { %2304 = vmatprep.subr.mxu0 %v2037_v55  ;;  %2375 = vmatprep.subr.mxu1 %v2039_v38  ;;  %v2584_v55 = vld [vmem:[#allocation4 + $0x3d0] sm:$0xff]  ;;  %v2575_v38 = vld [vmem:[#allocation4 + $0x388] sm:$0xff] }
 0x321   :  { %2305 = vmatpush2.msra.mxu0 %v2036_v49  ;;  %2376 = vmatpush2.msra.mxu1 %v2038_v41  ;;  %v2577_v49 = vld [vmem:[#allocation4 + $0x398] sm:$0xff]  ;;  %v2574_v41 = vld [vmem:[#allocation4 + $0x380] sm:$0xff] }
 0x322   :  { %2306 = vmatprep.subr.mxu0 %v2029_v36  ;;  %2377 = vmatprep.subr.mxu1 %v2031_v31  ;;  %v2576_v36 = vld [vmem:[#allocation4 + $0x390] sm:$0xff]  ;;  %v2567_v31 = vld [vmem:[#allocation4 + $0x348] sm:$0xff] }
 0x323   :  { %2307 = vmatpush2.msra.mxu0 %v2028_v6  ;;  %2378 = vmatpush2.msra.mxu1 %v2030_v30  ;;  %v2569_v6 = vld [vmem:[#allocation4 + $0x358] sm:$0xff]  ;;  %v2566_v30 = vld [vmem:[#allocation4 + $0x340] sm:$0xff] }
 0x324   :  { %2308 = vmatprep.subr.mxu0 %v2021_v27  ;;  %2379 = vmatprep.subr.mxu1 %v2023_v33  ;;  %v2568_v27 = vld [vmem:[#allocation4 + $0x350] sm:$0xff]  ;;  %v2559_v33 = vld [vmem:[#allocation4 + $0x308] sm:$0xff] }
 0x325   :  { %2309 = vmatpush2.msra.mxu0 %v2020_v10  ;;  %2380 = vmatpush2.msra.mxu1 %v2022_v5  ;;  %v2561_v10 = vld [vmem:[#allocation4 + $0x318] sm:$0xff]  ;;  %v2558_v5 = vld [vmem:[#allocation4 + $0x300] sm:$0xff] }
 0x326   :  { %2310 = vmatprep.subr.mxu0 %v2013_v21  ;;  %2381 = vmatprep.subr.mxu1 %v2015_v54  ;;  %v2560_v21 = vld [vmem:[#allocation4 + $0x310] sm:$0xff]  ;;  %v2551_v54 = vld [vmem:[#allocation4 + $0x2c8] sm:$0xff] }
 0x327   :  { %2311 = vmatpush2.msra.mxu0 %v2012_v40  ;;  %2382 = vmatpush2.msra.mxu1 %v2014_v47  ;;  %v2553_v40 = vld [vmem:[#allocation4 + $0x2d8] sm:$0xff]  ;;  %v2550_v47 = vld [vmem:[#allocation4 + $0x2c0] sm:$0xff] }
 0x328   :  { %2312 = vmatprep.subr.mxu0 %v2005_v20  ;;  %2383 = vmatprep.subr.mxu1 %v2007_v34  ;;  %v2552_v20 = vld [vmem:[#allocation4 + $0x2d0] sm:$0xff]  ;;  %v2543_v34 = vld [vmem:[#allocation4 + $0x288] sm:$0xff] }
 0x329   :  { %2313 = vmatpush2.msra.mxu0 %v2004_v58  ;;  %2384 = vmatpush2.msra.mxu1 %v2006_v51  ;;  %v2545_v58 = vld [vmem:[#allocation4 + $0x298] sm:$0xff]  ;;  %v2542_v51 = vld [vmem:[#allocation4 + $0x280] sm:$0xff] }
 0x32a   :  { %2314 = vmatprep.subr.mxu0 %v1997_v15  ;;  %2385 = vmatprep.subr.mxu1 %v1999_v28  ;;  %v2544_v15 = vld [vmem:[#allocation4 + $0x290] sm:$0xff]  ;;  %v2535_v28 = vld [vmem:[#allocation4 + $0x248] sm:$0xff] }
 0x32b   :  { %2315 = vmatpush2.msra.mxu0 %v1996_v26  ;;  %2386 = vmatpush2.msra.mxu1 %v1998_v17  ;;  %v2537_v26 = vld [vmem:[#allocation4 + $0x258] sm:$0xff]  ;;  %v2534_v17 = vld [vmem:[#allocation4 + $0x240] sm:$0xff] }
 0x32c   :  { %2316 = vmatprep.subr.mxu0 %v1989_v48  ;;  %2387 = vmatprep.subr.mxu1 %v1991_v0  ;;  %v2536_v48 = vld [vmem:[#allocation4 + $0x250] sm:$0xff]  ;;  %v2527_v0 = vld [vmem:[#allocation4 + $0x208] sm:$0xff] }
 0x32d   :  { %2317 = vmatpush2.msra.mxu0 %v1988_v23  ;;  %2388 = vmatpush2.msra.mxu1 %v1990_v56  ;;  %v2529_v23 = vld [vmem:[#allocation4 + $0x218] sm:$0xff]  ;;  %v2526_v56 = vld [vmem:[#allocation4 + $0x200] sm:$0xff] }
 0x32e   :  { %2319 = vmatmul.mubr.f32.vlgmr.msra.gmra.mxu0 %v6758_v52  ;;  %2390 = vmatmul.mubr.f32.vlgmr.msra.gmra.mxu1 %v6758_v52 }
 0x32f   :  { %2718 = vmatprep.subr.mxu0 %v2583_v63  ;;  %2789 = vmatprep.subr.mxu1 %v2585_v39  ;;  %v2528_v63 = vld [vmem:[#allocation4 + $0x210] sm:$0xff]  ;;  %v2519_v39 = vld [vmem:[#allocation4 + $0x1c8] sm:$0xff] }
 0x330   :  { %2719 = vmatpush1.msra.mxu0 %v2582_v24  ;;  %2790 = vmatpush1.msra.mxu1 %v2584_v55  ;;  %v2521_v24 = vld [vmem:[#allocation4 + $0x1d8] sm:$0xff]  ;;  %v2518_v55 = vld [vmem:[#allocation4 + $0x1c0] sm:$0xff] }
 0x331   :  { %2720 = vmatprep.subr.mxu0 %v2575_v38  ;;  %2791 = vmatprep.subr.mxu1 %v2577_v49  ;;  %v2520_v38 = vld [vmem:[#allocation4 + $0x1d0] sm:$0xff]  ;;  %v2511_v49 = vld [vmem:[#allocation4 + $0x188] sm:$0xff] }
 0x332   :  { %2721 = vmatpush1.msra.mxu0 %v2574_v41  ;;  %2792 = vmatpush1.msra.mxu1 %v2576_v36  ;;  %v2513_v41 = vld [vmem:[#allocation4 + $0x198] sm:$0xff]  ;;  %v2510_v36 = vld [vmem:[#allocation4 + $0x180] sm:$0xff] }
 0x333   :  { %2722 = vmatprep.subr.mxu0 %v2567_v31  ;;  %2793 = vmatprep.subr.mxu1 %v2569_v6  ;;  %v2512_v31 = vld [vmem:[#allocation4 + $0x190] sm:$0xff]  ;;  %v2503_v6 = vld [vmem:[#allocation4 + $0x148] sm:$0xff] }
 0x334   :  { %2723 = vmatpush1.msra.mxu0 %v2566_v30  ;;  %2794 = vmatpush1.msra.mxu1 %v2568_v27  ;;  %v2505_v30 = vld [vmem:[#allocation4 + $0x158] sm:$0xff]  ;;  %v2502_v27 = vld [vmem:[#allocation4 + $0x140] sm:$0xff] }
 0x335   :  { %2724 = vmatprep.subr.mxu0 %v2559_v33  ;;  %2795 = vmatprep.subr.mxu1 %v2561_v10  ;;  %v2504_v33 = vld [vmem:[#allocation4 + $0x150] sm:$0xff]  ;;  %v2495_v10 = vld [vmem:[#allocation4 + $0x108] sm:$0xff] }
 0x336   :  { %2725 = vmatpush1.msra.mxu0 %v2558_v5  ;;  %2796 = vmatpush1.msra.mxu1 %v2560_v21  ;;  %v2497_v5 = vld [vmem:[#allocation4 + $0x118] sm:$0xff]  ;;  %v2494_v21 = vld [vmem:[#allocation4 + $0x100] sm:$0xff] }
 0x337   :  { %2726 = vmatprep.subr.mxu0 %v2551_v54  ;;  %2797 = vmatprep.subr.mxu1 %v2553_v40  ;;  %v2496_v54 = vld [vmem:[#allocation4 + $0x110] sm:$0xff]  ;;  %v2487_v40 = vld [vmem:[#allocation4 + $0xc8] sm:$0xff] }
 0x338   :  { %2727 = vmatpush1.msra.mxu0 %v2550_v47  ;;  %2798 = vmatpush1.msra.mxu1 %v2552_v20  ;;  %v2489_v47 = vld [vmem:[#allocation4 + $0xd8] sm:$0xff]  ;;  %v2486_v20 = vld [vmem:[#allocation4 + $0xc0] sm:$0xff] }
 0x339   :  { %2728 = vmatprep.subr.mxu0 %v2543_v34  ;;  %2799 = vmatprep.subr.mxu1 %v2545_v58  ;;  %v2488_v34 = vld [vmem:[#allocation4 + $0xd0] sm:$0xff]  ;;  %v2479_v58 = vld [vmem:[#allocation4 + $0x88] sm:$0xff] }
 0x33a   :  { %2729 = vmatpush1.msra.mxu0 %v2542_v51  ;;  %2800 = vmatpush1.msra.mxu1 %v2544_v15  ;;  %v2481_v51 = vld [vmem:[#allocation4 + $0x98] sm:$0xff]  ;;  %v2478_v15 = vld [vmem:[#allocation4 + $0x80] sm:$0xff] }
 0x33b   :  { %2730 = vmatprep.subr.mxu0 %v2535_v28  ;;  %2801 = vmatprep.subr.mxu1 %v2537_v26  ;;  %v2480_v28 = vld [vmem:[#allocation4 + $0x90] sm:$0xff]  ;;  %v2471_v26 = vld [vmem:[#allocation4 + $0x48] sm:$0xff] }
 0x33c   :  { %2731 = vmatpush1.msra.mxu0 %v2534_v17  ;;  %2802 = vmatpush1.msra.mxu1 %v2536_v48  ;;  %v2473_v17 = vld [vmem:[#allocation4 + $0x58] sm:$0xff]  ;;  %v2470_v48 = vld [vmem:[#allocation4 + $0x40] sm:$0xff] }
 0x33d   :  { %2732 = vmatprep.subr.mxu0 %v2527_v0  ;;  %2803 = vmatprep.subr.mxu1 %v2529_v23  ;;  %v2472_v0 = vld [vmem:[#allocation4 + $0x50] sm:$0xff]  ;;  %v2463_v23 = vld [vmem:[#allocation4 + $0x8] sm:$0xff] }
 0x33e   :  { %2733 = vmatpush1.msra.mxu0 %v2526_v56  ;;  %2804 = vmatpush1.msra.mxu1 %v2528_v63  ;;  %v2465_v56 = vld [vmem:[#allocation4 + $0x18] sm:$0xff]  ;;  %v2462_v63 = vld [vmem:[#allocation4] sm:$0xff] }
 0x33f   :  { %2734 = vmatprep.subr.mxu0 %v2519_v39  ;;  %2805 = vmatprep.subr.mxu1 %v2521_v24  ;;  %v2464_v39 = vld [vmem:[#allocation4 + $0x10] sm:$0xff]  ;;  %v2711_v24 = vld [vmem:[#allocation4 + $0x7c8] sm:$0xff] }
 0x340   :  { %2735 = vmatpush1.msra.mxu0 %v2518_v55  ;;  %2806 = vmatpush1.msra.mxu1 %v2520_v38  ;;  %v2713_v55 = vld [vmem:[#allocation4 + $0x7d8] sm:$0xff]  ;;  %v2710_v38 = vld [vmem:[#allocation4 + $0x7c0] sm:$0xff] }
 0x341   :  { %2736 = vmatprep.subr.mxu0 %v2511_v49  ;;  %2807 = vmatprep.subr.mxu1 %v2513_v41  ;;  %v2712_v49 = vld [vmem:[#allocation4 + $0x7d0] sm:$0xff]  ;;  %v2703_v41 = vld [vmem:[#allocation4 + $0x788] sm:$0xff] }
 0x342   :  { %2737 = vmatpush1.msra.mxu0 %v2510_v36  ;;  %2808 = vmatpush1.msra.mxu1 %v2512_v31  ;;  %v2705_v36 = vld [vmem:[#allocation4 + $0x798] sm:$0xff]  ;;  %v2702_v31 = vld [vmem:[#allocation4 + $0x780] sm:$0xff] }
 0x343   :  { %2738 = vmatprep.subr.mxu0 %v2503_v6  ;;  %2809 = vmatprep.subr.mxu1 %v2505_v30  ;;  %v2704_v6 = vld [vmem:[#allocation4 + $0x790] sm:$0xff]  ;;  %v2695_v30 = vld [vmem:[#allocation4 + $0x748] sm:$0xff] }
 0x344   :  { %2739 = vmatpush1.msra.mxu0 %v2502_v27  ;;  %2810 = vmatpush1.msra.mxu1 %v2504_v33  ;;  %v2697_v27 = vld [vmem:[#allocation4 + $0x758] sm:$0xff]  ;;  %v2694_v33 = vld [vmem:[#allocation4 + $0x740] sm:$0xff] }
 0x345   :  { %2740 = vmatprep.subr.mxu0 %v2495_v10  ;;  %2811 = vmatprep.subr.mxu1 %v2497_v5  ;;  %v2696_v10 = vld [vmem:[#allocation4 + $0x750] sm:$0xff]  ;;  %v2687_v5 = vld [vmem:[#allocation4 + $0x708] sm:$0xff] }
 0x346   :  { %2741 = vmatpush1.msra.mxu0 %v2494_v21  ;;  %2812 = vmatpush1.msra.mxu1 %v2496_v54  ;;  %v2689_v21 = vld [vmem:[#allocation4 + $0x718] sm:$0xff]  ;;  %v2686_v54 = vld [vmem:[#allocation4 + $0x700] sm:$0xff] }
 0x347   :  { %2742 = vmatprep.subr.mxu0 %v2487_v40  ;;  %2813 = vmatprep.subr.mxu1 %v2489_v47  ;;  %v2688_v40 = vld [vmem:[#allocation4 + $0x710] sm:$0xff]  ;;  %v2679_v47 = vld [vmem:[#allocation4 + $0x6c8] sm:$0xff] }
 0x348   :  { %2743 = vmatpush1.msra.mxu0 %v2486_v20  ;;  %2814 = vmatpush1.msra.mxu1 %v2488_v34  ;;  %v2681_v20 = vld [vmem:[#allocation4 + $0x6d8] sm:$0xff]  ;;  %v2678_v34 = vld [vmem:[#allocation4 + $0x6c0] sm:$0xff] }
 0x349   :  { %2744 = vmatprep.subr.mxu0 %v2479_v58  ;;  %2815 = vmatprep.subr.mxu1 %v2481_v51  ;;  %v2680_v58 = vld [vmem:[#allocation4 + $0x6d0] sm:$0xff]  ;;  %v2671_v51 = vld [vmem:[#allocation4 + $0x688] sm:$0xff] }
 0x34a   :  { %2745 = vmatpush1.msra.mxu0 %v2478_v15  ;;  %2816 = vmatpush1.msra.mxu1 %v2480_v28  ;;  %v2673_v15 = vld [vmem:[#allocation4 + $0x698] sm:$0xff]  ;;  %v2670_v28 = vld [vmem:[#allocation4 + $0x680] sm:$0xff] }
 0x34b   :  { %2746 = vmatprep.subr.mxu0 %v2471_v26  ;;  %2817 = vmatprep.subr.mxu1 %v2473_v17  ;;  %v2672_v26 = vld [vmem:[#allocation4 + $0x690] sm:$0xff]  ;;  %v2663_v17 = vld [vmem:[#allocation4 + $0x648] sm:$0xff] }
 0x34c   :  { %2747 = vmatpush1.msra.mxu0 %v2470_v48  ;;  %2818 = vmatpush1.msra.mxu1 %v2472_v0  ;;  %v2665_v48 = vld [vmem:[#allocation4 + $0x658] sm:$0xff]  ;;  %v2662_v0 = vld [vmem:[#allocation4 + $0x640] sm:$0xff] }
 0x34d   :  { %2748 = vmatprep.subr.mxu0 %v2463_v23  ;;  %2819 = vmatprep.subr.mxu1 %v2465_v56  ;;  %v2664_v23 = vld [vmem:[#allocation4 + $0x650] sm:$0xff]  ;;  %v2655_v56 = vld [vmem:[#allocation4 + $0x608] sm:$0xff] }
 0x34e   :  { %2749 = vmatpush1.msra.mxu0 %v2462_v63  ;;  %2820 = vmatpush1.msra.mxu1 %v2464_v39  ;;  %v2657_v63 = vld [vmem:[#allocation4 + $0x618] sm:$0xff]  ;;  %v2654_v39 = vld [vmem:[#allocation4 + $0x600] sm:$0xff] }
 0x34f   :  { %2750 = vmatprep.subr.mxu0 %v2711_v24  ;;  %2821 = vmatprep.subr.mxu1 %v2713_v55  ;;  %v2656_v24 = vld [vmem:[#allocation4 + $0x610] sm:$0xff]  ;;  %v2647_v55 = vld [vmem:[#allocation4 + $0x5c8] sm:$0xff] }
 0x350   :  { %2751 = vmatpush2.msra.mxu0 %v2710_v38  ;;  %2822 = vmatpush2.msra.mxu1 %v2712_v49  ;;  %v2649_v38 = vld [vmem:[#allocation4 + $0x5d8] sm:$0xff]  ;;  %v2646_v49 = vld [vmem:[#allocation4 + $0x5c0] sm:$0xff] }
 0x351   :  { %2752 = vmatprep.subr.mxu0 %v2703_v41  ;;  %2823 = vmatprep.subr.mxu1 %v2705_v36  ;;  %v2648_v41 = vld [vmem:[#allocation4 + $0x5d0] sm:$0xff]  ;;  %v2639_v36 = vld [vmem:[#allocation4 + $0x588] sm:$0xff] }
 0x352   :  { %2753 = vmatpush2.msra.mxu0 %v2702_v31  ;;  %2824 = vmatpush2.msra.mxu1 %v2704_v6  ;;  %v2641_v31 = vld [vmem:[#allocation4 + $0x598] sm:$0xff]  ;;  %v2638_v6 = vld [vmem:[#allocation4 + $0x580] sm:$0xff] }
 0x353   :  { %2754 = vmatprep.subr.mxu0 %v2695_v30  ;;  %2825 = vmatprep.subr.mxu1 %v2697_v27  ;;  %v2640_v30 = vld [vmem:[#allocation4 + $0x590] sm:$0xff]  ;;  %v2631_v27 = vld [vmem:[#allocation4 + $0x548] sm:$0xff] }
 0x354   :  { %2755 = vmatpush2.msra.mxu0 %v2694_v33  ;;  %2826 = vmatpush2.msra.mxu1 %v2696_v10  ;;  %v2633_v33 = vld [vmem:[#allocation4 + $0x558] sm:$0xff]  ;;  %v2630_v10 = vld [vmem:[#allocation4 + $0x540] sm:$0xff] }
 0x355   :  { %2756 = vmatprep.subr.mxu0 %v2687_v5  ;;  %2827 = vmatprep.subr.mxu1 %v2689_v21  ;;  %v2632_v5 = vld [vmem:[#allocation4 + $0x550] sm:$0xff]  ;;  %v2623_v21 = vld [vmem:[#allocation4 + $0x508] sm:$0xff] }
 0x356   :  { %2757 = vmatpush2.msra.mxu0 %v2686_v54  ;;  %2828 = vmatpush2.msra.mxu1 %v2688_v40  ;;  %v2625_v54 = vld [vmem:[#allocation4 + $0x518] sm:$0xff]  ;;  %v2622_v40 = vld [vmem:[#allocation4 + $0x500] sm:$0xff] }
 0x357   :  { %2758 = vmatprep.subr.mxu0 %v2679_v47  ;;  %2829 = vmatprep.subr.mxu1 %v2681_v20  ;;  %v2624_v47 = vld [vmem:[#allocation4 + $0x510] sm:$0xff]  ;;  %v2615_v20 = vld [vmem:[#allocation4 + $0x4c8] sm:$0xff] }
 0x358   :  { %2759 = vmatpush2.msra.mxu0 %v2678_v34  ;;  %2830 = vmatpush2.msra.mxu1 %v2680_v58  ;;  %v2617_v34 = vld [vmem:[#allocation4 + $0x4d8] sm:$0xff]  ;;  %v2614_v58 = vld [vmem:[#allocation4 + $0x4c0] sm:$0xff] }
 0x359   :  { %2760 = vmatprep.subr.mxu0 %v2671_v51  ;;  %2831 = vmatprep.subr.mxu1 %v2673_v15  ;;  %v2616_v51 = vld [vmem:[#allocation4 + $0x4d0] sm:$0xff]  ;;  %v2607_v15 = vld [vmem:[#allocation4 + $0x488] sm:$0xff] }
 0x35a   :  { %2761 = vmatpush2.msra.mxu0 %v2670_v28  ;;  %2832 = vmatpush2.msra.mxu1 %v2672_v26  ;;  %v2609_v28 = vld [vmem:[#allocation4 + $0x498] sm:$0xff]  ;;  %v2606_v26 = vld [vmem:[#allocation4 + $0x480] sm:$0xff] }
 0x35b   :  { %2762 = vmatprep.subr.mxu0 %v2663_v17  ;;  %2833 = vmatprep.subr.mxu1 %v2665_v48  ;;  %v2608_v17 = vld [vmem:[#allocation4 + $0x490] sm:$0xff]  ;;  %v2599_v48 = vld [vmem:[#allocation4 + $0x448] sm:$0xff] }
 0x35c   :  { %2763 = vmatpush2.msra.mxu0 %v2662_v0  ;;  %2834 = vmatpush2.msra.mxu1 %v2664_v23  ;;  %v2601_v0 = vld [vmem:[#allocation4 + $0x458] sm:$0xff]  ;;  %v2598_v23 = vld [vmem:[#allocation4 + $0x440] sm:$0xff] }
 0x35d   :  { %2764 = vmatprep.subr.mxu0 %v2655_v56  ;;  %2835 = vmatprep.subr.mxu1 %v2657_v63  ;;  %v2600_v56 = vld [vmem:[#allocation4 + $0x450] sm:$0xff]  ;;  %v2591_v63 = vld [vmem:[#allocation4 + $0x408] sm:$0xff] }
 0x35e   :  { %2765 = vmatpush2.msra.mxu0 %v2654_v39  ;;  %2836 = vmatpush2.msra.mxu1 %v2656_v24  ;;  %v2593_v39 = vld [vmem:[#allocation4 + $0x418] sm:$0xff]  ;;  %v2590_v24 = vld [vmem:[#allocation4 + $0x400] sm:$0xff] }
 0x35f   :  { %2766 = vmatprep.subr.mxu0 %v2647_v55  ;;  %2837 = vmatprep.subr.mxu1 %v2649_v38  ;;  %v2592_v55 = vld [vmem:[#allocation4 + $0x410] sm:$0xff]  ;;  %v2587_v38 = vld [vmem:[#allocation4 + $0x3e8] sm:$0xff] }
 0x360   :  { %2767 = vmatpush2.msra.mxu0 %v2646_v49  ;;  %2838 = vmatpush2.msra.mxu1 %v2648_v41  ;;  %v2589_v49 = vld [vmem:[#allocation4 + $0x3f8] sm:$0xff] }
 0x361   :  { %2768 = vmatprep.subr.mxu0 %v2639_v36  ;;  %2839 = vmatprep.subr.mxu1 %v2641_v31 }
 0x362   :  { %2769 = vmatpush2.msra.mxu0 %v2638_v6  ;;  %2840 = vmatpush2.msra.mxu1 %v2640_v30 }
 0x363   :  { %2770 = vmatprep.subr.mxu0 %v2631_v27  ;;  %2841 = vmatprep.subr.mxu1 %v2633_v33 }
 0x364   :  { %2771 = vmatpush2.msra.mxu0 %v2630_v10  ;;  %2842 = vmatpush2.msra.mxu1 %v2632_v5 }
 0x365   :  { %2772 = vmatprep.subr.mxu0 %v2623_v21  ;;  %2843 = vmatprep.subr.mxu1 %v2625_v54 }
 0x366   :  { %2773 = vmatpush2.msra.mxu0 %v2622_v40  ;;  %2844 = vmatpush2.msra.mxu1 %v2624_v47 }
 0x367   :  { %2774 = vmatprep.subr.mxu0 %v2615_v20  ;;  %2845 = vmatprep.subr.mxu1 %v2617_v34 }
 0x368   :  { %2775 = vmatpush2.msra.mxu0 %v2614_v58  ;;  %2846 = vmatpush2.msra.mxu1 %v2616_v51 }
 0x369   :  { %2776 = vmatprep.subr.mxu0 %v2607_v15  ;;  %2847 = vmatprep.subr.mxu1 %v2609_v28 }
 0x36a   :  { %2777 = vmatpush2.msra.mxu0 %v2606_v26  ;;  %2848 = vmatpush2.msra.mxu1 %v2608_v17  ;;  %v540_v26 = vadd.f32 %v6674_v37, %v6714_v45 }
 0x36b   :  { %2778 = vmatprep.subr.mxu0 %v2599_v48  ;;  %2849 = vmatprep.subr.mxu1 %v2601_v0 }
 0x36c   :  { %2779 = vmatpush2.msra.mxu0 %v2598_v23  ;;  %2850 = vmatpush2.msra.mxu1 %v2600_v56 }
 0x36d   :  { %2780 = vmatprep.subr.mxu0 %v2591_v63  ;;  %2851 = vmatprep.subr.mxu1 %v2593_v39 }
 0x36e   :  { %2781 = vmatpush2.msra.mxu0 %v2590_v24  ;;  %2852 = vmatpush2.msra.mxu1 %v2592_v55 }
 0x36f   :  { %2860 = vmatprep.subr.mxu0 %v2587_v38  ;;  %2931 = vmatprep.subr.mxu1 %v2589_v49 }
 0x3ad   :  { %v2178_v41 = vpop.f32.mrf.mxu0  ;;  %v2249_v36 = vpop.f32.mrf.mxu1 }
 0x3ae   :  { %v2396_v6 = vadd.f32 %v2178_v41, %v6535_v57  ;;  %v2398_v30 = vadd.f32 %v2249_v36, %v6626_v7 }
 0x3af   :  { %v2180_v31 = vpop.f32.mrf.mxu0  ;;  %v2251_v27 = vpop.f32.mrf.mxu1 }
 0x3b0   :  { %v2397_v33 = vadd.f32 %v2180_v31, %v6542_v60  ;;  %v5878_v10 = vmul.f32 -1.442695, %v2396_v6  ;;  %v2399_v5 = vadd.f32 %v2251_v27, %v6632_v14  ;;  %v5880_v21 = vmul.f32 -1.442695, %v2398_v30 }
 0x3b1   :  { %v538_v60 = vadd.f32 %v6672_v59, %v6711_v44 }
 0x3b2   :  { %v5879_v54 = vmul.f32 -1.442695, %v2397_v33  ;;  %6039 = vpow2.f32 %v5878_v10  ;;  %v5881_v40 = vmul.f32 -1.442695, %v2399_v5 }
 0x3b3   :  { %6041 = vpow2.f32 %v5880_v21 }
 0x3b4   :  { %6043 = vpow2.f32 %v5879_v54 }
 0x3b5   :  { %6045 = vpow2.f32 %v5881_v40 }
 0x3bf   :  { %v6040_v47 = vpop.eup %6039 }
 0x3c0   :  { %v6042_v20 = vpop.eup %6041  ;;  %v2422_v58 = vadd.f32 1.0, %v6040_v47 }
 0x3c1   :  { %v6044_v34 = vpop.eup %6043  ;;  %v2424_v51 = vadd.f32 1.0, %v6042_v20 }
 0x3c2   :  { %v6046_v57 = vpop.eup %6045  ;;  %v2423_v7 = vadd.f32 1.0, %v6044_v34  ;;  %6047 = vrcp.f32 %v2422_v58  ;;  %v2586_v34 = vld [vmem:[#allocation4 + $0x3e0] sm:$0xff]  ;;  %v2579_v58 = vld [vmem:[#allocation4 + $0x3a8] sm:$0xff] }
 0x3c3   :  { %v2425_v15 = vadd.f32 1.0, %v6046_v57  ;;  %6049 = vrcp.f32 %v2424_v51  ;;  %v2581_v57 = vld [vmem:[#allocation4 + $0x3b8] sm:$0xff]  ;;  %v2578_v51 = vld [vmem:[#allocation4 + $0x3a0] sm:$0xff] }
 0x3c4   :  { %6051 = vrcp.f32 %v2423_v7  ;;  %v2580_v7 = vld [vmem:[#allocation4 + $0x3b0] sm:$0xff] }
 0x3cf   :  { %v6048_v24 = vpop.eup %6047 }
 0x3d0   :  { %v6050_v55 = vpop.eup %6049 }
 0x3d1   :  { %v6052_v37 = vpop.eup %6051 }
 0x3ee   :  { %v2320_v14 = vpop.f32.mrf.mxu0  ;;  %v2391_v28 = vpop.f32.mrf.mxu1 }
 0x3ef   :  { %v2400_v17 = vadd.f32 %v2320_v14, %v6545_v61  ;;  %v2402_v48 = vadd.f32 %v2391_v28, %v538_v60  ;;  %v2442_v61 = vmul.f32 %v6050_v55, %v6749_v43  ;;  %v2571_v60 = vld [vmem:[#allocation4 + $0x368] sm:$0xff]  ;;  %v2570_v14 = vld [vmem:[#allocation4 + $0x360] sm:$0xff]  ;;  %v2572_v28 = vld [vmem:[#allocation4 + $0x370] sm:$0xff] }
 0x3f0   :  { %v2322_v0 = vpop.f32.mrf.mxu0  ;;  %v2393_v23 = vpop.f32.mrf.mxu1  ;;  %v2546_v55 = vld [vmem:[#allocation4 + $0x2a0] sm:$0xff] }
 0x3f1   :  { %v5882_v56 = vmul.f32 -1.442695, %v2400_v17  ;;  %6053 = vtanh.f32 %v2402_v48  ;;  %v2401_v63 = vadd.f32 %v2322_v0, %v6551_v2  ;;  %v2403_v39 = vadd.f32 %v2393_v23, %v540_v26  ;;  %v2563_v26 = vld [vmem:[#allocation4 + $0x328] sm:$0xff]  ;;  %v2565_v17 = vld [vmem:[#allocation4 + $0x338] sm:$0xff]  ;;  %v2562_v48 = vld [vmem:[#allocation4 + $0x320] sm:$0xff] }
 0x3f2   :  { %6055 = vrcp.f32 %v2425_v15  ;;  %v2573_v15 = vld [vmem:[#allocation4 + $0x378] sm:$0xff]  ;;  %v2564_v0 = vld [vmem:[#allocation4 + $0x330] sm:$0xff]  ;;  %v2555_v23 = vld [vmem:[#allocation4 + $0x2e8] sm:$0xff] }
 0x3f3   :  { %6057 = vpow2.f32 %v5882_v56  ;;  %v5883_v59 = vmul.f32 -1.442695, %v2401_v63  ;;  %v2557_v56 = vld [vmem:[#allocation4 + $0x2f8] sm:$0xff]  ;;  %v2554_v63 = vld [vmem:[#allocation4 + $0x2e0] sm:$0xff] }
 0x3f4   :  { %6059 = vtanh.f32 %v2403_v39  ;;  %v2556_v39 = vld [vmem:[#allocation4 + $0x2f0] sm:$0xff] }
 0x3f5   :  { %6061 = vpow2.f32 %v5883_v59  ;;  %v2547_v59 = vld [vmem:[#allocation4 + $0x2a8] sm:$0xff] }
 0x3fe   :  { %v6054_v38 = vpop.eup %6053 }
 0x3ff   :  { %v6056_v49 = vpop.eup %6055  ;;  %v2444_v41 = vmul.f32 %v6054_v38, %v6048_v24  ;;  %v2549_v24 = vld [vmem:[#allocation4 + $0x2b8] sm:$0xff]  ;;  %v2539_v38 = vld [vmem:[#allocation4 + $0x268] sm:$0xff] }
 0x400   :  { %v6058_v36 = vpop.eup %6057  ;;  %v2443_v27 = vmul.f32 %v6056_v49, %v6753_v11  ;;  %v2588_v11 = vld [vmem:[#allocation4 + $0x3f0] sm:$0xff]  ;;  %v2541_v49 = vld [vmem:[#allocation4 + $0x278] sm:$0xff] }
 0x401   :  { %v6060_v31 = vpop.eup %6059  ;;  %v2426_v6 = vadd.f32 1.0, %v6058_v36  ;;  %v6779_v30 = vadd.f32 %v2444_v41, %v2442_v61  ;;  %v2538_v61 = vld [vmem:[#allocation4 + $0x260] sm:$0xff]  ;;  %v2540_v41 = vld [vmem:[#allocation4 + $0x270] sm:$0xff]  ;;  %v2531_v36 = vld [vmem:[#allocation4 + $0x228] sm:$0xff] }
 0x402   :  { %v6062_v2 = vpop.eup %6061  ;;  %v2445_v33 = vmul.f32 %v6060_v31, %v6052_v37  ;;  %v2548_v37 = vld [vmem:[#allocation4 + $0x2b0] sm:$0xff]  ;;  %v2533_v31 = vld [vmem:[#allocation4 + $0x238] sm:$0xff] }
 0x403   :  { %6063 = vrcp.f32 %v2426_v6  ;;  %v2427_v10 = vadd.f32 1.0, %v6062_v2  ;;  %v2530_v6 = vld [vmem:[#allocation4 + $0x220] sm:$0xff]  ;;  %v2532_v2 = vld [vmem:[#allocation4 + $0x230] sm:$0xff] }
 0x404   :  { %6065 = vtanh.f32 %v6779_v30  ;;  %v6783_v5 = vadd.f32 %v2445_v33, %v2443_v27  ;;  %v2523_v27 = vld [vmem:[#allocation4 + $0x1e8] sm:$0xff]  ;;  %v2525_v33 = vld [vmem:[#allocation4 + $0x1f8] sm:$0xff] }
 0x405   :  { %6067 = vrcp.f32 %v2427_v10  ;;  %v2522_v10 = vld [vmem:[#allocation4 + $0x1e0] sm:$0xff] }
 0x406   :  { %6069 = vtanh.f32 %v6783_v5 }
 0x410   :  { %v6064_v43 = vpop.eup %6063 }
 0x411   :  { %v6066_v21 = vpop.eup %6065 }
 0x412   :  { %v6068_v54 = vpop.eup %6067  ;;  %v6788_v20 = vmul.f32 %v6066_v21, %v6064_v43  ;;  %v2524_v43 = vld [vmem:[#allocation4 + $0x1f0] sm:$0xff]  ;;  %v2515_v21 = vld [vmem:[#allocation4 + $0x1a8] sm:$0xff] }
 0x413   :  { %v6070_v40 = vpop.eup %6069 }
 0x414   :  { %v6786_v47 = vmul.f32 %v6070_v40, %v6068_v54  ;;  %v2517_v54 = vld [vmem:[#allocation4 + $0x1b8] sm:$0xff]  ;;  %v2514_v40 = vld [vmem:[#allocation4 + $0x1a0] sm:$0xff] }
 0x416   :  { %2782 = vmatprep.mubr.f32.mxu0 %v6786_v47  ;;  %2853 = vmatprep.mubr.f32.mxu1 %v6786_v47 }
 0x417   :  { %2783 = vmatmul.mubr.f32.vlgmr.msra.gmra.mxu0 %v6788_v20  ;;  %2854 = vmatmul.mubr.f32.vlgmr.msra.gmra.mxu1 %v6788_v20 }
 0x418   :  { %2861 = vmatpush1.msra.mxu0 %v2586_v34  ;;  %2932 = vmatpush1.msra.mxu1 %v2588_v11  ;;  %v2516_v34 = vld [vmem:[#allocation4 + $0x1b0] sm:$0xff]  ;;  %v2507_v11 = vld [vmem:[#allocation4 + $0x168] sm:$0xff] }
 0x419   :  { %2862 = vmatprep.subr.mxu0 %v2579_v58  ;;  %2924 = vmatprep.mubr.f32.mxu0 %v6786_v47  ;;  %v2509_v58 = vld [vmem:[#allocation4 + $0x178] sm:$0xff] }
 0x41a   :  { %2933 = vmatprep.subr.mxu1 %v2581_v57  ;;  %2995 = vmatprep.mubr.f32.mxu1 %v6786_v47  ;;  %v2506_v57 = vld [vmem:[#allocation4 + $0x160] sm:$0xff] }
 0x41b   :  { %2863 = vmatpush1.msra.mxu0 %v2578_v51  ;;  %2934 = vmatpush1.msra.mxu1 %v2580_v7  ;;  %v2508_v51 = vld [vmem:[#allocation4 + $0x170] sm:$0xff]  ;;  %v2499_v7 = vld [vmem:[#allocation4 + $0x128] sm:$0xff] }
 0x41c   :  { %2864 = vmatprep.subr.mxu0 %v2571_v60  ;;  %2935 = vmatprep.subr.mxu1 %v2573_v15  ;;  %v2501_v60 = vld [vmem:[#allocation4 + $0x138] sm:$0xff]  ;;  %v2498_v15 = vld [vmem:[#allocation4 + $0x120] sm:$0xff] }
 0x41d   :  { %2865 = vmatpush1.msra.mxu0 %v2570_v14  ;;  %2936 = vmatpush1.msra.mxu1 %v2572_v28  ;;  %v2500_v14 = vld [vmem:[#allocation4 + $0x130] sm:$0xff]  ;;  %v2491_v28 = vld [vmem:[#allocation4 + $0xe8] sm:$0xff] }
 0x41e   :  { %2866 = vmatprep.subr.mxu0 %v2563_v26  ;;  %2937 = vmatprep.subr.mxu1 %v2565_v17  ;;  %v2493_v26 = vld [vmem:[#allocation4 + $0xf8] sm:$0xff]  ;;  %v2490_v17 = vld [vmem:[#allocation4 + $0xe0] sm:$0xff] }
 0x41f   :  { %2867 = vmatpush1.msra.mxu0 %v2562_v48  ;;  %2938 = vmatpush1.msra.mxu1 %v2564_v0  ;;  %v2492_v48 = vld [vmem:[#allocation4 + $0xf0] sm:$0xff]  ;;  %v2483_v0 = vld [vmem:[#allocation4 + $0xa8] sm:$0xff] }
 0x420   :  { %2868 = vmatprep.subr.mxu0 %v2555_v23  ;;  %2939 = vmatprep.subr.mxu1 %v2557_v56  ;;  %v2485_v23 = vld [vmem:[#allocation4 + $0xb8] sm:$0xff]  ;;  %v2482_v56 = vld [vmem:[#allocation4 + $0xa0] sm:$0xff] }
 0x421   :  { %2869 = vmatpush1.msra.mxu0 %v2554_v63  ;;  %2940 = vmatpush1.msra.mxu1 %v2556_v39  ;;  %v2484_v63 = vld [vmem:[#allocation4 + $0xb0] sm:$0xff]  ;;  %v2475_v39 = vld [vmem:[#allocation4 + $0x68] sm:$0xff] }
 0x422   :  { %2870 = vmatprep.subr.mxu0 %v2547_v59  ;;  %2941 = vmatprep.subr.mxu1 %v2549_v24  ;;  %v2477_v59 = vld [vmem:[#allocation4 + $0x78] sm:$0xff]  ;;  %v2474_v24 = vld [vmem:[#allocation4 + $0x60] sm:$0xff] }
 0x423   :  { %2871 = vmatpush1.msra.mxu0 %v2546_v55  ;;  %2942 = vmatpush1.msra.mxu1 %v2548_v37  ;;  %v2476_v55 = vld [vmem:[#allocation4 + $0x70] sm:$0xff]  ;;  %v2467_v37 = vld [vmem:[#allocation4 + $0x28] sm:$0xff] }
 0x424   :  { %2872 = vmatprep.subr.mxu0 %v2539_v38  ;;  %2943 = vmatprep.subr.mxu1 %v2541_v49  ;;  %v2469_v38 = vld [vmem:[#allocation4 + $0x38] sm:$0xff]  ;;  %v2466_v49 = vld [vmem:[#allocation4 + $0x20] sm:$0xff] }
 0x425   :  { %2873 = vmatpush1.msra.mxu0 %v2538_v61  ;;  %2944 = vmatpush1.msra.mxu1 %v2540_v41  ;;  %v2468_v61 = vld [vmem:[#allocation4 + $0x30] sm:$0xff]  ;;  %v2715_v41 = vld [vmem:[#allocation4 + $0x7e8] sm:$0xff] }
 0x426   :  { %2874 = vmatprep.subr.mxu0 %v2531_v36  ;;  %2945 = vmatprep.subr.mxu1 %v2533_v31  ;;  %v2717_v36 = vld [vmem:[#allocation4 + $0x7f8] sm:$0xff]  ;;  %v2714_v31 = vld [vmem:[#allocation4 + $0x7e0] sm:$0xff] }
 0x427   :  { %2875 = vmatpush1.msra.mxu0 %v2530_v6  ;;  %2946 = vmatpush1.msra.mxu1 %v2532_v2  ;;  %v2716_v6 = vld [vmem:[#allocation4 + $0x7f0] sm:$0xff]  ;;  %v2707_v2 = vld [vmem:[#allocation4 + $0x7a8] sm:$0xff] }
 0x428   :  { %2876 = vmatprep.subr.mxu0 %v2523_v27  ;;  %2947 = vmatprep.subr.mxu1 %v2525_v33  ;;  %v2709_v27 = vld [vmem:[#allocation4 + $0x7b8] sm:$0xff]  ;;  %v2706_v33 = vld [vmem:[#allocation4 + $0x7a0] sm:$0xff] }
 0x429   :  { %2877 = vmatpush1.msra.mxu0 %v2522_v10  ;;  %2948 = vmatpush1.msra.mxu1 %v2524_v43  ;;  %v2708_v10 = vld [vmem:[#allocation4 + $0x7b0] sm:$0xff]  ;;  %v2699_v43 = vld [vmem:[#allocation4 + $0x768] sm:$0xff] }
 0x42a   :  { %2878 = vmatprep.subr.mxu0 %v2515_v21  ;;  %2949 = vmatprep.subr.mxu1 %v2517_v54  ;;  %v2701_v21 = vld [vmem:[#allocation4 + $0x778] sm:$0xff]  ;;  %v2698_v54 = vld [vmem:[#allocation4 + $0x760] sm:$0xff] }
 0x42b   :  { %2879 = vmatpush1.msra.mxu0 %v2514_v40  ;;  %2950 = vmatpush1.msra.mxu1 %v2516_v34  ;;  %v2700_v40 = vld [vmem:[#allocation4 + $0x770] sm:$0xff]  ;;  %v2691_v34 = vld [vmem:[#allocation4 + $0x728] sm:$0xff] }
 0x42c   :  { %2880 = vmatprep.subr.mxu0 %v2507_v11  ;;  %2951 = vmatprep.subr.mxu1 %v2509_v58  ;;  %v2693_v11 = vld [vmem:[#allocation4 + $0x738] sm:$0xff]  ;;  %v2690_v58 = vld [vmem:[#allocation4 + $0x720] sm:$0xff] }
 0x42d   :  { %2881 = vmatpush1.msra.mxu0 %v2506_v57  ;;  %2952 = vmatpush1.msra.mxu1 %v2508_v51  ;;  %v2692_v57 = vld [vmem:[#allocation4 + $0x730] sm:$0xff]  ;;  %v2683_v51 = vld [vmem:[#allocation4 + $0x6e8] sm:$0xff] }
 0x42e   :  { %2882 = vmatprep.subr.mxu0 %v2499_v7  ;;  %2953 = vmatprep.subr.mxu1 %v2501_v60  ;;  %v2685_v7 = vld [vmem:[#allocation4 + $0x6f8] sm:$0xff]  ;;  %v2682_v60 = vld [vmem:[#allocation4 + $0x6e0] sm:$0xff] }
 0x42f   :  { %2883 = vmatpush1.msra.mxu0 %v2498_v15  ;;  %2954 = vmatpush1.msra.mxu1 %v2500_v14  ;;  %v2684_v15 = vld [vmem:[#allocation4 + $0x6f0] sm:$0xff]  ;;  %v2675_v14 = vld [vmem:[#allocation4 + $0x6a8] sm:$0xff] }
 0x430   :  { %2884 = vmatprep.subr.mxu0 %v2491_v28  ;;  %2955 = vmatprep.subr.mxu1 %v2493_v26  ;;  %v2677_v28 = vld [vmem:[#allocation4 + $0x6b8] sm:$0xff]  ;;  %v2674_v26 = vld [vmem:[#allocation4 + $0x6a0] sm:$0xff] }
 0x431   :  { %2885 = vmatpush1.msra.mxu0 %v2490_v17  ;;  %2956 = vmatpush1.msra.mxu1 %v2492_v48  ;;  %v2676_v17 = vld [vmem:[#allocation4 + $0x6b0] sm:$0xff]  ;;  %v2667_v48 = vld [vmem:[#allocation4 + $0x668] sm:$0xff] }
 0x432   :  { %2886 = vmatprep.subr.mxu0 %v2483_v0  ;;  %2957 = vmatprep.subr.mxu1 %v2485_v23  ;;  %v2669_v0 = vld [vmem:[#allocation4 + $0x678] sm:$0xff]  ;;  %v2666_v23 = vld [vmem:[#allocation4 + $0x660] sm:$0xff] }
 0x433   :  { %2887 = vmatpush1.msra.mxu0 %v2482_v56  ;;  %2958 = vmatpush1.msra.mxu1 %v2484_v63  ;;  %v2668_v56 = vld [vmem:[#allocation4 + $0x670] sm:$0xff]  ;;  %v2659_v63 = vld [vmem:[#allocation4 + $0x628] sm:$0xff] }
 0x434   :  { %2888 = vmatprep.subr.mxu0 %v2475_v39  ;;  %2959 = vmatprep.subr.mxu1 %v2477_v59  ;;  %v2661_v39 = vld [vmem:[#allocation4 + $0x638] sm:$0xff]  ;;  %v2658_v59 = vld [vmem:[#allocation4 + $0x620] sm:$0xff] }
 0x435   :  { %2889 = vmatpush1.msra.mxu0 %v2474_v24  ;;  %2960 = vmatpush1.msra.mxu1 %v2476_v55  ;;  %v2660_v24 = vld [vmem:[#allocation4 + $0x630] sm:$0xff]  ;;  %v2651_v55 = vld [vmem:[#allocation4 + $0x5e8] sm:$0xff] }
 0x436   :  { %2890 = vmatprep.subr.mxu0 %v2467_v37  ;;  %2961 = vmatprep.subr.mxu1 %v2469_v38  ;;  %v2653_v37 = vld [vmem:[#allocation4 + $0x5f8] sm:$0xff]  ;;  %v2650_v38 = vld [vmem:[#allocation4 + $0x5e0] sm:$0xff] }
 0x437   :  { %2891 = vmatpush1.msra.mxu0 %v2466_v49  ;;  %2962 = vmatpush1.msra.mxu1 %v2468_v61  ;;  %v2652_v49 = vld [vmem:[#allocation4 + $0x5f0] sm:$0xff]  ;;  %v2643_v61 = vld [vmem:[#allocation4 + $0x5a8] sm:$0xff] }
 0x438   :  { %2892 = vmatprep.subr.mxu0 %v2715_v41  ;;  %2963 = vmatprep.subr.mxu1 %v2717_v36  ;;  %v2645_v41 = vld [vmem:[#allocation4 + $0x5b8] sm:$0xff]  ;;  %v2642_v36 = vld [vmem:[#allocation4 + $0x5a0] sm:$0xff] }
 0x439   :  { %2893 = vmatpush2.msra.mxu0 %v2714_v31  ;;  %2964 = vmatpush2.msra.mxu1 %v2716_v6  ;;  %v2644_v31 = vld [vmem:[#allocation4 + $0x5b0] sm:$0xff]  ;;  %v2635_v6 = vld [vmem:[#allocation4 + $0x568] sm:$0xff] }
 0x43a   :  { %2894 = vmatprep.subr.mxu0 %v2707_v2  ;;  %2965 = vmatprep.subr.mxu1 %v2709_v27  ;;  %v2637_v2 = vld [vmem:[#allocation4 + $0x578] sm:$0xff]  ;;  %v2634_v27 = vld [vmem:[#allocation4 + $0x560] sm:$0xff] }
 0x43b   :  { %2895 = vmatpush2.msra.mxu0 %v2706_v33  ;;  %2966 = vmatpush2.msra.mxu1 %v2708_v10  ;;  %v2636_v33 = vld [vmem:[#allocation4 + $0x570] sm:$0xff]  ;;  %v2627_v10 = vld [vmem:[#allocation4 + $0x528] sm:$0xff] }
 0x43c   :  { %2896 = vmatprep.subr.mxu0 %v2699_v43  ;;  %2967 = vmatprep.subr.mxu1 %v2701_v21  ;;  %v2629_v43 = vld [vmem:[#allocation4 + $0x538] sm:$0xff]  ;;  %v2626_v21 = vld [vmem:[#allocation4 + $0x520] sm:$0xff] }
 0x43d   :  { %2897 = vmatpush2.msra.mxu0 %v2698_v54  ;;  %2968 = vmatpush2.msra.mxu1 %v2700_v40  ;;  %v2628_v54 = vld [vmem:[#allocation4 + $0x530] sm:$0xff]  ;;  %v2619_v40 = vld [vmem:[#allocation4 + $0x4e8] sm:$0xff] }
 0x43e   :  { %2898 = vmatprep.subr.mxu0 %v2691_v34  ;;  %2969 = vmatprep.subr.mxu1 %v2693_v11  ;;  %v2621_v34 = vld [vmem:[#allocation4 + $0x4f8] sm:$0xff]  ;;  %v2618_v11 = vld [vmem:[#allocation4 + $0x4e0] sm:$0xff] }
 0x43f   :  { %2899 = vmatpush2.msra.mxu0 %v2690_v58  ;;  %2970 = vmatpush2.msra.mxu1 %v2692_v57  ;;  %v2620_v58 = vld [vmem:[#allocation4 + $0x4f0] sm:$0xff]  ;;  %v2611_v57 = vld [vmem:[#allocation4 + $0x4a8] sm:$0xff] }
 0x440   :  { %2900 = vmatprep.subr.mxu0 %v2683_v51  ;;  %2971 = vmatprep.subr.mxu1 %v2685_v7  ;;  %v2613_v51 = vld [vmem:[#allocation4 + $0x4b8] sm:$0xff]  ;;  %v2610_v7 = vld [vmem:[#allocation4 + $0x4a0] sm:$0xff] }
 0x441   :  { %2901 = vmatpush2.msra.mxu0 %v2682_v60  ;;  %2972 = vmatpush2.msra.mxu1 %v2684_v15  ;;  %v2612_v60 = vld [vmem:[#allocation4 + $0x4b0] sm:$0xff]  ;;  %v2603_v15 = vld [vmem:[#allocation4 + $0x468] sm:$0xff] }
 0x442   :  { %2902 = vmatprep.subr.mxu0 %v2675_v14  ;;  %2973 = vmatprep.subr.mxu1 %v2677_v28  ;;  %v2605_v14 = vld [vmem:[#allocation4 + $0x478] sm:$0xff]  ;;  %v2602_v28 = vld [vmem:[#allocation4 + $0x460] sm:$0xff] }
 0x443   :  { %2903 = vmatpush2.msra.mxu0 %v2674_v26  ;;  %2974 = vmatpush2.msra.mxu1 %v2676_v17  ;;  %v2604_v26 = vld [vmem:[#allocation4 + $0x470] sm:$0xff]  ;;  %v2595_v17 = vld [vmem:[#allocation4 + $0x428] sm:$0xff] }
 0x444   :  { %2904 = vmatprep.subr.mxu0 %v2667_v48  ;;  %2975 = vmatprep.subr.mxu1 %v2669_v0  ;;  %v2597_v48 = vld [vmem:[#allocation4 + $0x438] sm:$0xff]  ;;  %v2594_v0 = vld [vmem:[#allocation4 + $0x420] sm:$0xff] }
 0x445   :  { %2905 = vmatpush2.msra.mxu0 %v2666_v23  ;;  %2976 = vmatpush2.msra.mxu1 %v2668_v56  ;;  %v2596_v23 = vld [vmem:[#allocation4 + $0x430] sm:$0xff]  ;;  %v3189_v56 = vld [vmem:[#allocation4 + $0x3c8] sm:$0xff] }
 0x446   :  { %2906 = vmatprep.subr.mxu0 %v2659_v63  ;;  %2977 = vmatprep.subr.mxu1 %v2661_v39  ;;  %v3191_v63 = vld [vmem:[#allocation4 + $0x3d8] sm:$0xff]  ;;  %v3188_v39 = vld [vmem:[#allocation4 + $0x3c0] sm:$0xff] }
 0x447   :  { %2907 = vmatpush2.msra.mxu0 %v2658_v59  ;;  %2978 = vmatpush2.msra.mxu1 %v2660_v24  ;;  %v3190_v59 = vld [vmem:[#allocation4 + $0x3d0] sm:$0xff]  ;;  %v3181_v24 = vld [vmem:[#allocation4 + $0x388] sm:$0xff] }
 0x448   :  { %2908 = vmatprep.subr.mxu0 %v2651_v55  ;;  %2979 = vmatprep.subr.mxu1 %v2653_v37  ;;  %v3183_v55 = vld [vmem:[#allocation4 + $0x398] sm:$0xff]  ;;  %v3180_v37 = vld [vmem:[#allocation4 + $0x380] sm:$0xff] }
 0x449   :  { %2909 = vmatpush2.msra.mxu0 %v2650_v38  ;;  %2980 = vmatpush2.msra.mxu1 %v2652_v49  ;;  %v3182_v38 = vld [vmem:[#allocation4 + $0x390] sm:$0xff]  ;;  %v3173_v49 = vld [vmem:[#allocation4 + $0x348] sm:$0xff] }
 0x44a   :  { %2910 = vmatprep.subr.mxu0 %v2643_v61  ;;  %2981 = vmatprep.subr.mxu1 %v2645_v41  ;;  %v3175_v61 = vld [vmem:[#allocation4 + $0x358] sm:$0xff]  ;;  %v3172_v41 = vld [vmem:[#allocation4 + $0x340] sm:$0xff] }
 0x44b   :  { %2911 = vmatpush2.msra.mxu0 %v2642_v36  ;;  %2982 = vmatpush2.msra.mxu1 %v2644_v31  ;;  %v3174_v36 = vld [vmem:[#allocation4 + $0x350] sm:$0xff]  ;;  %v3165_v31 = vld [vmem:[#allocation4 + $0x308] sm:$0xff] }
 0x44c   :  { %2912 = vmatprep.subr.mxu0 %v2635_v6  ;;  %2983 = vmatprep.subr.mxu1 %v2637_v2  ;;  %v3167_v6 = vld [vmem:[#allocation4 + $0x318] sm:$0xff]  ;;  %v3164_v2 = vld [vmem:[#allocation4 + $0x300] sm:$0xff] }
 0x44d   :  { %2913 = vmatpush2.msra.mxu0 %v2634_v27  ;;  %2984 = vmatpush2.msra.mxu1 %v2636_v33  ;;  %v3166_v27 = vld [vmem:[#allocation4 + $0x310] sm:$0xff]  ;;  %v3157_v33 = vld [vmem:[#allocation4 + $0x2c8] sm:$0xff] }
 0x44e   :  { %2914 = vmatprep.subr.mxu0 %v2627_v10  ;;  %2985 = vmatprep.subr.mxu1 %v2629_v43  ;;  %v3159_v10 = vld [vmem:[#allocation4 + $0x2d8] sm:$0xff]  ;;  %v3156_v43 = vld [vmem:[#allocation4 + $0x2c0] sm:$0xff] }
 0x44f   :  { %2915 = vmatpush2.msra.mxu0 %v2626_v21  ;;  %2986 = vmatpush2.msra.mxu1 %v2628_v54  ;;  %v3158_v21 = vld [vmem:[#allocation4 + $0x2d0] sm:$0xff]  ;;  %v3149_v54 = vld [vmem:[#allocation4 + $0x288] sm:$0xff] }
 0x450   :  { %2916 = vmatprep.subr.mxu0 %v2619_v40  ;;  %2987 = vmatprep.subr.mxu1 %v2621_v34  ;;  %v3151_v40 = vld [vmem:[#allocation4 + $0x298] sm:$0xff]  ;;  %v3148_v34 = vld [vmem:[#allocation4 + $0x280] sm:$0xff] }
 0x451   :  { %2917 = vmatpush2.msra.mxu0 %v2618_v11  ;;  %2988 = vmatpush2.msra.mxu1 %v2620_v58  ;;  %v3150_v11 = vld [vmem:[#allocation4 + $0x290] sm:$0xff]  ;;  %v3141_v58 = vld [vmem:[#allocation4 + $0x248] sm:$0xff] }
 0x452   :  { %2918 = vmatprep.subr.mxu0 %v2611_v57  ;;  %2989 = vmatprep.subr.mxu1 %v2613_v51  ;;  %v3143_v57 = vld [vmem:[#allocation4 + $0x258] sm:$0xff]  ;;  %v3140_v51 = vld [vmem:[#allocation4 + $0x240] sm:$0xff] }
 0x453   :  { %2919 = vmatpush2.msra.mxu0 %v2610_v7  ;;  %2990 = vmatpush2.msra.mxu1 %v2612_v60  ;;  %v3142_v7 = vld [vmem:[#allocation4 + $0x250] sm:$0xff]  ;;  %v3133_v60 = vld [vmem:[#allocation4 + $0x208] sm:$0xff] }
 0x454   :  { %2920 = vmatprep.subr.mxu0 %v2603_v15  ;;  %2991 = vmatprep.subr.mxu1 %v2605_v14  ;;  %v3135_v15 = vld [vmem:[#allocation4 + $0x218] sm:$0xff]  ;;  %v3132_v14 = vld [vmem:[#allocation4 + $0x200] sm:$0xff] }
 0x455   :  { %2921 = vmatpush2.msra.mxu0 %v2602_v28  ;;  %2992 = vmatpush2.msra.mxu1 %v2604_v26  ;;  %v3134_v28 = vld [vmem:[#allocation4 + $0x210] sm:$0xff]  ;;  %v3125_v26 = vld [vmem:[#allocation4 + $0x1c8] sm:$0xff] }
 0x456   :  { %2922 = vmatprep.subr.mxu0 %v2595_v17  ;;  %2993 = vmatprep.subr.mxu1 %v2597_v48  ;;  %v3127_v17 = vld [vmem:[#allocation4 + $0x1d8] sm:$0xff]  ;;  %v3124_v48 = vld [vmem:[#allocation4 + $0x1c0] sm:$0xff] }
 0x457   :  { %2923 = vmatpush2.msra.mxu0 %v2594_v0  ;;  %2994 = vmatpush2.msra.mxu1 %v2596_v23  ;;  %v3126_v0 = vld [vmem:[#allocation4 + $0x1d0] sm:$0xff]  ;;  %v3117_v23 = vld [vmem:[#allocation4 + $0x188] sm:$0xff] }
 0x458   :  { %2925 = vmatmul.mubr.f32.vlgmr.msra.gmra.mxu0 %v6788_v20  ;;  %2996 = vmatmul.mubr.f32.vlgmr.msra.gmra.mxu1 %v6788_v20 }
 0x459   :  { %3324 = vmatprep.subr.mxu0 %v3189_v56  ;;  %3395 = vmatprep.subr.mxu1 %v3191_v63  ;;  %v3119_v56 = vld [vmem:[#allocation4 + $0x198] sm:$0xff]  ;;  %v3116_v63 = vld [vmem:[#allocation4 + $0x180] sm:$0xff] }
 0x45a   :  { %3325 = vmatpush1.msra.mxu0 %v3188_v39  ;;  %3396 = vmatpush1.msra.mxu1 %v3190_v59  ;;  %v3118_v39 = vld [vmem:[#allocation4 + $0x190] sm:$0xff]  ;;  %v3109_v59 = vld [vmem:[#allocation4 + $0x148] sm:$0xff] }
 0x45b   :  { %3326 = vmatprep.subr.mxu0 %v3181_v24  ;;  %3397 = vmatprep.subr.mxu1 %v3183_v55  ;;  %v3111_v24 = vld [vmem:[#allocation4 + $0x158] sm:$0xff]  ;;  %v3108_v55 = vld [vmem:[#allocation4 + $0x140] sm:$0xff] }
 0x45c   :  { %3327 = vmatpush1.msra.mxu0 %v3180_v37  ;;  %3398 = vmatpush1.msra.mxu1 %v3182_v38  ;;  %v3110_v37 = vld [vmem:[#allocation4 + $0x150] sm:$0xff]  ;;  %v3101_v38 = vld [vmem:[#allocation4 + $0x108] sm:$0xff] }
 0x45d   :  { %3328 = vmatprep.subr.mxu0 %v3173_v49  ;;  %3399 = vmatprep.subr.mxu1 %v3175_v61  ;;  %v3103_v49 = vld [vmem:[#allocation4 + $0x118] sm:$0xff]  ;;  %v3100_v61 = vld [vmem:[#allocation4 + $0x100] sm:$0xff] }
 0x45e   :  { %3329 = vmatpush1.msra.mxu0 %v3172_v41  ;;  %3400 = vmatpush1.msra.mxu1 %v3174_v36  ;;  %v3102_v41 = vld [vmem:[#allocation4 + $0x110] sm:$0xff]  ;;  %v3093_v36 = vld [vmem:[#allocation4 + $0xc8] sm:$0xff] }
 0x45f   :  { %3330 = vmatprep.subr.mxu0 %v3165_v31  ;;  %3401 = vmatprep.subr.mxu1 %v3167_v6  ;;  %v3095_v31 = vld [vmem:[#allocation4 + $0xd8] sm:$0xff]  ;;  %v3092_v6 = vld [vmem:[#allocation4 + $0xc0] sm:$0xff] }
 0x460   :  { %3331 = vmatpush1.msra.mxu0 %v3164_v2  ;;  %3402 = vmatpush1.msra.mxu1 %v3166_v27  ;;  %v3094_v2 = vld [vmem:[#allocation4 + $0xd0] sm:$0xff]  ;;  %v3085_v27 = vld [vmem:[#allocation4 + $0x88] sm:$0xff] }
 0x461   :  { %3332 = vmatprep.subr.mxu0 %v3157_v33  ;;  %3403 = vmatprep.subr.mxu1 %v3159_v10  ;;  %v3087_v33 = vld [vmem:[#allocation4 + $0x98] sm:$0xff]  ;;  %v3084_v10 = vld [vmem:[#allocation4 + $0x80] sm:$0xff] }
 0x462   :  { %3333 = vmatpush1.msra.mxu0 %v3156_v43  ;;  %3404 = vmatpush1.msra.mxu1 %v3158_v21  ;;  %v3086_v43 = vld [vmem:[#allocation4 + $0x90] sm:$0xff]  ;;  %v3077_v21 = vld [vmem:[#allocation4 + $0x48] sm:$0xff] }
 0x463   :  { %3334 = vmatprep.subr.mxu0 %v3149_v54  ;;  %3405 = vmatprep.subr.mxu1 %v3151_v40  ;;  %v3079_v54 = vld [vmem:[#allocation4 + $0x58] sm:$0xff]  ;;  %v3076_v40 = vld [vmem:[#allocation4 + $0x40] sm:$0xff] }
 0x464   :  { %3335 = vmatpush1.msra.mxu0 %v3148_v34  ;;  %3406 = vmatpush1.msra.mxu1 %v3150_v11  ;;  %v3078_v34 = vld [vmem:[#allocation4 + $0x50] sm:$0xff]  ;;  %v3069_v11 = vld [vmem:[#allocation4 + $0x8] sm:$0xff] }
 0x465   :  { %3336 = vmatprep.subr.mxu0 %v3141_v58  ;;  %3407 = vmatprep.subr.mxu1 %v3143_v57  ;;  %v3071_v58 = vld [vmem:[#allocation4 + $0x18] sm:$0xff]  ;;  %v3068_v57 = vld [vmem:[#allocation4] sm:$0xff] }
 0x466   :  { %3337 = vmatpush1.msra.mxu0 %v3140_v51  ;;  %3408 = vmatpush1.msra.mxu1 %v3142_v7  ;;  %v3070_v51 = vld [vmem:[#allocation4 + $0x10] sm:$0xff]  ;;  %v3317_v7 = vld [vmem:[#allocation4 + $0x7c8] sm:$0xff] }
 0x467   :  { %3338 = vmatprep.subr.mxu0 %v3133_v60  ;;  %3409 = vmatprep.subr.mxu1 %v3135_v15  ;;  %v3319_v60 = vld [vmem:[#allocation4 + $0x7d8] sm:$0xff]  ;;  %v3316_v15 = vld [vmem:[#allocation4 + $0x7c0] sm:$0xff] }
 0x468   :  { %3339 = vmatpush1.msra.mxu0 %v3132_v14  ;;  %3410 = vmatpush1.msra.mxu1 %v3134_v28  ;;  %v3318_v14 = vld [vmem:[#allocation4 + $0x7d0] sm:$0xff]  ;;  %v3309_v28 = vld [vmem:[#allocation4 + $0x788] sm:$0xff] }
 0x469   :  { %3340 = vmatprep.subr.mxu0 %v3125_v26  ;;  %3411 = vmatprep.subr.mxu1 %v3127_v17  ;;  %v3311_v26 = vld [vmem:[#allocation4 + $0x798] sm:$0xff]  ;;  %v3308_v17 = vld [vmem:[#allocation4 + $0x780] sm:$0xff] }
 0x46a   :  { %3341 = vmatpush1.msra.mxu0 %v3124_v48  ;;  %3412 = vmatpush1.msra.mxu1 %v3126_v0  ;;  %v3310_v48 = vld [vmem:[#allocation4 + $0x790] sm:$0xff]  ;;  %v3301_v0 = vld [vmem:[#allocation4 + $0x748] sm:$0xff] }
 0x46b   :  { %3342 = vmatprep.subr.mxu0 %v3117_v23  ;;  %3413 = vmatprep.subr.mxu1 %v3119_v56  ;;  %v3303_v23 = vld [vmem:[#allocation4 + $0x758] sm:$0xff]  ;;  %v3300_v56 = vld [vmem:[#allocation4 + $0x740] sm:$0xff] }
 0x46c   :  { %3343 = vmatpush1.msra.mxu0 %v3116_v63  ;;  %3414 = vmatpush1.msra.mxu1 %v3118_v39  ;;  %v3302_v63 = vld [vmem:[#allocation4 + $0x750] sm:$0xff]  ;;  %v3293_v39 = vld [vmem:[#allocation4 + $0x708] sm:$0xff] }
 0x46d   :  { %3344 = vmatprep.subr.mxu0 %v3109_v59  ;;  %3415 = vmatprep.subr.mxu1 %v3111_v24  ;;  %v3295_v59 = vld [vmem:[#allocation4 + $0x718] sm:$0xff]  ;;  %v3292_v24 = vld [vmem:[#allocation4 + $0x700] sm:$0xff] }
 0x46e   :  { %3345 = vmatpush1.msra.mxu0 %v3108_v55  ;;  %3416 = vmatpush1.msra.mxu1 %v3110_v37  ;;  %v3294_v55 = vld [vmem:[#allocation4 + $0x710] sm:$0xff]  ;;  %v3285_v37 = vld [vmem:[#allocation4 + $0x6c8] sm:$0xff] }
 0x46f   :  { %3346 = vmatprep.subr.mxu0 %v3101_v38  ;;  %3417 = vmatprep.subr.mxu1 %v3103_v49  ;;  %v3287_v38 = vld [vmem:[#allocation4 + $0x6d8] sm:$0xff]  ;;  %v3284_v49 = vld [vmem:[#allocation4 + $0x6c0] sm:$0xff] }
 0x470   :  { %3347 = vmatpush1.msra.mxu0 %v3100_v61  ;;  %3418 = vmatpush1.msra.mxu1 %v3102_v41  ;;  %v3286_v61 = vld [vmem:[#allocation4 + $0x6d0] sm:$0xff]  ;;  %v3277_v41 = vld [vmem:[#allocation4 + $0x688] sm:$0xff] }
 0x471   :  { %3348 = vmatprep.subr.mxu0 %v3093_v36  ;;  %3419 = vmatprep.subr.mxu1 %v3095_v31  ;;  %v3279_v36 = vld [vmem:[#allocation4 + $0x698] sm:$0xff]  ;;  %v3276_v31 = vld [vmem:[#allocation4 + $0x680] sm:$0xff] }
 0x472   :  { %3349 = vmatpush1.msra.mxu0 %v3092_v6  ;;  %3420 = vmatpush1.msra.mxu1 %v3094_v2  ;;  %v3278_v6 = vld [vmem:[#allocation4 + $0x690] sm:$0xff]  ;;  %v3269_v2 = vld [vmem:[#allocation4 + $0x648] sm:$0xff] }
 0x473   :  { %3350 = vmatprep.subr.mxu0 %v3085_v27  ;;  %3421 = vmatprep.subr.mxu1 %v3087_v33  ;;  %v3271_v27 = vld [vmem:[#allocation4 + $0x658] sm:$0xff]  ;;  %v3268_v33 = vld [vmem:[#allocation4 + $0x640] sm:$0xff] }
 0x474   :  { %3351 = vmatpush1.msra.mxu0 %v3084_v10  ;;  %3422 = vmatpush1.msra.mxu1 %v3086_v43  ;;  %v3270_v10 = vld [vmem:[#allocation4 + $0x650] sm:$0xff]  ;;  %v3261_v43 = vld [vmem:[#allocation4 + $0x608] sm:$0xff] }
 0x475   :  { %3352 = vmatprep.subr.mxu0 %v3077_v21  ;;  %3423 = vmatprep.subr.mxu1 %v3079_v54  ;;  %v3263_v21 = vld [vmem:[#allocation4 + $0x618] sm:$0xff]  ;;  %v3260_v54 = vld [vmem:[#allocation4 + $0x600] sm:$0xff] }
 0x476   :  { %3353 = vmatpush1.msra.mxu0 %v3076_v40  ;;  %3424 = vmatpush1.msra.mxu1 %v3078_v34  ;;  %v3262_v40 = vld [vmem:[#allocation4 + $0x610] sm:$0xff]  ;;  %v3253_v34 = vld [vmem:[#allocation4 + $0x5c8] sm:$0xff] }
 0x477   :  { %3354 = vmatprep.subr.mxu0 %v3069_v11  ;;  %3425 = vmatprep.subr.mxu1 %v3071_v58  ;;  %v3255_v11 = vld [vmem:[#allocation4 + $0x5d8] sm:$0xff]  ;;  %v3252_v58 = vld [vmem:[#allocation4 + $0x5c0] sm:$0xff] }
 0x478   :  { %3355 = vmatpush1.msra.mxu0 %v3068_v57  ;;  %3426 = vmatpush1.msra.mxu1 %v3070_v51  ;;  %v3254_v57 = vld [vmem:[#allocation4 + $0x5d0] sm:$0xff]  ;;  %v3245_v51 = vld [vmem:[#allocation4 + $0x588] sm:$0xff] }
 0x479   :  { %3356 = vmatprep.subr.mxu0 %v3317_v7  ;;  %3427 = vmatprep.subr.mxu1 %v3319_v60  ;;  %v3247_v7 = vld [vmem:[#allocation4 + $0x598] sm:$0xff]  ;;  %v3244_v60 = vld [vmem:[#allocation4 + $0x580] sm:$0xff] }
 0x47a   :  { %3357 = vmatpush2.msra.mxu0 %v3316_v15  ;;  %3428 = vmatpush2.msra.mxu1 %v3318_v14  ;;  %v3246_v15 = vld [vmem:[#allocation4 + $0x590] sm:$0xff]  ;;  %v3237_v14 = vld [vmem:[#allocation4 + $0x548] sm:$0xff] }
 0x47b   :  { %3358 = vmatprep.subr.mxu0 %v3309_v28  ;;  %3429 = vmatprep.subr.mxu1 %v3311_v26  ;;  %v3239_v28 = vld [vmem:[#allocation4 + $0x558] sm:$0xff]  ;;  %v3236_v26 = vld [vmem:[#allocation4 + $0x540] sm:$0xff] }
 0x47c   :  { %3359 = vmatpush2.msra.mxu0 %v3308_v17  ;;  %3430 = vmatpush2.msra.mxu1 %v3310_v48  ;;  %v3238_v17 = vld [vmem:[#allocation4 + $0x550] sm:$0xff]  ;;  %v3229_v48 = vld [vmem:[#allocation4 + $0x508] sm:$0xff] }
 0x47d   :  { %3360 = vmatprep.subr.mxu0 %v3301_v0  ;;  %3431 = vmatprep.subr.mxu1 %v3303_v23  ;;  %v3231_v0 = vld [vmem:[#allocation4 + $0x518] sm:$0xff]  ;;  %v3228_v23 = vld [vmem:[#allocation4 + $0x500] sm:$0xff] }
 0x47e   :  { %3361 = vmatpush2.msra.mxu0 %v3300_v56  ;;  %3432 = vmatpush2.msra.mxu1 %v3302_v63  ;;  %v3230_v56 = vld [vmem:[#allocation4 + $0x510] sm:$0xff]  ;;  %v3221_v63 = vld [vmem:[#allocation4 + $0x4c8] sm:$0xff] }
 0x47f   :  { %3362 = vmatprep.subr.mxu0 %v3293_v39  ;;  %3433 = vmatprep.subr.mxu1 %v3295_v59  ;;  %v3223_v39 = vld [vmem:[#allocation4 + $0x4d8] sm:$0xff]  ;;  %v3220_v59 = vld [vmem:[#allocation4 + $0x4c0] sm:$0xff] }
 0x480   :  { %3363 = vmatpush2.msra.mxu0 %v3292_v24  ;;  %3434 = vmatpush2.msra.mxu1 %v3294_v55  ;;  %v3222_v24 = vld [vmem:[#allocation4 + $0x4d0] sm:$0xff]  ;;  %v3213_v55 = vld [vmem:[#allocation4 + $0x488] sm:$0xff] }
 0x481   :  { %3364 = vmatprep.subr.mxu0 %v3285_v37  ;;  %3435 = vmatprep.subr.mxu1 %v3287_v38  ;;  %v3215_v37 = vld [vmem:[#allocation4 + $0x498] sm:$0xff]  ;;  %v3212_v38 = vld [vmem:[#allocation4 + $0x480] sm:$0xff] }
 0x482   :  { %3365 = vmatpush2.msra.mxu0 %v3284_v49  ;;  %3436 = vmatpush2.msra.mxu1 %v3286_v61  ;;  %v3214_v49 = vld [vmem:[#allocation4 + $0x490] sm:$0xff]  ;;  %v3205_v61 = vld [vmem:[#allocation4 + $0x448] sm:$0xff] }
 0x483   :  { %3366 = vmatprep.subr.mxu0 %v3277_v41  ;;  %3437 = vmatprep.subr.mxu1 %v3279_v36  ;;  %v3207_v41 = vld [vmem:[#allocation4 + $0x458] sm:$0xff]  ;;  %v3204_v36 = vld [vmem:[#allocation4 + $0x440] sm:$0xff] }
 0x484   :  { %3367 = vmatpush2.msra.mxu0 %v3276_v31  ;;  %3438 = vmatpush2.msra.mxu1 %v3278_v6  ;;  %v3206_v31 = vld [vmem:[#allocation4 + $0x450] sm:$0xff]  ;;  %v3197_v6 = vld [vmem:[#allocation4 + $0x408] sm:$0xff] }
 0x485   :  { %3368 = vmatprep.subr.mxu0 %v3269_v2  ;;  %3439 = vmatprep.subr.mxu1 %v3271_v27  ;;  %v3199_v2 = vld [vmem:[#allocation4 + $0x418] sm:$0xff]  ;;  %v3196_v27 = vld [vmem:[#allocation4 + $0x400] sm:$0xff] }
 0x486   :  { %3369 = vmatpush2.msra.mxu0 %v3268_v33  ;;  %3440 = vmatpush2.msra.mxu1 %v3270_v10  ;;  %v3198_v33 = vld [vmem:[#allocation4 + $0x410] sm:$0xff]  ;;  %v3193_v10 = vld [vmem:[#allocation4 + $0x3e8] sm:$0xff] }
 0x487   :  { %3370 = vmatprep.subr.mxu0 %v3261_v43  ;;  %3441 = vmatprep.subr.mxu1 %v3263_v21  ;;  %v3195_v43 = vld [vmem:[#allocation4 + $0x3f8] sm:$0xff] }
 0x488   :  { %3371 = vmatpush2.msra.mxu0 %v3260_v54  ;;  %3442 = vmatpush2.msra.mxu1 %v3262_v40 }
 0x489   :  { %3372 = vmatprep.subr.mxu0 %v3253_v34  ;;  %3443 = vmatprep.subr.mxu1 %v3255_v11 }
 0x48a   :  { %3373 = vmatpush2.msra.mxu0 %v3252_v58  ;;  %3444 = vmatpush2.msra.mxu1 %v3254_v57 }
 0x48b   :  { %3374 = vmatprep.subr.mxu0 %v3245_v51  ;;  %3445 = vmatprep.subr.mxu1 %v3247_v7 }
 0x48c   :  { %3375 = vmatpush2.msra.mxu0 %v3244_v60  ;;  %3446 = vmatpush2.msra.mxu1 %v3246_v15 }
 0x48d   :  { %3376 = vmatprep.subr.mxu0 %v3237_v14  ;;  %3447 = vmatprep.subr.mxu1 %v3239_v28 }
 0x48e   :  { %3377 = vmatpush2.msra.mxu0 %v3236_v26  ;;  %3448 = vmatpush2.msra.mxu1 %v3238_v17 }
 0x48f   :  { %3378 = vmatprep.subr.mxu0 %v3229_v48  ;;  %3449 = vmatprep.subr.mxu1 %v3231_v0 }
 0x490   :  { %3379 = vmatpush2.msra.mxu0 %v3228_v23  ;;  %3450 = vmatpush2.msra.mxu1 %v3230_v56 }
 0x491   :  { %3380 = vmatprep.subr.mxu0 %v3221_v63  ;;  %3451 = vmatprep.subr.mxu1 %v3223_v39  ;;  %v546_v63 = vadd.f32 %v6678_v50, %v6714_v45 }
 0x492   :  { %3381 = vmatpush2.msra.mxu0 %v3220_v59  ;;  %3452 = vmatpush2.msra.mxu1 %v3222_v24 }
 0x493   :  { %3382 = vmatprep.subr.mxu0 %v3213_v55  ;;  %3453 = vmatprep.subr.mxu1 %v3215_v37 }
 0x494   :  { %3383 = vmatpush2.msra.mxu0 %v3212_v38  ;;  %3454 = vmatpush2.msra.mxu1 %v3214_v49 }
 0x495   :  { %3384 = vmatprep.subr.mxu0 %v3205_v61  ;;  %3455 = vmatprep.subr.mxu1 %v3207_v41 }
 0x496   :  { %3385 = vmatpush2.msra.mxu0 %v3204_v36  ;;  %3456 = vmatpush2.msra.mxu1 %v3206_v31 }
 0x497   :  { %3386 = vmatprep.subr.mxu0 %v3197_v6  ;;  %3457 = vmatprep.subr.mxu1 %v3199_v2 }
 0x498   :  { %3387 = vmatpush2.msra.mxu0 %v3196_v27  ;;  %3458 = vmatpush2.msra.mxu1 %v3198_v33 }
 0x499   :  { %3466 = vmatprep.subr.mxu0 %v3193_v10  ;;  %3537 = vmatprep.subr.mxu1 %v3195_v43 }
 0x4d7   :  { %v2784_v21 = vpop.f32.mrf.mxu0  ;;  %v2855_v54 = vpop.f32.mrf.mxu1 }
 0x4d8   :  { %v3002_v34 = vadd.f32 %v2784_v21, %v6548_v1  ;;  %v3004_v11 = vadd.f32 %v2855_v54, %v6635_v19 }
 0x4d9   :  { %v2786_v40 = vpop.f32.mrf.mxu0  ;;  %v2857_v58 = vpop.f32.mrf.mxu1 }
 0x4da   :  { %v3003_v57 = vadd.f32 %v2786_v40, %v6554_v3  ;;  %v5884_v51 = vmul.f32 -1.442695, %v3002_v34  ;;  %v3005_v7 = vadd.f32 %v2857_v58, %v6638_v29  ;;  %v5886_v60 = vmul.f32 -1.442695, %v3004_v11 }
 0x4db   :  { %v544_v3 = vadd.f32 %v6676_v35, %v6711_v44 }
 0x4dc   :  { %v5885_v15 = vmul.f32 -1.442695, %v3003_v57  ;;  %6071 = vpow2.f32 %v5884_v51  ;;  %v5887_v14 = vmul.f32 -1.442695, %v3005_v7  ;;  %v3192_v7 = vld [vmem:[#allocation4 + $0x3e0] sm:$0xff] }
 0x4dd   :  { %6073 = vpow2.f32 %v5886_v60  ;;  %v3185_v60 = vld [vmem:[#allocation4 + $0x3a8] sm:$0xff] }
 0x4de   :  { %6075 = vpow2.f32 %v5885_v15  ;;  %v3187_v15 = vld [vmem:[#allocation4 + $0x3b8] sm:$0xff] }
 0x4df   :  { %6077 = vpow2.f32 %v5887_v14  ;;  %v3184_v14 = vld [vmem:[#allocation4 + $0x3a0] sm:$0xff] }
 0x4e9   :  { %v6072_v28 = vpop.eup %6071 }
 0x4ea   :  { %v6074_v26 = vpop.eup %6073  ;;  %v3028_v48 = vadd.f32 1.0, %v6072_v28  ;;  %v3186_v28 = vld [vmem:[#allocation4 + $0x3b0] sm:$0xff] }
 0x4eb   :  { %v6076_v17 = vpop.eup %6075  ;;  %v3030_v0 = vadd.f32 1.0, %v6074_v26  ;;  %v3177_v26 = vld [vmem:[#allocation4 + $0x368] sm:$0xff] }
 0x4ec   :  { %v6078_v1 = vpop.eup %6077  ;;  %v3029_v19 = vadd.f32 1.0, %v6076_v17  ;;  %6079 = vrcp.f32 %v3028_v48  ;;  %v3179_v17 = vld [vmem:[#allocation4 + $0x378] sm:$0xff]  ;;  %v3176_v48 = vld [vmem:[#allocation4 + $0x360] sm:$0xff] }
 0x4ed   :  { %v3031_v23 = vadd.f32 1.0, %v6078_v1  ;;  %6081 = vrcp.f32 %v3030_v0  ;;  %v3178_v1 = vld [vmem:[#allocation4 + $0x370] sm:$0xff]  ;;  %v3169_v0 = vld [vmem:[#allocation4 + $0x328] sm:$0xff] }
 0x4ee   :  { %6083 = vrcp.f32 %v3029_v19  ;;  %v3171_v19 = vld [vmem:[#allocation4 + $0x338] sm:$0xff] }
 0x4f9   :  { %v6080_v61 = vpop.eup %6079 }
 0x4fa   :  { %v6082_v41 = vpop.eup %6081 }
 0x4fb   :  { %v6084_v50 = vpop.eup %6083 }
 0x518   :  { %v2926_v29 = vpop.f32.mrf.mxu0  ;;  %v2997_v56 = vpop.f32.mrf.mxu1 }
 0x519   :  { %v3006_v39 = vadd.f32 %v2926_v29, %v6563_v9  ;;  %v3008_v59 = vadd.f32 %v2997_v56, %v544_v3  ;;  %v3048_v9 = vmul.f32 %v6082_v41, %v6779_v30  ;;  %v3168_v3 = vld [vmem:[#allocation4 + $0x320] sm:$0xff]  ;;  %v3161_v29 = vld [vmem:[#allocation4 + $0x2e8] sm:$0xff]  ;;  %v3163_v56 = vld [vmem:[#allocation4 + $0x2f8] sm:$0xff] }
 0x51a   :  { %v2928_v24 = vpop.f32.mrf.mxu0  ;;  %v2999_v55 = vpop.f32.mrf.mxu1  ;;  %v3137_v41 = vld [vmem:[#allocation4 + $0x228] sm:$0xff] }
 0x51b   :  { %v5888_v37 = vmul.f32 -1.442695, %v3006_v39  ;;  %6085 = vtanh.f32 %v3008_v59  ;;  %v3007_v38 = vadd.f32 %v2928_v24, %v6569_v13  ;;  %v3009_v49 = vadd.f32 %v2999_v55, %v546_v63  ;;  %v3160_v63 = vld [vmem:[#allocation4 + $0x2e0] sm:$0xff]  ;;  %v3162_v39 = vld [vmem:[#allocation4 + $0x2f0] sm:$0xff]  ;;  %v3153_v59 = vld [vmem:[#allocation4 + $0x2a8] sm:$0xff] }
 0x51c   :  { %6087 = vrcp.f32 %v3031_v23  ;;  %v3170_v23 = vld [vmem:[#allocation4 + $0x330] sm:$0xff]  ;;  %v3155_v24 = vld [vmem:[#allocation4 + $0x2b8] sm:$0xff]  ;;  %v3152_v55 = vld [vmem:[#allocation4 + $0x2a0] sm:$0xff] }
 0x51d   :  { %6089 = vpow2.f32 %v5888_v37  ;;  %v5889_v35 = vmul.f32 -1.442695, %v3007_v38  ;;  %v3154_v37 = vld [vmem:[#allocation4 + $0x2b0] sm:$0xff]  ;;  %v3145_v38 = vld [vmem:[#allocation4 + $0x268] sm:$0xff] }
 0x51e   :  { %6091 = vtanh.f32 %v3009_v49  ;;  %v3147_v49 = vld [vmem:[#allocation4 + $0x278] sm:$0xff] }
 0x51f   :  { %6093 = vpow2.f32 %v5889_v35  ;;  %v3144_v35 = vld [vmem:[#allocation4 + $0x260] sm:$0xff] }
 0x528   :  { %v6086_v36 = vpop.eup %6085 }
 0x529   :  { %v6088_v31 = vpop.eup %6087  ;;  %v3050_v6 = vmul.f32 %v6086_v36, %v6080_v61  ;;  %v3146_v61 = vld [vmem:[#allocation4 + $0x270] sm:$0xff]  ;;  %v3136_v36 = vld [vmem:[#allocation4 + $0x220] sm:$0xff] }
 0x52a   :  { %v6090_v2 = vpop.eup %6089  ;;  %v3049_v43 = vmul.f32 %v6088_v31, %v6783_v5  ;;  %v3194_v5 = vld [vmem:[#allocation4 + $0x3f0] sm:$0xff] }
 0x52b   :  { %v6092_v27 = vpop.eup %6091  ;;  %v3032_v33 = vadd.f32 1.0, %v6090_v2  ;;  %v6809_v10 = vadd.f32 %v3050_v6, %v3048_v9  ;;  %v3138_v31 = vld [vmem:[#allocation4 + $0x230] sm:$0xff]  ;;  %v3129_v9 = vld [vmem:[#allocation4 + $0x1e8] sm:$0xff]  ;;  %v3131_v6 = vld [vmem:[#allocation4 + $0x1f8] sm:$0xff] }
 0x52c   :  { %v6094_v13 = vpop.eup %6093  ;;  %v3051_v21 = vmul.f32 %v6092_v27, %v6084_v50  ;;  %v3139_v50 = vld [vmem:[#allocation4 + $0x238] sm:$0xff]  ;;  %v3128_v2 = vld [vmem:[#allocation4 + $0x1e0] sm:$0xff]  ;;  %v3130_v27 = vld [vmem:[#allocation4 + $0x1f0] sm:$0xff] }
 0x52d   :  { %6095 = vrcp.f32 %v3032_v33  ;;  %v3033_v54 = vadd.f32 1.0, %v6094_v13  ;;  %v3121_v33 = vld [vmem:[#allocation4 + $0x1a8] sm:$0xff]  ;;  %v3123_v13 = vld [vmem:[#allocation4 + $0x1b8] sm:$0xff] }
 0x52e   :  { %6097 = vtanh.f32 %v6809_v10  ;;  %v6813_v40 = vadd.f32 %v3051_v21, %v3049_v43  ;;  %v3120_v43 = vld [vmem:[#allocation4 + $0x1a0] sm:$0xff]  ;;  %v3122_v21 = vld [vmem:[#allocation4 + $0x1b0] sm:$0xff] }
 0x52f   :  { %6099 = vrcp.f32 %v3033_v54  ;;  %v3113_v54 = vld [vmem:[#allocation4 + $0x168] sm:$0xff] }
 0x530   :  { %6101 = vtanh.f32 %v6813_v40 }
 0x53a   :  { %v6096_v30 = vpop.eup %6095 }
 0x53b   :  { %v6098_v34 = vpop.eup %6097 }
 0x53c   :  { %v6100_v11 = vpop.eup %6099  ;;  %v6818_v51 = vmul.f32 %v6098_v34, %v6096_v30  ;;  %v3115_v30 = vld [vmem:[#allocation4 + $0x178] sm:$0xff]  ;;  %v3112_v34 = vld [vmem:[#allocation4 + $0x160] sm:$0xff] }
 0x53d   :  { %v6102_v58 = vpop.eup %6101 }
 0x53e   :  { %v6816_v57 = vmul.f32 %v6102_v58, %v6100_v11  ;;  %v3114_v11 = vld [vmem:[#allocation4 + $0x170] sm:$0xff]  ;;  %v3105_v58 = vld [vmem:[#allocation4 + $0x128] sm:$0xff] }
 0x540   :  { %3388 = vmatprep.mubr.f32.mxu0 %v6816_v57  ;;  %3459 = vmatprep.mubr.f32.mxu1 %v6816_v57 }
 0x541   :  { %3389 = vmatmul.mubr.f32.vlgmr.msra.gmra.mxu0 %v6818_v51  ;;  %3460 = vmatmul.mubr.f32.vlgmr.msra.gmra.mxu1 %v6818_v51 }
 0x542   :  { %3467 = vmatpush1.msra.mxu0 %v3192_v7  ;;  %3538 = vmatpush1.msra.mxu1 %v3194_v5  ;;  %v3107_v7 = vld [vmem:[#allocation4 + $0x138] sm:$0xff]  ;;  %v3104_v5 = vld [vmem:[#allocation4 + $0x120] sm:$0xff] }
 0x543   :  { %3468 = vmatprep.subr.mxu0 %v3185_v60  ;;  %3530 = vmatprep.mubr.f32.mxu0 %v6816_v57  ;;  %v3106_v60 = vld [vmem:[#allocation4 + $0x130] sm:$0xff] }
 0x544   :  { %3539 = vmatprep.subr.mxu1 %v3187_v15  ;;  %3601 = vmatprep.mubr.f32.mxu1 %v6816_v57  ;;  %v3097_v15 = vld [vmem:[#allocation4 + $0xe8] sm:$0xff] }
 0x545   :  { %3469 = vmatpush1.msra.mxu0 %v3184_v14  ;;  %3540 = vmatpush1.msra.mxu1 %v3186_v28  ;;  %v3099_v14 = vld [vmem:[#allocation4 + $0xf8] sm:$0xff]  ;;  %v3096_v28 = vld [vmem:[#allocation4 + $0xe0] sm:$0xff] }
 0x546   :  { %3470 = vmatprep.subr.mxu0 %v3177_v26  ;;  %3541 = vmatprep.subr.mxu1 %v3179_v17  ;;  %v3098_v26 = vld [vmem:[#allocation4 + $0xf0] sm:$0xff]  ;;  %v3089_v17 = vld [vmem:[#allocation4 + $0xa8] sm:$0xff] }
 0x547   :  { %3471 = vmatpush1.msra.mxu0 %v3176_v48  ;;  %3542 = vmatpush1.msra.mxu1 %v3178_v1  ;;  %v3091_v48 = vld [vmem:[#allocation4 + $0xb8] sm:$0xff]  ;;  %v3088_v1 = vld [vmem:[#allocation4 + $0xa0] sm:$0xff] }
 0x548   :  { %3472 = vmatprep.subr.mxu0 %v3169_v0  ;;  %3543 = vmatprep.subr.mxu1 %v3171_v19  ;;  %v3090_v0 = vld [vmem:[#allocation4 + $0xb0] sm:$0xff]  ;;  %v3081_v19 = vld [vmem:[#allocation4 + $0x68] sm:$0xff] }
 0x549   :  { %3473 = vmatpush1.msra.mxu0 %v3168_v3  ;;  %3544 = vmatpush1.msra.mxu1 %v3170_v23  ;;  %v3083_v3 = vld [vmem:[#allocation4 + $0x78] sm:$0xff]  ;;  %v3080_v23 = vld [vmem:[#allocation4 + $0x60] sm:$0xff] }
 0x54a   :  { %3474 = vmatprep.subr.mxu0 %v3161_v29  ;;  %3545 = vmatprep.subr.mxu1 %v3163_v56  ;;  %v3082_v29 = vld [vmem:[#allocation4 + $0x70] sm:$0xff]  ;;  %v3073_v56 = vld [vmem:[#allocation4 + $0x28] sm:$0xff] }
 0x54b   :  { %3475 = vmatpush1.msra.mxu0 %v3160_v63  ;;  %3546 = vmatpush1.msra.mxu1 %v3162_v39  ;;  %v3075_v63 = vld [vmem:[#allocation4 + $0x38] sm:$0xff]  ;;  %v3072_v39 = vld [vmem:[#allocation4 + $0x20] sm:$0xff] }
 0x54c   :  { %3476 = vmatprep.subr.mxu0 %v3153_v59  ;;  %3547 = vmatprep.subr.mxu1 %v3155_v24  ;;  %v3074_v59 = vld [vmem:[#allocation4 + $0x30] sm:$0xff]  ;;  %v3321_v24 = vld [vmem:[#allocation4 + $0x7e8] sm:$0xff] }
 0x54d   :  { %3477 = vmatpush1.msra.mxu0 %v3152_v55  ;;  %3548 = vmatpush1.msra.mxu1 %v3154_v37  ;;  %v3323_v55 = vld [vmem:[#allocation4 + $0x7f8] sm:$0xff]  ;;  %v3320_v37 = vld [vmem:[#allocation4 + $0x7e0] sm:$0xff] }
 0x54e   :  { %3478 = vmatprep.subr.mxu0 %v3145_v38  ;;  %3549 = vmatprep.subr.mxu1 %v3147_v49  ;;  %v3322_v38 = vld [vmem:[#allocation4 + $0x7f0] sm:$0xff]  ;;  %v3313_v49 = vld [vmem:[#allocation4 + $0x7a8] sm:$0xff] }
 0x54f   :  { %3479 = vmatpush1.msra.mxu0 %v3144_v35  ;;  %3550 = vmatpush1.msra.mxu1 %v3146_v61  ;;  %v3315_v35 = vld [vmem:[#allocation4 + $0x7b8] sm:$0xff]  ;;  %v3312_v61 = vld [vmem:[#allocation4 + $0x7a0] sm:$0xff] }
 0x550   :  { %3480 = vmatprep.subr.mxu0 %v3137_v41  ;;  %3551 = vmatprep.subr.mxu1 %v3139_v50  ;;  %v3314_v41 = vld [vmem:[#allocation4 + $0x7b0] sm:$0xff]  ;;  %v3305_v50 = vld [vmem:[#allocation4 + $0x768] sm:$0xff] }
 0x551   :  { %3481 = vmatpush1.msra.mxu0 %v3136_v36  ;;  %3552 = vmatpush1.msra.mxu1 %v3138_v31  ;;  %v3307_v36 = vld [vmem:[#allocation4 + $0x778] sm:$0xff]  ;;  %v3304_v31 = vld [vmem:[#allocation4 + $0x760] sm:$0xff] }
 0x552   :  { %3482 = vmatprep.subr.mxu0 %v3129_v9  ;;  %3553 = vmatprep.subr.mxu1 %v3131_v6  ;;  %v3306_v9 = vld [vmem:[#allocation4 + $0x770] sm:$0xff]  ;;  %v3297_v6 = vld [vmem:[#allocation4 + $0x728] sm:$0xff] }
 0x553   :  { %3483 = vmatpush1.msra.mxu0 %v3128_v2  ;;  %3554 = vmatpush1.msra.mxu1 %v3130_v27  ;;  %v3299_v2 = vld [vmem:[#allocation4 + $0x738] sm:$0xff]  ;;  %v3296_v27 = vld [vmem:[#allocation4 + $0x720] sm:$0xff] }
 0x554   :  { %3484 = vmatprep.subr.mxu0 %v3121_v33  ;;  %3555 = vmatprep.subr.mxu1 %v3123_v13  ;;  %v3298_v33 = vld [vmem:[#allocation4 + $0x730] sm:$0xff]  ;;  %v3289_v13 = vld [vmem:[#allocation4 + $0x6e8] sm:$0xff] }
 0x555   :  { %3485 = vmatpush1.msra.mxu0 %v3120_v43  ;;  %3556 = vmatpush1.msra.mxu1 %v3122_v21  ;;  %v3291_v43 = vld [vmem:[#allocation4 + $0x6f8] sm:$0xff]  ;;  %v3288_v21 = vld [vmem:[#allocation4 + $0x6e0] sm:$0xff] }
 0x556   :  { %3486 = vmatprep.subr.mxu0 %v3113_v54  ;;  %3557 = vmatprep.subr.mxu1 %v3115_v30  ;;  %v3290_v54 = vld [vmem:[#allocation4 + $0x6f0] sm:$0xff]  ;;  %v3281_v30 = vld [vmem:[#allocation4 + $0x6a8] sm:$0xff] }
 0x557   :  { %3487 = vmatpush1.msra.mxu0 %v3112_v34  ;;  %3558 = vmatpush1.msra.mxu1 %v3114_v11  ;;  %v3283_v34 = vld [vmem:[#allocation4 + $0x6b8] sm:$0xff]  ;;  %v3280_v11 = vld [vmem:[#allocation4 + $0x6a0] sm:$0xff] }
 0x558   :  { %3488 = vmatprep.subr.mxu0 %v3105_v58  ;;  %3559 = vmatprep.subr.mxu1 %v3107_v7  ;;  %v3282_v58 = vld [vmem:[#allocation4 + $0x6b0] sm:$0xff]  ;;  %v3273_v7 = vld [vmem:[#allocation4 + $0x668] sm:$0xff] }
 0x559   :  { %3489 = vmatpush1.msra.mxu0 %v3104_v5  ;;  %3560 = vmatpush1.msra.mxu1 %v3106_v60  ;;  %v3275_v5 = vld [vmem:[#allocation4 + $0x678] sm:$0xff]  ;;  %v3272_v60 = vld [vmem:[#allocation4 + $0x660] sm:$0xff] }
 0x55a   :  { %3490 = vmatprep.subr.mxu0 %v3097_v15  ;;  %3561 = vmatprep.subr.mxu1 %v3099_v14  ;;  %v3274_v15 = vld [vmem:[#allocation4 + $0x670] sm:$0xff]  ;;  %v3265_v14 = vld [vmem:[#allocation4 + $0x628] sm:$0xff] }
 0x55b   :  { %3491 = vmatpush1.msra.mxu0 %v3096_v28  ;;  %3562 = vmatpush1.msra.mxu1 %v3098_v26  ;;  %v3267_v28 = vld [vmem:[#allocation4 + $0x638] sm:$0xff]  ;;  %v3264_v26 = vld [vmem:[#allocation4 + $0x620] sm:$0xff] }
 0x55c   :  { %3492 = vmatprep.subr.mxu0 %v3089_v17  ;;  %3563 = vmatprep.subr.mxu1 %v3091_v48  ;;  %v3266_v17 = vld [vmem:[#allocation4 + $0x630] sm:$0xff]  ;;  %v3257_v48 = vld [vmem:[#allocation4 + $0x5e8] sm:$0xff] }
 0x55d   :  { %3493 = vmatpush1.msra.mxu0 %v3088_v1  ;;  %3564 = vmatpush1.msra.mxu1 %v3090_v0  ;;  %v3259_v1 = vld [vmem:[#allocation4 + $0x5f8] sm:$0xff]  ;;  %v3256_v0 = vld [vmem:[#allocation4 + $0x5e0] sm:$0xff] }
 0x55e   :  { %3494 = vmatprep.subr.mxu0 %v3081_v19  ;;  %3565 = vmatprep.subr.mxu1 %v3083_v3  ;;  %v3258_v19 = vld [vmem:[#allocation4 + $0x5f0] sm:$0xff]  ;;  %v3249_v3 = vld [vmem:[#allocation4 + $0x5a8] sm:$0xff] }
 0x55f   :  { %3495 = vmatpush1.msra.mxu0 %v3080_v23  ;;  %3566 = vmatpush1.msra.mxu1 %v3082_v29  ;;  %v3251_v23 = vld [vmem:[#allocation4 + $0x5b8] sm:$0xff]  ;;  %v3248_v29 = vld [vmem:[#allocation4 + $0x5a0] sm:$0xff] }
 0x560   :  { %3496 = vmatprep.subr.mxu0 %v3073_v56  ;;  %3567 = vmatprep.subr.mxu1 %v3075_v63  ;;  %v3250_v56 = vld [vmem:[#allocation4 + $0x5b0] sm:$0xff]  ;;  %v3241_v63 = vld [vmem:[#allocation4 + $0x568] sm:$0xff] }
 0x561   :  { %3497 = vmatpush1.msra.mxu0 %v3072_v39  ;;  %3568 = vmatpush1.msra.mxu1 %v3074_v59  ;;  %v3243_v39 = vld [vmem:[#allocation4 + $0x578] sm:$0xff]  ;;  %v3240_v59 = vld [vmem:[#allocation4 + $0x560] sm:$0xff] }
 0x562   :  { %3498 = vmatprep.subr.mxu0 %v3321_v24  ;;  %3569 = vmatprep.subr.mxu1 %v3323_v55  ;;  %v3242_v24 = vld [vmem:[#allocation4 + $0x570] sm:$0xff]  ;;  %v3233_v55 = vld [vmem:[#allocation4 + $0x528] sm:$0xff] }
 0x563   :  { %3499 = vmatpush2.msra.mxu0 %v3320_v37  ;;  %3570 = vmatpush2.msra.mxu1 %v3322_v38  ;;  %v3235_v37 = vld [vmem:[#allocation4 + $0x538] sm:$0xff]  ;;  %v3232_v38 = vld [vmem:[#allocation4 + $0x520] sm:$0xff] }
 0x564   :  { %3500 = vmatprep.subr.mxu0 %v3313_v49  ;;  %3571 = vmatprep.subr.mxu1 %v3315_v35  ;;  %v3234_v49 = vld [vmem:[#allocation4 + $0x530] sm:$0xff]  ;;  %v3225_v35 = vld [vmem:[#allocation4 + $0x4e8] sm:$0xff] }
 0x565   :  { %3501 = vmatpush2.msra.mxu0 %v3312_v61  ;;  %3572 = vmatpush2.msra.mxu1 %v3314_v41  ;;  %v3227_v61 = vld [vmem:[#allocation4 + $0x4f8] sm:$0xff]  ;;  %v3224_v41 = vld [vmem:[#allocation4 + $0x4e0] sm:$0xff] }
 0x566   :  { %3502 = vmatprep.subr.mxu0 %v3305_v50  ;;  %3573 = vmatprep.subr.mxu1 %v3307_v36  ;;  %v3226_v50 = vld [vmem:[#allocation4 + $0x4f0] sm:$0xff]  ;;  %v3217_v36 = vld [vmem:[#allocation4 + $0x4a8] sm:$0xff] }
 0x567   :  { %3503 = vmatpush2.msra.mxu0 %v3304_v31  ;;  %3574 = vmatpush2.msra.mxu1 %v3306_v9  ;;  %v3219_v31 = vld [vmem:[#allocation4 + $0x4b8] sm:$0xff]  ;;  %v3216_v9 = vld [vmem:[#allocation4 + $0x4a0] sm:$0xff] }
 0x568   :  { %3504 = vmatprep.subr.mxu0 %v3297_v6  ;;  %3575 = vmatprep.subr.mxu1 %v3299_v2  ;;  %v3218_v6 = vld [vmem:[#allocation4 + $0x4b0] sm:$0xff]  ;;  %v3209_v2 = vld [vmem:[#allocation4 + $0x468] sm:$0xff] }
 0x569   :  { %3505 = vmatpush2.msra.mxu0 %v3296_v27  ;;  %3576 = vmatpush2.msra.mxu1 %v3298_v33  ;;  %v3211_v27 = vld [vmem:[#allocation4 + $0x478] sm:$0xff]  ;;  %v3208_v33 = vld [vmem:[#allocation4 + $0x460] sm:$0xff] }
 0x56a   :  { %3506 = vmatprep.subr.mxu0 %v3289_v13  ;;  %3577 = vmatprep.subr.mxu1 %v3291_v43  ;;  %v3210_v13 = vld [vmem:[#allocation4 + $0x470] sm:$0xff]  ;;  %v3201_v43 = vld [vmem:[#allocation4 + $0x428] sm:$0xff] }
 0x56b   :  { %3507 = vmatpush2.msra.mxu0 %v3288_v21  ;;  %3578 = vmatpush2.msra.mxu1 %v3290_v54  ;;  %v3203_v21 = vld [vmem:[#allocation4 + $0x438] sm:$0xff]  ;;  %v3200_v54 = vld [vmem:[#allocation4 + $0x420] sm:$0xff] }
 0x56c   :  { %3508 = vmatprep.subr.mxu0 %v3281_v30  ;;  %3579 = vmatprep.subr.mxu1 %v3283_v34  ;;  %v3202_v30 = vld [vmem:[#allocation4 + $0x430] sm:$0xff]  ;;  %v3795_v34 = vld [vmem:[#allocation4 + $0x3c8] sm:$0xff] }
 0x56d   :  { %3509 = vmatpush2.msra.mxu0 %v3280_v11  ;;  %3580 = vmatpush2.msra.mxu1 %v3282_v58  ;;  %v3797_v11 = vld [vmem:[#allocation4 + $0x3d8] sm:$0xff]  ;;  %v3794_v58 = vld [vmem:[#allocation4 + $0x3c0] sm:$0xff] }
 0x56e   :  { %3510 = vmatprep.subr.mxu0 %v3273_v7  ;;  %3581 = vmatprep.subr.mxu1 %v3275_v5  ;;  %v3796_v7 = vld [vmem:[#allocation4 + $0x3d0] sm:$0xff]  ;;  %v3787_v5 = vld [vmem:[#allocation4 + $0x388] sm:$0xff] }
 0x56f   :  { %3511 = vmatpush2.msra.mxu0 %v3272_v60  ;;  %3582 = vmatpush2.msra.mxu1 %v3274_v15  ;;  %v3789_v60 = vld [vmem:[#allocation4 + $0x398] sm:$0xff]  ;;  %v3786_v15 = vld [vmem:[#allocation4 + $0x380] sm:$0xff] }
 0x570   :  { %3512 = vmatprep.subr.mxu0 %v3265_v14  ;;  %3583 = vmatprep.subr.mxu1 %v3267_v28  ;;  %v3788_v14 = vld [vmem:[#allocation4 + $0x390] sm:$0xff]  ;;  %v3779_v28 = vld [vmem:[#allocation4 + $0x348] sm:$0xff] }
 0x571   :  { %3513 = vmatpush2.msra.mxu0 %v3264_v26  ;;  %3584 = vmatpush2.msra.mxu1 %v3266_v17  ;;  %v3781_v26 = vld [vmem:[#allocation4 + $0x358] sm:$0xff]  ;;  %v3778_v17 = vld [vmem:[#allocation4 + $0x340] sm:$0xff] }
 0x572   :  { %3514 = vmatprep.subr.mxu0 %v3257_v48  ;;  %3585 = vmatprep.subr.mxu1 %v3259_v1  ;;  %v3780_v48 = vld [vmem:[#allocation4 + $0x350] sm:$0xff]  ;;  %v3771_v1 = vld [vmem:[#allocation4 + $0x308] sm:$0xff] }
 0x573   :  { %3515 = vmatpush2.msra.mxu0 %v3256_v0  ;;  %3586 = vmatpush2.msra.mxu1 %v3258_v19  ;;  %v3773_v0 = vld [vmem:[#allocation4 + $0x318] sm:$0xff]  ;;  %v3770_v19 = vld [vmem:[#allocation4 + $0x300] sm:$0xff] }
 0x574   :  { %3516 = vmatprep.subr.mxu0 %v3249_v3  ;;  %3587 = vmatprep.subr.mxu1 %v3251_v23  ;;  %v3772_v3 = vld [vmem:[#allocation4 + $0x310] sm:$0xff]  ;;  %v3763_v23 = vld [vmem:[#allocation4 + $0x2c8] sm:$0xff] }
 0x575   :  { %3517 = vmatpush2.msra.mxu0 %v3248_v29  ;;  %3588 = vmatpush2.msra.mxu1 %v3250_v56  ;;  %v3765_v29 = vld [vmem:[#allocation4 + $0x2d8] sm:$0xff]  ;;  %v3762_v56 = vld [vmem:[#allocation4 + $0x2c0] sm:$0xff] }
 0x576   :  { %3518 = vmatprep.subr.mxu0 %v3241_v63  ;;  %3589 = vmatprep.subr.mxu1 %v3243_v39  ;;  %v3764_v63 = vld [vmem:[#allocation4 + $0x2d0] sm:$0xff]  ;;  %v3755_v39 = vld [vmem:[#allocation4 + $0x288] sm:$0xff] }
 0x577   :  { %3519 = vmatpush2.msra.mxu0 %v3240_v59  ;;  %3590 = vmatpush2.msra.mxu1 %v3242_v24  ;;  %v3757_v59 = vld [vmem:[#allocation4 + $0x298] sm:$0xff]  ;;  %v3754_v24 = vld [vmem:[#allocation4 + $0x280] sm:$0xff] }
 0x578   :  { %3520 = vmatprep.subr.mxu0 %v3233_v55  ;;  %3591 = vmatprep.subr.mxu1 %v3235_v37  ;;  %v3756_v55 = vld [vmem:[#allocation4 + $0x290] sm:$0xff]  ;;  %v3747_v37 = vld [vmem:[#allocation4 + $0x248] sm:$0xff] }
 0x579   :  { %3521 = vmatpush2.msra.mxu0 %v3232_v38  ;;  %3592 = vmatpush2.msra.mxu1 %v3234_v49  ;;  %v3749_v38 = vld [vmem:[#allocation4 + $0x258] sm:$0xff]  ;;  %v3746_v49 = vld [vmem:[#allocation4 + $0x240] sm:$0xff] }
 0x57a   :  { %3522 = vmatprep.subr.mxu0 %v3225_v35  ;;  %3593 = vmatprep.subr.mxu1 %v3227_v61  ;;  %v3748_v35 = vld [vmem:[#allocation4 + $0x250] sm:$0xff]  ;;  %v3739_v61 = vld [vmem:[#allocation4 + $0x208] sm:$0xff] }
 0x57b   :  { %3523 = vmatpush2.msra.mxu0 %v3224_v41  ;;  %3594 = vmatpush2.msra.mxu1 %v3226_v50  ;;  %v3741_v41 = vld [vmem:[#allocation4 + $0x218] sm:$0xff]  ;;  %v3738_v50 = vld [vmem:[#allocation4 + $0x200] sm:$0xff] }
 0x57c   :  { %3524 = vmatprep.subr.mxu0 %v3217_v36  ;;  %3595 = vmatprep.subr.mxu1 %v3219_v31  ;;  %v3740_v36 = vld [vmem:[#allocation4 + $0x210] sm:$0xff]  ;;  %v3731_v31 = vld [vmem:[#allocation4 + $0x1c8] sm:$0xff] }
 0x57d   :  { %3525 = vmatpush2.msra.mxu0 %v3216_v9  ;;  %3596 = vmatpush2.msra.mxu1 %v3218_v6  ;;  %v3733_v9 = vld [vmem:[#allocation4 + $0x1d8] sm:$0xff]  ;;  %v3730_v6 = vld [vmem:[#allocation4 + $0x1c0] sm:$0xff] }
 0x57e   :  { %3526 = vmatprep.subr.mxu0 %v3209_v2  ;;  %3597 = vmatprep.subr.mxu1 %v3211_v27  ;;  %v3732_v2 = vld [vmem:[#allocation4 + $0x1d0] sm:$0xff]  ;;  %v3723_v27 = vld [vmem:[#allocation4 + $0x188] sm:$0xff] }
 0x57f   :  { %3527 = vmatpush2.msra.mxu0 %v3208_v33  ;;  %3598 = vmatpush2.msra.mxu1 %v3210_v13  ;;  %v3725_v33 = vld [vmem:[#allocation4 + $0x198] sm:$0xff]  ;;  %v3722_v13 = vld [vmem:[#allocation4 + $0x180] sm:$0xff] }
 0x580   :  { %3528 = vmatprep.subr.mxu0 %v3201_v43  ;;  %3599 = vmatprep.subr.mxu1 %v3203_v21  ;;  %v3724_v43 = vld [vmem:[#allocation4 + $0x190] sm:$0xff]  ;;  %v3715_v21 = vld [vmem:[#allocation4 + $0x148] sm:$0xff] }
 0x581   :  { %3529 = vmatpush2.msra.mxu0 %v3200_v54  ;;  %3600 = vmatpush2.msra.mxu1 %v3202_v30  ;;  %v3717_v54 = vld [vmem:[#allocation4 + $0x158] sm:$0xff]  ;;  %v3714_v30 = vld [vmem:[#allocation4 + $0x140] sm:$0xff] }
 0x582   :  { %3531 = vmatmul.mubr.f32.vlgmr.msra.gmra.mxu0 %v6818_v51  ;;  %3602 = vmatmul.mubr.f32.vlgmr.msra.gmra.mxu1 %v6818_v51 }
 0x583   :  { %3930 = vmatprep.subr.mxu0 %v3795_v34  ;;  %4001 = vmatprep.subr.mxu1 %v3797_v11  ;;  %v3716_v34 = vld [vmem:[#allocation4 + $0x150] sm:$0xff]  ;;  %v3707_v11 = vld [vmem:[#allocation4 + $0x108] sm:$0xff] }
 0x584   :  { %3931 = vmatpush1.msra.mxu0 %v3794_v58  ;;  %4002 = vmatpush1.msra.mxu1 %v3796_v7  ;;  %v3709_v58 = vld [vmem:[#allocation4 + $0x118] sm:$0xff]  ;;  %v3706_v7 = vld [vmem:[#allocation4 + $0x100] sm:$0xff] }
 0x585   :  { %3932 = vmatprep.subr.mxu0 %v3787_v5  ;;  %4003 = vmatprep.subr.mxu1 %v3789_v60  ;;  %v3708_v5 = vld [vmem:[#allocation4 + $0x110] sm:$0xff]  ;;  %v3699_v60 = vld [vmem:[#allocation4 + $0xc8] sm:$0xff] }
 0x586   :  { %3933 = vmatpush1.msra.mxu0 %v3786_v15  ;;  %4004 = vmatpush1.msra.mxu1 %v3788_v14  ;;  %v3701_v15 = vld [vmem:[#allocation4 + $0xd8] sm:$0xff]  ;;  %v3698_v14 = vld [vmem:[#allocation4 + $0xc0] sm:$0xff] }
 0x587   :  { %3934 = vmatprep.subr.mxu0 %v3779_v28  ;;  %4005 = vmatprep.subr.mxu1 %v3781_v26  ;;  %v3700_v28 = vld [vmem:[#allocation4 + $0xd0] sm:$0xff]  ;;  %v3691_v26 = vld [vmem:[#allocation4 + $0x88] sm:$0xff] }
 0x588   :  { %3935 = vmatpush1.msra.mxu0 %v3778_v17  ;;  %4006 = vmatpush1.msra.mxu1 %v3780_v48  ;;  %v3693_v17 = vld [vmem:[#allocation4 + $0x98] sm:$0xff]  ;;  %v3690_v48 = vld [vmem:[#allocation4 + $0x80] sm:$0xff] }
 0x589   :  { %3936 = vmatprep.subr.mxu0 %v3771_v1  ;;  %4007 = vmatprep.subr.mxu1 %v3773_v0  ;;  %v3692_v1 = vld [vmem:[#allocation4 + $0x90] sm:$0xff]  ;;  %v3683_v0 = vld [vmem:[#allocation4 + $0x48] sm:$0xff] }
 0x58a   :  { %3937 = vmatpush1.msra.mxu0 %v3770_v19  ;;  %4008 = vmatpush1.msra.mxu1 %v3772_v3  ;;  %v3685_v19 = vld [vmem:[#allocation4 + $0x58] sm:$0xff]  ;;  %v3682_v3 = vld [vmem:[#allocation4 + $0x40] sm:$0xff] }
 0x58b   :  { %3938 = vmatprep.subr.mxu0 %v3763_v23  ;;  %4009 = vmatprep.subr.mxu1 %v3765_v29  ;;  %v3684_v23 = vld [vmem:[#allocation4 + $0x50] sm:$0xff]  ;;  %v3675_v29 = vld [vmem:[#allocation4 + $0x8] sm:$0xff] }
 0x58c   :  { %3939 = vmatpush1.msra.mxu0 %v3762_v56  ;;  %4010 = vmatpush1.msra.mxu1 %v3764_v63  ;;  %v3677_v56 = vld [vmem:[#allocation4 + $0x18] sm:$0xff]  ;;  %v3674_v63 = vld [vmem:[#allocation4] sm:$0xff] }
 0x58d   :  { %3940 = vmatprep.subr.mxu0 %v3755_v39  ;;  %4011 = vmatprep.subr.mxu1 %v3757_v59  ;;  %v3676_v39 = vld [vmem:[#allocation4 + $0x10] sm:$0xff]  ;;  %v3923_v59 = vld [vmem:[#allocation4 + $0x7c8] sm:$0xff] }
 0x58e   :  { %3941 = vmatpush1.msra.mxu0 %v3754_v24  ;;  %4012 = vmatpush1.msra.mxu1 %v3756_v55  ;;  %v3925_v24 = vld [vmem:[#allocation4 + $0x7d8] sm:$0xff]  ;;  %v3922_v55 = vld [vmem:[#allocation4 + $0x7c0] sm:$0xff] }
 0x58f   :  { %3942 = vmatprep.subr.mxu0 %v3747_v37  ;;  %4013 = vmatprep.subr.mxu1 %v3749_v38  ;;  %v3924_v37 = vld [vmem:[#allocation4 + $0x7d0] sm:$0xff]  ;;  %v3915_v38 = vld [vmem:[#allocation4 + $0x788] sm:$0xff] }
 0x590   :  { %3943 = vmatpush1.msra.mxu0 %v3746_v49  ;;  %4014 = vmatpush1.msra.mxu1 %v3748_v35  ;;  %v3917_v49 = vld [vmem:[#allocation4 + $0x798] sm:$0xff]  ;;  %v3914_v35 = vld [vmem:[#allocation4 + $0x780] sm:$0xff] }
 0x591   :  { %3944 = vmatprep.subr.mxu0 %v3739_v61  ;;  %4015 = vmatprep.subr.mxu1 %v3741_v41  ;;  %v3916_v61 = vld [vmem:[#allocation4 + $0x790] sm:$0xff]  ;;  %v3907_v41 = vld [vmem:[#allocation4 + $0x748] sm:$0xff] }
 0x592   :  { %3945 = vmatpush1.msra.mxu0 %v3738_v50  ;;  %4016 = vmatpush1.msra.mxu1 %v3740_v36  ;;  %v3909_v50 = vld [vmem:[#allocation4 + $0x758] sm:$0xff]  ;;  %v3906_v36 = vld [vmem:[#allocation4 + $0x740] sm:$0xff] }
 0x593   :  { %3946 = vmatprep.subr.mxu0 %v3731_v31  ;;  %4017 = vmatprep.subr.mxu1 %v3733_v9  ;;  %v3908_v31 = vld [vmem:[#allocation4 + $0x750] sm:$0xff]  ;;  %v3899_v9 = vld [vmem:[#allocation4 + $0x708] sm:$0xff] }
 0x594   :  { %3947 = vmatpush1.msra.mxu0 %v3730_v6  ;;  %4018 = vmatpush1.msra.mxu1 %v3732_v2  ;;  %v3901_v6 = vld [vmem:[#allocation4 + $0x718] sm:$0xff]  ;;  %v3898_v2 = vld [vmem:[#allocation4 + $0x700] sm:$0xff] }
 0x595   :  { %3948 = vmatprep.subr.mxu0 %v3723_v27  ;;  %4019 = vmatprep.subr.mxu1 %v3725_v33  ;;  %v3900_v27 = vld [vmem:[#allocation4 + $0x710] sm:$0xff]  ;;  %v3891_v33 = vld [vmem:[#allocation4 + $0x6c8] sm:$0xff] }
 0x596   :  { %3949 = vmatpush1.msra.mxu0 %v3722_v13  ;;  %4020 = vmatpush1.msra.mxu1 %v3724_v43  ;;  %v3893_v13 = vld [vmem:[#allocation4 + $0x6d8] sm:$0xff]  ;;  %v3890_v43 = vld [vmem:[#allocation4 + $0x6c0] sm:$0xff] }
 0x597   :  { %3950 = vmatprep.subr.mxu0 %v3715_v21  ;;  %4021 = vmatprep.subr.mxu1 %v3717_v54  ;;  %v3892_v21 = vld [vmem:[#allocation4 + $0x6d0] sm:$0xff]  ;;  %v3883_v54 = vld [vmem:[#allocation4 + $0x688] sm:$0xff] }
 0x598   :  { %3951 = vmatpush1.msra.mxu0 %v3714_v30  ;;  %4022 = vmatpush1.msra.mxu1 %v3716_v34  ;;  %v3885_v30 = vld [vmem:[#allocation4 + $0x698] sm:$0xff]  ;;  %v3882_v34 = vld [vmem:[#allocation4 + $0x680] sm:$0xff] }
 0x599   :  { %3952 = vmatprep.subr.mxu0 %v3707_v11  ;;  %4023 = vmatprep.subr.mxu1 %v3709_v58  ;;  %v3884_v11 = vld [vmem:[#allocation4 + $0x690] sm:$0xff]  ;;  %v3875_v58 = vld [vmem:[#allocation4 + $0x648] sm:$0xff] }
 0x59a   :  { %3953 = vmatpush1.msra.mxu0 %v3706_v7  ;;  %4024 = vmatpush1.msra.mxu1 %v3708_v5  ;;  %v3877_v7 = vld [vmem:[#allocation4 + $0x658] sm:$0xff]  ;;  %v3874_v5 = vld [vmem:[#allocation4 + $0x640] sm:$0xff] }
 0x59b   :  { %3954 = vmatprep.subr.mxu0 %v3699_v60  ;;  %4025 = vmatprep.subr.mxu1 %v3701_v15  ;;  %v3876_v60 = vld [vmem:[#allocation4 + $0x650] sm:$0xff]  ;;  %v3867_v15 = vld [vmem:[#allocation4 + $0x608] sm:$0xff] }
 0x59c   :  { %3955 = vmatpush1.msra.mxu0 %v3698_v14  ;;  %4026 = vmatpush1.msra.mxu1 %v3700_v28  ;;  %v3869_v14 = vld [vmem:[#allocation4 + $0x618] sm:$0xff]  ;;  %v3866_v28 = vld [vmem:[#allocation4 + $0x600] sm:$0xff] }
 0x59d   :  { %3956 = vmatprep.subr.mxu0 %v3691_v26  ;;  %4027 = vmatprep.subr.mxu1 %v3693_v17  ;;  %v3868_v26 = vld [vmem:[#allocation4 + $0x610] sm:$0xff]  ;;  %v3859_v17 = vld [vmem:[#allocation4 + $0x5c8] sm:$0xff] }
 0x59e   :  { %3957 = vmatpush1.msra.mxu0 %v3690_v48  ;;  %4028 = vmatpush1.msra.mxu1 %v3692_v1  ;;  %v3861_v48 = vld [vmem:[#allocation4 + $0x5d8] sm:$0xff]  ;;  %v3858_v1 = vld [vmem:[#allocation4 + $0x5c0] sm:$0xff] }
 0x59f   :  { %3958 = vmatprep.subr.mxu0 %v3683_v0  ;;  %4029 = vmatprep.subr.mxu1 %v3685_v19  ;;  %v3860_v0 = vld [vmem:[#allocation4 + $0x5d0] sm:$0xff]  ;;  %v3851_v19 = vld [vmem:[#allocation4 + $0x588] sm:$0xff] }
 0x5a0   :  { %3959 = vmatpush1.msra.mxu0 %v3682_v3  ;;  %4030 = vmatpush1.msra.mxu1 %v3684_v23  ;;  %v3853_v3 = vld [vmem:[#allocation4 + $0x598] sm:$0xff]  ;;  %v3850_v23 = vld [vmem:[#allocation4 + $0x580] sm:$0xff] }
 0x5a1   :  { %3960 = vmatprep.subr.mxu0 %v3675_v29  ;;  %4031 = vmatprep.subr.mxu1 %v3677_v56  ;;  %v3852_v29 = vld [vmem:[#allocation4 + $0x590] sm:$0xff]  ;;  %v3843_v56 = vld [vmem:[#allocation4 + $0x548] sm:$0xff] }
 0x5a2   :  { %3961 = vmatpush1.msra.mxu0 %v3674_v63  ;;  %4032 = vmatpush1.msra.mxu1 %v3676_v39  ;;  %v3845_v63 = vld [vmem:[#allocation4 + $0x558] sm:$0xff]  ;;  %v3842_v39 = vld [vmem:[#allocation4 + $0x540] sm:$0xff] }
 0x5a3   :  { %3962 = vmatprep.subr.mxu0 %v3923_v59  ;;  %4033 = vmatprep.subr.mxu1 %v3925_v24  ;;  %v3844_v59 = vld [vmem:[#allocation4 + $0x550] sm:$0xff]  ;;  %v3835_v24 = vld [vmem:[#allocation4 + $0x508] sm:$0xff] }
 0x5a4   :  { %3963 = vmatpush2.msra.mxu0 %v3922_v55  ;;  %4034 = vmatpush2.msra.mxu1 %v3924_v37  ;;  %v3837_v55 = vld [vmem:[#allocation4 + $0x518] sm:$0xff]  ;;  %v3834_v37 = vld [vmem:[#allocation4 + $0x500] sm:$0xff] }
 0x5a5   :  { %3964 = vmatprep.subr.mxu0 %v3915_v38  ;;  %4035 = vmatprep.subr.mxu1 %v3917_v49  ;;  %v3836_v38 = vld [vmem:[#allocation4 + $0x510] sm:$0xff]  ;;  %v3827_v49 = vld [vmem:[#allocation4 + $0x4c8] sm:$0xff] }
 0x5a6   :  { %3965 = vmatpush2.msra.mxu0 %v3914_v35  ;;  %4036 = vmatpush2.msra.mxu1 %v3916_v61  ;;  %v3829_v35 = vld [vmem:[#allocation4 + $0x4d8] sm:$0xff]  ;;  %v3826_v61 = vld [vmem:[#allocation4 + $0x4c0] sm:$0xff] }
 0x5a7   :  { %3966 = vmatprep.subr.mxu0 %v3907_v41  ;;  %4037 = vmatprep.subr.mxu1 %v3909_v50  ;;  %v3828_v41 = vld [vmem:[#allocation4 + $0x4d0] sm:$0xff]  ;;  %v3819_v50 = vld [vmem:[#allocation4 + $0x488] sm:$0xff] }
 0x5a8   :  { %3967 = vmatpush2.msra.mxu0 %v3906_v36  ;;  %4038 = vmatpush2.msra.mxu1 %v3908_v31  ;;  %v3821_v36 = vld [vmem:[#allocation4 + $0x498] sm:$0xff]  ;;  %v3818_v31 = vld [vmem:[#allocation4 + $0x480] sm:$0xff] }
 0x5a9   :  { %3968 = vmatprep.subr.mxu0 %v3899_v9  ;;  %4039 = vmatprep.subr.mxu1 %v3901_v6  ;;  %v3820_v9 = vld [vmem:[#allocation4 + $0x490] sm:$0xff]  ;;  %v3811_v6 = vld [vmem:[#allocation4 + $0x448] sm:$0xff] }
 0x5aa   :  { %3969 = vmatpush2.msra.mxu0 %v3898_v2  ;;  %4040 = vmatpush2.msra.mxu1 %v3900_v27  ;;  %v3813_v2 = vld [vmem:[#allocation4 + $0x458] sm:$0xff]  ;;  %v3810_v27 = vld [vmem:[#allocation4 + $0x440] sm:$0xff] }
 0x5ab   :  { %3970 = vmatprep.subr.mxu0 %v3891_v33  ;;  %4041 = vmatprep.subr.mxu1 %v3893_v13  ;;  %v3812_v33 = vld [vmem:[#allocation4 + $0x450] sm:$0xff]  ;;  %v3803_v13 = vld [vmem:[#allocation4 + $0x408] sm:$0xff] }
 0x5ac   :  { %3971 = vmatpush2.msra.mxu0 %v3890_v43  ;;  %4042 = vmatpush2.msra.mxu1 %v3892_v21  ;;  %v3805_v43 = vld [vmem:[#allocation4 + $0x418] sm:$0xff]  ;;  %v3802_v21 = vld [vmem:[#allocation4 + $0x400] sm:$0xff] }
 0x5ad   :  { %3972 = vmatprep.subr.mxu0 %v3883_v54  ;;  %4043 = vmatprep.subr.mxu1 %v3885_v30  ;;  %v3804_v54 = vld [vmem:[#allocation4 + $0x410] sm:$0xff]  ;;  %v3799_v30 = vld [vmem:[#allocation4 + $0x3e8] sm:$0xff] }
 0x5ae   :  { %3973 = vmatpush2.msra.mxu0 %v3882_v34  ;;  %4044 = vmatpush2.msra.mxu1 %v3884_v11  ;;  %v3801_v34 = vld [vmem:[#allocation4 + $0x3f8] sm:$0xff] }
 0x5af   :  { %3974 = vmatprep.subr.mxu0 %v3875_v58  ;;  %4045 = vmatprep.subr.mxu1 %v3877_v7 }
 0x5b0   :  { %3975 = vmatpush2.msra.mxu0 %v3874_v5  ;;  %4046 = vmatpush2.msra.mxu1 %v3876_v60 }
 0x5b1   :  { %3976 = vmatprep.subr.mxu0 %v3867_v15  ;;  %4047 = vmatprep.subr.mxu1 %v3869_v14 }
 0x5b2   :  { %3977 = vmatpush2.msra.mxu0 %v3866_v28  ;;  %4048 = vmatpush2.msra.mxu1 %v3868_v26 }
 0x5b3   :  { %3978 = vmatprep.subr.mxu0 %v3859_v17  ;;  %4049 = vmatprep.subr.mxu1 %v3861_v48 }
 0x5b4   :  { %3979 = vmatpush2.msra.mxu0 %v3858_v1  ;;  %4050 = vmatpush2.msra.mxu1 %v3860_v0 }
 0x5b5   :  { %3980 = vmatprep.subr.mxu0 %v3851_v19  ;;  %4051 = vmatprep.subr.mxu1 %v3853_v3 }
 0x5b6   :  { %3981 = vmatpush2.msra.mxu0 %v3850_v23  ;;  %4052 = vmatpush2.msra.mxu1 %v3852_v29 }
 0x5b7   :  { %3982 = vmatprep.subr.mxu0 %v3843_v56  ;;  %4053 = vmatprep.subr.mxu1 %v3845_v63 }
 0x5b8   :  { %3983 = vmatpush2.msra.mxu0 %v3842_v39  ;;  %4054 = vmatpush2.msra.mxu1 %v3844_v59  ;;  %v552_v39 = vadd.f32 %v6682_v42, %v6714_v45 }
 0x5b9   :  { %3984 = vmatprep.subr.mxu0 %v3835_v24  ;;  %4055 = vmatprep.subr.mxu1 %v3837_v55 }
 0x5ba   :  { %3985 = vmatpush2.msra.mxu0 %v3834_v37  ;;  %4056 = vmatpush2.msra.mxu1 %v3836_v38 }
 0x5bb   :  { %3986 = vmatprep.subr.mxu0 %v3827_v49  ;;  %4057 = vmatprep.subr.mxu1 %v3829_v35 }
 0x5bc   :  { %3987 = vmatpush2.msra.mxu0 %v3826_v61  ;;  %4058 = vmatpush2.msra.mxu1 %v3828_v41 }
 0x5bd   :  { %3988 = vmatprep.subr.mxu0 %v3819_v50  ;;  %4059 = vmatprep.subr.mxu1 %v3821_v36 }
 0x5be   :  { %3989 = vmatpush2.msra.mxu0 %v3818_v31  ;;  %4060 = vmatpush2.msra.mxu1 %v3820_v9 }
 0x5bf   :  { %3990 = vmatprep.subr.mxu0 %v3811_v6  ;;  %4061 = vmatprep.subr.mxu1 %v3813_v2 }
 0x5c0   :  { %3991 = vmatpush2.msra.mxu0 %v3810_v27  ;;  %4062 = vmatpush2.msra.mxu1 %v3812_v33 }
 0x5c1   :  { %3992 = vmatprep.subr.mxu0 %v3803_v13  ;;  %4063 = vmatprep.subr.mxu1 %v3805_v43 }
 0x5c2   :  { %3993 = vmatpush2.msra.mxu0 %v3802_v21  ;;  %4064 = vmatpush2.msra.mxu1 %v3804_v54 }
 0x5c3   :  { %4072 = vmatprep.subr.mxu0 %v3799_v30  ;;  %4143 = vmatprep.subr.mxu1 %v3801_v34 }
 0x601   :  { %v3390_v11 = vpop.f32.mrf.mxu0  ;;  %v3461_v58 = vpop.f32.mrf.mxu1 }
 0x602   :  { %v3608_v5 = vadd.f32 %v3390_v11, %v6557_v4  ;;  %v3610_v60 = vadd.f32 %v3461_v58, %v6641_v62 }
 0x603   :  { %v3392_v7 = vpop.f32.mrf.mxu0  ;;  %v3463_v15 = vpop.f32.mrf.mxu1 }
 0x604   :  { %v3609_v14 = vadd.f32 %v3392_v7, %v6560_v8  ;;  %v5890_v28 = vmul.f32 -1.442695, %v3608_v5  ;;  %v3611_v26 = vadd.f32 %v3463_v15, %v6644_v25  ;;  %v5892_v17 = vmul.f32 -1.442695, %v3610_v60  ;;  %v3798_v7 = vld [vmem:[#allocation4 + $0x3e0] sm:$0xff]  ;;  %v3791_v5 = vld [vmem:[#allocation4 + $0x3a8] sm:$0xff] }
 0x605   :  { %v550_v8 = vadd.f32 %v6680_v32, %v6711_v44  ;;  %v3793_v60 = vld [vmem:[#allocation4 + $0x3b8] sm:$0xff]  ;;  %v3790_v15 = vld [vmem:[#allocation4 + $0x3a0] sm:$0xff] }
 0x606   :  { %v5891_v48 = vmul.f32 -1.442695, %v3609_v14  ;;  %6103 = vpow2.f32 %v5890_v28  ;;  %v5893_v1 = vmul.f32 -1.442695, %v3611_v26  ;;  %v3792_v14 = vld [vmem:[#allocation4 + $0x3b0] sm:$0xff]  ;;  %v3783_v28 = vld [vmem:[#allocation4 + $0x368] sm:$0xff] }
 0x607   :  { %6105 = vpow2.f32 %v5892_v17  ;;  %v3785_v26 = vld [vmem:[#allocation4 + $0x378] sm:$0xff]  ;;  %v3782_v17 = vld [vmem:[#allocation4 + $0x360] sm:$0xff] }
 0x608   :  { %6107 = vpow2.f32 %v5891_v48  ;;  %v3784_v48 = vld [vmem:[#allocation4 + $0x370] sm:$0xff] }
 0x609   :  { %6109 = vpow2.f32 %v5893_v1  ;;  %v3775_v1 = vld [vmem:[#allocation4 + $0x328] sm:$0xff] }
 0x613   :  { %v6104_v0 = vpop.eup %6103 }
 0x614   :  { %v6106_v19 = vpop.eup %6105  ;;  %v3634_v23 = vadd.f32 1.0, %v6104_v0  ;;  %v3777_v0 = vld [vmem:[#allocation4 + $0x338] sm:$0xff] }
 0x615   :  { %v6108_v3 = vpop.eup %6107  ;;  %v3636_v29 = vadd.f32 1.0, %v6106_v19  ;;  %v3774_v19 = vld [vmem:[#allocation4 + $0x320] sm:$0xff] }
 0x616   :  { %v6110_v4 = vpop.eup %6109  ;;  %v3635_v62 = vadd.f32 1.0, %v6108_v3  ;;  %6111 = vrcp.f32 %v3634_v23  ;;  %v3776_v3 = vld [vmem:[#allocation4 + $0x330] sm:$0xff]  ;;  %v3767_v23 = vld [vmem:[#allocation4 + $0x2e8] sm:$0xff] }
 0x617   :  { %v3637_v56 = vadd.f32 1.0, %v6110_v4  ;;  %6113 = vrcp.f32 %v3636_v29  ;;  %v3769_v4 = vld [vmem:[#allocation4 + $0x2f8] sm:$0xff]  ;;  %v3766_v29 = vld [vmem:[#allocation4 + $0x2e0] sm:$0xff] }
 0x618   :  { %6115 = vrcp.f32 %v3635_v62  ;;  %v3768_v62 = vld [vmem:[#allocation4 + $0x2f0] sm:$0xff] }
 0x623   :  { %v6112_v61 = vpop.eup %6111 }
 0x624   :  { %v6114_v41 = vpop.eup %6113 }
 0x625   :  { %v6116_v42 = vpop.eup %6115 }
 0x642   :  { %v3532_v25 = vpop.f32.mrf.mxu0  ;;  %v3603_v63 = vpop.f32.mrf.mxu1 }
 0x643   :  { %v3612_v59 = vadd.f32 %v3532_v25, %v6575_v18  ;;  %v3614_v24 = vadd.f32 %v3603_v63, %v550_v8  ;;  %v3654_v18 = vmul.f32 %v6114_v41, %v6809_v10  ;;  %v3759_v8 = vld [vmem:[#allocation4 + $0x2a8] sm:$0xff]  ;;  %v3758_v25 = vld [vmem:[#allocation4 + $0x2a0] sm:$0xff]  ;;  %v3760_v63 = vld [vmem:[#allocation4 + $0x2b0] sm:$0xff] }
 0x644   :  { %v3534_v55 = vpop.f32.mrf.mxu0  ;;  %v3605_v37 = vpop.f32.mrf.mxu1  ;;  %v3734_v41 = vld [vmem:[#allocation4 + $0x1e0] sm:$0xff] }
 0x645   :  { %v5894_v38 = vmul.f32 -1.442695, %v3612_v59  ;;  %6117 = vtanh.f32 %v3614_v24  ;;  %v3613_v49 = vadd.f32 %v3534_v55, %v6581_v22  ;;  %v3615_v35 = vadd.f32 %v3605_v37, %v552_v39  ;;  %v3751_v39 = vld [vmem:[#allocation4 + $0x268] sm:$0xff]  ;;  %v3753_v59 = vld [vmem:[#allocation4 + $0x278] sm:$0xff]  ;;  %v3750_v24 = vld [vmem:[#allocation4 + $0x260] sm:$0xff] }
 0x646   :  { %6119 = vrcp.f32 %v3637_v56  ;;  %v3761_v56 = vld [vmem:[#allocation4 + $0x2b8] sm:$0xff]  ;;  %v3752_v55 = vld [vmem:[#allocation4 + $0x270] sm:$0xff]  ;;  %v3743_v37 = vld [vmem:[#allocation4 + $0x228] sm:$0xff] }
 0x647   :  { %6121 = vpow2.f32 %v5894_v38  ;;  %v5895_v32 = vmul.f32 -1.442695, %v3613_v49  ;;  %v3745_v38 = vld [vmem:[#allocation4 + $0x238] sm:$0xff]  ;;  %v3742_v49 = vld [vmem:[#allocation4 + $0x220] sm:$0xff] }
 0x648   :  { %6123 = vtanh.f32 %v3615_v35  ;;  %v3744_v35 = vld [vmem:[#allocation4 + $0x230] sm:$0xff] }
 0x649   :  { %6125 = vpow2.f32 %v5895_v32  ;;  %v3735_v32 = vld [vmem:[#allocation4 + $0x1e8] sm:$0xff] }
 0x652   :  { %v6118_v50 = vpop.eup %6117 }
 0x653   :  { %v6120_v36 = vpop.eup %6119  ;;  %v3656_v31 = vmul.f32 %v6118_v50, %v6112_v61  ;;  %v3737_v61 = vld [vmem:[#allocation4 + $0x1f8] sm:$0xff]  ;;  %v3727_v50 = vld [vmem:[#allocation4 + $0x1a8] sm:$0xff] }
 0x654   :  { %v6122_v9 = vpop.eup %6121  ;;  %v3655_v33 = vmul.f32 %v6120_v36, %v6813_v40  ;;  %v3800_v40 = vld [vmem:[#allocation4 + $0x3f0] sm:$0xff]  ;;  %v3729_v36 = vld [vmem:[#allocation4 + $0x1b8] sm:$0xff] }
 0x655   :  { %v6124_v6 = vpop.eup %6123  ;;  %v3638_v2 = vadd.f32 1.0, %v6122_v9  ;;  %v6839_v27 = vadd.f32 %v3656_v31, %v3654_v18  ;;  %v3726_v18 = vld [vmem:[#allocation4 + $0x1a0] sm:$0xff]  ;;  %v3728_v31 = vld [vmem:[#allocation4 + $0x1b0] sm:$0xff]  ;;  %v3719_v9 = vld [vmem:[#allocation4 + $0x168] sm:$0xff] }
 0x656   :  { %v6126_v22 = vpop.eup %6125  ;;  %v3657_v13 = vmul.f32 %v6124_v6, %v6116_v42  ;;  %v3736_v42 = vld [vmem:[#allocation4 + $0x1f0] sm:$0xff]  ;;  %v3721_v6 = vld [vmem:[#allocation4 + $0x178] sm:$0xff] }
 0x657   :  { %6127 = vrcp.f32 %v3638_v2  ;;  %v3639_v43 = vadd.f32 1.0, %v6126_v22  ;;  %v3718_v2 = vld [vmem:[#allocation4 + $0x160] sm:$0xff]  ;;  %v3720_v22 = vld [vmem:[#allocation4 + $0x170] sm:$0xff] }
 0x658   :  { %6129 = vtanh.f32 %v6839_v27  ;;  %v6843_v21 = vadd.f32 %v3657_v13, %v3655_v33  ;;  %v3711_v33 = vld [vmem:[#allocation4 + $0x128] sm:$0xff]  ;;  %v3713_v13 = vld [vmem:[#allocation4 + $0x138] sm:$0xff] }
 0x659   :  { %6131 = vrcp.f32 %v3639_v43  ;;  %v3710_v43 = vld [vmem:[#allocation4 + $0x120] sm:$0xff] }
 0x65a   :  { %6133 = vtanh.f32 %v6843_v21 }
 0x664   :  { %v6128_v10 = vpop.eup %6127 }
 0x665   :  { %v6130_v54 = vpop.eup %6129 }
 0x666   :  { %v6132_v30 = vpop.eup %6131  ;;  %v6848_v58 = vmul.f32 %v6130_v54, %v6128_v10  ;;  %v3712_v10 = vld [vmem:[#allocation4 + $0x130] sm:$0xff]  ;;  %v3703_v54 = vld [vmem:[#allocation4 + $0xe8] sm:$0xff] }
 0x667   :  { %v6134_v34 = vpop.eup %6133 }
 0x668   :  { %v6846_v11 = vmul.f32 %v6134_v34, %v6132_v30  ;;  %v3705_v30 = vld [vmem:[#allocation4 + $0xf8] sm:$0xff]  ;;  %v3702_v34 = vld [vmem:[#allocation4 + $0xe0] sm:$0xff] }
 0x66a   :  { %3994 = vmatprep.mubr.f32.mxu0 %v6846_v11  ;;  %4065 = vmatprep.mubr.f32.mxu1 %v6846_v11 }
 0x66b   :  { %3995 = vmatmul.mubr.f32.vlgmr.msra.gmra.mxu0 %v6848_v58  ;;  %4066 = vmatmul.mubr.f32.vlgmr.msra.gmra.mxu1 %v6848_v58 }
 0x66c   :  { %4073 = vmatpush1.msra.mxu0 %v3798_v7  ;;  %4144 = vmatpush1.msra.mxu1 %v3800_v40  ;;  %v3704_v7 = vld [vmem:[#allocation4 + $0xf0] sm:$0xff]  ;;  %v3695_v40 = vld [vmem:[#allocation4 + $0xa8] sm:$0xff] }
 0x66d   :  { %4074 = vmatprep.subr.mxu0 %v3791_v5  ;;  %4136 = vmatprep.mubr.f32.mxu0 %v6846_v11  ;;  %v3697_v5 = vld [vmem:[#allocation4 + $0xb8] sm:$0xff] }
 0x66e   :  { %4145 = vmatprep.subr.mxu1 %v3793_v60  ;;  %4207 = vmatprep.mubr.f32.mxu1 %v6846_v11  ;;  %v3694_v60 = vld [vmem:[#allocation4 + $0xa0] sm:$0xff] }
 0x66f   :  { %4075 = vmatpush1.msra.mxu0 %v3790_v15  ;;  %4146 = vmatpush1.msra.mxu1 %v3792_v14  ;;  %v3696_v15 = vld [vmem:[#allocation4 + $0xb0] sm:$0xff]  ;;  %v3687_v14 = vld [vmem:[#allocation4 + $0x68] sm:$0xff] }
 0x670   :  { %4076 = vmatprep.subr.mxu0 %v3783_v28  ;;  %4147 = vmatprep.subr.mxu1 %v3785_v26  ;;  %v3689_v28 = vld [vmem:[#allocation4 + $0x78] sm:$0xff]  ;;  %v3686_v26 = vld [vmem:[#allocation4 + $0x60] sm:$0xff] }
 0x671   :  { %4077 = vmatpush1.msra.mxu0 %v3782_v17  ;;  %4148 = vmatpush1.msra.mxu1 %v3784_v48  ;;  %v3688_v17 = vld [vmem:[#allocation4 + $0x70] sm:$0xff]  ;;  %v3679_v48 = vld [vmem:[#allocation4 + $0x28] sm:$0xff] }
 0x672   :  { %4078 = vmatprep.subr.mxu0 %v3775_v1  ;;  %4149 = vmatprep.subr.mxu1 %v3777_v0  ;;  %v3681_v1 = vld [vmem:[#allocation4 + $0x38] sm:$0xff]  ;;  %v3678_v0 = vld [vmem:[#allocation4 + $0x20] sm:$0xff] }
 0x673   :  { %4079 = vmatpush1.msra.mxu0 %v3774_v19  ;;  %4150 = vmatpush1.msra.mxu1 %v3776_v3  ;;  %v3680_v19 = vld [vmem:[#allocation4 + $0x30] sm:$0xff]  ;;  %v3927_v3 = vld [vmem:[#allocation4 + $0x7e8] sm:$0xff] }
 0x674   :  { %4080 = vmatprep.subr.mxu0 %v3767_v23  ;;  %4151 = vmatprep.subr.mxu1 %v3769_v4  ;;  %v3929_v23 = vld [vmem:[#allocation4 + $0x7f8] sm:$0xff]  ;;  %v3926_v4 = vld [vmem:[#allocation4 + $0x7e0] sm:$0xff] }
 0x675   :  { %4081 = vmatpush1.msra.mxu0 %v3766_v29  ;;  %4152 = vmatpush1.msra.mxu1 %v3768_v62  ;;  %v3928_v29 = vld [vmem:[#allocation4 + $0x7f0] sm:$0xff]  ;;  %v3919_v62 = vld [vmem:[#allocation4 + $0x7a8] sm:$0xff] }
 0x676   :  { %4082 = vmatprep.subr.mxu0 %v3759_v8  ;;  %4153 = vmatprep.subr.mxu1 %v3761_v56  ;;  %v3921_v8 = vld [vmem:[#allocation4 + $0x7b8] sm:$0xff]  ;;  %v3918_v56 = vld [vmem:[#allocation4 + $0x7a0] sm:$0xff] }
 0x677   :  { %4083 = vmatpush1.msra.mxu0 %v3758_v25  ;;  %4154 = vmatpush1.msra.mxu1 %v3760_v63  ;;  %v3920_v25 = vld [vmem:[#allocation4 + $0x7b0] sm:$0xff]  ;;  %v3911_v63 = vld [vmem:[#allocation4 + $0x768] sm:$0xff] }
 0x678   :  { %4084 = vmatprep.subr.mxu0 %v3751_v39  ;;  %4155 = vmatprep.subr.mxu1 %v3753_v59  ;;  %v3913_v39 = vld [vmem:[#allocation4 + $0x778] sm:$0xff]  ;;  %v3910_v59 = vld [vmem:[#allocation4 + $0x760] sm:$0xff] }
 0x679   :  { %4085 = vmatpush1.msra.mxu0 %v3750_v24  ;;  %4156 = vmatpush1.msra.mxu1 %v3752_v55  ;;  %v3912_v24 = vld [vmem:[#allocation4 + $0x770] sm:$0xff]  ;;  %v3903_v55 = vld [vmem:[#allocation4 + $0x728] sm:$0xff] }
 0x67a   :  { %4086 = vmatprep.subr.mxu0 %v3743_v37  ;;  %4157 = vmatprep.subr.mxu1 %v3745_v38  ;;  %v3905_v37 = vld [vmem:[#allocation4 + $0x738] sm:$0xff]  ;;  %v3902_v38 = vld [vmem:[#allocation4 + $0x720] sm:$0xff] }
 0x67b   :  { %4087 = vmatpush1.msra.mxu0 %v3742_v49  ;;  %4158 = vmatpush1.msra.mxu1 %v3744_v35  ;;  %v3904_v49 = vld [vmem:[#allocation4 + $0x730] sm:$0xff]  ;;  %v3895_v35 = vld [vmem:[#allocation4 + $0x6e8] sm:$0xff] }
 0x67c   :  { %4088 = vmatprep.subr.mxu0 %v3735_v32  ;;  %4159 = vmatprep.subr.mxu1 %v3737_v61  ;;  %v3897_v32 = vld [vmem:[#allocation4 + $0x6f8] sm:$0xff]  ;;  %v3894_v61 = vld [vmem:[#allocation4 + $0x6e0] sm:$0xff] }
 0x67d   :  { %4089 = vmatpush1.msra.mxu0 %v3734_v41  ;;  %4160 = vmatpush1.msra.mxu1 %v3736_v42  ;;  %v3896_v41 = vld [vmem:[#allocation4 + $0x6f0] sm:$0xff]  ;;  %v3887_v42 = vld [vmem:[#allocation4 + $0x6a8] sm:$0xff] }
 0x67e   :  { %4090 = vmatprep.subr.mxu0 %v3727_v50  ;;  %4161 = vmatprep.subr.mxu1 %v3729_v36  ;;  %v3889_v50 = vld [vmem:[#allocation4 + $0x6b8] sm:$0xff]  ;;  %v3886_v36 = vld [vmem:[#allocation4 + $0x6a0] sm:$0xff] }
 0x67f   :  { %4091 = vmatpush1.msra.mxu0 %v3726_v18  ;;  %4162 = vmatpush1.msra.mxu1 %v3728_v31  ;;  %v3888_v18 = vld [vmem:[#allocation4 + $0x6b0] sm:$0xff]  ;;  %v3879_v31 = vld [vmem:[#allocation4 + $0x668] sm:$0xff] }
 0x680   :  { %4092 = vmatprep.subr.mxu0 %v3719_v9  ;;  %4163 = vmatprep.subr.mxu1 %v3721_v6  ;;  %v3881_v9 = vld [vmem:[#allocation4 + $0x678] sm:$0xff]  ;;  %v3878_v6 = vld [vmem:[#allocation4 + $0x660] sm:$0xff] }
 0x681   :  { %4093 = vmatpush1.msra.mxu0 %v3718_v2  ;;  %4164 = vmatpush1.msra.mxu1 %v3720_v22  ;;  %v3880_v2 = vld [vmem:[#allocation4 + $0x670] sm:$0xff]  ;;  %v3871_v22 = vld [vmem:[#allocation4 + $0x628] sm:$0xff] }
 0x682   :  { %4094 = vmatprep.subr.mxu0 %v3711_v33  ;;  %4165 = vmatprep.subr.mxu1 %v3713_v13  ;;  %v3873_v33 = vld [vmem:[#allocation4 + $0x638] sm:$0xff]  ;;  %v3870_v13 = vld [vmem:[#allocation4 + $0x620] sm:$0xff] }
 0x683   :  { %4095 = vmatpush1.msra.mxu0 %v3710_v43  ;;  %4166 = vmatpush1.msra.mxu1 %v3712_v10  ;;  %v3872_v43 = vld [vmem:[#allocation4 + $0x630] sm:$0xff]  ;;  %v3863_v10 = vld [vmem:[#allocation4 + $0x5e8] sm:$0xff] }
 0x684   :  { %4096 = vmatprep.subr.mxu0 %v3703_v54  ;;  %4167 = vmatprep.subr.mxu1 %v3705_v30  ;;  %v3865_v54 = vld [vmem:[#allocation4 + $0x5f8] sm:$0xff]  ;;  %v3862_v30 = vld [vmem:[#allocation4 + $0x5e0] sm:$0xff] }
 0x685   :  { %4097 = vmatpush1.msra.mxu0 %v3702_v34  ;;  %4168 = vmatpush1.msra.mxu1 %v3704_v7  ;;  %v3864_v34 = vld [vmem:[#allocation4 + $0x5f0] sm:$0xff]  ;;  %v3855_v7 = vld [vmem:[#allocation4 + $0x5a8] sm:$0xff] }
 0x686   :  { %4098 = vmatprep.subr.mxu0 %v3695_v40  ;;  %4169 = vmatprep.subr.mxu1 %v3697_v5  ;;  %v3857_v40 = vld [vmem:[#allocation4 + $0x5b8] sm:$0xff]  ;;  %v3854_v5 = vld [vmem:[#allocation4 + $0x5a0] sm:$0xff] }
 0x687   :  { %4099 = vmatpush1.msra.mxu0 %v3694_v60  ;;  %4170 = vmatpush1.msra.mxu1 %v3696_v15  ;;  %v3856_v60 = vld [vmem:[#allocation4 + $0x5b0] sm:$0xff]  ;;  %v3847_v15 = vld [vmem:[#allocation4 + $0x568] sm:$0xff] }
 0x688   :  { %4100 = vmatprep.subr.mxu0 %v3687_v14  ;;  %4171 = vmatprep.subr.mxu1 %v3689_v28  ;;  %v3849_v14 = vld [vmem:[#allocation4 + $0x578] sm:$0xff]  ;;  %v3846_v28 = vld [vmem:[#allocation4 + $0x560] sm:$0xff] }
 0x689   :  { %4101 = vmatpush1.msra.mxu0 %v3686_v26  ;;  %4172 = vmatpush1.msra.mxu1 %v3688_v17  ;;  %v3848_v26 = vld [vmem:[#allocation4 + $0x570] sm:$0xff]  ;;  %v3839_v17 = vld [vmem:[#allocation4 + $0x528] sm:$0xff] }
 0x68a   :  { %4102 = vmatprep.subr.mxu0 %v3679_v48  ;;  %4173 = vmatprep.subr.mxu1 %v3681_v1  ;;  %v3841_v48 = vld [vmem:[#allocation4 + $0x538] sm:$0xff]  ;;  %v3838_v1 = vld [vmem:[#allocation4 + $0x520] sm:$0xff] }
 0x68b   :  { %4103 = vmatpush1.msra.mxu0 %v3678_v0  ;;  %4174 = vmatpush1.msra.mxu1 %v3680_v19  ;;  %v3840_v0 = vld [vmem:[#allocation4 + $0x530] sm:$0xff]  ;;  %v3831_v19 = vld [vmem:[#allocation4 + $0x4e8] sm:$0xff] }
 0x68c   :  { %4104 = vmatprep.subr.mxu0 %v3927_v3  ;;  %4175 = vmatprep.subr.mxu1 %v3929_v23  ;;  %v3833_v3 = vld [vmem:[#allocation4 + $0x4f8] sm:$0xff]  ;;  %v3830_v23 = vld [vmem:[#allocation4 + $0x4e0] sm:$0xff] }
 0x68d   :  { %4105 = vmatpush2.msra.mxu0 %v3926_v4  ;;  %4176 = vmatpush2.msra.mxu1 %v3928_v29  ;;  %v3832_v4 = vld [vmem:[#allocation4 + $0x4f0] sm:$0xff]  ;;  %v3823_v29 = vld [vmem:[#allocation4 + $0x4a8] sm:$0xff] }
 0x68e   :  { %4106 = vmatprep.subr.mxu0 %v3919_v62  ;;  %4177 = vmatprep.subr.mxu1 %v3921_v8  ;;  %v3825_v62 = vld [vmem:[#allocation4 + $0x4b8] sm:$0xff]  ;;  %v3822_v8 = vld [vmem:[#allocation4 + $0x4a0] sm:$0xff] }
 0x68f   :  { %4107 = vmatpush2.msra.mxu0 %v3918_v56  ;;  %4178 = vmatpush2.msra.mxu1 %v3920_v25  ;;  %v3824_v56 = vld [vmem:[#allocation4 + $0x4b0] sm:$0xff]  ;;  %v3815_v25 = vld [vmem:[#allocation4 + $0x468] sm:$0xff] }
 0x690   :  { %4108 = vmatprep.subr.mxu0 %v3911_v63  ;;  %4179 = vmatprep.subr.mxu1 %v3913_v39  ;;  %v3817_v63 = vld [vmem:[#allocation4 + $0x478] sm:$0xff]  ;;  %v3814_v39 = vld [vmem:[#allocation4 + $0x460] sm:$0xff] }
 0x691   :  { %4109 = vmatpush2.msra.mxu0 %v3910_v59  ;;  %4180 = vmatpush2.msra.mxu1 %v3912_v24  ;;  %v3816_v59 = vld [vmem:[#allocation4 + $0x470] sm:$0xff]  ;;  %v3807_v24 = vld [vmem:[#allocation4 + $0x428] sm:$0xff] }
 0x692   :  { %4110 = vmatprep.subr.mxu0 %v3903_v55  ;;  %4181 = vmatprep.subr.mxu1 %v3905_v37  ;;  %v3809_v55 = vld [vmem:[#allocation4 + $0x438] sm:$0xff]  ;;  %v3806_v37 = vld [vmem:[#allocation4 + $0x420] sm:$0xff] }
 0x693   :  { %4111 = vmatpush2.msra.mxu0 %v3902_v38  ;;  %4182 = vmatpush2.msra.mxu1 %v3904_v49  ;;  %v3808_v38 = vld [vmem:[#allocation4 + $0x430] sm:$0xff]  ;;  %v4401_v49 = vld [vmem:[#allocation4 + $0x3c8] sm:$0xff] }
 0x694   :  { %4112 = vmatprep.subr.mxu0 %v3895_v35  ;;  %4183 = vmatprep.subr.mxu1 %v3897_v32  ;;  %v4403_v35 = vld [vmem:[#allocation4 + $0x3d8] sm:$0xff]  ;;  %v4400_v32 = vld [vmem:[#allocation4 + $0x3c0] sm:$0xff] }
 0x695   :  { %4113 = vmatpush2.msra.mxu0 %v3894_v61  ;;  %4184 = vmatpush2.msra.mxu1 %v3896_v41  ;;  %v4402_v61 = vld [vmem:[#allocation4 + $0x3d0] sm:$0xff]  ;;  %v4393_v41 = vld [vmem:[#allocation4 + $0x388] sm:$0xff] }
 0x696   :  { %4114 = vmatprep.subr.mxu0 %v3887_v42  ;;  %4185 = vmatprep.subr.mxu1 %v3889_v50  ;;  %v4395_v42 = vld [vmem:[#allocation4 + $0x398] sm:$0xff]  ;;  %v4392_v50 = vld [vmem:[#allocation4 + $0x380] sm:$0xff] }
 0x697   :  { %4115 = vmatpush2.msra.mxu0 %v3886_v36  ;;  %4186 = vmatpush2.msra.mxu1 %v3888_v18  ;;  %v4394_v36 = vld [vmem:[#allocation4 + $0x390] sm:$0xff]  ;;  %v4385_v18 = vld [vmem:[#allocation4 + $0x348] sm:$0xff] }
 0x698   :  { %4116 = vmatprep.subr.mxu0 %v3879_v31  ;;  %4187 = vmatprep.subr.mxu1 %v3881_v9  ;;  %v4387_v31 = vld [vmem:[#allocation4 + $0x358] sm:$0xff]  ;;  %v4384_v9 = vld [vmem:[#allocation4 + $0x340] sm:$0xff] }
 0x699   :  { %4117 = vmatpush2.msra.mxu0 %v3878_v6  ;;  %4188 = vmatpush2.msra.mxu1 %v3880_v2  ;;  %v4386_v6 = vld [vmem:[#allocation4 + $0x350] sm:$0xff]  ;;  %v4377_v2 = vld [vmem:[#allocation4 + $0x308] sm:$0xff] }
 0x69a   :  { %4118 = vmatprep.subr.mxu0 %v3871_v22  ;;  %4189 = vmatprep.subr.mxu1 %v3873_v33  ;;  %v4379_v22 = vld [vmem:[#allocation4 + $0x318] sm:$0xff]  ;;  %v4376_v33 = vld [vmem:[#allocation4 + $0x300] sm:$0xff] }
 0x69b   :  { %4119 = vmatpush2.msra.mxu0 %v3870_v13  ;;  %4190 = vmatpush2.msra.mxu1 %v3872_v43  ;;  %v4378_v13 = vld [vmem:[#allocation4 + $0x310] sm:$0xff]  ;;  %v4369_v43 = vld [vmem:[#allocation4 + $0x2c8] sm:$0xff] }
 0x69c   :  { %4120 = vmatprep.subr.mxu0 %v3863_v10  ;;  %4191 = vmatprep.subr.mxu1 %v3865_v54  ;;  %v4371_v10 = vld [vmem:[#allocation4 + $0x2d8] sm:$0xff]  ;;  %v4368_v54 = vld [vmem:[#allocation4 + $0x2c0] sm:$0xff] }
 0x69d   :  { %4121 = vmatpush2.msra.mxu0 %v3862_v30  ;;  %4192 = vmatpush2.msra.mxu1 %v3864_v34  ;;  %v4370_v30 = vld [vmem:[#allocation4 + $0x2d0] sm:$0xff]  ;;  %v4361_v34 = vld [vmem:[#allocation4 + $0x288] sm:$0xff] }
 0x69e   :  { %4122 = vmatprep.subr.mxu0 %v3855_v7  ;;  %4193 = vmatprep.subr.mxu1 %v3857_v40  ;;  %v4363_v7 = vld [vmem:[#allocation4 + $0x298] sm:$0xff]  ;;  %v4360_v40 = vld [vmem:[#allocation4 + $0x280] sm:$0xff] }
 0x69f   :  { %4123 = vmatpush2.msra.mxu0 %v3854_v5  ;;  %4194 = vmatpush2.msra.mxu1 %v3856_v60  ;;  %v4362_v5 = vld [vmem:[#allocation4 + $0x290] sm:$0xff]  ;;  %v4353_v60 = vld [vmem:[#allocation4 + $0x248] sm:$0xff] }
 0x6a0   :  { %4124 = vmatprep.subr.mxu0 %v3847_v15  ;;  %4195 = vmatprep.subr.mxu1 %v3849_v14  ;;  %v4355_v15 = vld [vmem:[#allocation4 + $0x258] sm:$0xff]  ;;  %v4352_v14 = vld [vmem:[#allocation4 + $0x240] sm:$0xff] }
 0x6a1   :  { %4125 = vmatpush2.msra.mxu0 %v3846_v28  ;;  %4196 = vmatpush2.msra.mxu1 %v3848_v26  ;;  %v4354_v28 = vld [vmem:[#allocation4 + $0x250] sm:$0xff]  ;;  %v4345_v26 = vld [vmem:[#allocation4 + $0x208] sm:$0xff] }
 0x6a2   :  { %4126 = vmatprep.subr.mxu0 %v3839_v17  ;;  %4197 = vmatprep.subr.mxu1 %v3841_v48  ;;  %v4347_v17 = vld [vmem:[#allocation4 + $0x218] sm:$0xff]  ;;  %v4344_v48 = vld [vmem:[#allocation4 + $0x200] sm:$0xff] }
 0x6a3   :  { %4127 = vmatpush2.msra.mxu0 %v3838_v1  ;;  %4198 = vmatpush2.msra.mxu1 %v3840_v0  ;;  %v4346_v1 = vld [vmem:[#allocation4 + $0x210] sm:$0xff]  ;;  %v4337_v0 = vld [vmem:[#allocation4 + $0x1c8] sm:$0xff] }
 0x6a4   :  { %4128 = vmatprep.subr.mxu0 %v3831_v19  ;;  %4199 = vmatprep.subr.mxu1 %v3833_v3  ;;  %v4339_v19 = vld [vmem:[#allocation4 + $0x1d8] sm:$0xff]  ;;  %v4336_v3 = vld [vmem:[#allocation4 + $0x1c0] sm:$0xff] }
 0x6a5   :  { %4129 = vmatpush2.msra.mxu0 %v3830_v23  ;;  %4200 = vmatpush2.msra.mxu1 %v3832_v4  ;;  %v4338_v23 = vld [vmem:[#allocation4 + $0x1d0] sm:$0xff]  ;;  %v4329_v4 = vld [vmem:[#allocation4 + $0x188] sm:$0xff] }
 0x6a6   :  { %4130 = vmatprep.subr.mxu0 %v3823_v29  ;;  %4201 = vmatprep.subr.mxu1 %v3825_v62  ;;  %v4331_v29 = vld [vmem:[#allocation4 + $0x198] sm:$0xff]  ;;  %v4328_v62 = vld [vmem:[#allocation4 + $0x180] sm:$0xff] }
 0x6a7   :  { %4131 = vmatpush2.msra.mxu0 %v3822_v8  ;;  %4202 = vmatpush2.msra.mxu1 %v3824_v56  ;;  %v4330_v8 = vld [vmem:[#allocation4 + $0x190] sm:$0xff]  ;;  %v4321_v56 = vld [vmem:[#allocation4 + $0x148] sm:$0xff] }
 0x6a8   :  { %4132 = vmatprep.subr.mxu0 %v3815_v25  ;;  %4203 = vmatprep.subr.mxu1 %v3817_v63  ;;  %v4323_v25 = vld [vmem:[#allocation4 + $0x158] sm:$0xff]  ;;  %v4320_v63 = vld [vmem:[#allocation4 + $0x140] sm:$0xff] }
 0x6a9   :  { %4133 = vmatpush2.msra.mxu0 %v3814_v39  ;;  %4204 = vmatpush2.msra.mxu1 %v3816_v59  ;;  %v4322_v39 = vld [vmem:[#allocation4 + $0x150] sm:$0xff]  ;;  %v4313_v59 = vld [vmem:[#allocation4 + $0x108] sm:$0xff] }
 0x6aa   :  { %4134 = vmatprep.subr.mxu0 %v3807_v24  ;;  %4205 = vmatprep.subr.mxu1 %v3809_v55  ;;  %v4315_v24 = vld [vmem:[#allocation4 + $0x118] sm:$0xff]  ;;  %v4312_v55 = vld [vmem:[#allocation4 + $0x100] sm:$0xff] }
 0x6ab   :  { %4135 = vmatpush2.msra.mxu0 %v3806_v37  ;;  %4206 = vmatpush2.msra.mxu1 %v3808_v38  ;;  %v4314_v37 = vld [vmem:[#allocation4 + $0x110] sm:$0xff]  ;;  %v4305_v38 = vld [vmem:[#allocation4 + $0xc8] sm:$0xff] }
 0x6ac   :  { %4137 = vmatmul.mubr.f32.vlgmr.msra.gmra.mxu0 %v6848_v58  ;;  %4208 = vmatmul.mubr.f32.vlgmr.msra.gmra.mxu1 %v6848_v58 }
 0x6ad   :  { %4536 = vmatprep.subr.mxu0 %v4401_v49  ;;  %4607 = vmatprep.subr.mxu1 %v4403_v35  ;;  %v4307_v49 = vld [vmem:[#allocation4 + $0xd8] sm:$0xff]  ;;  %v4304_v35 = vld [vmem:[#allocation4 + $0xc0] sm:$0xff] }
 0x6ae   :  { %4537 = vmatpush1.msra.mxu0 %v4400_v32  ;;  %4608 = vmatpush1.msra.mxu1 %v4402_v61  ;;  %v4306_v32 = vld [vmem:[#allocation4 + $0xd0] sm:$0xff]  ;;  %v4297_v61 = vld [vmem:[#allocation4 + $0x88] sm:$0xff] }
 0x6af   :  { %4538 = vmatprep.subr.mxu0 %v4393_v41  ;;  %4609 = vmatprep.subr.mxu1 %v4395_v42  ;;  %v4299_v41 = vld [vmem:[#allocation4 + $0x98] sm:$0xff]  ;;  %v4296_v42 = vld [vmem:[#allocation4 + $0x80] sm:$0xff] }
 0x6b0   :  { %4539 = vmatpush1.msra.mxu0 %v4392_v50  ;;  %4610 = vmatpush1.msra.mxu1 %v4394_v36  ;;  %v4298_v50 = vld [vmem:[#allocation4 + $0x90] sm:$0xff]  ;;  %v4289_v36 = vld [vmem:[#allocation4 + $0x48] sm:$0xff] }
 0x6b1   :  { %4540 = vmatprep.subr.mxu0 %v4385_v18  ;;  %4611 = vmatprep.subr.mxu1 %v4387_v31  ;;  %v4291_v18 = vld [vmem:[#allocation4 + $0x58] sm:$0xff]  ;;  %v4288_v31 = vld [vmem:[#allocation4 + $0x40] sm:$0xff] }
 0x6b2   :  { %4541 = vmatpush1.msra.mxu0 %v4384_v9  ;;  %4612 = vmatpush1.msra.mxu1 %v4386_v6  ;;  %v4290_v9 = vld [vmem:[#allocation4 + $0x50] sm:$0xff]  ;;  %v4281_v6 = vld [vmem:[#allocation4 + $0x8] sm:$0xff] }
 0x6b3   :  { %4542 = vmatprep.subr.mxu0 %v4377_v2  ;;  %4613 = vmatprep.subr.mxu1 %v4379_v22  ;;  %v4283_v2 = vld [vmem:[#allocation4 + $0x18] sm:$0xff]  ;;  %v4280_v22 = vld [vmem:[#allocation4] sm:$0xff] }
 0x6b4   :  { %4543 = vmatpush1.msra.mxu0 %v4376_v33  ;;  %4614 = vmatpush1.msra.mxu1 %v4378_v13  ;;  %v4282_v33 = vld [vmem:[#allocation4 + $0x10] sm:$0xff]  ;;  %v4529_v13 = vld [vmem:[#allocation4 + $0x7c8] sm:$0xff] }
 0x6b5   :  { %4544 = vmatprep.subr.mxu0 %v4369_v43  ;;  %4615 = vmatprep.subr.mxu1 %v4371_v10  ;;  %v4531_v43 = vld [vmem:[#allocation4 + $0x7d8] sm:$0xff]  ;;  %v4528_v10 = vld [vmem:[#allocation4 + $0x7c0] sm:$0xff] }
 0x6b6   :  { %4545 = vmatpush1.msra.mxu0 %v4368_v54  ;;  %4616 = vmatpush1.msra.mxu1 %v4370_v30  ;;  %v4530_v54 = vld [vmem:[#allocation4 + $0x7d0] sm:$0xff]  ;;  %v4521_v30 = vld [vmem:[#allocation4 + $0x788] sm:$0xff] }
 0x6b7   :  { %4546 = vmatprep.subr.mxu0 %v4361_v34  ;;  %4617 = vmatprep.subr.mxu1 %v4363_v7  ;;  %v4523_v34 = vld [vmem:[#allocation4 + $0x798] sm:$0xff]  ;;  %v4520_v7 = vld [vmem:[#allocation4 + $0x780] sm:$0xff] }
 0x6b8   :  { %4547 = vmatpush1.msra.mxu0 %v4360_v40  ;;  %4618 = vmatpush1.msra.mxu1 %v4362_v5  ;;  %v4522_v40 = vld [vmem:[#allocation4 + $0x790] sm:$0xff]  ;;  %v4513_v5 = vld [vmem:[#allocation4 + $0x748] sm:$0xff] }
 0x6b9   :  { %4548 = vmatprep.subr.mxu0 %v4353_v60  ;;  %4619 = vmatprep.subr.mxu1 %v4355_v15  ;;  %v4515_v60 = vld [vmem:[#allocation4 + $0x758] sm:$0xff]  ;;  %v4512_v15 = vld [vmem:[#allocation4 + $0x740] sm:$0xff] }
 0x6ba   :  { %4549 = vmatpush1.msra.mxu0 %v4352_v14  ;;  %4620 = vmatpush1.msra.mxu1 %v4354_v28  ;;  %v4514_v14 = vld [vmem:[#allocation4 + $0x750] sm:$0xff]  ;;  %v4505_v28 = vld [vmem:[#allocation4 + $0x708] sm:$0xff] }
 0x6bb   :  { %4550 = vmatprep.subr.mxu0 %v4345_v26  ;;  %4621 = vmatprep.subr.mxu1 %v4347_v17  ;;  %v4507_v26 = vld [vmem:[#allocation4 + $0x718] sm:$0xff]  ;;  %v4504_v17 = vld [vmem:[#allocation4 + $0x700] sm:$0xff] }
 0x6bc   :  { %4551 = vmatpush1.msra.mxu0 %v4344_v48  ;;  %4622 = vmatpush1.msra.mxu1 %v4346_v1  ;;  %v4506_v48 = vld [vmem:[#allocation4 + $0x710] sm:$0xff]  ;;  %v4497_v1 = vld [vmem:[#allocation4 + $0x6c8] sm:$0xff] }
 0x6bd   :  { %4552 = vmatprep.subr.mxu0 %v4337_v0  ;;  %4623 = vmatprep.subr.mxu1 %v4339_v19  ;;  %v4499_v0 = vld [vmem:[#allocation4 + $0x6d8] sm:$0xff]  ;;  %v4496_v19 = vld [vmem:[#allocation4 + $0x6c0] sm:$0xff] }
 0x6be   :  { %4553 = vmatpush1.msra.mxu0 %v4336_v3  ;;  %4624 = vmatpush1.msra.mxu1 %v4338_v23  ;;  %v4498_v3 = vld [vmem:[#allocation4 + $0x6d0] sm:$0xff]  ;;  %v4489_v23 = vld [vmem:[#allocation4 + $0x688] sm:$0xff] }
 0x6bf   :  { %4554 = vmatprep.subr.mxu0 %v4329_v4  ;;  %4625 = vmatprep.subr.mxu1 %v4331_v29  ;;  %v4491_v4 = vld [vmem:[#allocation4 + $0x698] sm:$0xff]  ;;  %v4488_v29 = vld [vmem:[#allocation4 + $0x680] sm:$0xff] }
 0x6c0   :  { %4555 = vmatpush1.msra.mxu0 %v4328_v62  ;;  %4626 = vmatpush1.msra.mxu1 %v4330_v8  ;;  %v4490_v62 = vld [vmem:[#allocation4 + $0x690] sm:$0xff]  ;;  %v4481_v8 = vld [vmem:[#allocation4 + $0x648] sm:$0xff] }
 0x6c1   :  { %4556 = vmatprep.subr.mxu0 %v4321_v56  ;;  %4627 = vmatprep.subr.mxu1 %v4323_v25  ;;  %v4483_v56 = vld [vmem:[#allocation4 + $0x658] sm:$0xff]  ;;  %v4480_v25 = vld [vmem:[#allocation4 + $0x640] sm:$0xff] }
 0x6c2   :  { %4557 = vmatpush1.msra.mxu0 %v4320_v63  ;;  %4628 = vmatpush1.msra.mxu1 %v4322_v39  ;;  %v4482_v63 = vld [vmem:[#allocation4 + $0x650] sm:$0xff]  ;;  %v4473_v39 = vld [vmem:[#allocation4 + $0x608] sm:$0xff] }
 0x6c3   :  { %4558 = vmatprep.subr.mxu0 %v4313_v59  ;;  %4629 = vmatprep.subr.mxu1 %v4315_v24  ;;  %v4475_v59 = vld [vmem:[#allocation4 + $0x618] sm:$0xff]  ;;  %v4472_v24 = vld [vmem:[#allocation4 + $0x600] sm:$0xff] }
 0x6c4   :  { %4559 = vmatpush1.msra.mxu0 %v4312_v55  ;;  %4630 = vmatpush1.msra.mxu1 %v4314_v37  ;;  %v4474_v55 = vld [vmem:[#allocation4 + $0x610] sm:$0xff]  ;;  %v4465_v37 = vld [vmem:[#allocation4 + $0x5c8] sm:$0xff] }
 0x6c5   :  { %4560 = vmatprep.subr.mxu0 %v4305_v38  ;;  %4631 = vmatprep.subr.mxu1 %v4307_v49  ;;  %v4467_v38 = vld [vmem:[#allocation4 + $0x5d8] sm:$0xff]  ;;  %v4464_v49 = vld [vmem:[#allocation4 + $0x5c0] sm:$0xff] }
 0x6c6   :  { %4561 = vmatpush1.msra.mxu0 %v4304_v35  ;;  %4632 = vmatpush1.msra.mxu1 %v4306_v32  ;;  %v4466_v35 = vld [vmem:[#allocation4 + $0x5d0] sm:$0xff]  ;;  %v4457_v32 = vld [vmem:[#allocation4 + $0x588] sm:$0xff] }
 0x6c7   :  { %4562 = vmatprep.subr.mxu0 %v4297_v61  ;;  %4633 = vmatprep.subr.mxu1 %v4299_v41  ;;  %v4459_v61 = vld [vmem:[#allocation4 + $0x598] sm:$0xff]  ;;  %v4456_v41 = vld [vmem:[#allocation4 + $0x580] sm:$0xff] }
 0x6c8   :  { %4563 = vmatpush1.msra.mxu0 %v4296_v42  ;;  %4634 = vmatpush1.msra.mxu1 %v4298_v50  ;;  %v4458_v42 = vld [vmem:[#allocation4 + $0x590] sm:$0xff]  ;;  %v4449_v50 = vld [vmem:[#allocation4 + $0x548] sm:$0xff] }
 0x6c9   :  { %4564 = vmatprep.subr.mxu0 %v4289_v36  ;;  %4635 = vmatprep.subr.mxu1 %v4291_v18  ;;  %v4451_v36 = vld [vmem:[#allocation4 + $0x558] sm:$0xff]  ;;  %v4448_v18 = vld [vmem:[#allocation4 + $0x540] sm:$0xff] }
 0x6ca   :  { %4565 = vmatpush1.msra.mxu0 %v4288_v31  ;;  %4636 = vmatpush1.msra.mxu1 %v4290_v9  ;;  %v4450_v31 = vld [vmem:[#allocation4 + $0x550] sm:$0xff]  ;;  %v4441_v9 = vld [vmem:[#allocation4 + $0x508] sm:$0xff] }
 0x6cb   :  { %4566 = vmatprep.subr.mxu0 %v4281_v6  ;;  %4637 = vmatprep.subr.mxu1 %v4283_v2  ;;  %v4443_v6 = vld [vmem:[#allocation4 + $0x518] sm:$0xff]  ;;  %v4440_v2 = vld [vmem:[#allocation4 + $0x500] sm:$0xff] }
 0x6cc   :  { %4567 = vmatpush1.msra.mxu0 %v4280_v22  ;;  %4638 = vmatpush1.msra.mxu1 %v4282_v33  ;;  %v4442_v22 = vld [vmem:[#allocation4 + $0x510] sm:$0xff]  ;;  %v4433_v33 = vld [vmem:[#allocation4 + $0x4c8] sm:$0xff] }
 0x6cd   :  { %4568 = vmatprep.subr.mxu0 %v4529_v13  ;;  %4639 = vmatprep.subr.mxu1 %v4531_v43  ;;  %v4435_v13 = vld [vmem:[#allocation4 + $0x4d8] sm:$0xff]  ;;  %v4432_v43 = vld [vmem:[#allocation4 + $0x4c0] sm:$0xff] }
 0x6ce   :  { %4569 = vmatpush2.msra.mxu0 %v4528_v10  ;;  %4640 = vmatpush2.msra.mxu1 %v4530_v54  ;;  %v4434_v10 = vld [vmem:[#allocation4 + $0x4d0] sm:$0xff]  ;;  %v4425_v54 = vld [vmem:[#allocation4 + $0x488] sm:$0xff] }
 0x6cf   :  { %4570 = vmatprep.subr.mxu0 %v4521_v30  ;;  %4641 = vmatprep.subr.mxu1 %v4523_v34  ;;  %v4427_v30 = vld [vmem:[#allocation4 + $0x498] sm:$0xff]  ;;  %v4424_v34 = vld [vmem:[#allocation4 + $0x480] sm:$0xff] }
 0x6d0   :  { %4571 = vmatpush2.msra.mxu0 %v4520_v7  ;;  %4642 = vmatpush2.msra.mxu1 %v4522_v40  ;;  %v4426_v7 = vld [vmem:[#allocation4 + $0x490] sm:$0xff]  ;;  %v4417_v40 = vld [vmem:[#allocation4 + $0x448] sm:$0xff] }
 0x6d1   :  { %4572 = vmatprep.subr.mxu0 %v4513_v5  ;;  %4643 = vmatprep.subr.mxu1 %v4515_v60  ;;  %v4419_v5 = vld [vmem:[#allocation4 + $0x458] sm:$0xff]  ;;  %v4416_v60 = vld [vmem:[#allocation4 + $0x440] sm:$0xff] }
 0x6d2   :  { %4573 = vmatpush2.msra.mxu0 %v4512_v15  ;;  %4644 = vmatpush2.msra.mxu1 %v4514_v14  ;;  %v4418_v15 = vld [vmem:[#allocation4 + $0x450] sm:$0xff]  ;;  %v4409_v14 = vld [vmem:[#allocation4 + $0x408] sm:$0xff] }
 0x6d3   :  { %4574 = vmatprep.subr.mxu0 %v4505_v28  ;;  %4645 = vmatprep.subr.mxu1 %v4507_v26  ;;  %v4411_v28 = vld [vmem:[#allocation4 + $0x418] sm:$0xff]  ;;  %v4408_v26 = vld [vmem:[#allocation4 + $0x400] sm:$0xff] }
 0x6d4   :  { %4575 = vmatpush2.msra.mxu0 %v4504_v17  ;;  %4646 = vmatpush2.msra.mxu1 %v4506_v48  ;;  %v4410_v17 = vld [vmem:[#allocation4 + $0x410] sm:$0xff]  ;;  %v4405_v48 = vld [vmem:[#allocation4 + $0x3e8] sm:$0xff] }
 0x6d5   :  { %4576 = vmatprep.subr.mxu0 %v4497_v1  ;;  %4647 = vmatprep.subr.mxu1 %v4499_v0  ;;  %v4407_v1 = vld [vmem:[#allocation4 + $0x3f8] sm:$0xff] }
 0x6d6   :  { %4577 = vmatpush2.msra.mxu0 %v4496_v19  ;;  %4648 = vmatpush2.msra.mxu1 %v4498_v3 }
 0x6d7   :  { %4578 = vmatprep.subr.mxu0 %v4489_v23  ;;  %4649 = vmatprep.subr.mxu1 %v4491_v4  ;;  %v7159_v4 = vld [vmem:[#allocation18_spill] sm:$0xff] }
 0x6d8   :  { %4579 = vmatpush2.msra.mxu0 %v4488_v29  ;;  %4650 = vmatpush2.msra.mxu1 %v4490_v62 }
 0x6d9   :  { %4580 = vmatprep.subr.mxu0 %v4481_v8  ;;  %4651 = vmatprep.subr.mxu1 %v4483_v56  ;;  %v7160_v8 = vld [vmem:[#allocation7_spill] sm:$0xff] }
 0x6da   :  { %4581 = vmatpush2.msra.mxu0 %v4480_v25  ;;  %4652 = vmatpush2.msra.mxu1 %v4482_v63  ;;  %v7161_v63 = vld [vmem:[#allocation19_spill] sm:$0xff] }
 0x6db   :  { %4582 = vmatprep.subr.mxu0 %v4473_v39  ;;  %4653 = vmatprep.subr.mxu1 %v4475_v59 }
 0x6dc   :  { %4583 = vmatpush2.msra.mxu0 %v4472_v24  ;;  %4654 = vmatpush2.msra.mxu1 %v4474_v55 }
 0x6dd   :  { %4584 = vmatprep.subr.mxu0 %v4465_v37  ;;  %4655 = vmatprep.subr.mxu1 %v4467_v38 }
 0x6de   :  { %4585 = vmatpush2.msra.mxu0 %v4464_v49  ;;  %4656 = vmatpush2.msra.mxu1 %v4466_v35 }
 0x6df   :  { %4586 = vmatprep.subr.mxu0 %v4457_v32  ;;  %4657 = vmatprep.subr.mxu1 %v4459_v61 }
 0x6e0   :  { %4587 = vmatpush2.msra.mxu0 %v4456_v41  ;;  %4658 = vmatpush2.msra.mxu1 %v4458_v42  ;;  %v7162_v41 = vld [vmem:[#allocation24_spill] sm:$0xff] }
 0x6e1   :  { %4588 = vmatprep.subr.mxu0 %v4449_v50  ;;  %4659 = vmatprep.subr.mxu1 %v4451_v36  ;;  %v556_v42 = vadd.f32 %v7162_v41, %v6711_v44  ;;  %v4382_v41 = vld [vmem:[#allocation4 + $0x330] sm:$0xff] }
 0x6e2   :  { %4589 = vmatpush2.msra.mxu0 %v4448_v18  ;;  %4660 = vmatpush2.msra.mxu1 %v4450_v31  ;;  %v7163_v31 = vld [vmem:[#allocation25_spill] sm:$0xff] }
 0x6e3   :  { %4590 = vmatprep.subr.mxu0 %v4441_v9  ;;  %4661 = vmatprep.subr.mxu1 %v4443_v6  ;;  %v558_v9 = vadd.f32 %v7163_v31, %v6714_v45  ;;  %v7164_v6 = vld [vmem:[#allocation10_spill] sm:$0xff]  ;;  %v4365_v31 = vld [vmem:[#allocation4 + $0x2a8] sm:$0xff] }
 0x6e4   :  { %4591 = vmatpush2.msra.mxu0 %v4440_v2  ;;  %4662 = vmatpush2.msra.mxu1 %v4442_v22 }
 0x6e5   :  { %4592 = vmatprep.subr.mxu0 %v4433_v33  ;;  %4663 = vmatprep.subr.mxu1 %v4435_v13 }
 0x6e6   :  { %4593 = vmatpush2.msra.mxu0 %v4432_v43  ;;  %4664 = vmatpush2.msra.mxu1 %v4434_v10  ;;  %v7165_v10 = vld [vmem:[#allocation12_spill] sm:$0xff] }
 0x6e7   :  { %4594 = vmatprep.subr.mxu0 %v4425_v54  ;;  %4665 = vmatprep.subr.mxu1 %v4427_v30 }
 0x6e8   :  { %4595 = vmatpush2.msra.mxu0 %v4424_v34  ;;  %4666 = vmatpush2.msra.mxu1 %v4426_v7 }
 0x6e9   :  { %4596 = vmatprep.subr.mxu0 %v4417_v40  ;;  %4667 = vmatprep.subr.mxu1 %v4419_v5 }
 0x6ea   :  { %4597 = vmatpush2.msra.mxu0 %v4416_v60  ;;  %4668 = vmatpush2.msra.mxu1 %v4418_v15 }
 0x6eb   :  { %4598 = vmatprep.subr.mxu0 %v4409_v14  ;;  %4669 = vmatprep.subr.mxu1 %v4411_v28 }
 0x6ec   :  { %4599 = vmatpush2.msra.mxu0 %v4408_v26  ;;  %4670 = vmatpush2.msra.mxu1 %v4410_v17 }
 0x6ed   :  { %4678 = vmatprep.subr.mxu0 %v4405_v48  ;;  %4749 = vmatprep.subr.mxu1 %v4407_v1 }
 0x72b   :  { %v3996_v0 = vpop.f32.mrf.mxu0  ;;  %v4067_v19 = vpop.f32.mrf.mxu1 }
 0x72c   :  { %v4214_v23 = vadd.f32 %v3996_v0, %v6566_v12  ;;  %v4216_v29 = vadd.f32 %v4067_v19, %v7159_v4 }
 0x72d   :  { %v3998_v3 = vpop.f32.mrf.mxu0  ;;  %v4069_v62 = vpop.f32.mrf.mxu1 }
 0x72e   :  { %v4215_v56 = vadd.f32 %v3998_v3, %v7160_v8  ;;  %v5896_v25 = vmul.f32 -1.442695, %v4214_v23  ;;  %v4217_v39 = vadd.f32 %v4069_v62, %v7161_v63  ;;  %v5898_v59 = vmul.f32 -1.442695, %v4216_v29  ;;  %v4404_v63 = vld [vmem:[#allocation4 + $0x3e0] sm:$0xff] }
 0x730   :  { %v5897_v24 = vmul.f32 -1.442695, %v4215_v56  ;;  %6135 = vpow2.f32 %v5896_v25  ;;  %v5899_v55 = vmul.f32 -1.442695, %v4217_v39  ;;  %v4397_v39 = vld [vmem:[#allocation4 + $0x3a8] sm:$0xff] }
 0x731   :  { %6137 = vpow2.f32 %v5898_v59  ;;  %v4399_v59 = vld [vmem:[#allocation4 + $0x3b8] sm:$0xff] }
 0x732   :  { %6139 = vpow2.f32 %v5897_v24  ;;  %v4396_v24 = vld [vmem:[#allocation4 + $0x3a0] sm:$0xff] }
 0x733   :  { %6141 = vpow2.f32 %v5899_v55  ;;  %v4398_v55 = vld [vmem:[#allocation4 + $0x3b0] sm:$0xff] }
 0x73d   :  { %v6136_v37 = vpop.eup %6135 }
 0x73e   :  { %v6138_v38 = vpop.eup %6137  ;;  %v4240_v35 = vadd.f32 1.0, %v6136_v37  ;;  %v4389_v37 = vld [vmem:[#allocation4 + $0x368] sm:$0xff] }
 0x73f   :  { %v6140_v49 = vpop.eup %6139  ;;  %v4242_v32 = vadd.f32 1.0, %v6138_v38  ;;  %v4391_v38 = vld [vmem:[#allocation4 + $0x378] sm:$0xff] }
 0x740   :  { %v6142_v12 = vpop.eup %6141  ;;  %v4241_v61 = vadd.f32 1.0, %v6140_v49  ;;  %6143 = vrcp.f32 %v4240_v35  ;;  %v4388_v49 = vld [vmem:[#allocation4 + $0x360] sm:$0xff]  ;;  %v4390_v35 = vld [vmem:[#allocation4 + $0x370] sm:$0xff] }
 0x741   :  { %v4243_v50 = vadd.f32 1.0, %v6142_v12  ;;  %6145 = vrcp.f32 %v4242_v32  ;;  %v4381_v12 = vld [vmem:[#allocation4 + $0x328] sm:$0xff]  ;;  %v4383_v32 = vld [vmem:[#allocation4 + $0x338] sm:$0xff] }
 0x742   :  { %6147 = vrcp.f32 %v4241_v61  ;;  %v4380_v61 = vld [vmem:[#allocation4 + $0x320] sm:$0xff] }
 0x74d   :  { %v6144_v7 = vpop.eup %6143 }
 0x74e   :  { %v6146_v40 = vpop.eup %6145 }
 0x74f   :  { %v6148_v5 = vpop.eup %6147  ;;  %v4260_v14 = vmul.f32 %v6146_v40, %v6839_v27  ;;  %v4343_v40 = vld [vmem:[#allocation4 + $0x1f8] sm:$0xff] }
 0x76c   :  { %v4138_v36 = vpop.f32.mrf.mxu0  ;;  %v4209_v18 = vpop.f32.mrf.mxu1 }
 0x76d   :  { %v4218_v2 = vadd.f32 %v4138_v36, %v7164_v6  ;;  %v4220_v22 = vadd.f32 %v4209_v18, %v556_v42  ;;  %v4373_v42 = vld [vmem:[#allocation4 + $0x2e8] sm:$0xff]  ;;  %v4372_v36 = vld [vmem:[#allocation4 + $0x2e0] sm:$0xff]  ;;  %v4374_v18 = vld [vmem:[#allocation4 + $0x2f0] sm:$0xff] }
 0x76e   :  { %v4140_v33 = vpop.f32.mrf.mxu0  ;;  %v4211_v13 = vpop.f32.mrf.mxu1  ;;  %v4364_v6 = vld [vmem:[#allocation4 + $0x2a0] sm:$0xff] }
 0x76f   :  { %v5900_v43 = vmul.f32 -1.442695, %v4218_v2  ;;  %6149 = vtanh.f32 %v4220_v22  ;;  %v4219_v54 = vadd.f32 %v4140_v33, %v7165_v10  ;;  %v4221_v30 = vadd.f32 %v4211_v13, %v558_v9  ;;  %v4367_v9 = vld [vmem:[#allocation4 + $0x2b8] sm:$0xff]  ;;  %v4366_v2 = vld [vmem:[#allocation4 + $0x2b0] sm:$0xff]  ;;  %v4357_v22 = vld [vmem:[#allocation4 + $0x268] sm:$0xff] }
 0x770   :  { %6151 = vrcp.f32 %v4243_v50  ;;  %v4375_v50 = vld [vmem:[#allocation4 + $0x2f8] sm:$0xff]  ;;  %v4356_v13 = vld [vmem:[#allocation4 + $0x260] sm:$0xff]  ;;  %v4349_v10 = vld [vmem:[#allocation4 + $0x228] sm:$0xff] }
 0x771   :  { %6153 = vpow2.f32 %v5900_v43  ;;  %v5901_v34 = vmul.f32 -1.442695, %v4219_v54  ;;  %v4359_v33 = vld [vmem:[#allocation4 + $0x278] sm:$0xff]  ;;  %v4358_v43 = vld [vmem:[#allocation4 + $0x270] sm:$0xff] }
 0x772   :  { %6155 = vtanh.f32 %v4221_v30  ;;  %v4351_v54 = vld [vmem:[#allocation4 + $0x238] sm:$0xff]  ;;  %v4348_v30 = vld [vmem:[#allocation4 + $0x220] sm:$0xff] }
 0x773   :  { %6157 = vpow2.f32 %v5901_v34  ;;  %v4350_v34 = vld [vmem:[#allocation4 + $0x230] sm:$0xff] }
 0x77c   :  { %v6150_v60 = vpop.eup %6149 }
 0x77d   :  { %v6152_v15 = vpop.eup %6151  ;;  %v4262_v28 = vmul.f32 %v6150_v60, %v6144_v7  ;;  %v4341_v7 = vld [vmem:[#allocation4 + $0x1e8] sm:$0xff]  ;;  %v4342_v60 = vld [vmem:[#allocation4 + $0x1f0] sm:$0xff] }
 0x77e   :  { %v6154_v26 = vpop.eup %6153  ;;  %v4261_v19 = vmul.f32 %v6152_v15, %v6843_v21  ;;  %v4406_v21 = vld [vmem:[#allocation4 + $0x3f0] sm:$0xff]  ;;  %v4333_v15 = vld [vmem:[#allocation4 + $0x1a8] sm:$0xff] }
 0x77f   :  { %v6156_v17 = vpop.eup %6155  ;;  %v4244_v48 = vadd.f32 1.0, %v6154_v26  ;;  %v6869_v1 = vadd.f32 %v4262_v28, %v4260_v14  ;;  %v4335_v14 = vld [vmem:[#allocation4 + $0x1b8] sm:$0xff]  ;;  %v4332_v28 = vld [vmem:[#allocation4 + $0x1a0] sm:$0xff]  ;;  %v4334_v26 = vld [vmem:[#allocation4 + $0x1b0] sm:$0xff] }
 0x780   :  { %v6158_v0 = vpop.eup %6157  ;;  %v4263_v3 = vmul.f32 %v6156_v17, %v6148_v5  ;;  %v4340_v5 = vld [vmem:[#allocation4 + $0x1e0] sm:$0xff]  ;;  %v4325_v17 = vld [vmem:[#allocation4 + $0x168] sm:$0xff] }
 0x781   :  { %6159 = vrcp.f32 %v4244_v48  ;;  %v4245_v23 = vadd.f32 1.0, %v6158_v0  ;;  %v4327_v48 = vld [vmem:[#allocation4 + $0x178] sm:$0xff]  ;;  %v4324_v0 = vld [vmem:[#allocation4 + $0x160] sm:$0xff] }
 0x782   :  { %6161 = vtanh.f32 %v6869_v1  ;;  %v6873_v4 = vadd.f32 %v4263_v3, %v4261_v19  ;;  %v4326_v19 = vld [vmem:[#allocation4 + $0x170] sm:$0xff]  ;;  %v4317_v3 = vld [vmem:[#allocation4 + $0x128] sm:$0xff] }
 0x783   :  { %6163 = vrcp.f32 %v4245_v23  ;;  %v4319_v23 = vld [vmem:[#allocation4 + $0x138] sm:$0xff] }
 0x784   :  { %6165 = vtanh.f32 %v6873_v4 }
 0x78e   :  { %v6160_v27 = vpop.eup %6159 }
 0x78f   :  { %v6162_v29 = vpop.eup %6161 }
 0x790   :  { %v6164_v62 = vpop.eup %6163  ;;  %v6878_v25 = vmul.f32 %v6162_v29, %v6160_v27  ;;  %v4316_v27 = vld [vmem:[#allocation4 + $0x120] sm:$0xff]  ;;  %v4318_v29 = vld [vmem:[#allocation4 + $0x130] sm:$0xff] }
 0x791   :  { %v6166_v8 = vpop.eup %6165 }
 0x792   :  { %v6876_v56 = vmul.f32 %v6166_v8, %v6164_v62  ;;  %v4309_v62 = vld [vmem:[#allocation4 + $0xe8] sm:$0xff]  ;;  %v4311_v8 = vld [vmem:[#allocation4 + $0xf8] sm:$0xff] }
 0x794   :  { %4600 = vmatprep.mubr.f32.mxu0 %v6876_v56  ;;  %4671 = vmatprep.mubr.f32.mxu1 %v6876_v56 }
 0x795   :  { %4601 = vmatmul.mubr.f32.vlgmr.msra.gmra.mxu0 %v6878_v25  ;;  %4672 = vmatmul.mubr.f32.vlgmr.msra.gmra.mxu1 %v6878_v25 }
 0x796   :  { %4679 = vmatpush1.msra.mxu0 %v4404_v63  ;;  %4750 = vmatpush1.msra.mxu1 %v4406_v21  ;;  %v4308_v63 = vld [vmem:[#allocation4 + $0xe0] sm:$0xff]  ;;  %v4310_v21 = vld [vmem:[#allocation4 + $0xf0] sm:$0xff] }
 0x797   :  { %4680 = vmatprep.subr.mxu0 %v4397_v39  ;;  %4742 = vmatprep.mubr.f32.mxu0 %v6876_v56  ;;  %v4301_v39 = vld [vmem:[#allocation4 + $0xa8] sm:$0xff] }
 0x798   :  { %4751 = vmatprep.subr.mxu1 %v4399_v59  ;;  %4813 = vmatprep.mubr.f32.mxu1 %v6876_v56  ;;  %v4303_v59 = vld [vmem:[#allocation4 + $0xb8] sm:$0xff] }
 0x799   :  { %4681 = vmatpush1.msra.mxu0 %v4396_v24  ;;  %4752 = vmatpush1.msra.mxu1 %v4398_v55  ;;  %v4300_v24 = vld [vmem:[#allocation4 + $0xa0] sm:$0xff]  ;;  %v4302_v55 = vld [vmem:[#allocation4 + $0xb0] sm:$0xff] }
 0x79a   :  { %4682 = vmatprep.subr.mxu0 %v4389_v37  ;;  %4753 = vmatprep.subr.mxu1 %v4391_v38  ;;  %v4293_v37 = vld [vmem:[#allocation4 + $0x68] sm:$0xff]  ;;  %v4295_v38 = vld [vmem:[#allocation4 + $0x78] sm:$0xff] }
 0x79b   :  { %4683 = vmatpush1.msra.mxu0 %v4388_v49  ;;  %4754 = vmatpush1.msra.mxu1 %v4390_v35  ;;  %v4292_v49 = vld [vmem:[#allocation4 + $0x60] sm:$0xff]  ;;  %v4294_v35 = vld [vmem:[#allocation4 + $0x70] sm:$0xff] }
 0x79c   :  { %4684 = vmatprep.subr.mxu0 %v4381_v12  ;;  %4755 = vmatprep.subr.mxu1 %v4383_v32  ;;  %v4285_v12 = vld [vmem:[#allocation4 + $0x28] sm:$0xff]  ;;  %v4287_v32 = vld [vmem:[#allocation4 + $0x38] sm:$0xff] }
 0x79d   :  { %4685 = vmatpush1.msra.mxu0 %v4380_v61  ;;  %4756 = vmatpush1.msra.mxu1 %v4382_v41  ;;  %v4284_v61 = vld [vmem:[#allocation4 + $0x20] sm:$0xff]  ;;  %v4286_v41 = vld [vmem:[#allocation4 + $0x30] sm:$0xff] }
 0x79e   :  { %4686 = vmatprep.subr.mxu0 %v4373_v42  ;;  %4757 = vmatprep.subr.mxu1 %v4375_v50  ;;  %v4533_v42 = vld [vmem:[#allocation4 + $0x7e8] sm:$0xff]  ;;  %v4535_v50 = vld [vmem:[#allocation4 + $0x7f8] sm:$0xff] }
 0x79f   :  { %4687 = vmatpush1.msra.mxu0 %v4372_v36  ;;  %4758 = vmatpush1.msra.mxu1 %v4374_v18  ;;  %v4532_v36 = vld [vmem:[#allocation4 + $0x7e0] sm:$0xff]  ;;  %v4534_v18 = vld [vmem:[#allocation4 + $0x7f0] sm:$0xff] }
 0x7a0   :  { %4688 = vmatprep.subr.mxu0 %v4365_v31  ;;  %4759 = vmatprep.subr.mxu1 %v4367_v9  ;;  %v4525_v31 = vld [vmem:[#allocation4 + $0x7a8] sm:$0xff]  ;;  %v4527_v9 = vld [vmem:[#allocation4 + $0x7b8] sm:$0xff] }
 0x7a1   :  { %4689 = vmatpush1.msra.mxu0 %v4364_v6  ;;  %4760 = vmatpush1.msra.mxu1 %v4366_v2  ;;  %v4524_v6 = vld [vmem:[#allocation4 + $0x7a0] sm:$0xff]  ;;  %v4526_v2 = vld [vmem:[#allocation4 + $0x7b0] sm:$0xff] }
 0x7a2   :  { %4690 = vmatprep.subr.mxu0 %v4357_v22  ;;  %4761 = vmatprep.subr.mxu1 %v4359_v33  ;;  %v4517_v22 = vld [vmem:[#allocation4 + $0x768] sm:$0xff]  ;;  %v4519_v33 = vld [vmem:[#allocation4 + $0x778] sm:$0xff] }
 0x7a3   :  { %4691 = vmatpush1.msra.mxu0 %v4356_v13  ;;  %4762 = vmatpush1.msra.mxu1 %v4358_v43  ;;  %v4516_v13 = vld [vmem:[#allocation4 + $0x760] sm:$0xff]  ;;  %v4518_v43 = vld [vmem:[#allocation4 + $0x770] sm:$0xff] }
 0x7a4   :  { %4692 = vmatprep.subr.mxu0 %v4349_v10  ;;  %4763 = vmatprep.subr.mxu1 %v4351_v54  ;;  %v4509_v10 = vld [vmem:[#allocation4 + $0x728] sm:$0xff]  ;;  %v4511_v54 = vld [vmem:[#allocation4 + $0x738] sm:$0xff] }
 0x7a5   :  { %4693 = vmatpush1.msra.mxu0 %v4348_v30  ;;  %4764 = vmatpush1.msra.mxu1 %v4350_v34  ;;  %v4508_v30 = vld [vmem:[#allocation4 + $0x720] sm:$0xff]  ;;  %v4510_v34 = vld [vmem:[#allocation4 + $0x730] sm:$0xff] }
 0x7a6   :  { %4694 = vmatprep.subr.mxu0 %v4341_v7  ;;  %4765 = vmatprep.subr.mxu1 %v4343_v40  ;;  %v4501_v7 = vld [vmem:[#allocation4 + $0x6e8] sm:$0xff]  ;;  %v4503_v40 = vld [vmem:[#allocation4 + $0x6f8] sm:$0xff] }
 0x7a7   :  { %4695 = vmatpush1.msra.mxu0 %v4340_v5  ;;  %4766 = vmatpush1.msra.mxu1 %v4342_v60  ;;  %v4500_v5 = vld [vmem:[#allocation4 + $0x6e0] sm:$0xff]  ;;  %v4502_v60 = vld [vmem:[#allocation4 + $0x6f0] sm:$0xff] }
 0x7a8   :  { %4696 = vmatprep.subr.mxu0 %v4333_v15  ;;  %4767 = vmatprep.subr.mxu1 %v4335_v14  ;;  %v4493_v15 = vld [vmem:[#allocation4 + $0x6a8] sm:$0xff]  ;;  %v4495_v14 = vld [vmem:[#allocation4 + $0x6b8] sm:$0xff] }
 0x7a9   :  { %4697 = vmatpush1.msra.mxu0 %v4332_v28  ;;  %4768 = vmatpush1.msra.mxu1 %v4334_v26  ;;  %v4492_v28 = vld [vmem:[#allocation4 + $0x6a0] sm:$0xff]  ;;  %v4494_v26 = vld [vmem:[#allocation4 + $0x6b0] sm:$0xff] }
 0x7aa   :  { %4698 = vmatprep.subr.mxu0 %v4325_v17  ;;  %4769 = vmatprep.subr.mxu1 %v4327_v48  ;;  %v4485_v17 = vld [vmem:[#allocation4 + $0x668] sm:$0xff]  ;;  %v4487_v48 = vld [vmem:[#allocation4 + $0x678] sm:$0xff] }
 0x7ab   :  { %4699 = vmatpush1.msra.mxu0 %v4324_v0  ;;  %4770 = vmatpush1.msra.mxu1 %v4326_v19  ;;  %v4484_v0 = vld [vmem:[#allocation4 + $0x660] sm:$0xff]  ;;  %v4486_v19 = vld [vmem:[#allocation4 + $0x670] sm:$0xff] }
 0x7ac   :  { %4700 = vmatprep.subr.mxu0 %v4317_v3  ;;  %4771 = vmatprep.subr.mxu1 %v4319_v23  ;;  %v4477_v3 = vld [vmem:[#allocation4 + $0x628] sm:$0xff]  ;;  %v4479_v23 = vld [vmem:[#allocation4 + $0x638] sm:$0xff] }
 0x7ad   :  { %4701 = vmatpush1.msra.mxu0 %v4316_v27  ;;  %4772 = vmatpush1.msra.mxu1 %v4318_v29  ;;  %v4476_v27 = vld [vmem:[#allocation4 + $0x620] sm:$0xff]  ;;  %v4478_v29 = vld [vmem:[#allocation4 + $0x630] sm:$0xff] }
 0x7ae   :  { %4702 = vmatprep.subr.mxu0 %v4309_v62  ;;  %4773 = vmatprep.subr.mxu1 %v4311_v8  ;;  %v4469_v62 = vld [vmem:[#allocation4 + $0x5e8] sm:$0xff]  ;;  %v4471_v8 = vld [vmem:[#allocation4 + $0x5f8] sm:$0xff] }
 0x7af   :  { %4703 = vmatpush1.msra.mxu0 %v4308_v63  ;;  %4774 = vmatpush1.msra.mxu1 %v4310_v21  ;;  %v4468_v63 = vld [vmem:[#allocation4 + $0x5e0] sm:$0xff]  ;;  %v4470_v21 = vld [vmem:[#allocation4 + $0x5f0] sm:$0xff] }
 0x7b0   :  { %4704 = vmatprep.subr.mxu0 %v4301_v39  ;;  %4775 = vmatprep.subr.mxu1 %v4303_v59  ;;  %v4461_v39 = vld [vmem:[#allocation4 + $0x5a8] sm:$0xff]  ;;  %v4463_v59 = vld [vmem:[#allocation4 + $0x5b8] sm:$0xff] }
 0x7b1   :  { %4705 = vmatpush1.msra.mxu0 %v4300_v24  ;;  %4776 = vmatpush1.msra.mxu1 %v4302_v55  ;;  %v4460_v24 = vld [vmem:[#allocation4 + $0x5a0] sm:$0xff]  ;;  %v4462_v55 = vld [vmem:[#allocation4 + $0x5b0] sm:$0xff] }
 0x7b2   :  { %4706 = vmatprep.subr.mxu0 %v4293_v37  ;;  %4777 = vmatprep.subr.mxu1 %v4295_v38  ;;  %v4453_v37 = vld [vmem:[#allocation4 + $0x568] sm:$0xff]  ;;  %v4455_v38 = vld [vmem:[#allocation4 + $0x578] sm:$0xff] }
 0x7b3   :  { %4707 = vmatpush1.msra.mxu0 %v4292_v49  ;;  %4778 = vmatpush1.msra.mxu1 %v4294_v35  ;;  %v4452_v49 = vld [vmem:[#allocation4 + $0x560] sm:$0xff]  ;;  %v4454_v35 = vld [vmem:[#allocation4 + $0x570] sm:$0xff] }
 0x7b4   :  { %4708 = vmatprep.subr.mxu0 %v4285_v12  ;;  %4779 = vmatprep.subr.mxu1 %v4287_v32  ;;  %v4445_v12 = vld [vmem:[#allocation4 + $0x528] sm:$0xff]  ;;  %v4447_v32 = vld [vmem:[#allocation4 + $0x538] sm:$0xff] }
 0x7b5   :  { %4709 = vmatpush1.msra.mxu0 %v4284_v61  ;;  %4780 = vmatpush1.msra.mxu1 %v4286_v41  ;;  %v4444_v61 = vld [vmem:[#allocation4 + $0x520] sm:$0xff]  ;;  %v4446_v41 = vld [vmem:[#allocation4 + $0x530] sm:$0xff] }
 0x7b6   :  { %4710 = vmatprep.subr.mxu0 %v4533_v42  ;;  %4781 = vmatprep.subr.mxu1 %v4535_v50  ;;  %v4437_v42 = vld [vmem:[#allocation4 + $0x4e8] sm:$0xff]  ;;  %v4439_v50 = vld [vmem:[#allocation4 + $0x4f8] sm:$0xff] }
 0x7b7   :  { %4711 = vmatpush2.msra.mxu0 %v4532_v36  ;;  %4782 = vmatpush2.msra.mxu1 %v4534_v18  ;;  %v4436_v36 = vld [vmem:[#allocation4 + $0x4e0] sm:$0xff]  ;;  %v4438_v18 = vld [vmem:[#allocation4 + $0x4f0] sm:$0xff] }
 0x7b8   :  { %4712 = vmatprep.subr.mxu0 %v4525_v31  ;;  %4783 = vmatprep.subr.mxu1 %v4527_v9  ;;  %v4429_v31 = vld [vmem:[#allocation4 + $0x4a8] sm:$0xff]  ;;  %v4431_v9 = vld [vmem:[#allocation4 + $0x4b8] sm:$0xff] }
 0x7b9   :  { %4713 = vmatpush2.msra.mxu0 %v4524_v6  ;;  %4784 = vmatpush2.msra.mxu1 %v4526_v2  ;;  %v4428_v6 = vld [vmem:[#allocation4 + $0x4a0] sm:$0xff]  ;;  %v4430_v2 = vld [vmem:[#allocation4 + $0x4b0] sm:$0xff] }
 0x7ba   :  { %4714 = vmatprep.subr.mxu0 %v4517_v22  ;;  %4785 = vmatprep.subr.mxu1 %v4519_v33  ;;  %v4421_v22 = vld [vmem:[#allocation4 + $0x468] sm:$0xff]  ;;  %v4423_v33 = vld [vmem:[#allocation4 + $0x478] sm:$0xff] }
 0x7bb   :  { %4715 = vmatpush2.msra.mxu0 %v4516_v13  ;;  %4786 = vmatpush2.msra.mxu1 %v4518_v43  ;;  %v4420_v13 = vld [vmem:[#allocation4 + $0x460] sm:$0xff]  ;;  %v4422_v43 = vld [vmem:[#allocation4 + $0x470] sm:$0xff] }
 0x7bc   :  { %4716 = vmatprep.subr.mxu0 %v4509_v10  ;;  %4787 = vmatprep.subr.mxu1 %v4511_v54  ;;  %v4413_v10 = vld [vmem:[#allocation4 + $0x428] sm:$0xff]  ;;  %v4415_v54 = vld [vmem:[#allocation4 + $0x438] sm:$0xff] }
 0x7bd   :  { %4717 = vmatpush2.msra.mxu0 %v4508_v30  ;;  %4788 = vmatpush2.msra.mxu1 %v4510_v34  ;;  %v4412_v30 = vld [vmem:[#allocation4 + $0x420] sm:$0xff]  ;;  %v4414_v34 = vld [vmem:[#allocation4 + $0x430] sm:$0xff] }
 0x7be   :  { %4718 = vmatprep.subr.mxu0 %v4501_v7  ;;  %4789 = vmatprep.subr.mxu1 %v4503_v40  ;;  %v5007_v7 = vld [vmem:[#allocation4 + $0x3c8] sm:$0xff]  ;;  %v5009_v40 = vld [vmem:[#allocation4 + $0x3d8] sm:$0xff] }
 0x7bf   :  { %4719 = vmatpush2.msra.mxu0 %v4500_v5  ;;  %4790 = vmatpush2.msra.mxu1 %v4502_v60  ;;  %v5006_v5 = vld [vmem:[#allocation4 + $0x3c0] sm:$0xff]  ;;  %v5008_v60 = vld [vmem:[#allocation4 + $0x3d0] sm:$0xff] }
 0x7c0   :  { %4720 = vmatprep.subr.mxu0 %v4493_v15  ;;  %4791 = vmatprep.subr.mxu1 %v4495_v14  ;;  %v4999_v15 = vld [vmem:[#allocation4 + $0x388] sm:$0xff]  ;;  %v5001_v14 = vld [vmem:[#allocation4 + $0x398] sm:$0xff] }
 0x7c1   :  { %4721 = vmatpush2.msra.mxu0 %v4492_v28  ;;  %4792 = vmatpush2.msra.mxu1 %v4494_v26  ;;  %v4998_v28 = vld [vmem:[#allocation4 + $0x380] sm:$0xff]  ;;  %v5000_v26 = vld [vmem:[#allocation4 + $0x390] sm:$0xff] }
 0x7c2   :  { %4722 = vmatprep.subr.mxu0 %v4485_v17  ;;  %4793 = vmatprep.subr.mxu1 %v4487_v48  ;;  %v4991_v17 = vld [vmem:[#allocation4 + $0x348] sm:$0xff]  ;;  %v4993_v48 = vld [vmem:[#allocation4 + $0x358] sm:$0xff] }
 0x7c3   :  { %4723 = vmatpush2.msra.mxu0 %v4484_v0  ;;  %4794 = vmatpush2.msra.mxu1 %v4486_v19  ;;  %v4990_v0 = vld [vmem:[#allocation4 + $0x340] sm:$0xff]  ;;  %v4992_v19 = vld [vmem:[#allocation4 + $0x350] sm:$0xff] }
 0x7c4   :  { %4724 = vmatprep.subr.mxu0 %v4477_v3  ;;  %4795 = vmatprep.subr.mxu1 %v4479_v23  ;;  %v4983_v3 = vld [vmem:[#allocation4 + $0x308] sm:$0xff]  ;;  %v4985_v23 = vld [vmem:[#allocation4 + $0x318] sm:$0xff] }
 0x7c5   :  { %4725 = vmatpush2.msra.mxu0 %v4476_v27  ;;  %4796 = vmatpush2.msra.mxu1 %v4478_v29  ;;  %v4982_v27 = vld [vmem:[#allocation4 + $0x300] sm:$0xff]  ;;  %v4984_v29 = vld [vmem:[#allocation4 + $0x310] sm:$0xff] }
 0x7c6   :  { %4726 = vmatprep.subr.mxu0 %v4469_v62  ;;  %4797 = vmatprep.subr.mxu1 %v4471_v8  ;;  %v4975_v62 = vld [vmem:[#allocation4 + $0x2c8] sm:$0xff]  ;;  %v4977_v8 = vld [vmem:[#allocation4 + $0x2d8] sm:$0xff] }
 0x7c7   :  { %4727 = vmatpush2.msra.mxu0 %v4468_v63  ;;  %4798 = vmatpush2.msra.mxu1 %v4470_v21  ;;  %v4974_v63 = vld [vmem:[#allocation4 + $0x2c0] sm:$0xff]  ;;  %v4976_v21 = vld [vmem:[#allocation4 + $0x2d0] sm:$0xff] }
 0x7c8   :  { %4728 = vmatprep.subr.mxu0 %v4461_v39  ;;  %4799 = vmatprep.subr.mxu1 %v4463_v59  ;;  %v4967_v39 = vld [vmem:[#allocation4 + $0x288] sm:$0xff]  ;;  %v4969_v59 = vld [vmem:[#allocation4 + $0x298] sm:$0xff] }
 0x7c9   :  { %4729 = vmatpush2.msra.mxu0 %v4460_v24  ;;  %4800 = vmatpush2.msra.mxu1 %v4462_v55  ;;  %v4966_v24 = vld [vmem:[#allocation4 + $0x280] sm:$0xff]  ;;  %v4968_v55 = vld [vmem:[#allocation4 + $0x290] sm:$0xff] }
 0x7ca   :  { %4730 = vmatprep.subr.mxu0 %v4453_v37  ;;  %4801 = vmatprep.subr.mxu1 %v4455_v38  ;;  %v4959_v37 = vld [vmem:[#allocation4 + $0x248] sm:$0xff]  ;;  %v4961_v38 = vld [vmem:[#allocation4 + $0x258] sm:$0xff] }
 0x7cb   :  { %4731 = vmatpush2.msra.mxu0 %v4452_v49  ;;  %4802 = vmatpush2.msra.mxu1 %v4454_v35  ;;  %v4958_v49 = vld [vmem:[#allocation4 + $0x240] sm:$0xff]  ;;  %v4960_v35 = vld [vmem:[#allocation4 + $0x250] sm:$0xff] }
 0x7cc   :  { %4732 = vmatprep.subr.mxu0 %v4445_v12  ;;  %4803 = vmatprep.subr.mxu1 %v4447_v32  ;;  %v4951_v12 = vld [vmem:[#allocation4 + $0x208] sm:$0xff]  ;;  %v4953_v32 = vld [vmem:[#allocation4 + $0x218] sm:$0xff] }
 0x7cd   :  { %4733 = vmatpush2.msra.mxu0 %v4444_v61  ;;  %4804 = vmatpush2.msra.mxu1 %v4446_v41  ;;  %v4950_v61 = vld [vmem:[#allocation4 + $0x200] sm:$0xff]  ;;  %v4952_v41 = vld [vmem:[#allocation4 + $0x210] sm:$0xff] }
 0x7ce   :  { %4734 = vmatprep.subr.mxu0 %v4437_v42  ;;  %4805 = vmatprep.subr.mxu1 %v4439_v50  ;;  %v4943_v42 = vld [vmem:[#allocation4 + $0x1c8] sm:$0xff]  ;;  %v4945_v50 = vld [vmem:[#allocation4 + $0x1d8] sm:$0xff] }
 0x7cf   :  { %4735 = vmatpush2.msra.mxu0 %v4436_v36  ;;  %4806 = vmatpush2.msra.mxu1 %v4438_v18  ;;  %v4942_v36 = vld [vmem:[#allocation4 + $0x1c0] sm:$0xff]  ;;  %v4944_v18 = vld [vmem:[#allocation4 + $0x1d0] sm:$0xff] }
 0x7d0   :  { %4736 = vmatprep.subr.mxu0 %v4429_v31  ;;  %4807 = vmatprep.subr.mxu1 %v4431_v9  ;;  %v4935_v31 = vld [vmem:[#allocation4 + $0x188] sm:$0xff]  ;;  %v4937_v9 = vld [vmem:[#allocation4 + $0x198] sm:$0xff] }
 0x7d1   :  { %4737 = vmatpush2.msra.mxu0 %v4428_v6  ;;  %4808 = vmatpush2.msra.mxu1 %v4430_v2  ;;  %v4934_v6 = vld [vmem:[#allocation4 + $0x180] sm:$0xff]  ;;  %v4936_v2 = vld [vmem:[#allocation4 + $0x190] sm:$0xff] }
 0x7d2   :  { %4738 = vmatprep.subr.mxu0 %v4421_v22  ;;  %4809 = vmatprep.subr.mxu1 %v4423_v33  ;;  %v4927_v22 = vld [vmem:[#allocation4 + $0x148] sm:$0xff]  ;;  %v4929_v33 = vld [vmem:[#allocation4 + $0x158] sm:$0xff] }
 0x7d3   :  { %4739 = vmatpush2.msra.mxu0 %v4420_v13  ;;  %4810 = vmatpush2.msra.mxu1 %v4422_v43  ;;  %v4926_v13 = vld [vmem:[#allocation4 + $0x140] sm:$0xff]  ;;  %v4928_v43 = vld [vmem:[#allocation4 + $0x150] sm:$0xff] }
 0x7d4   :  { %4740 = vmatprep.subr.mxu0 %v4413_v10  ;;  %4811 = vmatprep.subr.mxu1 %v4415_v54  ;;  %v4919_v10 = vld [vmem:[#allocation4 + $0x108] sm:$0xff]  ;;  %v4921_v54 = vld [vmem:[#allocation4 + $0x118] sm:$0xff] }
 0x7d5   :  { %4741 = vmatpush2.msra.mxu0 %v4412_v30  ;;  %4812 = vmatpush2.msra.mxu1 %v4414_v34  ;;  %v4918_v30 = vld [vmem:[#allocation4 + $0x100] sm:$0xff]  ;;  %v4920_v34 = vld [vmem:[#allocation4 + $0x110] sm:$0xff] }
 0x7d6   :  { %4743 = vmatmul.mubr.f32.vlgmr.msra.gmra.mxu0 %v6878_v25  ;;  %4814 = vmatmul.mubr.f32.vlgmr.msra.gmra.mxu1 %v6878_v25 }
 0x7d7   :  { %5142 = vmatprep.subr.mxu0 %v5007_v7  ;;  %5213 = vmatprep.subr.mxu1 %v5009_v40  ;;  %v4911_v7 = vld [vmem:[#allocation4 + $0xc8] sm:$0xff]  ;;  %v4913_v40 = vld [vmem:[#allocation4 + $0xd8] sm:$0xff] }
 0x7d8   :  { %5143 = vmatpush1.msra.mxu0 %v5006_v5  ;;  %5214 = vmatpush1.msra.mxu1 %v5008_v60  ;;  %v4910_v5 = vld [vmem:[#allocation4 + $0xc0] sm:$0xff]  ;;  %v4912_v60 = vld [vmem:[#allocation4 + $0xd0] sm:$0xff] }
 0x7d9   :  { %5144 = vmatprep.subr.mxu0 %v4999_v15  ;;  %5215 = vmatprep.subr.mxu1 %v5001_v14  ;;  %v4903_v15 = vld [vmem:[#allocation4 + $0x88] sm:$0xff]  ;;  %v4905_v14 = vld [vmem:[#allocation4 + $0x98] sm:$0xff] }
 0x7da   :  { %5145 = vmatpush1.msra.mxu0 %v4998_v28  ;;  %5216 = vmatpush1.msra.mxu1 %v5000_v26  ;;  %v4902_v28 = vld [vmem:[#allocation4 + $0x80] sm:$0xff]  ;;  %v4904_v26 = vld [vmem:[#allocation4 + $0x90] sm:$0xff] }
 0x7db   :  { %5146 = vmatprep.subr.mxu0 %v4991_v17  ;;  %5217 = vmatprep.subr.mxu1 %v4993_v48  ;;  %v4895_v17 = vld [vmem:[#allocation4 + $0x48] sm:$0xff]  ;;  %v4897_v48 = vld [vmem:[#allocation4 + $0x58] sm:$0xff] }
 0x7dc   :  { %5147 = vmatpush1.msra.mxu0 %v4990_v0  ;;  %5218 = vmatpush1.msra.mxu1 %v4992_v19  ;;  %v4894_v0 = vld [vmem:[#allocation4 + $0x40] sm:$0xff]  ;;  %v4896_v19 = vld [vmem:[#allocation4 + $0x50] sm:$0xff] }
 0x7dd   :  { %5148 = vmatprep.subr.mxu0 %v4983_v3  ;;  %5219 = vmatprep.subr.mxu1 %v4985_v23  ;;  %v4887_v3 = vld [vmem:[#allocation4 + $0x8] sm:$0xff]  ;;  %v4889_v23 = vld [vmem:[#allocation4 + $0x18] sm:$0xff] }
 0x7de   :  { %5149 = vmatpush1.msra.mxu0 %v4982_v27  ;;  %5220 = vmatpush1.msra.mxu1 %v4984_v29  ;;  %v4886_v27 = vld [vmem:[#allocation4] sm:$0xff]  ;;  %v4888_v29 = vld [vmem:[#allocation4 + $0x10] sm:$0xff] }
 0x7df   :  { %5150 = vmatprep.subr.mxu0 %v4975_v62  ;;  %5221 = vmatprep.subr.mxu1 %v4977_v8  ;;  %v5135_v62 = vld [vmem:[#allocation4 + $0x7c8] sm:$0xff]  ;;  %v5137_v8 = vld [vmem:[#allocation4 + $0x7d8] sm:$0xff] }
 0x7e0   :  { %5151 = vmatpush1.msra.mxu0 %v4974_v63  ;;  %5222 = vmatpush1.msra.mxu1 %v4976_v21  ;;  %v5134_v63 = vld [vmem:[#allocation4 + $0x7c0] sm:$0xff]  ;;  %v5136_v21 = vld [vmem:[#allocation4 + $0x7d0] sm:$0xff] }
 0x7e1   :  { %5152 = vmatprep.subr.mxu0 %v4967_v39  ;;  %5223 = vmatprep.subr.mxu1 %v4969_v59  ;;  %v5127_v39 = vld [vmem:[#allocation4 + $0x788] sm:$0xff]  ;;  %v5129_v59 = vld [vmem:[#allocation4 + $0x798] sm:$0xff] }
 0x7e2   :  { %5153 = vmatpush1.msra.mxu0 %v4966_v24  ;;  %5224 = vmatpush1.msra.mxu1 %v4968_v55  ;;  %v5126_v24 = vld [vmem:[#allocation4 + $0x780] sm:$0xff]  ;;  %v5128_v55 = vld [vmem:[#allocation4 + $0x790] sm:$0xff] }
 0x7e3   :  { %5154 = vmatprep.subr.mxu0 %v4959_v37  ;;  %5225 = vmatprep.subr.mxu1 %v4961_v38  ;;  %v5119_v37 = vld [vmem:[#allocation4 + $0x748] sm:$0xff]  ;;  %v5121_v38 = vld [vmem:[#allocation4 + $0x758] sm:$0xff] }
 0x7e4   :  { %5155 = vmatpush1.msra.mxu0 %v4958_v49  ;;  %5226 = vmatpush1.msra.mxu1 %v4960_v35  ;;  %v5118_v49 = vld [vmem:[#allocation4 + $0x740] sm:$0xff]  ;;  %v5120_v35 = vld [vmem:[#allocation4 + $0x750] sm:$0xff] }
 0x7e5   :  { %5156 = vmatprep.subr.mxu0 %v4951_v12  ;;  %5227 = vmatprep.subr.mxu1 %v4953_v32  ;;  %v5111_v12 = vld [vmem:[#allocation4 + $0x708] sm:$0xff]  ;;  %v5113_v32 = vld [vmem:[#allocation4 + $0x718] sm:$0xff] }
 0x7e6   :  { %5157 = vmatpush1.msra.mxu0 %v4950_v61  ;;  %5228 = vmatpush1.msra.mxu1 %v4952_v41  ;;  %v5110_v61 = vld [vmem:[#allocation4 + $0x700] sm:$0xff]  ;;  %v5112_v41 = vld [vmem:[#allocation4 + $0x710] sm:$0xff] }
 0x7e7   :  { %5158 = vmatprep.subr.mxu0 %v4943_v42  ;;  %5229 = vmatprep.subr.mxu1 %v4945_v50  ;;  %v5103_v42 = vld [vmem:[#allocation4 + $0x6c8] sm:$0xff]  ;;  %v5105_v50 = vld [vmem:[#allocation4 + $0x6d8] sm:$0xff] }
 0x7e8   :  { %5159 = vmatpush1.msra.mxu0 %v4942_v36  ;;  %5230 = vmatpush1.msra.mxu1 %v4944_v18  ;;  %v5102_v36 = vld [vmem:[#allocation4 + $0x6c0] sm:$0xff]  ;;  %v5104_v18 = vld [vmem:[#allocation4 + $0x6d0] sm:$0xff] }
 0x7e9   :  { %5160 = vmatprep.subr.mxu0 %v4935_v31  ;;  %5231 = vmatprep.subr.mxu1 %v4937_v9  ;;  %v5095_v31 = vld [vmem:[#allocation4 + $0x688] sm:$0xff]  ;;  %v5097_v9 = vld [vmem:[#allocation4 + $0x698] sm:$0xff] }
 0x7ea   :  { %5161 = vmatpush1.msra.mxu0 %v4934_v6  ;;  %5232 = vmatpush1.msra.mxu1 %v4936_v2  ;;  %v5094_v6 = vld [vmem:[#allocation4 + $0x680] sm:$0xff]  ;;  %v5096_v2 = vld [vmem:[#allocation4 + $0x690] sm:$0xff] }
 0x7eb   :  { %5162 = vmatprep.subr.mxu0 %v4927_v22  ;;  %5233 = vmatprep.subr.mxu1 %v4929_v33  ;;  %v5087_v22 = vld [vmem:[#allocation4 + $0x648] sm:$0xff]  ;;  %v5089_v33 = vld [vmem:[#allocation4 + $0x658] sm:$0xff] }
 0x7ec   :  { %5163 = vmatpush1.msra.mxu0 %v4926_v13  ;;  %5234 = vmatpush1.msra.mxu1 %v4928_v43  ;;  %v5086_v13 = vld [vmem:[#allocation4 + $0x640] sm:$0xff]  ;;  %v5088_v43 = vld [vmem:[#allocation4 + $0x650] sm:$0xff] }
 0x7ed   :  { %5164 = vmatprep.subr.mxu0 %v4919_v10  ;;  %5235 = vmatprep.subr.mxu1 %v4921_v54  ;;  %v5079_v10 = vld [vmem:[#allocation4 + $0x608] sm:$0xff]  ;;  %v5081_v54 = vld [vmem:[#allocation4 + $0x618] sm:$0xff] }
 0x7ee   :  { %5165 = vmatpush1.msra.mxu0 %v4918_v30  ;;  %5236 = vmatpush1.msra.mxu1 %v4920_v34  ;;  %v5078_v30 = vld [vmem:[#allocation4 + $0x600] sm:$0xff]  ;;  %v5080_v34 = vld [vmem:[#allocation4 + $0x610] sm:$0xff] }
 0x7ef   :  { %5166 = vmatprep.subr.mxu0 %v4911_v7  ;;  %5237 = vmatprep.subr.mxu1 %v4913_v40  ;;  %v5071_v7 = vld [vmem:[#allocation4 + $0x5c8] sm:$0xff]  ;;  %v5073_v40 = vld [vmem:[#allocation4 + $0x5d8] sm:$0xff] }
 0x7f0   :  { %5167 = vmatpush1.msra.mxu0 %v4910_v5  ;;  %5238 = vmatpush1.msra.mxu1 %v4912_v60  ;;  %v5070_v5 = vld [vmem:[#allocation4 + $0x5c0] sm:$0xff]  ;;  %v5072_v60 = vld [vmem:[#allocation4 + $0x5d0] sm:$0xff] }
 0x7f1   :  { %5168 = vmatprep.subr.mxu0 %v4903_v15  ;;  %5239 = vmatprep.subr.mxu1 %v4905_v14  ;;  %v5063_v15 = vld [vmem:[#allocation4 + $0x588] sm:$0xff]  ;;  %v5065_v14 = vld [vmem:[#allocation4 + $0x598] sm:$0xff] }
 0x7f2   :  { %5169 = vmatpush1.msra.mxu0 %v4902_v28  ;;  %5240 = vmatpush1.msra.mxu1 %v4904_v26  ;;  %v5062_v28 = vld [vmem:[#allocation4 + $0x580] sm:$0xff]  ;;  %v5064_v26 = vld [vmem:[#allocation4 + $0x590] sm:$0xff] }
 0x7f3   :  { %5170 = vmatprep.subr.mxu0 %v4895_v17  ;;  %5241 = vmatprep.subr.mxu1 %v4897_v48  ;;  %v5055_v17 = vld [vmem:[#allocation4 + $0x548] sm:$0xff]  ;;  %v5057_v48 = vld [vmem:[#allocation4 + $0x558] sm:$0xff] }
 0x7f4   :  { %5171 = vmatpush1.msra.mxu0 %v4894_v0  ;;  %5242 = vmatpush1.msra.mxu1 %v4896_v19  ;;  %v5054_v0 = vld [vmem:[#allocation4 + $0x540] sm:$0xff]  ;;  %v5056_v19 = vld [vmem:[#allocation4 + $0x550] sm:$0xff] }
 0x7f5   :  { %5172 = vmatprep.subr.mxu0 %v4887_v3  ;;  %5243 = vmatprep.subr.mxu1 %v4889_v23  ;;  %v5047_v3 = vld [vmem:[#allocation4 + $0x508] sm:$0xff]  ;;  %v5049_v23 = vld [vmem:[#allocation4 + $0x518] sm:$0xff] }
 0x7f6   :  { %5173 = vmatpush1.msra.mxu0 %v4886_v27  ;;  %5244 = vmatpush1.msra.mxu1 %v4888_v29  ;;  %v5046_v27 = vld [vmem:[#allocation4 + $0x500] sm:$0xff]  ;;  %v5048_v29 = vld [vmem:[#allocation4 + $0x510] sm:$0xff] }
 0x7f7   :  { %5174 = vmatprep.subr.mxu0 %v5135_v62  ;;  %5245 = vmatprep.subr.mxu1 %v5137_v8  ;;  %v5039_v62 = vld [vmem:[#allocation4 + $0x4c8] sm:$0xff]  ;;  %v5041_v8 = vld [vmem:[#allocation4 + $0x4d8] sm:$0xff] }
 0x7f8   :  { %5175 = vmatpush2.msra.mxu0 %v5134_v63  ;;  %5246 = vmatpush2.msra.mxu1 %v5136_v21  ;;  %v5038_v63 = vld [vmem:[#allocation4 + $0x4c0] sm:$0xff]  ;;  %v5040_v21 = vld [vmem:[#allocation4 + $0x4d0] sm:$0xff] }
 0x7f9   :  { %5176 = vmatprep.subr.mxu0 %v5127_v39  ;;  %5247 = vmatprep.subr.mxu1 %v5129_v59  ;;  %v5031_v39 = vld [vmem:[#allocation4 + $0x488] sm:$0xff]  ;;  %v5033_v59 = vld [vmem:[#allocation4 + $0x498] sm:$0xff] }
 0x7fa   :  { %5177 = vmatpush2.msra.mxu0 %v5126_v24  ;;  %5248 = vmatpush2.msra.mxu1 %v5128_v55  ;;  %v5030_v24 = vld [vmem:[#allocation4 + $0x480] sm:$0xff]  ;;  %v5032_v55 = vld [vmem:[#allocation4 + $0x490] sm:$0xff] }
 0x7fb   :  { %5178 = vmatprep.subr.mxu0 %v5119_v37  ;;  %5249 = vmatprep.subr.mxu1 %v5121_v38  ;;  %v5023_v37 = vld [vmem:[#allocation4 + $0x448] sm:$0xff]  ;;  %v5025_v38 = vld [vmem:[#allocation4 + $0x458] sm:$0xff] }
 0x7fc   :  { %5179 = vmatpush2.msra.mxu0 %v5118_v49  ;;  %5250 = vmatpush2.msra.mxu1 %v5120_v35  ;;  %v5022_v49 = vld [vmem:[#allocation4 + $0x440] sm:$0xff]  ;;  %v5024_v35 = vld [vmem:[#allocation4 + $0x450] sm:$0xff] }
 0x7fd   :  { %5180 = vmatprep.subr.mxu0 %v5111_v12  ;;  %5251 = vmatprep.subr.mxu1 %v5113_v32  ;;  %v5015_v12 = vld [vmem:[#allocation4 + $0x408] sm:$0xff]  ;;  %v5017_v32 = vld [vmem:[#allocation4 + $0x418] sm:$0xff] }
 0x7fe   :  { %5181 = vmatpush2.msra.mxu0 %v5110_v61  ;;  %5252 = vmatpush2.msra.mxu1 %v5112_v41  ;;  %v5014_v61 = vld [vmem:[#allocation4 + $0x400] sm:$0xff]  ;;  %v5016_v41 = vld [vmem:[#allocation4 + $0x410] sm:$0xff] }
 0x7ff   :  { %5182 = vmatprep.subr.mxu0 %v5103_v42  ;;  %5253 = vmatprep.subr.mxu1 %v5105_v50  ;;  %v5011_v42 = vld [vmem:[#allocation4 + $0x3e8] sm:$0xff]  ;;  %v5013_v50 = vld [vmem:[#allocation4 + $0x3f8] sm:$0xff] }
 0x800   :  { %5183 = vmatpush2.msra.mxu0 %v5102_v36  ;;  %5254 = vmatpush2.msra.mxu1 %v5104_v18 }
 0x801   :  { %5184 = vmatprep.subr.mxu0 %v5095_v31  ;;  %5255 = vmatprep.subr.mxu1 %v5097_v9  ;;  %v7166_v9 = vld [vmem:[#allocation8_spill] sm:$0xff] }
 0x802   :  { %5185 = vmatpush2.msra.mxu0 %v5094_v6  ;;  %5256 = vmatpush2.msra.mxu1 %v5096_v2  ;;  %v7167_v2 = vld [vmem:[#allocation20_spill] sm:$0xff] }
 0x803   :  { %5186 = vmatprep.subr.mxu0 %v5087_v22  ;;  %5257 = vmatprep.subr.mxu1 %v5089_v33 }
 0x804   :  { %5187 = vmatpush2.msra.mxu0 %v5086_v13  ;;  %5258 = vmatpush2.msra.mxu1 %v5088_v43  ;;  %v7168_v13 = vld [vmem:[#allocation9_spill] sm:$0xff] }
 0x805   :  { %5188 = vmatprep.subr.mxu0 %v5079_v10  ;;  %5259 = vmatprep.subr.mxu1 %v5081_v54  ;;  %v7169_v54 = vld [vmem:[#allocation21_spill] sm:$0xff] }
 0x806   :  { %5189 = vmatpush2.msra.mxu0 %v5078_v30  ;;  %5260 = vmatpush2.msra.mxu1 %v5080_v34 }
 0x807   :  { %5190 = vmatprep.subr.mxu0 %v5071_v7  ;;  %5261 = vmatprep.subr.mxu1 %v5073_v40 }
 0x808   :  { %5191 = vmatpush2.msra.mxu0 %v5070_v5  ;;  %5262 = vmatpush2.msra.mxu1 %v5072_v60 }
 0x809   :  { %5192 = vmatprep.subr.mxu0 %v5063_v15  ;;  %5263 = vmatprep.subr.mxu1 %v5065_v14 }
 0x80a   :  { %5193 = vmatpush2.msra.mxu0 %v5062_v28  ;;  %5264 = vmatpush2.msra.mxu1 %v5064_v26 }
 0x80b   :  { %5194 = vmatprep.subr.mxu0 %v5055_v17  ;;  %5265 = vmatprep.subr.mxu1 %v5057_v48  ;;  %v7170_v48 = vld [vmem:[#allocation26_spill] sm:$0xff] }
 0x80c   :  { %5195 = vmatpush2.msra.mxu0 %v5054_v0  ;;  %5266 = vmatpush2.msra.mxu1 %v5056_v19  ;;  %v562_v0 = vadd.f32 %v7170_v48, %v6711_v44  ;;  %v4989_v48 = vld [vmem:[#allocation4 + $0x338] sm:$0xff] }
 0x80d   :  { %5196 = vmatprep.subr.mxu0 %v5047_v3  ;;  %5267 = vmatprep.subr.mxu1 %v5049_v23 }
 0x80e   :  { %5197 = vmatpush2.msra.mxu0 %v5046_v27  ;;  %5268 = vmatpush2.msra.mxu1 %v5048_v29  ;;  %v7171_v27 = vld [vmem:[#allocation27_spill] sm:$0xff] }
 0x80f   :  { %5198 = vmatprep.subr.mxu0 %v5039_v62  ;;  %5269 = vmatprep.subr.mxu1 %v5041_v8  ;;  %v564_v29 = vadd.f32 %v7171_v27, %v6714_v45  ;;  %v7172_v62 = vld [vmem:[#allocation14_spill] sm:$0xff]  ;;  %v4978_v27 = vld [vmem:[#allocation4 + $0x2e0] sm:$0xff] }
 0x810   :  { %5199 = vmatpush2.msra.mxu0 %v5038_v63  ;;  %5270 = vmatpush2.msra.mxu1 %v5040_v21 }
 0x811   :  { %5200 = vmatprep.subr.mxu0 %v5031_v39  ;;  %5271 = vmatprep.subr.mxu1 %v5033_v59 }
 0x812   :  { %5201 = vmatpush2.msra.mxu0 %v5030_v24  ;;  %5272 = vmatpush2.msra.mxu1 %v5032_v55  ;;  %v7173_v24 = vld [vmem:[#allocation15_spill] sm:$0xff] }
 0x813   :  { %5202 = vmatprep.subr.mxu0 %v5023_v37  ;;  %5273 = vmatprep.subr.mxu1 %v5025_v38 }
 0x814   :  { %5203 = vmatpush2.msra.mxu0 %v5022_v49  ;;  %5274 = vmatpush2.msra.mxu1 %v5024_v35 }
 0x815   :  { %5204 = vmatprep.subr.mxu0 %v5015_v12  ;;  %5275 = vmatprep.subr.mxu1 %v5017_v32 }
 0x816   :  { %5205 = vmatpush2.msra.mxu0 %v5014_v61  ;;  %5276 = vmatpush2.msra.mxu1 %v5016_v41 }
 0x817   :  { %5284 = vmatprep.subr.mxu0 %v5011_v42  ;;  %5355 = vmatprep.subr.mxu1 %v5013_v50 }
 0x855   :  { %v4602_v36 = vpop.f32.mrf.mxu0  ;;  %v4673_v18 = vpop.f32.mrf.mxu1 }
 0x856   :  { %v4820_v6 = vadd.f32 %v4602_v36, %v7166_v9  ;;  %v4822_v22 = vadd.f32 %v4673_v18, %v7167_v2 }
 0x857   :  { %v4604_v31 = vpop.f32.mrf.mxu0  ;;  %v4675_v33 = vpop.f32.mrf.mxu1 }
 0x858   :  { %v4821_v43 = vadd.f32 %v4604_v31, %v7168_v13  ;;  %v5902_v10 = vmul.f32 -1.442695, %v4820_v6  ;;  %v4823_v30 = vadd.f32 %v4675_v33, %v7169_v54  ;;  %v5904_v34 = vmul.f32 -1.442695, %v4822_v22 }
 0x85a   :  { %v5903_v7 = vmul.f32 -1.442695, %v4821_v43  ;;  %6167 = vpow2.f32 %v5902_v10  ;;  %v5905_v40 = vmul.f32 -1.442695, %v4823_v30 }
 0x85b   :  { %6169 = vpow2.f32 %v5904_v34  ;;  %v5010_v34 = vld [vmem:[#allocation4 + $0x3e0] sm:$0xff] }
 0x85c   :  { %6171 = vpow2.f32 %v5903_v7  ;;  %v5003_v7 = vld [vmem:[#allocation4 + $0x3a8] sm:$0xff] }
 0x85d   :  { %6173 = vpow2.f32 %v5905_v40  ;;  %v5005_v40 = vld [vmem:[#allocation4 + $0x3b8] sm:$0xff] }
 0x867   :  { %v6168_v5 = vpop.eup %6167 }
 0x868   :  { %v6170_v60 = vpop.eup %6169  ;;  %v4846_v14 = vadd.f32 1.0, %v6168_v5  ;;  %v5002_v5 = vld [vmem:[#allocation4 + $0x3a0] sm:$0xff] }
 0x869   :  { %v6172_v15 = vpop.eup %6171  ;;  %v4848_v26 = vadd.f32 1.0, %v6170_v60  ;;  %v5004_v60 = vld [vmem:[#allocation4 + $0x3b0] sm:$0xff] }
 0x86a   :  { %v6174_v28 = vpop.eup %6173  ;;  %v4847_v17 = vadd.f32 1.0, %v6172_v15  ;;  %6175 = vrcp.f32 %v4846_v14  ;;  %v4995_v15 = vld [vmem:[#allocation4 + $0x368] sm:$0xff]  ;;  %v4997_v14 = vld [vmem:[#allocation4 + $0x378] sm:$0xff] }
 0x86b   :  { %v4849_v19 = vadd.f32 1.0, %v6174_v28  ;;  %6177 = vrcp.f32 %v4848_v26  ;;  %v4994_v28 = vld [vmem:[#allocation4 + $0x360] sm:$0xff]  ;;  %v4996_v26 = vld [vmem:[#allocation4 + $0x370] sm:$0xff] }
 0x86c   :  { %6179 = vrcp.f32 %v4847_v17  ;;  %v4987_v17 = vld [vmem:[#allocation4 + $0x328] sm:$0xff] }
 0x877   :  { %v6176_v49 = vpop.eup %6175 }
 0x878   :  { %v6178_v35 = vpop.eup %6177 }
 0x879   :  { %v6180_v12 = vpop.eup %6179  ;;  %v4866_v41 = vmul.f32 %v6178_v35, %v6869_v1  ;;  %v4956_v35 = vld [vmem:[#allocation4 + $0x230] sm:$0xff] }
 0x896   :  { %v4744_v3 = vpop.f32.mrf.mxu0  ;;  %v4815_v23 = vpop.f32.mrf.mxu1 }
 0x897   :  { %v4824_v8 = vadd.f32 %v4744_v3, %v7172_v62  ;;  %v4826_v63 = vadd.f32 %v4815_v23, %v562_v0  ;;  %v4986_v0 = vld [vmem:[#allocation4 + $0x320] sm:$0xff]  ;;  %v4979_v3 = vld [vmem:[#allocation4 + $0x2e8] sm:$0xff]  ;;  %v4981_v23 = vld [vmem:[#allocation4 + $0x2f8] sm:$0xff] }
 0x898   :  { %v4746_v21 = vpop.f32.mrf.mxu0  ;;  %v4817_v39 = vpop.f32.mrf.mxu1  ;;  %v4971_v62 = vld [vmem:[#allocation4 + $0x2a8] sm:$0xff] }
 0x899   :  { %v5906_v59 = vmul.f32 -1.442695, %v4824_v8  ;;  %6181 = vtanh.f32 %v4826_v63  ;;  %v4825_v55 = vadd.f32 %v4746_v21, %v7173_v24  ;;  %v4827_v37 = vadd.f32 %v4817_v39, %v564_v29  ;;  %v4980_v29 = vld [vmem:[#allocation4 + $0x2f0] sm:$0xff]  ;;  %v4973_v8 = vld [vmem:[#allocation4 + $0x2b8] sm:$0xff]  ;;  %v4970_v63 = vld [vmem:[#allocation4 + $0x2a0] sm:$0xff] }
 0x89a   :  { %6183 = vrcp.f32 %v4849_v19  ;;  %v4988_v19 = vld [vmem:[#allocation4 + $0x330] sm:$0xff]  ;;  %v4963_v39 = vld [vmem:[#allocation4 + $0x268] sm:$0xff]  ;;  %v4962_v24 = vld [vmem:[#allocation4 + $0x260] sm:$0xff] }
 0x89b   :  { %6185 = vpow2.f32 %v5906_v59  ;;  %v5907_v38 = vmul.f32 -1.442695, %v4825_v55  ;;  %v4972_v21 = vld [vmem:[#allocation4 + $0x2b0] sm:$0xff]  ;;  %v4965_v59 = vld [vmem:[#allocation4 + $0x278] sm:$0xff] }
 0x89c   :  { %6187 = vtanh.f32 %v4827_v37  ;;  %v4964_v55 = vld [vmem:[#allocation4 + $0x270] sm:$0xff]  ;;  %v4955_v37 = vld [vmem:[#allocation4 + $0x228] sm:$0xff] }
 0x89d   :  { %6189 = vpow2.f32 %v5907_v38  ;;  %v4957_v38 = vld [vmem:[#allocation4 + $0x238] sm:$0xff] }
 0x8a6   :  { %v6182_v32 = vpop.eup %6181 }
 0x8a7   :  { %v6184_v61 = vpop.eup %6183  ;;  %v4868_v42 = vmul.f32 %v6182_v32, %v6176_v49  ;;  %v4954_v49 = vld [vmem:[#allocation4 + $0x220] sm:$0xff]  ;;  %v4949_v32 = vld [vmem:[#allocation4 + $0x1f8] sm:$0xff] }
 0x8a8   :  { %v6186_v50 = vpop.eup %6185  ;;  %v4867_v6 = vmul.f32 %v6184_v61, %v6873_v4  ;;  %v5012_v4 = vld [vmem:[#allocation4 + $0x3f0] sm:$0xff]  ;;  %v4946_v61 = vld [vmem:[#allocation4 + $0x1e0] sm:$0xff] }
 0x8a9   :  { %v6188_v36 = vpop.eup %6187  ;;  %v4850_v18 = vadd.f32 1.0, %v6186_v50  ;;  %v6899_v31 = vadd.f32 %v4868_v42, %v4866_v41  ;;  %v4948_v41 = vld [vmem:[#allocation4 + $0x1f0] sm:$0xff]  ;;  %v4939_v42 = vld [vmem:[#allocation4 + $0x1a8] sm:$0xff]  ;;  %v4941_v50 = vld [vmem:[#allocation4 + $0x1b8] sm:$0xff] }
 0x8aa   :  { %v6190_v9 = vpop.eup %6189  ;;  %v4869_v2 = vmul.f32 %v6188_v36, %v6180_v12  ;;  %v4947_v12 = vld [vmem:[#allocation4 + $0x1e8] sm:$0xff]  ;;  %v4938_v36 = vld [vmem:[#allocation4 + $0x1a0] sm:$0xff] }
 0x8ab   :  { %6191 = vrcp.f32 %v4850_v18  ;;  %v4851_v22 = vadd.f32 1.0, %v6190_v9  ;;  %v4940_v18 = vld [vmem:[#allocation4 + $0x1b0] sm:$0xff]  ;;  %v4931_v9 = vld [vmem:[#allocation4 + $0x168] sm:$0xff] }
 0x8ac   :  { %6193 = vtanh.f32 %v6899_v31  ;;  %v6903_v33 = vadd.f32 %v4869_v2, %v4867_v6  ;;  %v4933_v6 = vld [vmem:[#allocation4 + $0x178] sm:$0xff]  ;;  %v4930_v2 = vld [vmem:[#allocation4 + $0x160] sm:$0xff] }
 0x8ad   :  { %6195 = vrcp.f32 %v4851_v22  ;;  %v4932_v22 = vld [vmem:[#allocation4 + $0x170] sm:$0xff] }
 0x8ae   :  { %6197 = vtanh.f32 %v6903_v33 }
 0x8b8   :  { %v6192_v1 = vpop.eup %6191 }
 0x8b9   :  { %v6194_v13 = vpop.eup %6193 }
 0x8ba   :  { %v6196_v43 = vpop.eup %6195  ;;  %v6908_v30 = vmul.f32 %v6194_v13, %v6192_v1  ;;  %v4923_v1 = vld [vmem:[#allocation4 + $0x128] sm:$0xff]  ;;  %v4925_v13 = vld [vmem:[#allocation4 + $0x138] sm:$0xff] }
 0x8bb   :  { %v6198_v10 = vpop.eup %6197 }
 0x8bc   :  { %v6906_v54 = vmul.f32 %v6198_v10, %v6196_v43  ;;  %v4922_v43 = vld [vmem:[#allocation4 + $0x120] sm:$0xff]  ;;  %v4924_v10 = vld [vmem:[#allocation4 + $0x130] sm:$0xff] }
 0x8be   :  { %5206 = vmatprep.mubr.f32.mxu0 %v6906_v54  ;;  %5277 = vmatprep.mubr.f32.mxu1 %v6906_v54 }
 0x8bf   :  { %5207 = vmatmul.mubr.f32.vlgmr.msra.gmra.mxu0 %v6908_v30  ;;  %5278 = vmatmul.mubr.f32.vlgmr.msra.gmra.mxu1 %v6908_v30 }
 0x8c0   :  { %5285 = vmatpush1.msra.mxu0 %v5010_v34  ;;  %5356 = vmatpush1.msra.mxu1 %v5012_v4  ;;  %v4915_v34 = vld [vmem:[#allocation4 + $0xe8] sm:$0xff]  ;;  %v4917_v4 = vld [vmem:[#allocation4 + $0xf8] sm:$0xff] }
 0x8c1   :  { %5286 = vmatprep.subr.mxu0 %v5003_v7  ;;  %5348 = vmatprep.mubr.f32.mxu0 %v6906_v54  ;;  %v4914_v7 = vld [vmem:[#allocation4 + $0xe0] sm:$0xff] }
 0x8c2   :  { %5357 = vmatprep.subr.mxu1 %v5005_v40  ;;  %5419 = vmatprep.mubr.f32.mxu1 %v6906_v54  ;;  %v4916_v40 = vld [vmem:[#allocation4 + $0xf0] sm:$0xff] }
 0x8c3   :  { %5287 = vmatpush1.msra.mxu0 %v5002_v5  ;;  %5358 = vmatpush1.msra.mxu1 %v5004_v60  ;;  %v4907_v5 = vld [vmem:[#allocation4 + $0xa8] sm:$0xff]  ;;  %v4909_v60 = vld [vmem:[#allocation4 + $0xb8] sm:$0xff] }
 0x8c4   :  { %5288 = vmatprep.subr.mxu0 %v4995_v15  ;;  %5359 = vmatprep.subr.mxu1 %v4997_v14  ;;  %v4906_v15 = vld [vmem:[#allocation4 + $0xa0] sm:$0xff]  ;;  %v4908_v14 = vld [vmem:[#allocation4 + $0xb0] sm:$0xff] }
 0x8c5   :  { %5289 = vmatpush1.msra.mxu0 %v4994_v28  ;;  %5360 = vmatpush1.msra.mxu1 %v4996_v26  ;;  %v4899_v28 = vld [vmem:[#allocation4 + $0x68] sm:$0xff]  ;;  %v4901_v26 = vld [vmem:[#allocation4 + $0x78] sm:$0xff] }
 0x8c6   :  { %5290 = vmatprep.subr.mxu0 %v4987_v17  ;;  %5361 = vmatprep.subr.mxu1 %v4989_v48  ;;  %v4898_v17 = vld [vmem:[#allocation4 + $0x60] sm:$0xff]  ;;  %v4900_v48 = vld [vmem:[#allocation4 + $0x70] sm:$0xff] }
 0x8c7   :  { %5291 = vmatpush1.msra.mxu0 %v4986_v0  ;;  %5362 = vmatpush1.msra.mxu1 %v4988_v19  ;;  %v4891_v0 = vld [vmem:[#allocation4 + $0x28] sm:$0xff]  ;;  %v4893_v19 = vld [vmem:[#allocation4 + $0x38] sm:$0xff] }
 0x8c8   :  { %5292 = vmatprep.subr.mxu0 %v4979_v3  ;;  %5363 = vmatprep.subr.mxu1 %v4981_v23  ;;  %v4890_v3 = vld [vmem:[#allocation4 + $0x20] sm:$0xff]  ;;  %v4892_v23 = vld [vmem:[#allocation4 + $0x30] sm:$0xff] }
 0x8c9   :  { %5293 = vmatpush1.msra.mxu0 %v4978_v27  ;;  %5364 = vmatpush1.msra.mxu1 %v4980_v29  ;;  %v5139_v27 = vld [vmem:[#allocation4 + $0x7e8] sm:$0xff]  ;;  %v5141_v29 = vld [vmem:[#allocation4 + $0x7f8] sm:$0xff] }
 0x8ca   :  { %5294 = vmatprep.subr.mxu0 %v4971_v62  ;;  %5365 = vmatprep.subr.mxu1 %v4973_v8  ;;  %v5138_v62 = vld [vmem:[#allocation4 + $0x7e0] sm:$0xff]  ;;  %v5140_v8 = vld [vmem:[#allocation4 + $0x7f0] sm:$0xff] }
 0x8cb   :  { %5295 = vmatpush1.msra.mxu0 %v4970_v63  ;;  %5366 = vmatpush1.msra.mxu1 %v4972_v21  ;;  %v5131_v63 = vld [vmem:[#allocation4 + $0x7a8] sm:$0xff]  ;;  %v5133_v21 = vld [vmem:[#allocation4 + $0x7b8] sm:$0xff] }
 0x8cc   :  { %5296 = vmatprep.subr.mxu0 %v4963_v39  ;;  %5367 = vmatprep.subr.mxu1 %v4965_v59  ;;  %v5130_v39 = vld [vmem:[#allocation4 + $0x7a0] sm:$0xff]  ;;  %v5132_v59 = vld [vmem:[#allocation4 + $0x7b0] sm:$0xff] }
 0x8cd   :  { %5297 = vmatpush1.msra.mxu0 %v4962_v24  ;;  %5368 = vmatpush1.msra.mxu1 %v4964_v55  ;;  %v5123_v24 = vld [vmem:[#allocation4 + $0x768] sm:$0xff]  ;;  %v5125_v55 = vld [vmem:[#allocation4 + $0x778] sm:$0xff] }
 0x8ce   :  { %5298 = vmatprep.subr.mxu0 %v4955_v37  ;;  %5369 = vmatprep.subr.mxu1 %v4957_v38  ;;  %v5122_v37 = vld [vmem:[#allocation4 + $0x760] sm:$0xff]  ;;  %v5124_v38 = vld [vmem:[#allocation4 + $0x770] sm:$0xff] }
 0x8cf   :  { %5299 = vmatpush1.msra.mxu0 %v4954_v49  ;;  %5370 = vmatpush1.msra.mxu1 %v4956_v35  ;;  %v5115_v49 = vld [vmem:[#allocation4 + $0x728] sm:$0xff]  ;;  %v5117_v35 = vld [vmem:[#allocation4 + $0x738] sm:$0xff] }
 0x8d0   :  { %5300 = vmatprep.subr.mxu0 %v4947_v12  ;;  %5371 = vmatprep.subr.mxu1 %v4949_v32  ;;  %v5114_v12 = vld [vmem:[#allocation4 + $0x720] sm:$0xff]  ;;  %v5116_v32 = vld [vmem:[#allocation4 + $0x730] sm:$0xff] }
 0x8d1   :  { %5301 = vmatpush1.msra.mxu0 %v4946_v61  ;;  %5372 = vmatpush1.msra.mxu1 %v4948_v41  ;;  %v5107_v61 = vld [vmem:[#allocation4 + $0x6e8] sm:$0xff]  ;;  %v5109_v41 = vld [vmem:[#allocation4 + $0x6f8] sm:$0xff] }
 0x8d2   :  { %5302 = vmatprep.subr.mxu0 %v4939_v42  ;;  %5373 = vmatprep.subr.mxu1 %v4941_v50  ;;  %v5106_v42 = vld [vmem:[#allocation4 + $0x6e0] sm:$0xff]  ;;  %v5108_v50 = vld [vmem:[#allocation4 + $0x6f0] sm:$0xff] }
 0x8d3   :  { %5303 = vmatpush1.msra.mxu0 %v4938_v36  ;;  %5374 = vmatpush1.msra.mxu1 %v4940_v18  ;;  %v5099_v36 = vld [vmem:[#allocation4 + $0x6a8] sm:$0xff]  ;;  %v5101_v18 = vld [vmem:[#allocation4 + $0x6b8] sm:$0xff] }
 0x8d4   :  { %5304 = vmatprep.subr.mxu0 %v4931_v9  ;;  %5375 = vmatprep.subr.mxu1 %v4933_v6  ;;  %v5098_v9 = vld [vmem:[#allocation4 + $0x6a0] sm:$0xff]  ;;  %v5100_v6 = vld [vmem:[#allocation4 + $0x6b0] sm:$0xff] }
 0x8d5   :  { %5305 = vmatpush1.msra.mxu0 %v4930_v2  ;;  %5376 = vmatpush1.msra.mxu1 %v4932_v22  ;;  %v5091_v2 = vld [vmem:[#allocation4 + $0x668] sm:$0xff]  ;;  %v5093_v22 = vld [vmem:[#allocation4 + $0x678] sm:$0xff] }
 0x8d6   :  { %5306 = vmatprep.subr.mxu0 %v4923_v1  ;;  %5377 = vmatprep.subr.mxu1 %v4925_v13  ;;  %v5090_v1 = vld [vmem:[#allocation4 + $0x660] sm:$0xff]  ;;  %v5092_v13 = vld [vmem:[#allocation4 + $0x670] sm:$0xff] }
 0x8d7   :  { %5307 = vmatpush1.msra.mxu0 %v4922_v43  ;;  %5378 = vmatpush1.msra.mxu1 %v4924_v10  ;;  %v5083_v43 = vld [vmem:[#allocation4 + $0x628] sm:$0xff]  ;;  %v5085_v10 = vld [vmem:[#allocation4 + $0x638] sm:$0xff] }
 0x8d8   :  { %5308 = vmatprep.subr.mxu0 %v4915_v34  ;;  %5379 = vmatprep.subr.mxu1 %v4917_v4  ;;  %v5082_v34 = vld [vmem:[#allocation4 + $0x620] sm:$0xff]  ;;  %v5084_v4 = vld [vmem:[#allocation4 + $0x630] sm:$0xff] }
 0x8d9   :  { %5309 = vmatpush1.msra.mxu0 %v4914_v7  ;;  %5380 = vmatpush1.msra.mxu1 %v4916_v40  ;;  %v5075_v7 = vld [vmem:[#allocation4 + $0x5e8] sm:$0xff]  ;;  %v5077_v40 = vld [vmem:[#allocation4 + $0x5f8] sm:$0xff] }
 0x8da   :  { %5310 = vmatprep.subr.mxu0 %v4907_v5  ;;  %5381 = vmatprep.subr.mxu1 %v4909_v60  ;;  %v5074_v5 = vld [vmem:[#allocation4 + $0x5e0] sm:$0xff]  ;;  %v5076_v60 = vld [vmem:[#allocation4 + $0x5f0] sm:$0xff] }
 0x8db   :  { %5311 = vmatpush1.msra.mxu0 %v4906_v15  ;;  %5382 = vmatpush1.msra.mxu1 %v4908_v14  ;;  %v5067_v15 = vld [vmem:[#allocation4 + $0x5a8] sm:$0xff]  ;;  %v5069_v14 = vld [vmem:[#allocation4 + $0x5b8] sm:$0xff] }
 0x8dc   :  { %5312 = vmatprep.subr.mxu0 %v4899_v28  ;;  %5383 = vmatprep.subr.mxu1 %v4901_v26  ;;  %v5066_v28 = vld [vmem:[#allocation4 + $0x5a0] sm:$0xff]  ;;  %v5068_v26 = vld [vmem:[#allocation4 + $0x5b0] sm:$0xff] }
 0x8dd   :  { %5313 = vmatpush1.msra.mxu0 %v4898_v17  ;;  %5384 = vmatpush1.msra.mxu1 %v4900_v48  ;;  %v5059_v17 = vld [vmem:[#allocation4 + $0x568] sm:$0xff]  ;;  %v5061_v48 = vld [vmem:[#allocation4 + $0x578] sm:$0xff] }
 0x8de   :  { %5314 = vmatprep.subr.mxu0 %v4891_v0  ;;  %5385 = vmatprep.subr.mxu1 %v4893_v19  ;;  %v5058_v0 = vld [vmem:[#allocation4 + $0x560] sm:$0xff]  ;;  %v5060_v19 = vld [vmem:[#allocation4 + $0x570] sm:$0xff] }
 0x8df   :  { %5315 = vmatpush1.msra.mxu0 %v4890_v3  ;;  %5386 = vmatpush1.msra.mxu1 %v4892_v23  ;;  %v5051_v3 = vld [vmem:[#allocation4 + $0x528] sm:$0xff]  ;;  %v5053_v23 = vld [vmem:[#allocation4 + $0x538] sm:$0xff] }
 0x8e0   :  { %5316 = vmatprep.subr.mxu0 %v5139_v27  ;;  %5387 = vmatprep.subr.mxu1 %v5141_v29  ;;  %v5050_v27 = vld [vmem:[#allocation4 + $0x520] sm:$0xff]  ;;  %v5052_v29 = vld [vmem:[#allocation4 + $0x530] sm:$0xff] }
 0x8e1   :  { %5317 = vmatpush2.msra.mxu0 %v5138_v62  ;;  %5388 = vmatpush2.msra.mxu1 %v5140_v8  ;;  %v5043_v62 = vld [vmem:[#allocation4 + $0x4e8] sm:$0xff]  ;;  %v5045_v8 = vld [vmem:[#allocation4 + $0x4f8] sm:$0xff] }
 0x8e2   :  { %5318 = vmatprep.subr.mxu0 %v5131_v63  ;;  %5389 = vmatprep.subr.mxu1 %v5133_v21  ;;  %v5042_v63 = vld [vmem:[#allocation4 + $0x4e0] sm:$0xff]  ;;  %v5044_v21 = vld [vmem:[#allocation4 + $0x4f0] sm:$0xff] }
 0x8e3   :  { %5319 = vmatpush2.msra.mxu0 %v5130_v39  ;;  %5390 = vmatpush2.msra.mxu1 %v5132_v59  ;;  %v5035_v39 = vld [vmem:[#allocation4 + $0x4a8] sm:$0xff]  ;;  %v5037_v59 = vld [vmem:[#allocation4 + $0x4b8] sm:$0xff] }
 0x8e4   :  { %5320 = vmatprep.subr.mxu0 %v5123_v24  ;;  %5391 = vmatprep.subr.mxu1 %v5125_v55  ;;  %v5034_v24 = vld [vmem:[#allocation4 + $0x4a0] sm:$0xff]  ;;  %v5036_v55 = vld [vmem:[#allocation4 + $0x4b0] sm:$0xff] }
 0x8e5   :  { %5321 = vmatpush2.msra.mxu0 %v5122_v37  ;;  %5392 = vmatpush2.msra.mxu1 %v5124_v38  ;;  %v5027_v37 = vld [vmem:[#allocation4 + $0x468] sm:$0xff]  ;;  %v5029_v38 = vld [vmem:[#allocation4 + $0x478] sm:$0xff] }
 0x8e6   :  { %5322 = vmatprep.subr.mxu0 %v5115_v49  ;;  %5393 = vmatprep.subr.mxu1 %v5117_v35  ;;  %v5026_v49 = vld [vmem:[#allocation4 + $0x460] sm:$0xff]  ;;  %v5028_v35 = vld [vmem:[#allocation4 + $0x470] sm:$0xff] }
 0x8e7   :  { %5323 = vmatpush2.msra.mxu0 %v5114_v12  ;;  %5394 = vmatpush2.msra.mxu1 %v5116_v32  ;;  %v5019_v12 = vld [vmem:[#allocation4 + $0x428] sm:$0xff]  ;;  %v5021_v32 = vld [vmem:[#allocation4 + $0x438] sm:$0xff] }
 0x8e8   :  { %5324 = vmatprep.subr.mxu0 %v5107_v61  ;;  %5395 = vmatprep.subr.mxu1 %v5109_v41  ;;  %v5018_v61 = vld [vmem:[#allocation4 + $0x420] sm:$0xff]  ;;  %v5020_v41 = vld [vmem:[#allocation4 + $0x430] sm:$0xff] }
 0x8e9   :  { %5325 = vmatpush2.msra.mxu0 %v5106_v42  ;;  %5396 = vmatpush2.msra.mxu1 %v5108_v50  ;;  %v5547_v42 = vld [vmem:[%s7133_s4 + $0xf8] sm:$0xff] }
 0x8ea   :  { %5326 = vmatprep.subr.mxu0 %v5099_v36  ;;  %5397 = vmatprep.subr.mxu1 %v5101_v18  ;;  %v5531_v50 = vld [vmem:[%s7133_s4 + $0x78] sm:$0xff]  ;;  %v5501_v36 = vmax.f32 %v6726_v53, 0.0  ;;  %v5546_v18 = vld [vmem:[%s7133_s4 + $0xf0] sm:$0xff]  ;;  %v5529_v53 = vld [vmem:[%s7133_s4 + $0x68] sm:$0xff] }
 0x8eb   :  { %5327 = vmatpush2.msra.mxu0 %v5098_v9  ;;  %5398 = vmatpush2.msra.mxu1 %v5100_v6  ;;  %v5530_v9 = vld [vmem:[%s7133_s4 + $0x70] sm:$0xff]  ;;  %v5545_v6 = vld [vmem:[%s7133_s4 + $0xe8] sm:$0xff] }
 0x8ec   :  { %5328 = vmatprep.subr.mxu0 %v5091_v2  ;;  %5399 = vmatprep.subr.mxu1 %v5093_v22  ;;  %v5544_v2 = vld [vmem:[%s7133_s4 + $0xe0] sm:$0xff] }
 0x8ed   :  { %5329 = vmatpush2.msra.mxu0 %v5090_v1  ;;  %5400 = vmatpush2.msra.mxu1 %v5092_v13  ;;  %v5528_v22 = vld [vmem:[%s7133_s4 + $0x60] sm:$0xff]  ;;  %v5543_v1 = vld [vmem:[%s7133_s4 + $0xd8] sm:$0xff] }
 0x8ee   :  { %5330 = vmatprep.subr.mxu0 %v5083_v43  ;;  %5401 = vmatprep.subr.mxu1 %v5085_v10  ;;  %v5527_v13 = vld [vmem:[%s7133_s4 + $0x58] sm:$0xff]  ;;  %v5542_v43 = vld [vmem:[%s7133_s4 + $0xd0] sm:$0xff] }
 0x8ef   :  { %5331 = vmatpush2.msra.mxu0 %v5082_v34  ;;  %5402 = vmatpush2.msra.mxu1 %v5084_v4  ;;  %v5526_v10 = vld [vmem:[%s7133_s4 + $0x50] sm:$0xff]  ;;  %v5541_v34 = vld [vmem:[%s7133_s4 + $0xc8] sm:$0xff] }
 0x8f0   :  { %5332 = vmatprep.subr.mxu0 %v5075_v7  ;;  %5403 = vmatprep.subr.mxu1 %v5077_v40  ;;  %v5525_v4 = vld [vmem:[%s7133_s4 + $0x48] sm:$0xff]  ;;  %v5540_v7 = vld [vmem:[%s7133_s4 + $0xc0] sm:$0xff] }
 0x8f1   :  { %5333 = vmatpush2.msra.mxu0 %v5074_v5  ;;  %5404 = vmatpush2.msra.mxu1 %v5076_v60  ;;  %v5524_v40 = vld [vmem:[%s7133_s4 + $0x40] sm:$0xff]  ;;  %v5539_v5 = vld [vmem:[%s7133_s4 + $0xb8] sm:$0xff] }
 0x8f2   :  { %5334 = vmatprep.subr.mxu0 %v5067_v15  ;;  %5405 = vmatprep.subr.mxu1 %v5069_v14  ;;  %v5523_v60 = vld [vmem:[%s7133_s4 + $0x38] sm:$0xff]  ;;  %v5538_v15 = vld [vmem:[%s7133_s4 + $0xb0] sm:$0xff] }
 0x8f3   :  { %5335 = vmatpush2.msra.mxu0 %v5066_v28  ;;  %5406 = vmatpush2.msra.mxu1 %v5068_v26  ;;  %v5522_v14 = vld [vmem:[%s7133_s4 + $0x30] sm:$0xff]  ;;  %v5537_v28 = vld [vmem:[%s7133_s4 + $0xa8] sm:$0xff] }
 0x8f4   :  { %5336 = vmatprep.subr.mxu0 %v5059_v17  ;;  %5407 = vmatprep.subr.mxu1 %v5061_v48  ;;  %v5521_v26 = vld [vmem:[%s7133_s4 + $0x28] sm:$0xff]  ;;  %v5536_v17 = vld [vmem:[%s7133_s4 + $0xa0] sm:$0xff] }
 0x8f5   :  { %5337 = vmatpush2.msra.mxu0 %v5058_v0  ;;  %5408 = vmatpush2.msra.mxu1 %v5060_v19  ;;  %v5520_v48 = vld [vmem:[%s7133_s4 + $0x20] sm:$0xff]  ;;  %v5535_v0 = vld [vmem:[%s7133_s4 + $0x98] sm:$0xff] }
 0x8f6   :  { %5338 = vmatprep.subr.mxu0 %v5051_v3  ;;  %5409 = vmatprep.subr.mxu1 %v5053_v23  ;;  %v5519_v19 = vld [vmem:[%s7133_s4 + $0x18] sm:$0xff]  ;;  %v5534_v3 = vld [vmem:[%s7133_s4 + $0x90] sm:$0xff] }
 0x8f7   :  { %5339 = vmatpush2.msra.mxu0 %v5050_v27  ;;  %5410 = vmatpush2.msra.mxu1 %v5052_v29  ;;  %v5518_v23 = vld [vmem:[%s7133_s4 + $0x10] sm:$0xff]  ;;  %v5533_v27 = vld [vmem:[%s7133_s4 + $0x88] sm:$0xff] }
 0x8f8   :  { %5340 = vmatprep.subr.mxu0 %v5043_v62  ;;  %5411 = vmatprep.subr.mxu1 %v5045_v8  ;;  %v5517_v29 = vld [vmem:[%s7133_s4 + $0x8] sm:$0xff]  ;;  %v5532_v62 = vld [vmem:[%s7133_s4 + $0x80] sm:$0xff] }
 0x8f9   :  { %5341 = vmatpush2.msra.mxu0 %v5042_v63  ;;  %5412 = vmatpush2.msra.mxu1 %v5044_v21  ;;  %v5516_v8 = vld [vmem:[%s7133_s4] sm:$0xff]  ;;  %v5500_v63 = vmax.f32 %v6728_v46, 0.0  ;;  %v5503_v21 = vmax.f32 %v6756_v16, 0.0  ;;  %v5509_v46 = vmax.f32 %v6846_v11, 0.0  ;;  %v5508_v16 = vmax.f32 %v6848_v58, 0.0 }
 0x8fa   :  { %5342 = vmatprep.subr.mxu0 %v5035_v39  ;;  %5413 = vmatprep.subr.mxu1 %v5037_v59  ;;  %v5502_v39 = vmax.f32 %v6758_v52, 0.0  ;;  %v5505_v59 = vmax.f32 %v6786_v47, 0.0  ;;  %v5511_v52 = vmax.f32 %v6876_v56, 0.0  ;;  %v5510_v47 = vmax.f32 %v6878_v25, 0.0  ;;  %v7176_v56 = vld [vmem:[#allocation13_spill] sm:$0xff] }
 0x8fb   :  { %5343 = vmatpush2.msra.mxu0 %v5034_v24  ;;  %5414 = vmatpush2.msra.mxu1 %v5036_v55  ;;  %v5504_v24 = vmax.f32 %v6788_v20, 0.0  ;;  %v5507_v55 = vmax.f32 %v6816_v57, 0.0  ;;  %v5513_v20 = vmax.f32 %v6906_v54, 0.0  ;;  %v5512_v57 = vmax.f32 %v6908_v30, 0.0 }
 0x8fc   :  { %5344 = vmatprep.subr.mxu0 %v5027_v37  ;;  %5415 = vmatprep.subr.mxu1 %v5029_v38  ;;  %v5506_v37 = vmax.f32 %v6818_v51, 0.0 }
 0x8fd   :  { %5345 = vmatpush2.msra.mxu0 %v5026_v49  ;;  %5416 = vmatpush2.msra.mxu1 %v5028_v35  ;;  %v7174_v49 = vld [vmem:[#allocation11_spill] sm:$0xff] }
 0x8fe   :  { %5346 = vmatprep.subr.mxu0 %v5019_v12  ;;  %5417 = vmatprep.subr.mxu1 %v5021_v32  ;;  %v7175_v12 = vld [vmem:[#allocation22_spill] sm:$0xff] }
 0x8ff   :  { %5347 = vmatpush2.msra.mxu0 %v5018_v61  ;;  %5418 = vmatpush2.msra.mxu1 %v5020_v41 }
 0x900   :  { %5349 = vmatmul.mubr.f32.vlgmr.msra.gmra.mxu0 %v6908_v30  ;;  %5420 = vmatmul.mubr.f32.vlgmr.msra.gmra.mxu1 %v6908_v30 }
 0x901   :  { %5915 = vmatprep.subr.mxu0 %v5547_v42  ;;  %5619 = vmatprep.mubr.f32.mxu0 %v5501_v36  ;;  %v7177_v42 = vld [vmem:[#allocation23_spill] sm:$0xff] }
 0x902   :  { %5916 = vmatpush3.msra.mxu0 %v5531_v50 }
 0x903   :  { %5917 = vmatprep.subr.mxu0 %v5546_v18 }
 0x904   :  { %5918 = vmatpush3.msra.mxu0 %v5530_v9 }
 0x905   :  { %5919 = vmatprep.subr.mxu0 %v5545_v6 }
 0x906   :  { %5920 = vmatpush3.msra.mxu0 %v5529_v53 }
 0x907   :  { %5921 = vmatprep.subr.mxu0 %v5544_v2 }
 0x908   :  { %5922 = vmatpush3.msra.mxu0 %v5528_v22 }
 0x909   :  { %5923 = vmatprep.subr.mxu0 %v5543_v1  ;;  %v7178_v1 = vld [vmem:[#allocation28_spill] sm:$0xff] }
 0x90a   :  { %5924 = vmatpush3.msra.mxu0 %v5527_v13  ;;  %v568_v13 = vadd.f32 %v7178_v1, %v6711_v44 }
 0x90b   :  { %5925 = vmatprep.subr.mxu0 %v5542_v43 }
 0x90c   :  { %5926 = vmatpush3.msra.mxu0 %v5526_v10 }
 0x90d   :  { %5927 = vmatprep.subr.mxu0 %v5541_v34 }
 0x90e   :  { %5928 = vmatpush3.msra.mxu0 %v5525_v4  ;;  %v7179_v4 = vld [vmem:[#allocation29_spill] sm:$0xff] }
 0x90f   :  { %5929 = vmatprep.subr.mxu0 %v5540_v7  ;;  %v570_v7 = vadd.f32 %v7179_v4, %v6714_v45 }
 0x910   :  { %5930 = vmatpush3.msra.mxu0 %v5524_v40  ;;  %v7180_v40 = vld [vmem:[#allocation16_spill] sm:$0xff] }
 0x911   :  { %5931 = vmatprep.subr.mxu0 %v5539_v5 }
 0x912   :  { %5932 = vmatpush3.msra.mxu0 %v5523_v60 }
 0x913   :  { %5933 = vmatprep.subr.mxu0 %v5538_v15 }
 0x914   :  { %5934 = vmatpush3.msra.mxu0 %v5522_v14 }
 0x915   :  { %5935 = vmatprep.subr.mxu0 %v5537_v28 }
 0x916   :  { %5936 = vmatpush3.msra.mxu0 %v5521_v26  ;;  %v7181_v26 = vld [vmem:[#allocation17_spill] sm:$0xff] }
 0x917   :  { %5937 = vmatprep.subr.mxu0 %v5536_v17 }
 0x918   :  { %5938 = vmatpush3.msra.mxu0 %v5520_v48 }
 0x919   :  { %5939 = vmatprep.subr.mxu0 %v5535_v0 }
 0x91a   :  { %5940 = vmatpush3.msra.mxu0 %v5519_v19 }
 0x91b   :  { %5941 = vmatprep.subr.mxu0 %v5534_v3 }
 0x91c   :  { %5942 = vmatpush3.msra.mxu0 %v5518_v23 }
 0x91d   :  { %5943 = vmatprep.subr.mxu0 %v5533_v27 }
 0x91e   :  { %5944 = vmatpush3.msra.mxu0 %v5517_v29 }
 0x91f   :  { %5945 = vmatprep.subr.mxu0 %v5532_v62 }
 0x920   :  { %5946 = vmatpush3.msra.mxu0 %v5516_v8 }
 0x921   :  { %5620 = vmatmul.mubr.f32.vlgmr.msra.gmra.mxu0 %v5500_v63 }
 0x922   :  { %5624 = vmatprep.mubr.f32.mxu0 %v5503_v21 }
 0x925   :  { %5625 = vmatmul.mubr.f32.gmra.mxu0 %v5502_v39 }
 0x926   :  { %5629 = vmatprep.mubr.f32.mxu0 %v5505_v59 }
 0x929   :  { %5630 = vmatmul.mubr.f32.gmra.mxu0 %v5504_v24 }
 0x92a   :  { %5634 = vmatprep.mubr.f32.mxu0 %v5507_v55 }
 0x92d   :  { %5635 = vmatmul.mubr.f32.gmra.mxu0 %v5506_v37 }
 0x92e   :  { %5639 = vmatprep.mubr.f32.mxu0 %v5509_v46 }
 0x931   :  { %5640 = vmatmul.mubr.f32.gmra.mxu0 %v5508_v16 }
 0x932   :  { %5644 = vmatprep.mubr.f32.mxu0 %v5511_v52 }
 0x935   :  { %5645 = vmatmul.mubr.f32.gmra.mxu0 %v5510_v47 }
 0x936   :  { %5649 = vmatprep.mubr.f32.mxu0 %v5513_v20 }
 0x939   :  { %5650 = vmatmul.mubr.f32.gmra.mxu0 %v5512_v57 }
 0x97f   :  { %v5208_v51 = vpop.f32.mrf.mxu0  ;;  %v5279_v38 = vpop.f32.mrf.mxu1 }
 0x980   :  { %v5426_v35 = vadd.f32 %v5208_v51, %v7174_v49  ;;  %v5428_v58 = vadd.f32 %v5279_v38, %v7175_v12 }
 0x981   :  { %v5210_v11 = vpop.f32.mrf.mxu0  ;;  %v5281_v32 = vpop.f32.mrf.mxu1 }
 0x982   :  { %v5427_v61 = vadd.f32 %v5210_v11, %v7176_v56  ;;  %v5908_v41 = vmul.f32 -1.442695, %v5426_v35  ;;  %v5429_v25 = vadd.f32 %v5281_v32, %v7177_v42  ;;  %v5910_v50 = vmul.f32 -1.442695, %v5428_v58 }
 0x984   :  { %v5909_v54 = vmul.f32 -1.442695, %v5427_v61  ;;  %6199 = vpow2.f32 %v5908_v41  ;;  %v5911_v36 = vmul.f32 -1.442695, %v5429_v25 }
 0x985   :  { %6201 = vpow2.f32 %v5910_v50 }
 0x986   :  { %6203 = vpow2.f32 %v5909_v54 }
 0x987   :  { %6205 = vpow2.f32 %v5911_v36 }
 0x991   :  { %v6200_v30 = vpop.eup %6199 }
 0x992   :  { %v6202_v18 = vpop.eup %6201  ;;  %v5452_v6 = vadd.f32 1.0, %v6200_v30 }
 0x993   :  { %v6204_v9 = vpop.eup %6203  ;;  %v5454_v2 = vadd.f32 1.0, %v6202_v18 }
 0x994   :  { %v6206_v53 = vpop.eup %6205  ;;  %v5453_v22 = vadd.f32 1.0, %v6204_v9  ;;  %6207 = vrcp.f32 %v5452_v6 }
 0x995   :  { %v5455_v43 = vadd.f32 1.0, %v6206_v53  ;;  %6209 = vrcp.f32 %v5454_v2 }
 0x996   :  { %6211 = vrcp.f32 %v5453_v22 }
 0x9a1   :  { %v6208_v0 = vpop.eup %6207 }
 0x9a2   :  { %v6210_v19 = vpop.eup %6209 }
 0x9a3   :  { %v6212_v45 = vpop.eup %6211  ;;  %v5472_v27 = vmul.f32 %v6210_v19, %v6899_v31  ;;  %v7043_v31 = vld [vmem:[%s7134_s5] ss:$0 sm:$0xff] }
 0x9c0   :  { %v5350_v10 = vpop.f32.mrf.mxu0  ;;  %v5421_v34 = vpop.f32.mrf.mxu1 }
 0x9c1   :  { %v5430_v5 = vadd.f32 %v5350_v10, %v7180_v40  ;;  %v5432_v60 = vadd.f32 %v5421_v34, %v568_v13 }
 0x9c2   :  { %v5352_v15 = vpop.f32.mrf.mxu0  ;;  %v5423_v14 = vpop.f32.mrf.mxu1 }
 0x9c3   :  { %v5912_v28 = vmul.f32 -1.442695, %v5430_v5  ;;  %6213 = vtanh.f32 %v5432_v60  ;;  %v5431_v17 = vadd.f32 %v5352_v15, %v7181_v26  ;;  %v5433_v48 = vadd.f32 %v5423_v14, %v570_v7 }
 0x9c4   :  { %6215 = vrcp.f32 %v5455_v43 }
 0x9c5   :  { %6217 = vpow2.f32 %v5912_v28  ;;  %v5913_v44 = vmul.f32 -1.442695, %v5431_v17 }
 0x9c6   :  { %6219 = vtanh.f32 %v5433_v48 }
 0x9c7   :  { %6221 = vpow2.f32 %v5913_v44 }
 0x9d0   :  { %v6214_v3 = vpop.eup %6213 }
 0x9d1   :  { %v6216_v23 = vpop.eup %6215  ;;  %v5474_v29 = vmul.f32 %v6214_v3, %v6208_v0 }
 0x9d2   :  { %v6218_v62 = vpop.eup %6217  ;;  %v5473_v59 = vmul.f32 %v6216_v23, %v6903_v33 }
 0x9d3   :  { %v6220_v8 = vpop.eup %6219  ;;  %v5456_v63 = vadd.f32 1.0, %v6218_v62  ;;  %v5476_v21 = vadd.f32 %v5474_v29, %v5472_v27 }
 0x9d4   :  { %v6222_v39 = vpop.eup %6221  ;;  %v5475_v24 = vmul.f32 %v6220_v8, %v6212_v45 }
 0x9d5   :  { %6223 = vrcp.f32 %v5456_v63  ;;  %v5457_v55 = vadd.f32 1.0, %v6222_v39 }
 0x9d6   :  { %6225 = vtanh.f32 %v5476_v21  ;;  %v5477_v37 = vadd.f32 %v5475_v24, %v5473_v59 }
 0x9d7   :  { %6227 = vrcp.f32 %v5457_v55 }
 0x9d8   :  { %6229 = vtanh.f32 %v5477_v37 }
 0x9e1   :  { %v5947_v46 = vpop.f32.mrf.mxu0 }
 0x9e2   :  { %v6224_v16 = vpop.eup %6223 }
 0x9e3   :  { %v6226_v52 = vpop.eup %6225  ;;  %v5948_v47 = vpop.f32.mrf.mxu0 }
 0x9e4   :  { %v6228_v20 = vpop.eup %6227  ;;  %v5949_v57 = vadd.f32 %v5948_v47, %v5947_v46  ;;  %v5480_v51 = vmul.f32 %v6226_v52, %v6224_v16 }
 0x9e5   :  { %v6230_v33 = vpop.eup %6229  ;;  %v5950_v38 = vpop.f32.mrf.mxu0 }
 0x9e6   :  { %v5622_v11 = vadd.f32 %v5949_v57, %v7043_v31  ;;  %v5481_v49 = vmul.f32 %v6230_v33, %v6228_v20  ;;  %v5514_v41 = vmax.f32 %v5480_v51, 0.0 }
 0x9e7   :  { %v5951_v35 = vpop.f32.mrf.mxu0 }
 0x9e8   :  { %v5661_v12 = vsel %vm5660_vm1, %v5622_v11, -inf  ;;  %v5952_v58 = vadd.f32 %v5951_v35, %v5950_v38  ;;  %v5515_v32 = vmax.f32 %v5481_v49, 0.0 }
 0x9e9   :  { %v5662_v56 = vrot.slane %v5661_v12, 4  ;;  %v5953_v61 = vpop.f32.mrf.mxu0 }
 0x9ea   :  { %v5627_v42 = vadd.f32 %v5952_v58, %v7043_v31  ;;  %5654 = vmatprep.mubr.f32.mxu0 %v5515_v32 }
 0x9eb   :  { %v5663_v25 = vmax.f32 %v5661_v12, %v5662_v56  ;;  %v5954_v50 = vpop.f32.mrf.mxu0  ;;  %5655 = vmatmul.mubr.f32.gmra.mxu0 %v5514_v41 }
 0x9ec   :  { %v5668_v54 = vsel %vm5660_vm1, %v5627_v42, -inf  ;;  %v5955_v36 = vadd.f32 %v5954_v50, %v5953_v61 }
 0x9ed   :  { %v5664_v30 = vrot.slane %v5663_v25, 2  ;;  %v5669_v18 = vrot.slane %v5668_v54, 4  ;;  %v5956_v9 = vpop.f32.mrf.mxu0 }
 0x9ee   :  { %v5632_v6 = vadd.f32 %v5955_v36, %v7043_v31 }
 0x9ef   :  { %v5665_v53 = vmax.f32 %v5663_v25, %v5664_v30  ;;  %v5670_v2 = vmax.f32 %v5668_v54, %v5669_v18  ;;  %v5957_v22 = vpop.f32.mrf.mxu0 }
 0x9f0   :  { %v5675_v1 = vsel %vm5660_vm1, %v5632_v6, -inf  ;;  %v5958_v13 = vadd.f32 %v5957_v22, %v5956_v9 }
 0x9f1   :  { %v5666_v43 = vrot.slane %v5665_v53, 1  ;;  %v5671_v10 = vrot.slane %v5670_v2, 2  ;;  %v5676_v34 = vrot.slane %v5675_v1, 4  ;;  %v5959_v4 = vpop.f32.mrf.mxu0 }
 0x9f2   :  { %v5637_v7 = vadd.f32 %v5958_v13, %v7043_v31 }
 0x9f3   :  { %v5667_v40 = vmax.f32 %v5665_v53, %v5666_v43  ;;  %v5672_v5 = vmax.f32 %v5670_v2, %v5671_v10  ;;  %v5677_v60 = vmax.f32 %v5675_v1, %v5676_v34  ;;  %v5960_v15 = vpop.f32.mrf.mxu0 }
 0x9f4   :  { %v5682_v14 = vsel %vm5660_vm1, %v5637_v7, -inf  ;;  %v5961_v28 = vadd.f32 %v5960_v15, %v5959_v4 }
 0x9f5   :  { %v7053_v26 = vsub.f32 %v5622_v11, %v5667_v40  ;;  %v5673_v17 = vrot.slane %v5672_v5, 1  ;;  %v5678_v48 = vrot.slane %v5677_v60, 2  ;;  %v5683_v44 = vrot.slane %v5682_v14, 4  ;;  %v5962_v0 = vpop.f32.mrf.mxu0 }
 0x9f6   :  { %v5642_v19 = vadd.f32 %v5961_v28, %v7043_v31 }
 0x9f7   :  { %v5725_v45 = vmul.f32 1.442695, %v7053_v26  ;;  %v5674_v3 = vmax.f32 %v5672_v5, %v5673_v17  ;;  %v5679_v23 = vmax.f32 %v5677_v60, %v5678_v48  ;;  %v5684_v27 = vmax.f32 %v5682_v14, %v5683_v44  ;;  %v5963_v29 = vpop.f32.mrf.mxu0 }
 0x9f8   :  { %v5689_v62 = vsel %vm5660_vm1, %v5642_v19, -inf  ;;  %v5964_v8 = vadd.f32 %v5963_v29, %v5962_v0 }
 0x9f9   :  { %6231 = vpow2.f32 %v5725_v45  ;;  %v7058_v63 = vsub.f32 %v5627_v42, %v5674_v3  ;;  %v5680_v21 = vrot.slane %v5679_v23, 1  ;;  %v5685_v39 = vrot.slane %v5684_v27, 2  ;;  %v5965_v59 = vpop.f32.mrf.mxu0 }
 0x9fa   :  { %v5690_v24 = vrot.slane %v5689_v62, 4  ;;  %v5647_v55 = vadd.f32 %v5964_v8, %v7043_v31 }
 0x9fb   :  { %v5727_v37 = vmul.f32 1.442695, %v7058_v63  ;;  %v5681_v46 = vmax.f32 %v5679_v23, %v5680_v21  ;;  %v5686_v16 = vmax.f32 %v5684_v27, %v5685_v39  ;;  %v5966_v52 = vpop.f32.mrf.mxu0 }
 0x9fc   :  { %v5691_v47 = vmax.f32 %v5689_v62, %v5690_v24  ;;  %v5696_v20 = vsel %vm5660_vm1, %v5647_v55, -inf  ;;  %v5967_v57 = vadd.f32 %v5966_v52, %v5965_v59 }
 0x9fd   :  { %6233 = vpow2.f32 %v5727_v37  ;;  %v7063_v51 = vsub.f32 %v5632_v6, %v5681_v46  ;;  %v5687_v33 = vrot.slane %v5686_v16, 1  ;;  %v5697_v38 = vrot.slane %v5696_v20, 4 }
 0x9fe   :  { %v5692_v11 = vrot.slane %v5691_v47, 2  ;;  %v5652_v49 = vadd.f32 %v5967_v57, %v7043_v31 }
 0x9ff   :  { %v5729_v35 = vmul.f32 1.442695, %v7063_v51  ;;  %v5688_v12 = vmax.f32 %v5686_v16, %v5687_v33  ;;  %v5698_v58 = vmax.f32 %v5696_v20, %v5697_v38 }
 0xa00   :  { %v5693_v32 = vmax.f32 %v5691_v47, %v5692_v11  ;;  %v5703_v56 = vsel %vm5660_vm1, %v5652_v49, -inf }
 0xa01   :  { %6235 = vpow2.f32 %v5729_v35  ;;  %v7068_v61 = vsub.f32 %v5637_v7, %v5688_v12  ;;  %v5699_v41 = vrot.slane %v5698_v58, 2  ;;  %v5704_v42 = vrot.slane %v5703_v56, 4 }
 0xa02   :  { %v5694_v25 = vrot.slane %v5693_v32, 1 }
 0xa03   :  { %v5731_v50 = vmul.f32 1.442695, %v7068_v61  ;;  %v5700_v54 = vmax.f32 %v5698_v58, %v5699_v41  ;;  %v5705_v36 = vmax.f32 %v5703_v56, %v5704_v42 }
 0xa04   :  { %v5695_v30 = vmax.f32 %v5693_v32, %v5694_v25 }
 0xa05   :  { %6237 = vpow2.f32 %v5731_v50  ;;  %v5701_v18 = vrot.slane %v5700_v54, 1  ;;  %v5706_v9 = vrot.slane %v5705_v36, 2 }
 0xa06   :  { %v6232_v6 = vpop.eup %6231  ;;  %v7071_v53 = vsub.f32 %v5642_v19, %v5695_v30 }
 0xa07   :  { %v5741_v2 = vsel %vm5660_vm1, %v6232_v6, 0.0  ;;  %v5702_v22 = vmax.f32 %v5700_v54, %v5701_v18  ;;  %v5707_v1 = vmax.f32 %v5705_v36, %v5706_v9 }
 0xa08   :  { %v5742_v13 = vrot.slane %v5741_v2, 4  ;;  %v5733_v43 = vmul.f32 1.442695, %v7071_v53 }
 0xa09   :  { %v7075_v10 = vsub.f32 %v5647_v55, %v5702_v22  ;;  %v5708_v34 = vrot.slane %v5707_v1, 1 }
 0xa0a   :  { %v6234_v4 = vpop.eup %6233  ;;  %v5743_v7 = vadd.f32 %v5742_v13, %v5741_v2  ;;  %6239 = vpow2.f32 %v5733_v43 }
 0xa0b   :  { %v5748_v40 = vsel %vm5660_vm1, %v6234_v4, 0.0  ;;  %v5735_v5 = vmul.f32 1.442695, %v7075_v10  ;;  %v5709_v60 = vmax.f32 %v5707_v1, %v5708_v34 }
 0xa0c   :  { %v5744_v15 = vrot.slane %v5743_v7, 2  ;;  %v5749_v14 = vrot.slane %v5748_v40, 4 }
 0xa0d   :  { %6241 = vpow2.f32 %v5735_v5  ;;  %v7079_v28 = vsub.f32 %v5652_v49, %v5709_v60 }
 0xa0e   :  { %v6236_v17 = vpop.eup %6235  ;;  %v5745_v48 = vadd.f32 %v5744_v15, %v5743_v7  ;;  %v5750_v44 = vadd.f32 %v5749_v14, %v5748_v40 }
 0xa0f   :  { %v5755_v0 = vsel %vm5660_vm1, %v6236_v17, 0.0  ;;  %v5737_v19 = vmul.f32 1.442695, %v7079_v28 }
 0xa10   :  { %v5746_v45 = vrot.slane %v5745_v48, 1  ;;  %v5751_v3 = vrot.slane %v5750_v44, 2  ;;  %v5756_v23 = vrot.slane %v5755_v0, 4 }
 0xa11   :  { %6243 = vpow2.f32 %v5737_v19 }
 0xa12   :  { %v6238_v27 = vpop.eup %6237  ;;  %v5747_v29 = vadd.f32 %v5746_v45, %v5745_v48  ;;  %v5752_v62 = vadd.f32 %v5751_v3, %v5750_v44  ;;  %v5757_v8 = vadd.f32 %v5756_v23, %v5755_v0 }
 0xa13   :  { %v5762_v21 = vsel %vm5660_vm1, %v6238_v27, 0.0 }
 0xa14   :  { %6245 = vlog2.f32 %v5747_v29  ;;  %v5753_v39 = vrot.slane %v5752_v62, 1  ;;  %v5758_v59 = vrot.slane %v5757_v8, 2  ;;  %v5763_v24 = vrot.slane %v5762_v21, 4 }
 0xa16   :  { %v5754_v55 = vadd.f32 %v5753_v39, %v5752_v62  ;;  %v5759_v37 = vadd.f32 %v5758_v59, %v5757_v8  ;;  %v5764_v46 = vadd.f32 %v5763_v24, %v5762_v21 }
 0xa17   :  { %v6240_v16 = vpop.eup %6239 }
 0xa18   :  { %6247 = vlog2.f32 %v5754_v55  ;;  %v5760_v52 = vrot.slane %v5759_v37, 1  ;;  %v5765_v47 = vrot.slane %v5764_v46, 2  ;;  %v5769_v20 = vsel %vm5660_vm1, %v6240_v16, 0.0 }
 0xa19   :  { %v5770_v57 = vrot.slane %v5769_v20, 4 }
 0xa1a   :  { %v6242_v33 = vpop.eup %6241  ;;  %v5761_v38 = vadd.f32 %v5760_v52, %v5759_v37  ;;  %v5766_v11 = vadd.f32 %v5765_v47, %v5764_v46 }
 0xa1b   :  { %v5771_v49 = vadd.f32 %v5770_v57, %v5769_v20  ;;  %v5776_v35 = vsel %vm5660_vm1, %v6242_v33, 0.0 }
 0xa1c   :  { %6249 = vlog2.f32 %v5761_v38  ;;  %v5767_v12 = vrot.slane %v5766_v11, 1  ;;  %v5777_v58 = vrot.slane %v5776_v35, 4 }
 0xa1d   :  { %v5772_v32 = vrot.slane %v5771_v49, 2 }
 0xa1e   :  { %v6244_v56 = vpop.eup %6243  ;;  %v5768_v41 = vadd.f32 %v5767_v12, %v5766_v11  ;;  %v5778_v42 = vadd.f32 %v5777_v58, %v5776_v35 }
 0xa1f   :  { %v5773_v25 = vadd.f32 %v5772_v32, %v5771_v49  ;;  %v5783_v50 = vsel %vm5660_vm1, %v6244_v56, 0.0 }
 0xa20   :  { %6251 = vlog2.f32 %v5768_v41  ;;  %v5779_v54 = vrot.slane %v5778_v42, 2  ;;  %v5784_v36 = vrot.slane %v5783_v50, 4 }
 0xa21   :  { %v6246_v30 = vpop.eup %6245  ;;  %v5774_v18 = vrot.slane %v5773_v25, 1 }
 0xa22   :  { %v5798_v9 = vmul.f32 0.6931472, %v6246_v30  ;;  %v5780_v6 = vadd.f32 %v5779_v54, %v5778_v42  ;;  %v5785_v2 = vadd.f32 %v5784_v36, %v5783_v50 }
 0xa23   :  { %v5775_v22 = vadd.f32 %v5774_v18, %v5773_v25 }
 0xa24   :  { %v5813_v1 = vsub.f32 %v7053_v26, %v5798_v9  ;;  %v5781_v13 = vrot.slane %v5780_v6, 1  ;;  %v5786_v43 = vrot.slane %v5785_v2, 2 }
 0xa25   :  { %v6248_v34 = vpop.eup %6247  ;;  %6253 = vlog2.f32 %v5775_v22 }
 0xa26   :  { %5821 = vst.msk [vmem:[%s7135_s6] sm:$0x3] %vm5660_vm1, %v5813_v1  ;;  %v5800_v4 = vmul.f32 0.6931472, %v6248_v34  ;;  %v5782_v7 = vadd.f32 %v5781_v13, %v5780_v6  ;;  %v5787_v40 = vadd.f32 %v5786_v43, %v5785_v2 }
 0xa28   :  { %v5814_v5 = vsub.f32 %v7058_v63, %v5800_v4  ;;  %6255 = vlog2.f32 %v5782_v7  ;;  %v5788_v60 = vrot.slane %v5787_v40, 1 }
 0xa29   :  { %v6250_v15 = vpop.eup %6249 }
 0xa2a   :  { %5822 = vst.msk [vmem:[%s7135_s6 + $0x2] sm:$0x3] %vm5660_vm1, %v5814_v5  ;;  %v5802_v26 = vmul.f32 0.6931472, %v6250_v15  ;;  %v5789_v14 = vadd.f32 %v5788_v60, %v5787_v40 }
 0xa2c   :  { %v5815_v17 = vsub.f32 %v7063_v51, %v5802_v26  ;;  %6257 = vlog2.f32 %v5789_v14 }
 0xa2d   :  { %v6252_v48 = vpop.eup %6251 }
 0xa2e   :  { %5823 = vst.msk [vmem:[%s7135_s6 + $0x4] sm:$0x3] %vm5660_vm1, %v5815_v17  ;;  %v5804_v63 = vmul.f32 0.6931472, %v6252_v48 }
 0xa30   :  { %v5816_v44 = vsub.f32 %v7068_v61, %v5804_v63 }
 0xa32   :  { %v6254_v0 = vpop.eup %6253  ;;  %5824 = vst.msk [vmem:[%s7135_s6 + $0x6] sm:$0x3] %vm5660_vm1, %v5816_v44 }
 0xa33   :  { %v5806_v19 = vmul.f32 0.6931472, %v6254_v0 }
 0xa35   :  { %v6256_v45 = vpop.eup %6255  ;;  %v5817_v51 = vsub.f32 %v7071_v53, %v5806_v19 }
 0xa36   :  { %v5808_v3 = vmul.f32 0.6931472, %v6256_v45 }
 0xa37   :  { %5825 = vst.msk [vmem:[%s7135_s6 + $0x8] sm:$0x3] %vm5660_vm1, %v5817_v51 }
 0xa38   :  { %v5818_v23 = vsub.f32 %v7075_v10, %v5808_v3 }
 0xa39   :  { %v6258_v27 = vpop.eup %6257 }
 0xa3a   :  { %5826 = vst.msk [vmem:[%s7135_s6 + $0xa] sm:$0x3] %vm5660_vm1, %v5818_v23  ;;  %v5810_v61 = vmul.f32 0.6931472, %v6258_v27 }
 0xa3c   :  { %v5819_v29 = vsub.f32 %v7079_v28, %v5810_v61 }
 0xa3e   :  { %5827 = vst.msk [vmem:[%s7135_s6 + $0xc] sm:$0x3] %vm5660_vm1, %v5819_v29 }
 0xaab   :  { %v5968_v53 = vpop.f32.mrf.mxu0 }
 0xaad   :  { %v5969_v62 = vpop.f32.mrf.mxu0 }
 0xaae   :  { %v5970_v8 = vadd.f32 %v5969_v62, %v5968_v53 }
 0xab0   :  { %v5657_v21 = vadd.f32 %v5970_v8, %v7043_v31 }
 0xab2   :  { %v5710_v10 = vsel %vm5660_vm1, %v5657_v21, -inf }
 0xab3   :  { %v5711_v39 = vrot.slane %v5710_v10, 4 }
 0xab5   :  { %v5712_v59 = vmax.f32 %v5710_v10, %v5711_v39 }
 0xab7   :  { %v5713_v24 = vrot.slane %v5712_v59, 2 }
 0xab9   :  { %v5714_v55 = vmax.f32 %v5712_v59, %v5713_v24 }
 0xabb   :  { %v5715_v37 = vrot.slane %v5714_v55, 1 }
 0xabd   :  { %v5716_v46 = vmax.f32 %v5714_v55, %v5715_v37 }
 0xabf   :  { %v5724_v16 = vsub.f32 %v5657_v21, %v5716_v46 }
 0xac1   :  { %v5739_v28 = vmul.f32 1.442695, %v5724_v16 }
 0xac3   :  { %6259 = vpow2.f32 %v5739_v28 }
 0xad0   :  { %v6260_v52 = vpop.eup %6259 }
 0xad1   :  { %v5790_v47 = vsel %vm5660_vm1, %v6260_v52, 0.0 }
 0xad2   :  { %v5791_v20 = vrot.slane %v5790_v47, 4 }
 0xad4   :  { %v5792_v57 = vadd.f32 %v5791_v20, %v5790_v47 }
 0xad6   :  { %v5793_v33 = vrot.slane %v5792_v57, 2 }
 0xad8   :  { %v5794_v38 = vadd.f32 %v5793_v33, %v5792_v57 }
 0xada   :  { %v5795_v11 = vrot.slane %v5794_v38, 1 }
 0xadc   :  { %v5796_v31 = vadd.f32 %v5795_v11, %v5794_v38 }
 0xade   :  { %6261 = vlog2.f32 %v5796_v31 }
 0xaeb   :  { %v6262_v49 = vpop.eup %6261 }
 0xaec   :  { %v5812_v35 = vmul.f32 0.6931472, %v6262_v49 }
 0xaee   :  { %v5820_v12 = vsub.f32 %v5724_v16, %v5812_v35 }
 0xaf0   :  { %5828 = vst.msk [vmem:[%s7135_s6 + $0xe] sm:$0x3] %vm5660_vm1, %v5820_v12 }
 0xaf1   :  { %5833 = vsyncpa [#allocation5], 1 }

</bundles_post_ra>
